<compile_context>
chip_gen: v5e
topology: v5e:2x2
jax: 0.10.0
libtpu: 0.0.40
codegen_flags: <defaults>
</compile_context>

<pallas_src>
import math
import jax
import jax.numpy as jnp
from jax.experimental import pallas as pl
from jax.experimental.pallas import tpu as pltpu

# ----------------------------- configuration ---------------------------------
B = 2            # image batch
C_IN = 3         # image channels
IMG = 16         # image spatial size (synthetic; real CLIP uses 224)
PATCH = 4
N_PATCH = (IMG // PATCH) ** 2
PATCH_DIM = C_IN * PATCH * PATCH

N_CLS = 3        # number of class prompts
N_ATTR = 2       # number of attribute prompts (unused by forward(), see note)
N_CTX = 4        # 'a nodule image of' -> 4 context tokens
SEQ = 8          # tokenized prompt length (real CLIP: 77 -> pad to 80 for tiling)
N_SUF = SEQ - 1 - N_CTX
D_MODEL = 32     # ctx_dim == transformer width == ln_final dim
EMBED = 32       # joint embedding dim == visual.output_dim == vis_dim
VIS_DIM = EMBED
N_HEADS = 4
D_HEAD = D_MODEL // N_HEADS
N_LAYERS = 2
MLP_DIM = 4 * D_MODEL
VOCAB = 1000
N_PAIR = B * N_CLS          # all (image, class) prompt pairs, processed together
EPS = 1e-5
L2_EPS = 1e-12

BF16 = jnp.bfloat16
_VMEM = pl.BlockSpec(memory_space=pltpu.MemorySpace.VMEM)
_SMEM = pl.BlockSpec(memory_space=pltpu.MemorySpace.SMEM)


# ------------------------------ in-kernel helpers ------------------------------
def _layer_norm(x, g, b):
    mu = jnp.mean(x, axis=-1, keepdims=True)
    var = jnp.mean(jnp.square(x - mu), axis=-1, keepdims=True)
    return (x - mu) * jax.lax.rsqrt(var + EPS) * g + b


def _l2norm(x):
    return x * jax.lax.rsqrt(jnp.sum(x * x, axis=-1, keepdims=True) + L2_EPS)


def _tree_sum(xs):
    while len(xs) > 1:
        nxt = [xs[i] + xs[i + 1] for i in range(0, len(xs) - 1, 2)]
        if len(xs) % 2:
            nxt.append(xs[-1])
        xs = nxt
    return xs[0]


# ---------------- fused image encoder + prompt-learner meta-net ----------------
def _image_meta_kernel(patch_ref, pw_ref, lng_ref, lnb_ref, proj_ref,
                       mw1_ref, mb1_ref, mw2_ref, mb2_ref, ctx_ref,
                       imf_ref, ctxs_ref):
    # TODO(synk): clip_model.visual is an external pretrained ViT/ResNet; it is
    # approximated here by patch-embed (conv-as-matmul) + mean pool + LN + proj.
    emb = jnp.dot(patch_ref[...].astype(BF16), pw_ref[...],
                  preferred_element_type=jnp.float32)            # (B*N_PATCH, D)
    pooled = jnp.mean(emb.reshape(B, N_PATCH, D_MODEL), axis=1)  # in-kernel mean pool
    h = _layer_norm(pooled, lng_ref[...], lnb_ref[...])
    imf = jnp.dot(h.astype(BF16), proj_ref[...],
                  preferred_element_type=jnp.float32)            # (B, EMBED)
    imf = _l2norm(imf)                        # image_features / ||image_features||
    imf_ref[...] = imf
    # prompt_learner.meta_net: Linear -> ReLU -> Linear on normalized features
    hid = jnp.maximum(
        jnp.dot(imf.astype(BF16), mw1_ref[...],
                preferred_element_type=jnp.float32) + mb1_ref[...], 0.0)
    bias = jnp.dot(hid.astype(BF16), mw2_ref[...],
                   preferred_element_type=jnp.float32) + mb2_ref[...]
    # ctx_shifted = ctx.unsqueeze(0) + bias  (CoCoOp per-image shift), one full store
    ctxs_ref[...] = ctx_ref[...][None, :, :] + bias[:, None, :]


def image_and_prompt_ctx(params, patches):
    v = params["visual"]
    p = params["prompt_learner"]
    return pl.pallas_call(
        _image_meta_kernel,
        out_shape=(jax.ShapeDtypeStruct((B, EMBED), jnp.float32),
                   jax.ShapeDtypeStruct((B, N_CTX, D_MODEL), jnp.float32)),
        in_specs=[_VMEM] * 10,
        out_specs=(_VMEM, _VMEM),
    )(patches, v["patch_w"], v["ln_g"], v["ln_b"], v["proj"],
      p["meta_w1"], p["meta_b1"], p["meta_w2"], p["meta_b2"], p["ctx"])


# ---------- fused text encoder over ALL prompt pairs + cosine logits -----------
def _text_logits_kernel(ctxs_ref, pre_ref, suf_ref, pos_ref, eot_ref, imf_ref,
                        scale_ref,
                        ln1g_ref, ln1b_ref, wqkv_ref, bqkv_ref, wo_ref, bo_ref,
                        ln2g_ref, ln2b_ref, w1_ref, b1_ref, w2_ref, b2_ref,
                        lnfg_ref, lnfb_ref, tproj_ref,
                        logits_ref, xbuf_ref):
    # ---- prompt assembly [prefix | shifted ctx | suffix] for all pairs at once.
    # pair i = (image b = i // N_CLS, class c = i % N_CLS); leading-dim merges only.
    xbuf_ref[:, 0:1, :] = jnp.broadcast_to(
        pre_ref[...][None], (B, N_CLS, 1, D_MODEL)).reshape(N_PAIR, 1, D_MODEL)
    xbuf_ref[:, 1:1 + N_CTX, :] = jnp.broadcast_to(
        ctxs_ref[...][:, None], (B, N_CLS, N_CTX, D_MODEL)).reshape(N_PAIR, N_CTX, D_MODEL)
    xbuf_ref[:, 1 + N_CTX:SEQ, :] = jnp.broadcast_to(
        suf_ref[...][None], (B, N_CLS, N_SUF, D_MODEL)).reshape(N_PAIR, N_SUF, D_MODEL)
    x3 = xbuf_ref[...] + pos_ref[...][None, :, :]            # + positional_embedding
    # fold prompt pairs into the matmul M dimension (SEQ is a multiple of 8)
    x = x3.reshape(N_PAIR * SEQ, D_MODEL)                    # (48, 32) f32

    # causal mask, built once and reused across layers/heads (applied in f32)
    row = jax.lax.broadcasted_iota(jnp.int32, (SEQ, SEQ), 0)
    col = jax.lax.broadcasted_iota(jnp.int32, (SEQ, SEQ), 1)
    causal = col <= row
    attn_scale = 1.0 / math.sqrt(D_HEAD)

    # TODO(synk): at real CLIP dims (12 layers, D=512, MLP=2048) switch this static
    # Python loop to lax.fori_loop over the stacked weight refs, add an "arbitrary"
    # layer grid axis (or pltpu.emit_pipeline over l) so only 1-2 layers of bf16
    # weights are VMEM-live on v7x (64 MiB), and set vmem_limit_bytes explicitly.
    for l in range(N_LAYERS):
        # ---- multi-head causal self-attention (pre-LN), prompts batched ----
        h = _layer_norm(x, ln1g_ref[l], ln1b_ref[l])
        qkv = jnp.dot(h.astype(BF16), wqkv_ref[l],
                      preferred_element_type=jnp.float32) + bqkv_ref[l]   # (48, 96) f32
        qkv3 = qkv.reshape(N_PAIR, SEQ, 3 * D_MODEL)
        wol = wo_ref[l]                                        # (D_MODEL, D_MODEL) bf16
        head_outs = []
        for hh in range(N_HEADS):
            lo = hh * D_HEAD
            q = qkv3[:, :, lo:lo + D_HEAD].astype(BF16)
            k = qkv3[:, :, D_MODEL + lo:D_MODEL + lo + D_HEAD].astype(BF16)
            v = qkv3[:, :, 2 * D_MODEL + lo:2 * D_MODEL + lo + D_HEAD].astype(BF16)
            # scores for ALL prompt pairs of this head in one batched dot
            s = jnp.einsum('bqd,bkd->bqk', q, k,
                           preferred_element_type=jnp.float32) * attn_scale
            s = jnp.where(causal[None], s, -1e30)              # mask in f32 (no bf16 inf)
            m = jnp.max(s, axis=-1, keepdims=True)
            p = jnp.exp(s - m)
            p = p / jnp.sum(p, axis=-1, keepdims=True)
            oh = jnp.einsum('bqk,bkd->bqd', p.astype(BF16), v,
                            preferred_element_type=jnp.float32)           # (n, SEQ, Dh)
            # concat(heads) @ W_o == sum_h head_h @ W_o[h*Dh:(h+1)*Dh, :]
            # (sublane-aligned row blocks; independent dots, tree-summed below)
            head_outs.append(
                jnp.dot(oh.reshape(N_PAIR * SEQ, D_HEAD).astype(BF16),
                        wol[lo:lo + D_HEAD, :], preferred_element_type=jnp.float32))
        x = x + _tree_sum(head_outs) + bo_ref[l]
        # ---- MLP with QuickGELU ----
        h2 = _layer_norm(x, ln2g_ref[l], ln2b_ref[l])
        m1 = jnp.dot(h2.astype(BF16), w1_ref[l],
                     preferred_element_type=jnp.float32) + b1_ref[l]
        m1 = m1 * jax.nn.sigmoid(1.702 * m1)
        x = x + jnp.dot(m1.astype(BF16), w2_ref[l],
                        preferred_element_type=jnp.float32) + b2_ref[l]

    # ---- ln_final -> EOT pooling -> text projection -> L2 norm ----
    xf = _layer_norm(x, lnfg_ref[...], lnfb_ref[...])
    xf3 = xf.reshape(N_PAIR, SEQ, D_MODEL)
    pooled = jnp.sum(eot_ref[...][:, :, None] * xf3, axis=1)              # (n, D)
    feat = jnp.dot(pooled.astype(BF16), tproj_ref[...],
                   preferred_element_type=jnp.float32)                    # (n, EMBED)
    tf = _l2norm(feat)
    # ---- fused cosine logits: logit_scale * <imf_pair, tf> per prompt pair ----
    logits_ref[...] = scale_ref[0, 0] * jnp.sum(imf_ref[...] * tf, axis=-1,
                                                keepdims=True)            # (n, 1)


def text_logits(params, ctx_shifted, eot_pair, imf_pair, logit_scale_exp):
    """All B*N_CLS prompt pairs + logits in ONE grid-less pallas_call.

    No grid -> no per-step overhead, every weight tensor is DMA'd into VMEM exactly
    once (no double-buffer duplication).  NOTE: a v7x megacore split (parallel grid
    axis over prompt groups) only pays off once the per-core share amortizes a full
    weight copy; at toy dims a single step is strictly better.
    """
    p = params["prompt_learner"]
    t = params["text"]
    return pl.pallas_call(
        _text_logits_kernel,
        out_shape=jax.ShapeDtypeStruct((N_PAIR, 1), jnp.float32),
        in_specs=[_VMEM] * 6 + [_SMEM] + [_VMEM] * 15,
        out_specs=_VMEM,
        scratch_shapes=[pltpu.VMEM((N_PAIR, SEQ, D_MODEL), jnp.float32)],
    )(ctx_shifted, p["token_prefix"], p["token_suffix"], t["pos"], eot_pair,
      imf_pair, logit_scale_exp,
      t["ln1_g"], t["ln1_b"], t["wqkv"], t["bqkv"], t["wo"], t["bo"],
      t["ln2_g"], t["ln2_b"], t["w1"], t["b1"], t["w2"], t["b2"],
      t["lnf_g"], t["lnf_b"], t["tproj"])


# ------------------------------- cross entropy ---------------------------------
def _cross_entropy(logits, labels):
    # (B, N_CLS) = (2, 3): a pallas_call launch costs more than the math here
    # (per perf review), so keep F.cross_entropy semantics in plain JAX.
    logz = jax.nn.logsumexp(logits, axis=-1)
    picked = jnp.take_along_axis(logits, labels[:, None], axis=-1)[:, 0]
    return jnp.mean(logz - picked)


# ------------------------------ parameter init --------------------------------
def init_params(key):
    ks = iter(jax.random.split(key, 64))

    def nrm(shape, dtype=jnp.float32, std=0.02):
        return (std * jax.random.normal(next(ks), shape)).astype(dtype)

    def ones(shape):
        return jnp.ones(shape, jnp.float32)

    def zeros(shape):
        return jnp.zeros(shape, jnp.float32)

    params = {}
    # Synthetic stand-in for clip_model.visual (external module).  MXU weight
    # matrices are stored bf16 (native MXU input type, halves VMEM/DMA bytes);
    # LN params, biases and embeddings stay f32.
    params["visual"] = dict(
        patch_w=nrm((PATCH_DIM, D_MODEL), BF16),
        ln_g=ones((1, D_MODEL)), ln_b=zeros((1, D_MODEL)),
        proj=nrm((D_MODEL, EMBED), BF16),
    )
    L = N_LAYERS
    params["text"] = dict(
        pos=nrm((SEQ, D_MODEL)),
        ln1_g=ones((L, 1, D_MODEL)), ln1_b=zeros((L, 1, D_MODEL)),
        wqkv=nrm((L, D_MODEL, 3 * D_MODEL), BF16), bqkv=zeros((L, 1, 3 * D_MODEL)),
        wo=nrm((L, D_MODEL, D_MODEL), BF16), bo=zeros((L, 1, D_MODEL)),
        ln2_g=ones((L, 1, D_MODEL)), ln2_b=zeros((L, 1, D_MODEL)),
        w1=nrm((L, D_MODEL, MLP_DIM), BF16), b1=zeros((L, 1, MLP_DIM)),
        w2=nrm((L, MLP_DIM, D_MODEL), BF16), b2=zeros((L, 1, D_MODEL)),
        lnf_g=ones((1, D_MODEL)), lnf_b=zeros((1, D_MODEL)),
        tproj=nrm((D_MODEL, EMBED), BF16),
    )
    params["logit_scale"] = jnp.asarray(math.log(1.0 / 0.07), jnp.float32)
    params["prompt_learner"] = dict(
        ctx=nrm((N_CTX, D_MODEL)),
        token_prefix=nrm((N_CLS, 1, D_MODEL)),
        token_suffix=nrm((N_CLS, N_SUF, D_MODEL)),
        # attr prompt buffers exist in the reference module but do not affect the
        # forward output (the zip over the (prompts, attr_prompts) tuple in the
        # reference is a bug; intended CoCoOp semantics implemented here).
        token_attr_prefix=nrm((N_ATTR, 1, D_MODEL)),
        token_attr_suffix=nrm((N_ATTR, N_SUF, D_MODEL)),
        meta_w1=nrm((VIS_DIM, VIS_DIM // 16), BF16), meta_b1=zeros((1, VIS_DIM // 16)),
        meta_w2=nrm((VIS_DIM // 16, D_MODEL), BF16), meta_b2=zeros((1, D_MODEL)),
    )
    # TODO(synk): clip.tokenize / _Tokenizer are host-side string processing with
    # no Pallas equivalent; tokenized prompts are synthesized deterministically.
    params["tokenized_prompts"] = jax.random.randint(
        next(ks), (N_CLS, SEQ), 0, VOCAB, dtype=jnp.int32)
    return params


# ------------------------------ forward pass -----------------------------------
def _patchify(image):
    bi = image.shape[0]
    x = image.reshape(bi, C_IN, IMG // PATCH, PATCH, IMG // PATCH, PATCH)
    x = x.transpose(0, 2, 4, 1, 3, 5).reshape(bi * N_PATCH, PATCH_DIM)   # NCHW -> patches
    return x


def custom_clip_forward(params, image, label=None, training=False):
    tokenized = params["tokenized_prompts"]
    logit_scale = jnp.exp(params["logit_scale"]).reshape(1, 1)

    # ---- fused image encoder + prompt-learner meta-net (pallas_call #1) ----
    patches = _patchify(image)
    image_features, ctx_shifted = image_and_prompt_ctx(params, patches)

    # Tiny glue for the batched text/logits kernel (pair i = image i//N_CLS,
    # class i%N_CLS): EOT one-hot per pair and the matching image feature rows.
    eot = jnp.argmax(tokenized, axis=-1)
    eot_onehot = (jnp.arange(SEQ)[None, :] == eot[:, None]).astype(jnp.float32)
    eot_pair = jnp.tile(eot_onehot, (B, 1))                       # (N_PAIR, SEQ)
    imf_pair = jnp.repeat(image_features, N_CLS, axis=0)          # (N_PAIR, EMBED)

    # ---- fused text encoder over all pairs + cosine logits (pallas_call #2) ----
    logits = text_logits(params, ctx_shifted, eot_pair, imf_pair,
                         logit_scale).reshape(B, N_CLS)
    if training:
        return _cross_entropy(logits, label)
    return logits


# ---------------------------------- main ---------------------------------------
if __name__ == "__main__":
    key = jax.random.PRNGKey(0)
    pkey, ikey, lkey = jax.random.split(key, 3)
    params = init_params(pkey)
    image = jax.random.normal(ikey, (B, C_IN, IMG, IMG), dtype=jnp.float32)  # NCHW
    label = jax.random.randint(lkey, (B,), 0, N_CLS, dtype=jnp.int32)

    fwd_eval = jax.jit(lambda p, img: custom_clip_forward(p, img, training=False))
    fwd_train = jax.jit(lambda p, img, lbl: custom_clip_forward(p, img, lbl, training=True))

    logits = jax.block_until_ready(fwd_eval(params, image))
    loss = jax.block_until_ready(fwd_train(params, image, label))

    assert logits.shape == (B, N_CLS)
    assert loss.shape == ()
    assert bool(jnp.all(jnp.isfinite(logits))) and bool(jnp.isfinite(loss))
    print("KERNEL_OK")
</pallas_src>

<mosaic_0001>
module attributes {stable_mosaic.version = 11 : i64} {
  func.func @_image_meta_kernel(%arg0: memref<32x48xf32, #tpu.memory_space<vmem>>, %arg1: memref<48x32xbf16, #tpu.memory_space<vmem>>, %arg2: memref<1x32xf32, #tpu.memory_space<vmem>>, %arg3: memref<1x32xf32, #tpu.memory_space<vmem>>, %arg4: memref<32x32xbf16, #tpu.memory_space<vmem>>, %arg5: memref<32x2xbf16, #tpu.memory_space<vmem>>, %arg6: memref<1x2xf32, #tpu.memory_space<vmem>>, %arg7: memref<2x32xbf16, #tpu.memory_space<vmem>>, %arg8: memref<1x32xf32, #tpu.memory_space<vmem>>, %arg9: memref<4x32xf32, #tpu.memory_space<vmem>>, %arg10: memref<2x32xf32, #tpu.memory_space<vmem>>, %arg11: memref<2x4x32xf32, #tpu.memory_space<vmem>>) attributes {dimension_semantics = [], scalar_prefetch = 0 : i64, scratch_operands = 0 : i64, tpu.core_type = #tpu.core_type<tc>} {
    %c0 = arith.constant 0 : index
    %c0_0 = arith.constant 0 : index
    %0 = vector.load %arg0[%c0, %c0_0] : memref<32x48xf32, #tpu.memory_space<vmem>>, vector<32x48xf32>
    %1 = arith.truncf %0 : vector<32x48xf32> to vector<32x48xbf16>
    %c0_1 = arith.constant 0 : index
    %c0_2 = arith.constant 0 : index
    %2 = vector.load %arg1[%c0_1, %c0_2] : memref<48x32xbf16, #tpu.memory_space<vmem>>, vector<48x32xbf16>
    %cst = arith.constant dense<0.000000e+00> : vector<32x32xf32>
    %3 = tpu.matmul %1, %2, %cst {dimension_numbers = #tpu.dot_dimension_numbers<[1], [0], [0], [1], [0, 0, 1, 1], [], []>} : vector<32x48xbf16>, vector<48x32xbf16>, vector<32x32xf32> -> vector<32x32xf32>
    %4 = vector.shape_cast %3 : vector<32x32xf32> to vector<2x16x32xf32>
    %cst_3 = arith.constant dense<0.000000e+00> : vector<2x32xf32>
    %5 = vector.multi_reduction <add>, %4, %cst_3 [1] : vector<2x16x32xf32> to vector<2x32xf32>
    %cst_4 = arith.constant 1.600000e+01 : f32
    %6 = vector.broadcast %cst_4 : f32 to vector<2x32xf32>
    %7 = arith.divf %5, %6 : vector<2x32xf32>
    %c0_5 = arith.constant 0 : index
    %c0_6 = arith.constant 0 : index
    %8 = vector.load %arg2[%c0_5, %c0_6] : memref<1x32xf32, #tpu.memory_space<vmem>>, vector<1x32xf32>
    %c0_7 = arith.constant 0 : index
    %c0_8 = arith.constant 0 : index
    %9 = vector.load %arg3[%c0_7, %c0_8] : memref<1x32xf32, #tpu.memory_space<vmem>>, vector<1x32xf32>
    %cst_9 = arith.constant dense<0.000000e+00> : vector<2xf32>
    %10 = vector.multi_reduction <add>, %7, %cst_9 [1] : vector<2x32xf32> to vector<2xf32>
    %11 = vector.shape_cast %10 : vector<2xf32> to vector<2x1xf32>
    %cst_10 = arith.constant 3.200000e+01 : f32
    %12 = vector.broadcast %cst_10 : f32 to vector<2x1xf32>
    %13 = arith.divf %11, %12 : vector<2x1xf32>
    %14 = vector.broadcast %13 : vector<2x1xf32> to vector<2x32xf32>
    %15 = arith.subf %7, %14 : vector<2x32xf32>
    %16 = arith.mulf %15, %15 : vector<2x32xf32>
    %cst_11 = arith.constant dense<0.000000e+00> : vector<2xf32>
    %17 = vector.multi_reduction <add>, %16, %cst_11 [1] : vector<2x32xf32> to vector<2xf32>
    %18 = vector.shape_cast %17 : vector<2xf32> to vector<2x1xf32>
    %cst_12 = arith.constant 3.200000e+01 : f32
    %19 = vector.broadcast %cst_12 : f32 to vector<2x1xf32>
    %20 = arith.divf %18, %19 : vector<2x1xf32>
    %21 = vector.broadcast %13 : vector<2x1xf32> to vector<2x32xf32>
    %22 = arith.subf %7, %21 : vector<2x32xf32>
    %cst_13 = arith.constant 9.99999974E-6 : f32
    %23 = vector.broadcast %cst_13 : f32 to vector<2x1xf32>
    %24 = arith.addf %20, %23 : vector<2x1xf32>
    %25 = math.rsqrt %24 : vector<2x1xf32>
    %26 = vector.broadcast %25 : vector<2x1xf32> to vector<2x32xf32>
    %27 = arith.mulf %22, %26 : vector<2x32xf32>
    %28 = vector.broadcast %8 : vector<1x32xf32> to vector<2x32xf32>
    %29 = arith.mulf %27, %28 : vector<2x32xf32>
    %30 = vector.broadcast %9 : vector<1x32xf32> to vector<2x32xf32>
    %31 = arith.addf %29, %30 : vector<2x32xf32>
    %32 = arith.truncf %31 : vector<2x32xf32> to vector<2x32xbf16>
    %c0_14 = arith.constant 0 : index
    %c0_15 = arith.constant 0 : index
    %33 = vector.load %arg4[%c0_14, %c0_15] : memref<32x32xbf16, #tpu.memory_space<vmem>>, vector<32x32xbf16>
    %cst_16 = arith.constant dense<0.000000e+00> : vector<2x32xf32>
    %34 = tpu.matmul %32, %33, %cst_16 {dimension_numbers = #tpu.dot_dimension_numbers<[1], [0], [0], [1], [0, 0, 1, 1], [], []>} : vector<2x32xbf16>, vector<32x32xbf16>, vector<2x32xf32> -> vector<2x32xf32>
    %35 = arith.mulf %34, %34 : vector<2x32xf32>
    %cst_17 = arith.constant dense<0.000000e+00> : vector<2xf32>
    %36 = vector.multi_reduction <add>, %35, %cst_17 [1] : vector<2x32xf32> to vector<2xf32>
    %37 = vector.shape_cast %36 : vector<2xf32> to vector<2x1xf32>
    %cst_18 = arith.constant 9.99999996E-13 : f32
    %38 = vector.broadcast %cst_18 : f32 to vector<2x1xf32>
    %39 = arith.addf %37, %38 : vector<2x1xf32>
    %40 = math.rsqrt %39 : vector<2x1xf32>
    %41 = vector.broadcast %40 : vector<2x1xf32> to vector<2x32xf32>
    %42 = arith.mulf %34, %41 : vector<2x32xf32>
    %c0_19 = arith.constant 0 : index
    %c0_20 = arith.constant 0 : index
    %43 = vector.load %arg10[%c0_19, %c0_20] : memref<2x32xf32, #tpu.memory_space<vmem>>, vector<2x32xf32>
    tpu.vector_store %arg10[%c0_19, %c0_20], %42 {strides = array<i32>} : memref<2x32xf32, #tpu.memory_space<vmem>>, vector<2x32xf32>,
    %44 = arith.truncf %42 : vector<2x32xf32> to vector<2x32xbf16>
    %c0_21 = arith.constant 0 : index
    %c0_22 = arith.constant 0 : index
    %45 = vector.load %arg5[%c0_21, %c0_22] : memref<32x2xbf16, #tpu.memory_space<vmem>>, vector<32x2xbf16>
    %cst_23 = arith.constant dense<0.000000e+00> : vector<2x2xf32>
    %46 = tpu.matmul %44, %45, %cst_23 {dimension_numbers = #tpu.dot_dimension_numbers<[1], [0], [0], [1], [0, 0, 1, 1], [], []>} : vector<2x32xbf16>, vector<32x2xbf16>, vector<2x2xf32> -> vector<2x2xf32>
    %c0_24 = arith.constant 0 : index
    %c0_25 = arith.constant 0 : index
    %47 = vector.load %arg6[%c0_24, %c0_25] : memref<1x2xf32, #tpu.memory_space<vmem>>, vector<1x2xf32>
    %48 = vector.broadcast %47 : vector<1x2xf32> to vector<2x2xf32>
    %49 = arith.addf %46, %48 : vector<2x2xf32>
    %cst_26 = arith.constant 0.000000e+00 : f32
    %50 = vector.broadcast %cst_26 : f32 to vector<2x2xf32>
    %51 = arith.maximumf %49, %50 : vector<2x2xf32>
    %52 = arith.truncf %51 : vector<2x2xf32> to vector<2x2xbf16>
    %c0_27 = arith.constant 0 : index
    %c0_28 = arith.constant 0 : index
    %53 = vector.load %arg7[%c0_27, %c0_28] : memref<2x32xbf16, #tpu.memory_space<vmem>>, vector<2x32xbf16>
    %cst_29 = arith.constant dense<0.000000e+00> : vector<2x32xf32>
    %54 = tpu.matmul %52, %53, %cst_29 {dimension_numbers = #tpu.dot_dimension_numbers<[1], [0], [0], [1], [0, 0, 1, 1], [], []>} : vector<2x2xbf16>, vector<2x32xbf16>, vector<2x32xf32> -> vector<2x32xf32>
    %c0_30 = arith.constant 0 : index
    %c0_31 = arith.constant 0 : index
    %55 = vector.load %arg8[%c0_30, %c0_31] : memref<1x32xf32, #tpu.memory_space<vmem>>, vector<1x32xf32>
    %56 = vector.broadcast %55 : vector<1x32xf32> to vector<2x32xf32>
    %57 = arith.addf %54, %56 : vector<2x32xf32>
    %c0_32 = arith.constant 0 : index
    %c0_33 = arith.constant 0 : index
    %58 = vector.load %arg9[%c0_32, %c0_33] : memref<4x32xf32, #tpu.memory_space<vmem>>, vector<4x32xf32>
    %59 = vector.shape_cast %58 : vector<4x32xf32> to vector<1x4x32xf32>
    %60 = vector.shape_cast %57 : vector<2x32xf32> to vector<2x1x32xf32>
    %61 = vector.broadcast %59 : vector<1x4x32xf32> to vector<2x4x32xf32>
    %62 = vector.broadcast %60 : vector<2x1x32xf32> to vector<2x4x32xf32>
    %63 = arith.addf %61, %62 : vector<2x4x32xf32>
    %c0_34 = arith.constant 0 : index
    %c0_35 = arith.constant 0 : index
    %c0_36 = arith.constant 0 : index
    %64 = vector.load %arg11[%c0_34, %c0_35, %c0_36] : memref<2x4x32xf32, #tpu.memory_space<vmem>>, vector<2x4x32xf32>
    tpu.vector_store %arg11[%c0_34, %c0_35, %c0_36], %63 {strides = array<i32>} : memref<2x4x32xf32, #tpu.memory_space<vmem>>, vector<2x4x32xf32>,
    return
  }
}

module attributes {stable_mosaic.version = 11 : i64} {
  func.func @_text_logits_kernel(%arg0: memref<2x4x32xf32, #tpu.memory_space<vmem>>, %arg1: memref<3x1x32xf32, #tpu.memory_space<vmem>>, %arg2: memref<3x3x32xf32, #tpu.memory_space<vmem>>, %arg3: memref<8x32xf32, #tpu.memory_space<vmem>>, %arg4: memref<6x8xf32, #tpu.memory_space<vmem>>, %arg5: memref<6x32xf32, #tpu.memory_space<vmem>>, %arg6: memref<1x1xf32, #tpu.memory_space<smem>>, %arg7: memref<2x1x32xf32, #tpu.memory_space<vmem>>, %arg8: memref<2x1x32xf32, #tpu.memory_space<vmem>>, %arg9: memref<2x32x96xbf16, #tpu.memory_space<vmem>>, %arg10: memref<2x1x96xf32, #tpu.memory_space<vmem>>, %arg11: memref<2x32x32xbf16, #tpu.memory_space<vmem>>, %arg12: memref<2x1x32xf32, #tpu.memory_space<vmem>>, %arg13: memref<2x1x32xf32, #tpu.memory_space<vmem>>, %arg14: memref<2x1x32xf32, #tpu.memory_space<vmem>>, %arg15: memref<2x32x128xbf16, #tpu.memory_space<vmem>>, %arg16: memref<2x1x128xf32, #tpu.memory_space<vmem>>, %arg17: memref<2x128x32xbf16, #tpu.memory_space<vmem>>, %arg18: memref<2x1x32xf32, #tpu.memory_space<vmem>>, %arg19: memref<1x32xf32, #tpu.memory_space<vmem>>, %arg20: memref<1x32xf32, #tpu.memory_space<vmem>>, %arg21: memref<32x32xbf16, #tpu.memory_space<vmem>>, %arg22: memref<6x1xf32, #tpu.memory_space<vmem>>, %arg23: memref<6x8x32xf32, #tpu.memory_space<vmem>>) attributes {dimension_semantics = [], scalar_prefetch = 0 : i64, scratch_operands = 1 : i64, tpu.core_type = #tpu.core_type<tc>} {
    %c0 = arith.constant 0 : index
    %c0_0 = arith.constant 0 : index
    %c0_1 = arith.constant 0 : index
    %0 = vector.load %arg1[%c0, %c0_0, %c0_1] : memref<3x1x32xf32, #tpu.memory_space<vmem>>, vector<3x1x32xf32>
    %1 = vector.shape_cast %0 : vector<3x1x32xf32> to vector<1x3x1x32xf32>
    %2 = vector.shape_cast %1 : vector<1x3x1x32xf32> to vector<1x3x1x32xf32>
    %3 = vector.broadcast %2 : vector<1x3x1x32xf32> to vector<2x3x1x32xf32>
    %4 = vector.shape_cast %3 : vector<2x3x1x32xf32> to vector<6x1x32xf32>
    %c0_2 = arith.constant 0 : index
    %c0_3 = arith.constant 0 : index
    %c0_4 = arith.constant 0 : index
    %5 = vector.load %arg23[%c0_2, %c0_3, %c0_4] : memref<6x8x32xf32, #tpu.memory_space<vmem>>, vector<6x1x32xf32>
    tpu.vector_store %arg23[%c0_2, %c0_3, %c0_4], %4 {strides = array<i32>} : memref<6x8x32xf32, #tpu.memory_space<vmem>>, vector<6x1x32xf32>,
    %c0_5 = arith.constant 0 : index
    %c0_6 = arith.constant 0 : index
    %c0_7 = arith.constant 0 : index
    %6 = vector.load %arg0[%c0_5, %c0_6, %c0_7] : memref<2x4x32xf32, #tpu.memory_space<vmem>>, vector<2x4x32xf32>
    %7 = vector.shape_cast %6 : vector<2x4x32xf32> to vector<2x1x4x32xf32>
    %8 = vector.shape_cast %7 : vector<2x1x4x32xf32> to vector<2x1x4x32xf32>
    %9 = vector.broadcast %8 : vector<2x1x4x32xf32> to vector<2x3x4x32xf32>
    %10 = vector.shape_cast %9 : vector<2x3x4x32xf32> to vector<6x4x32xf32>
    %c0_8 = arith.constant 0 : index
    %c1 = arith.constant 1 : index
    %c0_9 = arith.constant 0 : index
    %11 = vector.load %arg23[%c0_8, %c1, %c0_9] : memref<6x8x32xf32, #tpu.memory_space<vmem>>, vector<6x4x32xf32>
    tpu.vector_store %arg23[%c0_8, %c1, %c0_9], %10 {strides = array<i32>} : memref<6x8x32xf32, #tpu.memory_space<vmem>>, vector<6x4x32xf32>,
    %c0_10 = arith.constant 0 : index
    %c0_11 = arith.constant 0 : index
    %c0_12 = arith.constant 0 : index
    %12 = vector.load %arg2[%c0_10, %c0_11, %c0_12] : memref<3x3x32xf32, #tpu.memory_space<vmem>>, vector<3x3x32xf32>
    %13 = vector.shape_cast %12 : vector<3x3x32xf32> to vector<1x3x3x32xf32>
    %14 = vector.shape_cast %13 : vector<1x3x3x32xf32> to vector<1x3x3x32xf32>
    %15 = vector.broadcast %14 : vector<1x3x3x32xf32> to vector<2x3x3x32xf32>
    %16 = vector.shape_cast %15 : vector<2x3x3x32xf32> to vector<6x3x32xf32>
    %c0_13 = arith.constant 0 : index
    %c5 = arith.constant 5 : index
    %c0_14 = arith.constant 0 : index
    %17 = vector.load %arg23[%c0_13, %c5, %c0_14] : memref<6x8x32xf32, #tpu.memory_space<vmem>>, vector<6x3x32xf32>
    tpu.vector_store %arg23[%c0_13, %c5, %c0_14], %16 {strides = array<i32>} : memref<6x8x32xf32, #tpu.memory_space<vmem>>, vector<6x3x32xf32>,
    %c0_15 = arith.constant 0 : index
    %c0_16 = arith.constant 0 : index
    %c0_17 = arith.constant 0 : index
    %18 = vector.load %arg23[%c0_15, %c0_16, %c0_17] : memref<6x8x32xf32, #tpu.memory_space<vmem>>, vector<6x8x32xf32>
    %c0_18 = arith.constant 0 : index
    %c0_19 = arith.constant 0 : index
    %19 = vector.load %arg3[%c0_18, %c0_19] : memref<8x32xf32, #tpu.memory_space<vmem>>, vector<8x32xf32>
    %20 = vector.shape_cast %19 : vector<8x32xf32> to vector<1x8x32xf32>
    %21 = vector.broadcast %20 : vector<1x8x32xf32> to vector<6x8x32xf32>
    %22 = arith.addf %18, %21 : vector<6x8x32xf32>
    %23 = vector.shape_cast %22 : vector<6x8x32xf32> to vector<48x32xf32>
    %24 = tpu.iota {dimensions = array<i32: 0>} : vector<8x8xi32>
    %25 = tpu.iota {dimensions = array<i32: 1>} : vector<8x8xi32>
    %26 = arith.cmpi sle, %25, %24 : vector<8x8xi32>
    %c0_20 = arith.constant 0 : index
    %c0_21 = arith.constant 0 : index
    %c0_22 = arith.constant 0 : index
    %27 = vector.load %arg7[%c0_20, %c0_21, %c0_22] : memref<2x1x32xf32, #tpu.memory_space<vmem>>, vector<1x1x32xf32>
    %28 = vector.shape_cast %27 : vector<1x1x32xf32> to vector<1x32xf32>
    %c0_23 = arith.constant 0 : index
    %c0_24 = arith.constant 0 : index
    %c0_25 = arith.constant 0 : index
    %29 = vector.load %arg8[%c0_23, %c0_24, %c0_25] : memref<2x1x32xf32, #tpu.memory_space<vmem>>, vector<1x1x32xf32>
    %30 = vector.shape_cast %29 : vector<1x1x32xf32> to vector<1x32xf32>
    %cst = arith.constant dense<0.000000e+00> : vector<48xf32>
    %31 = vector.multi_reduction <add>, %23, %cst [1] : vector<48x32xf32> to vector<48xf32>
    %32 = vector.shape_cast %31 : vector<48xf32> to vector<48x1xf32>
    %cst_26 = arith.constant 3.200000e+01 : f32
    %33 = vector.broadcast %cst_26 : f32 to vector<48x1xf32>
    %34 = arith.divf %32, %33 : vector<48x1xf32>
    %35 = vector.broadcast %34 : vector<48x1xf32> to vector<48x32xf32>
    %36 = arith.subf %23, %35 : vector<48x32xf32>
    %37 = arith.mulf %36, %36 : vector<48x32xf32>
    %cst_27 = arith.constant dense<0.000000e+00> : vector<48xf32>
    %38 = vector.multi_reduction <add>, %37, %cst_27 [1] : vector<48x32xf32> to vector<48xf32>
    %39 = vector.shape_cast %38 : vector<48xf32> to vector<48x1xf32>
    %cst_28 = arith.constant 3.200000e+01 : f32
    %40 = vector.broadcast %cst_28 : f32 to vector<48x1xf32>
    %41 = arith.divf %39, %40 : vector<48x1xf32>
    %42 = vector.broadcast %34 : vector<48x1xf32> to vector<48x32xf32>
    %43 = arith.subf %23, %42 : vector<48x32xf32>
    %cst_29 = arith.constant 9.99999974E-6 : f32
    %44 = vector.broadcast %cst_29 : f32 to vector<48x1xf32>
    %45 = arith.addf %41, %44 : vector<48x1xf32>
    %46 = math.rsqrt %45 : vector<48x1xf32>
    %47 = vector.broadcast %46 : vector<48x1xf32> to vector<48x32xf32>
    %48 = arith.mulf %43, %47 : vector<48x32xf32>
    %49 = vector.broadcast %28 : vector<1x32xf32> to vector<48x32xf32>
    %50 = arith.mulf %48, %49 : vector<48x32xf32>
    %51 = vector.broadcast %30 : vector<1x32xf32> to vector<48x32xf32>
    %52 = arith.addf %50, %51 : vector<48x32xf32>
    %53 = arith.truncf %52 : vector<48x32xf32> to vector<48x32xbf16>
    %c0_30 = arith.constant 0 : index
    %c0_31 = arith.constant 0 : index
    %c0_32 = arith.constant 0 : index
    %54 = vector.load %arg9[%c0_30, %c0_31, %c0_32] : memref<2x32x96xbf16, #tpu.memory_space<vmem>>, vector<1x32x96xbf16>
    %55 = vector.shape_cast %54 : vector<1x32x96xbf16> to vector<32x96xbf16>
    %cst_33 = arith.constant dense<0.000000e+00> : vector<48x96xf32>
    %56 = tpu.matmul %53, %55, %cst_33 {dimension_numbers = #tpu.dot_dimension_numbers<[1], [0], [0], [1], [0, 0, 1, 1], [], []>} : vector<48x32xbf16>, vector<32x96xbf16>, vector<48x96xf32> -> vector<48x96xf32>
    %c0_34 = arith.constant 0 : index
    %c0_35 = arith.constant 0 : index
    %c0_36 = arith.constant 0 : index
    %57 = vector.load %arg10[%c0_34, %c0_35, %c0_36] : memref<2x1x96xf32, #tpu.memory_space<vmem>>, vector<1x1x96xf32>
    %58 = vector.shape_cast %57 : vector<1x1x96xf32> to vector<1x96xf32>
    %59 = vector.broadcast %58 : vector<1x96xf32> to vector<48x96xf32>
    %60 = arith.addf %56, %59 : vector<48x96xf32>
    %61 = vector.shape_cast %60 : vector<48x96xf32> to vector<6x8x96xf32>
    %c0_37 = arith.constant 0 : index
    %c0_38 = arith.constant 0 : index
    %c0_39 = arith.constant 0 : index
    %62 = vector.load %arg11[%c0_37, %c0_38, %c0_39] : memref<2x32x32xbf16, #tpu.memory_space<vmem>>, vector<1x32x32xbf16>
    %63 = vector.shape_cast %62 : vector<1x32x32xbf16> to vector<32x32xbf16>
    %64 = vector.extract_strided_slice %61 {offsets = [0, 0, 0], sizes = [6, 8, 8], strides = [1, 1, 1]} : vector<6x8x96xf32> to vector<6x8x8xf32>
    %65 = arith.truncf %64 : vector<6x8x8xf32> to vector<6x8x8xbf16>
    %66 = vector.extract_strided_slice %61 {offsets = [0, 0, 32], sizes = [6, 8, 8], strides = [1, 1, 1]} : vector<6x8x96xf32> to vector<6x8x8xf32>
    %67 = arith.truncf %66 : vector<6x8x8xf32> to vector<6x8x8xbf16>
    %68 = vector.extract_strided_slice %61 {offsets = [0, 0, 64], sizes = [6, 8, 8], strides = [1, 1, 1]} : vector<6x8x96xf32> to vector<6x8x8xf32>
    %69 = arith.truncf %68 : vector<6x8x8xf32> to vector<6x8x8xbf16>
    "tpu.trace_start"() <{level = 10 : i32, message = "bqd,bkd->bqk"}> : () -> ()
    %cst_40 = arith.constant dense<0.000000e+00> : vector<6x8x8xf32>
    %70 = tpu.matmul %65, %67, %cst_40 {dimension_numbers = #tpu.dot_dimension_numbers<[2], [2], [1], [1], [0, 0, 0, 1, 1, 1], [0], [0]>} : vector<6x8x8xbf16>, vector<6x8x8xbf16>, vector<6x8x8xf32> -> vector<6x8x8xf32>
    "tpu.trace_stop"() : () -> ()
    %cst_41 = arith.constant 0.353553385 : f32
    %71 = vector.broadcast %cst_41 : f32 to vector<6x8x8xf32>
    %72 = arith.mulf %70, %71 : vector<6x8x8xf32>
    %73 = vector.shape_cast %26 : vector<8x8xi1> to vector<1x8x8xi1>
    %cst_42 = arith.constant -1.000000e+30 : f32
    %74 = vector.shape_cast %73 : vector<1x8x8xi1> to vector<1x8x8xi1>
    %75 = vector.broadcast %74 : vector<1x8x8xi1> to vector<6x8x8xi1>
    %76 = vector.broadcast %cst_42 : f32 to vector<6x8x8xf32>
    %77 = arith.select %75, %72, %76 : vector<6x8x8xi1>, vector<6x8x8xf32>
    %cst_43 = arith.constant dense<0xFF800000> : vector<6x8xf32>
    %78 = vector.multi_reduction <maximumf>, %77, %cst_43 [2] : vector<6x8x8xf32> to vector<6x8xf32>
    %79 = vector.shape_cast %78 : vector<6x8xf32> to vector<6x8x1xf32>
    %80 = vector.broadcast %79 : vector<6x8x1xf32> to vector<6x8x8xf32>
    %81 = arith.subf %77, %80 : vector<6x8x8xf32>
    %82 = math.exp %81 : vector<6x8x8xf32>
    %cst_44 = arith.constant dense<0.000000e+00> : vector<6x8xf32>
    %83 = vector.multi_reduction <add>, %82, %cst_44 [2] : vector<6x8x8xf32> to vector<6x8xf32>
    %84 = vector.shape_cast %83 : vector<6x8xf32> to vector<6x8x1xf32>
    %85 = vector.broadcast %84 : vector<6x8x1xf32> to vector<6x8x8xf32>
    %86 = arith.divf %82, %85 : vector<6x8x8xf32>
    %87 = arith.truncf %86 : vector<6x8x8xf32> to vector<6x8x8xbf16>
    "tpu.trace_start"() <{level = 10 : i32, message = "bqk,bkd->bqd"}> : () -> ()
    %cst_45 = arith.constant dense<0.000000e+00> : vector<6x8x8xf32>
    %88 = tpu.matmul %87, %69, %cst_45 {dimension_numbers = #tpu.dot_dimension_numbers<[2], [1], [1], [2], [0, 0, 0, 1, 1, 2], [0], [0]>} : vector<6x8x8xbf16>, vector<6x8x8xbf16>, vector<6x8x8xf32> -> vector<6x8x8xf32>
    "tpu.trace_stop"() : () -> ()
    %89 = vector.shape_cast %88 : vector<6x8x8xf32> to vector<48x8xf32>
    %90 = arith.truncf %89 : vector<48x8xf32> to vector<48x8xbf16>
    %91 = vector.extract_strided_slice %63 {offsets = [0, 0], sizes = [8, 32], strides = [1, 1]} : vector<32x32xbf16> to vector<8x32xbf16>
    %cst_46 = arith.constant dense<0.000000e+00> : vector<48x32xf32>
    %92 = tpu.matmul %90, %91, %cst_46 {dimension_numbers = #tpu.dot_dimension_numbers<[1], [0], [0], [1], [0, 0, 1, 1], [], []>} : vector<48x8xbf16>, vector<8x32xbf16>, vector<48x32xf32> -> vector<48x32xf32>
    %93 = vector.extract_strided_slice %61 {offsets = [0, 0, 8], sizes = [6, 8, 8], strides = [1, 1, 1]} : vector<6x8x96xf32> to vector<6x8x8xf32>
    %94 = arith.truncf %93 : vector<6x8x8xf32> to vector<6x8x8xbf16>
    %95 = vector.extract_strided_slice %61 {offsets = [0, 0, 40], sizes = [6, 8, 8], strides = [1, 1, 1]} : vector<6x8x96xf32> to vector<6x8x8xf32>
    %96 = arith.truncf %95 : vector<6x8x8xf32> to vector<6x8x8xbf16>
    %97 = vector.extract_strided_slice %61 {offsets = [0, 0, 72], sizes = [6, 8, 8], strides = [1, 1, 1]} : vector<6x8x96xf32> to vector<6x8x8xf32>
    %98 = arith.truncf %97 : vector<6x8x8xf32> to vector<6x8x8xbf16>
    "tpu.trace_start"() <{level = 10 : i32, message = "bqd,bkd->bqk"}> : () -> ()
    %cst_47 = arith.constant dense<0.000000e+00> : vector<6x8x8xf32>
    %99 = tpu.matmul %94, %96, %cst_47 {dimension_numbers = #tpu.dot_dimension_numbers<[2], [2], [1], [1], [0, 0, 0, 1, 1, 1], [0], [0]>} : vector<6x8x8xbf16>, vector<6x8x8xbf16>, vector<6x8x8xf32> -> vector<6x8x8xf32>
    "tpu.trace_stop"() : () -> ()
    %cst_48 = arith.constant 0.353553385 : f32
    %100 = vector.broadcast %cst_48 : f32 to vector<6x8x8xf32>
    %101 = arith.mulf %99, %100 : vector<6x8x8xf32>
    %102 = vector.shape_cast %26 : vector<8x8xi1> to vector<1x8x8xi1>
    %cst_49 = arith.constant -1.000000e+30 : f32
    %103 = vector.shape_cast %102 : vector<1x8x8xi1> to vector<1x8x8xi1>
    %104 = vector.broadcast %103 : vector<1x8x8xi1> to vector<6x8x8xi1>
    %105 = vector.broadcast %cst_49 : f32 to vector<6x8x8xf32>
    %106 = arith.select %104, %101, %105 : vector<6x8x8xi1>, vector<6x8x8xf32>
    %cst_50 = arith.constant dense<0xFF800000> : vector<6x8xf32>
    %107 = vector.multi_reduction <maximumf>, %106, %cst_50 [2] : vector<6x8x8xf32> to vector<6x8xf32>
    %108 = vector.shape_cast %107 : vector<6x8xf32> to vector<6x8x1xf32>
    %109 = vector.broadcast %108 : vector<6x8x1xf32> to vector<6x8x8xf32>
    %110 = arith.subf %106, %109 : vector<6x8x8xf32>
    %111 = math.exp %110 : vector<6x8x8xf32>
    %cst_51 = arith.constant dense<0.000000e+00> : vector<6x8xf32>
    %112 = vector.multi_reduction <add>, %111, %cst_51 [2] : vector<6x8x8xf32> to vector<6x8xf32>
    %113 = vector.shape_cast %112 : vector<6x8xf32> to vector<6x8x1xf32>
    %114 = vector.broadcast %113 : vector<6x8x1xf32> to vector<6x8x8xf32>
    %115 = arith.divf %111, %114 : vector<6x8x8xf32>
    %116 = arith.truncf %115 : vector<6x8x8xf32> to vector<6x8x8xbf16>
    "tpu.trace_start"() <{level = 10 : i32, message = "bqk,bkd->bqd"}> : () -> ()
    %cst_52 = arith.constant dense<0.000000e+00> : vector<6x8x8xf32>
    %117 = tpu.matmul %116, %98, %cst_52 {dimension_numbers = #tpu.dot_dimension_numbers<[2], [1], [1], [2], [0, 0, 0, 1, 1, 2], [0], [0]>} : vector<6x8x8xbf16>, vector<6x8x8xbf16>, vector<6x8x8xf32> -> vector<6x8x8xf32>
    "tpu.trace_stop"() : () -> ()
    %118 = vector.shape_cast %117 : vector<6x8x8xf32> to vector<48x8xf32>
    %119 = arith.truncf %118 : vector<48x8xf32> to vector<48x8xbf16>
    %120 = vector.extract_strided_slice %63 {offsets = [8, 0], sizes = [8, 32], strides = [1, 1]} : vector<32x32xbf16> to vector<8x32xbf16>
    %cst_53 = arith.constant dense<0.000000e+00> : vector<48x32xf32>
    %121 = tpu.matmul %119, %120, %cst_53 {dimension_numbers = #tpu.dot_dimension_numbers<[1], [0], [0], [1], [0, 0, 1, 1], [], []>} : vector<48x8xbf16>, vector<8x32xbf16>, vector<48x32xf32> -> vector<48x32xf32>
    %122 = vector.extract_strided_slice %61 {offsets = [0, 0, 16], sizes = [6, 8, 8], strides = [1, 1, 1]} : vector<6x8x96xf32> to vector<6x8x8xf32>
    %123 = arith.truncf %122 : vector<6x8x8xf32> to vector<6x8x8xbf16>
    %124 = vector.extract_strided_slice %61 {offsets = [0, 0, 48], sizes = [6, 8, 8], strides = [1, 1, 1]} : vector<6x8x96xf32> to vector<6x8x8xf32>
    %125 = arith.truncf %124 : vector<6x8x8xf32> to vector<6x8x8xbf16>
    %126 = vector.extract_strided_slice %61 {offsets = [0, 0, 80], sizes = [6, 8, 8], strides = [1, 1, 1]} : vector<6x8x96xf32> to vector<6x8x8xf32>
    %127 = arith.truncf %126 : vector<6x8x8xf32> to vector<6x8x8xbf16>
    "tpu.trace_start"() <{level = 10 : i32, message = "bqd,bkd->bqk"}> : () -> ()
    %cst_54 = arith.constant dense<0.000000e+00> : vector<6x8x8xf32>
    %128 = tpu.matmul %123, %125, %cst_54 {dimension_numbers = #tpu.dot_dimension_numbers<[2], [2], [1], [1], [0, 0, 0, 1, 1, 1], [0], [0]>} : vector<6x8x8xbf16>, vector<6x8x8xbf16>, vector<6x8x8xf32> -> vector<6x8x8xf32>
    "tpu.trace_stop"() : () -> ()
    %cst_55 = arith.constant 0.353553385 : f32
    %129 = vector.broadcast %cst_55 : f32 to vector<6x8x8xf32>
    %130 = arith.mulf %128, %129 : vector<6x8x8xf32>
    %131 = vector.shape_cast %26 : vector<8x8xi1> to vector<1x8x8xi1>
    %cst_56 = arith.constant -1.000000e+30 : f32
    %132 = vector.shape_cast %131 : vector<1x8x8xi1> to vector<1x8x8xi1>
    %133 = vector.broadcast %132 : vector<1x8x8xi1> to vector<6x8x8xi1>
    %134 = vector.broadcast %cst_56 : f32 to vector<6x8x8xf32>
    %135 = arith.select %133, %130, %134 : vector<6x8x8xi1>, vector<6x8x8xf32>
    %cst_57 = arith.constant dense<0xFF800000> : vector<6x8xf32>
    %136 = vector.multi_reduction <maximumf>, %135, %cst_57 [2] : vector<6x8x8xf32> to vector<6x8xf32>
    %137 = vector.shape_cast %136 : vector<6x8xf32> to vector<6x8x1xf32>
    %138 = vector.broadcast %137 : vector<6x8x1xf32> to vector<6x8x8xf32>
    %139 = arith.subf %135, %138 : vector<6x8x8xf32>
    %140 = math.exp %139 : vector<6x8x8xf32>
    %cst_58 = arith.constant dense<0.000000e+00> : vector<6x8xf32>
    %141 = vector.multi_reduction <add>, %140, %cst_58 [2] : vector<6x8x8xf32> to vector<6x8xf32>
    %142 = vector.shape_cast %141 : vector<6x8xf32> to vector<6x8x1xf32>
    %143 = vector.broadcast %142 : vector<6x8x1xf32> to vector<6x8x8xf32>
    %144 = arith.divf %140, %143 : vector<6x8x8xf32>
    %145 = arith.truncf %144 : vector<6x8x8xf32> to vector<6x8x8xbf16>
    "tpu.trace_start"() <{level = 10 : i32, message = "bqk,bkd->bqd"}> : () -> ()
    %cst_59 = arith.constant dense<0.000000e+00> : vector<6x8x8xf32>
    %146 = tpu.matmul %145, %127, %cst_59 {dimension_numbers = #tpu.dot_dimension_numbers<[2], [1], [1], [2], [0, 0, 0, 1, 1, 2], [0], [0]>} : vector<6x8x8xbf16>, vector<6x8x8xbf16>, vector<6x8x8xf32> -> vector<6x8x8xf32>
    "tpu.trace_stop"() : () -> ()
    %147 = vector.shape_cast %146 : vector<6x8x8xf32> to vector<48x8xf32>
    %148 = arith.truncf %147 : vector<48x8xf32> to vector<48x8xbf16>
    %149 = vector.extract_strided_slice %63 {offsets = [16, 0], sizes = [8, 32], strides = [1, 1]} : vector<32x32xbf16> to vector<8x32xbf16>
    %cst_60 = arith.constant dense<0.000000e+00> : vector<48x32xf32>
    %150 = tpu.matmul %148, %149, %cst_60 {dimension_numbers = #tpu.dot_dimension_numbers<[1], [0], [0], [1], [0, 0, 1, 1], [], []>} : vector<48x8xbf16>, vector<8x32xbf16>, vector<48x32xf32> -> vector<48x32xf32>
    %151 = vector.extract_strided_slice %61 {offsets = [0, 0, 24], sizes = [6, 8, 8], strides = [1, 1, 1]} : vector<6x8x96xf32> to vector<6x8x8xf32>
    %152 = arith.truncf %151 : vector<6x8x8xf32> to vector<6x8x8xbf16>
    %153 = vector.extract_strided_slice %61 {offsets = [0, 0, 56], sizes = [6, 8, 8], strides = [1, 1, 1]} : vector<6x8x96xf32> to vector<6x8x8xf32>
    %154 = arith.truncf %153 : vector<6x8x8xf32> to vector<6x8x8xbf16>
    %155 = vector.extract_strided_slice %61 {offsets = [0, 0, 88], sizes = [6, 8, 8], strides = [1, 1, 1]} : vector<6x8x96xf32> to vector<6x8x8xf32>
    %156 = arith.truncf %155 : vector<6x8x8xf32> to vector<6x8x8xbf16>
    "tpu.trace_start"() <{level = 10 : i32, message = "bqd,bkd->bqk"}> : () -> ()
    %cst_61 = arith.constant dense<0.000000e+00> : vector<6x8x8xf32>
    %157 = tpu.matmul %152, %154, %cst_61 {dimension_numbers = #tpu.dot_dimension_numbers<[2], [2], [1], [1], [0, 0, 0, 1, 1, 1], [0], [0]>} : vector<6x8x8xbf16>, vector<6x8x8xbf16>, vector<6x8x8xf32> -> vector<6x8x8xf32>
    "tpu.trace_stop"() : () -> ()
    %cst_62 = arith.constant 0.353553385 : f32
    %158 = vector.broadcast %cst_62 : f32 to vector<6x8x8xf32>
    %159 = arith.mulf %157, %158 : vector<6x8x8xf32>
    %160 = vector.shape_cast %26 : vector<8x8xi1> to vector<1x8x8xi1>
    %cst_63 = arith.constant -1.000000e+30 : f32
    %161 = vector.shape_cast %160 : vector<1x8x8xi1> to vector<1x8x8xi1>
    %162 = vector.broadcast %161 : vector<1x8x8xi1> to vector<6x8x8xi1>
    %163 = vector.broadcast %cst_63 : f32 to vector<6x8x8xf32>
    %164 = arith.select %162, %159, %163 : vector<6x8x8xi1>, vector<6x8x8xf32>
    %cst_64 = arith.constant dense<0xFF800000> : vector<6x8xf32>
    %165 = vector.multi_reduction <maximumf>, %164, %cst_64 [2] : vector<6x8x8xf32> to vector<6x8xf32>
    %166 = vector.shape_cast %165 : vector<6x8xf32> to vector<6x8x1xf32>
    %167 = vector.broadcast %166 : vector<6x8x1xf32> to vector<6x8x8xf32>
    %168 = arith.subf %164, %167 : vector<6x8x8xf32>
    %169 = math.exp %168 : vector<6x8x8xf32>
    %cst_65 = arith.constant dense<0.000000e+00> : vector<6x8xf32>
    %170 = vector.multi_reduction <add>, %169, %cst_65 [2] : vector<6x8x8xf32> to vector<6x8xf32>
    %171 = vector.shape_cast %170 : vector<6x8xf32> to vector<6x8x1xf32>
    %172 = vector.broadcast %171 : vector<6x8x1xf32> to vector<6x8x8xf32>
    %173 = arith.divf %169, %172 : vector<6x8x8xf32>
    %174 = arith.truncf %173 : vector<6x8x8xf32> to vector<6x8x8xbf16>
    "tpu.trace_start"() <{level = 10 : i32, message = "bqk,bkd->bqd"}> : () -> ()
    %cst_66 = arith.constant dense<0.000000e+00> : vector<6x8x8xf32>
    %175 = tpu.matmul %174, %156, %cst_66 {dimension_numbers = #tpu.dot_dimension_numbers<[2], [1], [1], [2], [0, 0, 0, 1, 1, 2], [0], [0]>} : vector<6x8x8xbf16>, vector<6x8x8xbf16>, vector<6x8x8xf32> -> vector<6x8x8xf32>
    "tpu.trace_stop"() : () -> ()
    %176 = vector.shape_cast %175 : vector<6x8x8xf32> to vector<48x8xf32>
    %177 = arith.truncf %176 : vector<48x8xf32> to vector<48x8xbf16>
    %178 = vector.extract_strided_slice %63 {offsets = [24, 0], sizes = [8, 32], strides = [1, 1]} : vector<32x32xbf16> to vector<8x32xbf16>
    %cst_67 = arith.constant dense<0.000000e+00> : vector<48x32xf32>
    %179 = tpu.matmul %177, %178, %cst_67 {dimension_numbers = #tpu.dot_dimension_numbers<[1], [0], [0], [1], [0, 0, 1, 1], [], []>} : vector<48x8xbf16>, vector<8x32xbf16>, vector<48x32xf32> -> vector<48x32xf32>
    %180 = arith.addf %92, %121 : vector<48x32xf32>
    %181 = arith.addf %150, %179 : vector<48x32xf32>
    %182 = arith.addf %180, %181 : vector<48x32xf32>
    %183 = arith.addf %23, %182 : vector<48x32xf32>
    %c0_68 = arith.constant 0 : index
    %c0_69 = arith.constant 0 : index
    %c0_70 = arith.constant 0 : index
    %184 = vector.load %arg12[%c0_68, %c0_69, %c0_70] : memref<2x1x32xf32, #tpu.memory_space<vmem>>, vector<1x1x32xf32>
    %185 = vector.shape_cast %184 : vector<1x1x32xf32> to vector<1x32xf32>
    %186 = vector.broadcast %185 : vector<1x32xf32> to vector<48x32xf32>
    %187 = arith.addf %183, %186 : vector<48x32xf32>
    %c0_71 = arith.constant 0 : index
    %c0_72 = arith.constant 0 : index
    %c0_73 = arith.constant 0 : index
    %188 = vector.load %arg13[%c0_71, %c0_72, %c0_73] : memref<2x1x32xf32, #tpu.memory_space<vmem>>, vector<1x1x32xf32>
    %189 = vector.shape_cast %188 : vector<1x1x32xf32> to vector<1x32xf32>
    %c0_74 = arith.constant 0 : index
    %c0_75 = arith.constant 0 : index
    %c0_76 = arith.constant 0 : index
    %190 = vector.load %arg14[%c0_74, %c0_75, %c0_76] : memref<2x1x32xf32, #tpu.memory_space<vmem>>, vector<1x1x32xf32>
    %191 = vector.shape_cast %190 : vector<1x1x32xf32> to vector<1x32xf32>
    %cst_77 = arith.constant dense<0.000000e+00> : vector<48xf32>
    %192 = vector.multi_reduction <add>, %187, %cst_77 [1] : vector<48x32xf32> to vector<48xf32>
    %193 = vector.shape_cast %192 : vector<48xf32> to vector<48x1xf32>
    %cst_78 = arith.constant 3.200000e+01 : f32
    %194 = vector.broadcast %cst_78 : f32 to vector<48x1xf32>
    %195 = arith.divf %193, %194 : vector<48x1xf32>
    %196 = vector.broadcast %195 : vector<48x1xf32> to vector<48x32xf32>
    %197 = arith.subf %187, %196 : vector<48x32xf32>
    %198 = arith.mulf %197, %197 : vector<48x32xf32>
    %cst_79 = arith.constant dense<0.000000e+00> : vector<48xf32>
    %199 = vector.multi_reduction <add>, %198, %cst_79 [1] : vector<48x32xf32> to vector<48xf32>
    %200 = vector.shape_cast %199 : vector<48xf32> to vector<48x1xf32>
    %cst_80 = arith.constant 3.200000e+01 : f32
    %201 = vector.broadcast %cst_80 : f32 to vector<48x1xf32>
    %202 = arith.divf %200, %201 : vector<48x1xf32>
    %203 = vector.broadcast %195 : vector<48x1xf32> to vector<48x32xf32>
    %204 = arith.subf %187, %203 : vector<48x32xf32>
    %cst_81 = arith.constant 9.99999974E-6 : f32
    %205 = vector.broadcast %cst_81 : f32 to vector<48x1xf32>
    %206 = arith.addf %202, %205 : vector<48x1xf32>
    %207 = math.rsqrt %206 : vector<48x1xf32>
    %208 = vector.broadcast %207 : vector<48x1xf32> to vector<48x32xf32>
    %209 = arith.mulf %204, %208 : vector<48x32xf32>
    %210 = vector.broadcast %189 : vector<1x32xf32> to vector<48x32xf32>
    %211 = arith.mulf %209, %210 : vector<48x32xf32>
    %212 = vector.broadcast %191 : vector<1x32xf32> to vector<48x32xf32>
    %213 = arith.addf %211, %212 : vector<48x32xf32>
    %214 = arith.truncf %213 : vector<48x32xf32> to vector<48x32xbf16>
    %c0_82 = arith.constant 0 : index
    %c0_83 = arith.constant 0 : index
    %c0_84 = arith.constant 0 : index
    %215 = vector.load %arg15[%c0_82, %c0_83, %c0_84] : memref<2x32x128xbf16, #tpu.memory_space<vmem>>, vector<1x32x128xbf16>
    %216 = vector.shape_cast %215 : vector<1x32x128xbf16> to vector<32x128xbf16>
    %cst_85 = arith.constant dense<0.000000e+00> : vector<48x128xf32>
    %217 = tpu.matmul %214, %216, %cst_85 {dimension_numbers = #tpu.dot_dimension_numbers<[1], [0], [0], [1], [0, 0, 1, 1], [], []>} : vector<48x32xbf16>, vector<32x128xbf16>, vector<48x128xf32> -> vector<48x128xf32>
    %c0_86 = arith.constant 0 : index
    %c0_87 = arith.constant 0 : index
    %c0_88 = arith.constant 0 : index
    %218 = vector.load %arg16[%c0_86, %c0_87, %c0_88] : memref<2x1x128xf32, #tpu.memory_space<vmem>>, vector<1x1x128xf32>
    %219 = vector.shape_cast %218 : vector<1x1x128xf32> to vector<1x128xf32>
    %220 = vector.broadcast %219 : vector<1x128xf32> to vector<48x128xf32>
    %221 = arith.addf %217, %220 : vector<48x128xf32>
    %cst_89 = arith.constant 1.702000e+00 : f32
    %222 = vector.broadcast %cst_89 : f32 to vector<48x128xf32>
    %223 = arith.mulf %222, %221 : vector<48x128xf32>
    %224 = arith.negf %223 : vector<48x128xf32>
    %225 = math.exp %224 : vector<48x128xf32>
    %cst_90 = arith.constant 1.000000e+00 : f32
    %226 = vector.broadcast %cst_90 : f32 to vector<48x128xf32>
    %227 = arith.addf %226, %225 : vector<48x128xf32>
    %228 = arith.divf %226, %227 : vector<48x128xf32>
    %229 = arith.mulf %221, %228 : vector<48x128xf32>
    %230 = arith.truncf %229 : vector<48x128xf32> to vector<48x128xbf16>
    %c0_91 = arith.constant 0 : index
    %c0_92 = arith.constant 0 : index
    %c0_93 = arith.constant 0 : index
    %231 = vector.load %arg17[%c0_91, %c0_92, %c0_93] : memref<2x128x32xbf16, #tpu.memory_space<vmem>>, vector<1x128x32xbf16>
    %232 = vector.shape_cast %231 : vector<1x128x32xbf16> to vector<128x32xbf16>
    %cst_94 = arith.constant dense<0.000000e+00> : vector<48x32xf32>
    %233 = tpu.matmul %230, %232, %cst_94 {dimension_numbers = #tpu.dot_dimension_numbers<[1], [0], [0], [1], [0, 0, 1, 1], [], []>} : vector<48x128xbf16>, vector<128x32xbf16>, vector<48x32xf32> -> vector<48x32xf32>
    %234 = arith.addf %187, %233 : vector<48x32xf32>
    %c0_95 = arith.constant 0 : index
    %c0_96 = arith.constant 0 : index
    %c0_97 = arith.constant 0 : index
    %235 = vector.load %arg18[%c0_95, %c0_96, %c0_97] : memref<2x1x32xf32, #tpu.memory_space<vmem>>, vector<1x1x32xf32>
    %236 = vector.shape_cast %235 : vector<1x1x32xf32> to vector<1x32xf32>
    %237 = vector.broadcast %236 : vector<1x32xf32> to vector<48x32xf32>
    %238 = arith.addf %234, %237 : vector<48x32xf32>
    %c1_98 = arith.constant 1 : index
    %c0_99 = arith.constant 0 : index
    %c0_100 = arith.constant 0 : index
    %239 = vector.load %arg7[%c1_98, %c0_99, %c0_100] : memref<2x1x32xf32, #tpu.memory_space<vmem>>, vector<1x1x32xf32>
    %240 = vector.shape_cast %239 : vector<1x1x32xf32> to vector<1x32xf32>
    %c1_101 = arith.constant 1 : index
    %c0_102 = arith.constant 0 : index
    %c0_103 = arith.constant 0 : index
    %241 = vector.load %arg8[%c1_101, %c0_102, %c0_103] : memref<2x1x32xf32, #tpu.memory_space<vmem>>, vector<1x1x32xf32>
    %242 = vector.shape_cast %241 : vector<1x1x32xf32> to vector<1x32xf32>
    %cst_104 = arith.constant dense<0.000000e+00> : vector<48xf32>
    %243 = vector.multi_reduction <add>, %238, %cst_104 [1] : vector<48x32xf32> to vector<48xf32>
    %244 = vector.shape_cast %243 : vector<48xf32> to vector<48x1xf32>
    %cst_105 = arith.constant 3.200000e+01 : f32
    %245 = vector.broadcast %cst_105 : f32 to vector<48x1xf32>
    %246 = arith.divf %244, %245 : vector<48x1xf32>
    %247 = vector.broadcast %246 : vector<48x1xf32> to vector<48x32xf32>
    %248 = arith.subf %238, %247 : vector<48x32xf32>
    %249 = arith.mulf %248, %248 : vector<48x32xf32>
    %cst_106 = arith.constant dense<0.000000e+00> : vector<48xf32>
    %250 = vector.multi_reduction <add>, %249, %cst_106 [1] : vector<48x32xf32> to vector<48xf32>
    %251 = vector.shape_cast %250 : vector<48xf32> to vector<48x1xf32>
    %cst_107 = arith.constant 3.200000e+01 : f32
    %252 = vector.broadcast %cst_107 : f32 to vector<48x1xf32>
    %253 = arith.divf %251, %252 : vector<48x1xf32>
    %254 = vector.broadcast %246 : vector<48x1xf32> to vector<48x32xf32>
    %255 = arith.subf %238, %254 : vector<48x32xf32>
    %cst_108 = arith.constant 9.99999974E-6 : f32
    %256 = vector.broadcast %cst_108 : f32 to vector<48x1xf32>
    %257 = arith.addf %253, %256 : vector<48x1xf32>
    %258 = math.rsqrt %257 : vector<48x1xf32>
    %259 = vector.broadcast %258 : vector<48x1xf32> to vector<48x32xf32>
    %260 = arith.mulf %255, %259 : vector<48x32xf32>
    %261 = vector.broadcast %240 : vector<1x32xf32> to vector<48x32xf32>
    %262 = arith.mulf %260, %261 : vector<48x32xf32>
    %263 = vector.broadcast %242 : vector<1x32xf32> to vector<48x32xf32>
    %264 = arith.addf %262, %263 : vector<48x32xf32>
    %265 = arith.truncf %264 : vector<48x32xf32> to vector<48x32xbf16>
    %c1_109 = arith.constant 1 : index
    %c0_110 = arith.constant 0 : index
    %c0_111 = arith.constant 0 : index
    %266 = vector.load %arg9[%c1_109, %c0_110, %c0_111] : memref<2x32x96xbf16, #tpu.memory_space<vmem>>, vector<1x32x96xbf16>
    %267 = vector.shape_cast %266 : vector<1x32x96xbf16> to vector<32x96xbf16>
    %cst_112 = arith.constant dense<0.000000e+00> : vector<48x96xf32>
    %268 = tpu.matmul %265, %267, %cst_112 {dimension_numbers = #tpu.dot_dimension_numbers<[1], [0], [0], [1], [0, 0, 1, 1], [], []>} : vector<48x32xbf16>, vector<32x96xbf16>, vector<48x96xf32> -> vector<48x96xf32>
    %c1_113 = arith.constant 1 : index
    %c0_114 = arith.constant 0 : index
    %c0_115 = arith.constant 0 : index
    %269 = vector.load %arg10[%c1_113, %c0_114, %c0_115] : memref<2x1x96xf32, #tpu.memory_space<vmem>>, vector<1x1x96xf32>
    %270 = vector.shape_cast %269 : vector<1x1x96xf32> to vector<1x96xf32>
    %271 = vector.broadcast %270 : vector<1x96xf32> to vector<48x96xf32>
    %272 = arith.addf %268, %271 : vector<48x96xf32>
    %273 = vector.shape_cast %272 : vector<48x96xf32> to vector<6x8x96xf32>
    %c1_116 = arith.constant 1 : index
    %c0_117 = arith.constant 0 : index
    %c0_118 = arith.constant 0 : index
    %274 = vector.load %arg11[%c1_116, %c0_117, %c0_118] : memref<2x32x32xbf16, #tpu.memory_space<vmem>>, vector<1x32x32xbf16>
    %275 = vector.shape_cast %274 : vector<1x32x32xbf16> to vector<32x32xbf16>
    %276 = vector.extract_strided_slice %273 {offsets = [0, 0, 0], sizes = [6, 8, 8], strides = [1, 1, 1]} : vector<6x8x96xf32> to vector<6x8x8xf32>
    %277 = arith.truncf %276 : vector<6x8x8xf32> to vector<6x8x8xbf16>
    %278 = vector.extract_strided_slice %273 {offsets = [0, 0, 32], sizes = [6, 8, 8], strides = [1, 1, 1]} : vector<6x8x96xf32> to vector<6x8x8xf32>
    %279 = arith.truncf %278 : vector<6x8x8xf32> to vector<6x8x8xbf16>
    %280 = vector.extract_strided_slice %273 {offsets = [0, 0, 64], sizes = [6, 8, 8], strides = [1, 1, 1]} : vector<6x8x96xf32> to vector<6x8x8xf32>
    %281 = arith.truncf %280 : vector<6x8x8xf32> to vector<6x8x8xbf16>
    "tpu.trace_start"() <{level = 10 : i32, message = "bqd,bkd->bqk"}> : () -> ()
    %cst_119 = arith.constant dense<0.000000e+00> : vector<6x8x8xf32>
    %282 = tpu.matmul %277, %279, %cst_119 {dimension_numbers = #tpu.dot_dimension_numbers<[2], [2], [1], [1], [0, 0, 0, 1, 1, 1], [0], [0]>} : vector<6x8x8xbf16>, vector<6x8x8xbf16>, vector<6x8x8xf32> -> vector<6x8x8xf32>
    "tpu.trace_stop"() : () -> ()
    %cst_120 = arith.constant 0.353553385 : f32
    %283 = vector.broadcast %cst_120 : f32 to vector<6x8x8xf32>
    %284 = arith.mulf %282, %283 : vector<6x8x8xf32>
    %285 = vector.shape_cast %26 : vector<8x8xi1> to vector<1x8x8xi1>
    %cst_121 = arith.constant -1.000000e+30 : f32
    %286 = vector.shape_cast %285 : vector<1x8x8xi1> to vector<1x8x8xi1>
    %287 = vector.broadcast %286 : vector<1x8x8xi1> to vector<6x8x8xi1>
    %288 = vector.broadcast %cst_121 : f32 to vector<6x8x8xf32>
    %289 = arith.select %287, %284, %288 : vector<6x8x8xi1>, vector<6x8x8xf32>
    %cst_122 = arith.constant dense<0xFF800000> : vector<6x8xf32>
    %290 = vector.multi_reduction <maximumf>, %289, %cst_122 [2] : vector<6x8x8xf32> to vector<6x8xf32>
    %291 = vector.shape_cast %290 : vector<6x8xf32> to vector<6x8x1xf32>
    %292 = vector.broadcast %291 : vector<6x8x1xf32> to vector<6x8x8xf32>
    %293 = arith.subf %289, %292 : vector<6x8x8xf32>
    %294 = math.exp %293 : vector<6x8x8xf32>
    %cst_123 = arith.constant dense<0.000000e+00> : vector<6x8xf32>
    %295 = vector.multi_reduction <add>, %294, %cst_123 [2] : vector<6x8x8xf32> to vector<6x8xf32>
    %296 = vector.shape_cast %295 : vector<6x8xf32> to vector<6x8x1xf32>
    %297 = vector.broadcast %296 : vector<6x8x1xf32> to vector<6x8x8xf32>
    %298 = arith.divf %294, %297 : vector<6x8x8xf32>
    %299 = arith.truncf %298 : vector<6x8x8xf32> to vector<6x8x8xbf16>
    "tpu.trace_start"() <{level = 10 : i32, message = "bqk,bkd->bqd"}> : () -> ()
    %cst_124 = arith.constant dense<0.000000e+00> : vector<6x8x8xf32>
    %300 = tpu.matmul %299, %281, %cst_124 {dimension_numbers = #tpu.dot_dimension_numbers<[2], [1], [1], [2], [0, 0, 0, 1, 1, 2], [0], [0]>} : vector<6x8x8xbf16>, vector<6x8x8xbf16>, vector<6x8x8xf32> -> vector<6x8x8xf32>
    "tpu.trace_stop"() : () -> ()
    %301 = vector.shape_cast %300 : vector<6x8x8xf32> to vector<48x8xf32>
    %302 = arith.truncf %301 : vector<48x8xf32> to vector<48x8xbf16>
    %303 = vector.extract_strided_slice %275 {offsets = [0, 0], sizes = [8, 32], strides = [1, 1]} : vector<32x32xbf16> to vector<8x32xbf16>
    %cst_125 = arith.constant dense<0.000000e+00> : vector<48x32xf32>
    %304 = tpu.matmul %302, %303, %cst_125 {dimension_numbers = #tpu.dot_dimension_numbers<[1], [0], [0], [1], [0, 0, 1, 1], [], []>} : vector<48x8xbf16>, vector<8x32xbf16>, vector<48x32xf32> -> vector<48x32xf32>
    %305 = vector.extract_strided_slice %273 {offsets = [0, 0, 8], sizes = [6, 8, 8], strides = [1, 1, 1]} : vector<6x8x96xf32> to vector<6x8x8xf32>
    %306 = arith.truncf %305 : vector<6x8x8xf32> to vector<6x8x8xbf16>
    %307 = vector.extract_strided_slice %273 {offsets = [0, 0, 40], sizes = [6, 8, 8], strides = [1, 1, 1]} : vector<6x8x96xf32> to vector<6x8x8xf32>
    %308 = arith.truncf %307 : vector<6x8x8xf32> to vector<6x8x8xbf16>
    %309 = vector.extract_strided_slice %273 {offsets = [0, 0, 72], sizes = [6, 8, 8], strides = [1, 1, 1]} : vector<6x8x96xf32> to vector<6x8x8xf32>
    %310 = arith.truncf %309 : vector<6x8x8xf32> to vector<6x8x8xbf16>
    "tpu.trace_start"() <{level = 10 : i32, message = "bqd,bkd->bqk"}> : () -> ()
    %cst_126 = arith.constant dense<0.000000e+00> : vector<6x8x8xf32>
    %311 = tpu.matmul %306, %308, %cst_126 {dimension_numbers = #tpu.dot_dimension_numbers<[2], [2], [1], [1], [0, 0, 0, 1, 1, 1], [0], [0]>} : vector<6x8x8xbf16>, vector<6x8x8xbf16>, vector<6x8x8xf32> -> vector<6x8x8xf32>
    "tpu.trace_stop"() : () -> ()
    %cst_127 = arith.constant 0.353553385 : f32
    %312 = vector.broadcast %cst_127 : f32 to vector<6x8x8xf32>
    %313 = arith.mulf %311, %312 : vector<6x8x8xf32>
    %314 = vector.shape_cast %26 : vector<8x8xi1> to vector<1x8x8xi1>
    %cst_128 = arith.constant -1.000000e+30 : f32
    %315 = vector.shape_cast %314 : vector<1x8x8xi1> to vector<1x8x8xi1>
    %316 = vector.broadcast %315 : vector<1x8x8xi1> to vector<6x8x8xi1>
    %317 = vector.broadcast %cst_128 : f32 to vector<6x8x8xf32>
    %318 = arith.select %316, %313, %317 : vector<6x8x8xi1>, vector<6x8x8xf32>
    %cst_129 = arith.constant dense<0xFF800000> : vector<6x8xf32>
    %319 = vector.multi_reduction <maximumf>, %318, %cst_129 [2] : vector<6x8x8xf32> to vector<6x8xf32>
    %320 = vector.shape_cast %319 : vector<6x8xf32> to vector<6x8x1xf32>
    %321 = vector.broadcast %320 : vector<6x8x1xf32> to vector<6x8x8xf32>
    %322 = arith.subf %318, %321 : vector<6x8x8xf32>
    %323 = math.exp %322 : vector<6x8x8xf32>
    %cst_130 = arith.constant dense<0.000000e+00> : vector<6x8xf32>
    %324 = vector.multi_reduction <add>, %323, %cst_130 [2] : vector<6x8x8xf32> to vector<6x8xf32>
    %325 = vector.shape_cast %324 : vector<6x8xf32> to vector<6x8x1xf32>
    %326 = vector.broadcast %325 : vector<6x8x1xf32> to vector<6x8x8xf32>
    %327 = arith.divf %323, %326 : vector<6x8x8xf32>
    %328 = arith.truncf %327 : vector<6x8x8xf32> to vector<6x8x8xbf16>
    "tpu.trace_start"() <{level = 10 : i32, message = "bqk,bkd->bqd"}> : () -> ()
    %cst_131 = arith.constant dense<0.000000e+00> : vector<6x8x8xf32>
    %329 = tpu.matmul %328, %310, %cst_131 {dimension_numbers = #tpu.dot_dimension_numbers<[2], [1], [1], [2], [0, 0, 0, 1, 1, 2], [0], [0]>} : vector<6x8x8xbf16>, vector<6x8x8xbf16>, vector<6x8x8xf32> -> vector<6x8x8xf32>
    "tpu.trace_stop"() : () -> ()
    %330 = vector.shape_cast %329 : vector<6x8x8xf32> to vector<48x8xf32>
    %331 = arith.truncf %330 : vector<48x8xf32> to vector<48x8xbf16>
    %332 = vector.extract_strided_slice %275 {offsets = [8, 0], sizes = [8, 32], strides = [1, 1]} : vector<32x32xbf16> to vector<8x32xbf16>
    %cst_132 = arith.constant dense<0.000000e+00> : vector<48x32xf32>
    %333 = tpu.matmul %331, %332, %cst_132 {dimension_numbers = #tpu.dot_dimension_numbers<[1], [0], [0], [1], [0, 0, 1, 1], [], []>} : vector<48x8xbf16>, vector<8x32xbf16>, vector<48x32xf32> -> vector<48x32xf32>
    %334 = vector.extract_strided_slice %273 {offsets = [0, 0, 16], sizes = [6, 8, 8], strides = [1, 1, 1]} : vector<6x8x96xf32> to vector<6x8x8xf32>
    %335 = arith.truncf %334 : vector<6x8x8xf32> to vector<6x8x8xbf16>
    %336 = vector.extract_strided_slice %273 {offsets = [0, 0, 48], sizes = [6, 8, 8], strides = [1, 1, 1]} : vector<6x8x96xf32> to vector<6x8x8xf32>
    %337 = arith.truncf %336 : vector<6x8x8xf32> to vector<6x8x8xbf16>
    %338 = vector.extract_strided_slice %273 {offsets = [0, 0, 80], sizes = [6, 8, 8], strides = [1, 1, 1]} : vector<6x8x96xf32> to vector<6x8x8xf32>
    %339 = arith.truncf %338 : vector<6x8x8xf32> to vector<6x8x8xbf16>
    "tpu.trace_start"() <{level = 10 : i32, message = "bqd,bkd->bqk"}> : () -> ()
    %cst_133 = arith.constant dense<0.000000e+00> : vector<6x8x8xf32>
    %340 = tpu.matmul %335, %337, %cst_133 {dimension_numbers = #tpu.dot_dimension_numbers<[2], [2], [1], [1], [0, 0, 0, 1, 1, 1], [0], [0]>} : vector<6x8x8xbf16>, vector<6x8x8xbf16>, vector<6x8x8xf32> -> vector<6x8x8xf32>
    "tpu.trace_stop"() : () -> ()
    %cst_134 = arith.constant 0.353553385 : f32
    %341 = vector.broadcast %cst_134 : f32 to vector<6x8x8xf32>
    %342 = arith.mulf %340, %341 : vector<6x8x8xf32>
    %343 = vector.shape_cast %26 : vector<8x8xi1> to vector<1x8x8xi1>
    %cst_135 = arith.constant -1.000000e+30 : f32
    %344 = vector.shape_cast %343 : vector<1x8x8xi1> to vector<1x8x8xi1>
    %345 = vector.broadcast %344 : vector<1x8x8xi1> to vector<6x8x8xi1>
    %346 = vector.broadcast %cst_135 : f32 to vector<6x8x8xf32>
    %347 = arith.select %345, %342, %346 : vector<6x8x8xi1>, vector<6x8x8xf32>
    %cst_136 = arith.constant dense<0xFF800000> : vector<6x8xf32>
    %348 = vector.multi_reduction <maximumf>, %347, %cst_136 [2] : vector<6x8x8xf32> to vector<6x8xf32>
    %349 = vector.shape_cast %348 : vector<6x8xf32> to vector<6x8x1xf32>
    %350 = vector.broadcast %349 : vector<6x8x1xf32> to vector<6x8x8xf32>
    %351 = arith.subf %347, %350 : vector<6x8x8xf32>
    %352 = math.exp %351 : vector<6x8x8xf32>
    %cst_137 = arith.constant dense<0.000000e+00> : vector<6x8xf32>
    %353 = vector.multi_reduction <add>, %352, %cst_137 [2] : vector<6x8x8xf32> to vector<6x8xf32>
    %354 = vector.shape_cast %353 : vector<6x8xf32> to vector<6x8x1xf32>
    %355 = vector.broadcast %354 : vector<6x8x1xf32> to vector<6x8x8xf32>
    %356 = arith.divf %352, %355 : vector<6x8x8xf32>
    %357 = arith.truncf %356 : vector<6x8x8xf32> to vector<6x8x8xbf16>
    "tpu.trace_start"() <{level = 10 : i32, message = "bqk,bkd->bqd"}> : () -> ()
    %cst_138 = arith.constant dense<0.000000e+00> : vector<6x8x8xf32>
    %358 = tpu.matmul %357, %339, %cst_138 {dimension_numbers = #tpu.dot_dimension_numbers<[2], [1], [1], [2], [0, 0, 0, 1, 1, 2], [0], [0]>} : vector<6x8x8xbf16>, vector<6x8x8xbf16>, vector<6x8x8xf32> -> vector<6x8x8xf32>
    "tpu.trace_stop"() : () -> ()
    %359 = vector.shape_cast %358 : vector<6x8x8xf32> to vector<48x8xf32>
    %360 = arith.truncf %359 : vector<48x8xf32> to vector<48x8xbf16>
    %361 = vector.extract_strided_slice %275 {offsets = [16, 0], sizes = [8, 32], strides = [1, 1]} : vector<32x32xbf16> to vector<8x32xbf16>
    %cst_139 = arith.constant dense<0.000000e+00> : vector<48x32xf32>
    %362 = tpu.matmul %360, %361, %cst_139 {dimension_numbers = #tpu.dot_dimension_numbers<[1], [0], [0], [1], [0, 0, 1, 1], [], []>} : vector<48x8xbf16>, vector<8x32xbf16>, vector<48x32xf32> -> vector<48x32xf32>
    %363 = vector.extract_strided_slice %273 {offsets = [0, 0, 24], sizes = [6, 8, 8], strides = [1, 1, 1]} : vector<6x8x96xf32> to vector<6x8x8xf32>
    %364 = arith.truncf %363 : vector<6x8x8xf32> to vector<6x8x8xbf16>
    %365 = vector.extract_strided_slice %273 {offsets = [0, 0, 56], sizes = [6, 8, 8], strides = [1, 1, 1]} : vector<6x8x96xf32> to vector<6x8x8xf32>
    %366 = arith.truncf %365 : vector<6x8x8xf32> to vector<6x8x8xbf16>
    %367 = vector.extract_strided_slice %273 {offsets = [0, 0, 88], sizes = [6, 8, 8], strides = [1, 1, 1]} : vector<6x8x96xf32> to vector<6x8x8xf32>
    %368 = arith.truncf %367 : vector<6x8x8xf32> to vector<6x8x8xbf16>
    "tpu.trace_start"() <{level = 10 : i32, message = "bqd,bkd->bqk"}> : () -> ()
    %cst_140 = arith.constant dense<0.000000e+00> : vector<6x8x8xf32>
    %369 = tpu.matmul %364, %366, %cst_140 {dimension_numbers = #tpu.dot_dimension_numbers<[2], [2], [1], [1], [0, 0, 0, 1, 1, 1], [0], [0]>} : vector<6x8x8xbf16>, vector<6x8x8xbf16>, vector<6x8x8xf32> -> vector<6x8x8xf32>
    "tpu.trace_stop"() : () -> ()
    %cst_141 = arith.constant 0.353553385 : f32
    %370 = vector.broadcast %cst_141 : f32 to vector<6x8x8xf32>
    %371 = arith.mulf %369, %370 : vector<6x8x8xf32>
    %372 = vector.shape_cast %26 : vector<8x8xi1> to vector<1x8x8xi1>
    %cst_142 = arith.constant -1.000000e+30 : f32
    %373 = vector.shape_cast %372 : vector<1x8x8xi1> to vector<1x8x8xi1>
    %374 = vector.broadcast %373 : vector<1x8x8xi1> to vector<6x8x8xi1>
    %375 = vector.broadcast %cst_142 : f32 to vector<6x8x8xf32>
    %376 = arith.select %374, %371, %375 : vector<6x8x8xi1>, vector<6x8x8xf32>
    %cst_143 = arith.constant dense<0xFF800000> : vector<6x8xf32>
    %377 = vector.multi_reduction <maximumf>, %376, %cst_143 [2] : vector<6x8x8xf32> to vector<6x8xf32>
    %378 = vector.shape_cast %377 : vector<6x8xf32> to vector<6x8x1xf32>
    %379 = vector.broadcast %378 : vector<6x8x1xf32> to vector<6x8x8xf32>
    %380 = arith.subf %376, %379 : vector<6x8x8xf32>
    %381 = math.exp %380 : vector<6x8x8xf32>
    %cst_144 = arith.constant dense<0.000000e+00> : vector<6x8xf32>
    %382 = vector.multi_reduction <add>, %381, %cst_144 [2] : vector<6x8x8xf32> to vector<6x8xf32>
    %383 = vector.shape_cast %382 : vector<6x8xf32> to vector<6x8x1xf32>
    %384 = vector.broadcast %383 : vector<6x8x1xf32> to vector<6x8x8xf32>
    %385 = arith.divf %381, %384 : vector<6x8x8xf32>
    %386 = arith.truncf %385 : vector<6x8x8xf32> to vector<6x8x8xbf16>
    "tpu.trace_start"() <{level = 10 : i32, message = "bqk,bkd->bqd"}> : () -> ()
    %cst_145 = arith.constant dense<0.000000e+00> : vector<6x8x8xf32>
    %387 = tpu.matmul %386, %368, %cst_145 {dimension_numbers = #tpu.dot_dimension_numbers<[2], [1], [1], [2], [0, 0, 0, 1, 1, 2], [0], [0]>} : vector<6x8x8xbf16>, vector<6x8x8xbf16>, vector<6x8x8xf32> -> vector<6x8x8xf32>
    "tpu.trace_stop"() : () -> ()
    %388 = vector.shape_cast %387 : vector<6x8x8xf32> to vector<48x8xf32>
    %389 = arith.truncf %388 : vector<48x8xf32> to vector<48x8xbf16>
    %390 = vector.extract_strided_slice %275 {offsets = [24, 0], sizes = [8, 32], strides = [1, 1]} : vector<32x32xbf16> to vector<8x32xbf16>
    %cst_146 = arith.constant dense<0.000000e+00> : vector<48x32xf32>
    %391 = tpu.matmul %389, %390, %cst_146 {dimension_numbers = #tpu.dot_dimension_numbers<[1], [0], [0], [1], [0, 0, 1, 1], [], []>} : vector<48x8xbf16>, vector<8x32xbf16>, vector<48x32xf32> -> vector<48x32xf32>
    %392 = arith.addf %304, %333 : vector<48x32xf32>
    %393 = arith.addf %362, %391 : vector<48x32xf32>
    %394 = arith.addf %392, %393 : vector<48x32xf32>
    %395 = arith.addf %238, %394 : vector<48x32xf32>
    %c1_147 = arith.constant 1 : index
    %c0_148 = arith.constant 0 : index
    %c0_149 = arith.constant 0 : index
    %396 = vector.load %arg12[%c1_147, %c0_148, %c0_149] : memref<2x1x32xf32, #tpu.memory_space<vmem>>, vector<1x1x32xf32>
    %397 = vector.shape_cast %396 : vector<1x1x32xf32> to vector<1x32xf32>
    %398 = vector.broadcast %397 : vector<1x32xf32> to vector<48x32xf32>
    %399 = arith.addf %395, %398 : vector<48x32xf32>
    %c1_150 = arith.constant 1 : index
    %c0_151 = arith.constant 0 : index
    %c0_152 = arith.constant 0 : index
    %400 = vector.load %arg13[%c1_150, %c0_151, %c0_152] : memref<2x1x32xf32, #tpu.memory_space<vmem>>, vector<1x1x32xf32>
    %401 = vector.shape_cast %400 : vector<1x1x32xf32> to vector<1x32xf32>
    %c1_153 = arith.constant 1 : index
    %c0_154 = arith.constant 0 : index
    %c0_155 = arith.constant 0 : index
    %402 = vector.load %arg14[%c1_153, %c0_154, %c0_155] : memref<2x1x32xf32, #tpu.memory_space<vmem>>, vector<1x1x32xf32>
    %403 = vector.shape_cast %402 : vector<1x1x32xf32> to vector<1x32xf32>
    %cst_156 = arith.constant dense<0.000000e+00> : vector<48xf32>
    %404 = vector.multi_reduction <add>, %399, %cst_156 [1] : vector<48x32xf32> to vector<48xf32>
    %405 = vector.shape_cast %404 : vector<48xf32> to vector<48x1xf32>
    %cst_157 = arith.constant 3.200000e+01 : f32
    %406 = vector.broadcast %cst_157 : f32 to vector<48x1xf32>
    %407 = arith.divf %405, %406 : vector<48x1xf32>
    %408 = vector.broadcast %407 : vector<48x1xf32> to vector<48x32xf32>
    %409 = arith.subf %399, %408 : vector<48x32xf32>
    %410 = arith.mulf %409, %409 : vector<48x32xf32>
    %cst_158 = arith.constant dense<0.000000e+00> : vector<48xf32>
    %411 = vector.multi_reduction <add>, %410, %cst_158 [1] : vector<48x32xf32> to vector<48xf32>
    %412 = vector.shape_cast %411 : vector<48xf32> to vector<48x1xf32>
    %cst_159 = arith.constant 3.200000e+01 : f32
    %413 = vector.broadcast %cst_159 : f32 to vector<48x1xf32>
    %414 = arith.divf %412, %413 : vector<48x1xf32>
    %415 = vector.broadcast %407 : vector<48x1xf32> to vector<48x32xf32>
    %416 = arith.subf %399, %415 : vector<48x32xf32>
    %cst_160 = arith.constant 9.99999974E-6 : f32
    %417 = vector.broadcast %cst_160 : f32 to vector<48x1xf32>
    %418 = arith.addf %414, %417 : vector<48x1xf32>
    %419 = math.rsqrt %418 : vector<48x1xf32>
    %420 = vector.broadcast %419 : vector<48x1xf32> to vector<48x32xf32>
    %421 = arith.mulf %416, %420 : vector<48x32xf32>
    %422 = vector.broadcast %401 : vector<1x32xf32> to vector<48x32xf32>
    %423 = arith.mulf %421, %422 : vector<48x32xf32>
    %424 = vector.broadcast %403 : vector<1x32xf32> to vector<48x32xf32>
    %425 = arith.addf %423, %424 : vector<48x32xf32>
    %426 = arith.truncf %425 : vector<48x32xf32> to vector<48x32xbf16>
    %c1_161 = arith.constant 1 : index
    %c0_162 = arith.constant 0 : index
    %c0_163 = arith.constant 0 : index
    %427 = vector.load %arg15[%c1_161, %c0_162, %c0_163] : memref<2x32x128xbf16, #tpu.memory_space<vmem>>, vector<1x32x128xbf16>
    %428 = vector.shape_cast %427 : vector<1x32x128xbf16> to vector<32x128xbf16>
    %cst_164 = arith.constant dense<0.000000e+00> : vector<48x128xf32>
    %429 = tpu.matmul %426, %428, %cst_164 {dimension_numbers = #tpu.dot_dimension_numbers<[1], [0], [0], [1], [0, 0, 1, 1], [], []>} : vector<48x32xbf16>, vector<32x128xbf16>, vector<48x128xf32> -> vector<48x128xf32>
    %c1_165 = arith.constant 1 : index
    %c0_166 = arith.constant 0 : index
    %c0_167 = arith.constant 0 : index
    %430 = vector.load %arg16[%c1_165, %c0_166, %c0_167] : memref<2x1x128xf32, #tpu.memory_space<vmem>>, vector<1x1x128xf32>
    %431 = vector.shape_cast %430 : vector<1x1x128xf32> to vector<1x128xf32>
    %432 = vector.broadcast %431 : vector<1x128xf32> to vector<48x128xf32>
    %433 = arith.addf %429, %432 : vector<48x128xf32>
    %cst_168 = arith.constant 1.702000e+00 : f32
    %434 = vector.broadcast %cst_168 : f32 to vector<48x128xf32>
    %435 = arith.mulf %434, %433 : vector<48x128xf32>
    %436 = arith.negf %435 : vector<48x128xf32>
    %437 = math.exp %436 : vector<48x128xf32>
    %cst_169 = arith.constant 1.000000e+00 : f32
    %438 = vector.broadcast %cst_169 : f32 to vector<48x128xf32>
    %439 = arith.addf %438, %437 : vector<48x128xf32>
    %440 = arith.divf %438, %439 : vector<48x128xf32>
    %441 = arith.mulf %433, %440 : vector<48x128xf32>
    %442 = arith.truncf %441 : vector<48x128xf32> to vector<48x128xbf16>
    %c1_170 = arith.constant 1 : index
    %c0_171 = arith.constant 0 : index
    %c0_172 = arith.constant 0 : index
    %443 = vector.load %arg17[%c1_170, %c0_171, %c0_172] : memref<2x128x32xbf16, #tpu.memory_space<vmem>>, vector<1x128x32xbf16>
    %444 = vector.shape_cast %443 : vector<1x128x32xbf16> to vector<128x32xbf16>
    %cst_173 = arith.constant dense<0.000000e+00> : vector<48x32xf32>
    %445 = tpu.matmul %442, %444, %cst_173 {dimension_numbers = #tpu.dot_dimension_numbers<[1], [0], [0], [1], [0, 0, 1, 1], [], []>} : vector<48x128xbf16>, vector<128x32xbf16>, vector<48x32xf32> -> vector<48x32xf32>
    %446 = arith.addf %399, %445 : vector<48x32xf32>
    %c1_174 = arith.constant 1 : index
    %c0_175 = arith.constant 0 : index
    %c0_176 = arith.constant 0 : index
    %447 = vector.load %arg18[%c1_174, %c0_175, %c0_176] : memref<2x1x32xf32, #tpu.memory_space<vmem>>, vector<1x1x32xf32>
    %448 = vector.shape_cast %447 : vector<1x1x32xf32> to vector<1x32xf32>
    %449 = vector.broadcast %448 : vector<1x32xf32> to vector<48x32xf32>
    %450 = arith.addf %446, %449 : vector<48x32xf32>
    %c0_177 = arith.constant 0 : index
    %c0_178 = arith.constant 0 : index
    %451 = vector.load %arg19[%c0_177, %c0_178] : memref<1x32xf32, #tpu.memory_space<vmem>>, vector<1x32xf32>
    %c0_179 = arith.constant 0 : index
    %c0_180 = arith.constant 0 : index
    %452 = vector.load %arg20[%c0_179, %c0_180] : memref<1x32xf32, #tpu.memory_space<vmem>>, vector<1x32xf32>
    %cst_181 = arith.constant dense<0.000000e+00> : vector<48xf32>
    %453 = vector.multi_reduction <add>, %450, %cst_181 [1] : vector<48x32xf32> to vector<48xf32>
    %454 = vector.shape_cast %453 : vector<48xf32> to vector<48x1xf32>
    %cst_182 = arith.constant 3.200000e+01 : f32
    %455 = vector.broadcast %cst_182 : f32 to vector<48x1xf32>
    %456 = arith.divf %454, %455 : vector<48x1xf32>
    %457 = vector.broadcast %456 : vector<48x1xf32> to vector<48x32xf32>
    %458 = arith.subf %450, %457 : vector<48x32xf32>
    %459 = arith.mulf %458, %458 : vector<48x32xf32>
    %cst_183 = arith.constant dense<0.000000e+00> : vector<48xf32>
    %460 = vector.multi_reduction <add>, %459, %cst_183 [1] : vector<48x32xf32> to vector<48xf32>
    %461 = vector.shape_cast %460 : vector<48xf32> to vector<48x1xf32>
    %cst_184 = arith.constant 3.200000e+01 : f32
    %462 = vector.broadcast %cst_184 : f32 to vector<48x1xf32>
    %463 = arith.divf %461, %462 : vector<48x1xf32>
    %464 = vector.broadcast %456 : vector<48x1xf32> to vector<48x32xf32>
    %465 = arith.subf %450, %464 : vector<48x32xf32>
    %cst_185 = arith.constant 9.99999974E-6 : f32
    %466 = vector.broadcast %cst_185 : f32 to vector<48x1xf32>
    %467 = arith.addf %463, %466 : vector<48x1xf32>
    %468 = math.rsqrt %467 : vector<48x1xf32>
    %469 = vector.broadcast %468 : vector<48x1xf32> to vector<48x32xf32>
    %470 = arith.mulf %465, %469 : vector<48x32xf32>
    %471 = vector.broadcast %451 : vector<1x32xf32> to vector<48x32xf32>
    %472 = arith.mulf %470, %471 : vector<48x32xf32>
    %473 = vector.broadcast %452 : vector<1x32xf32> to vector<48x32xf32>
    %474 = arith.addf %472, %473 : vector<48x32xf32>
    %475 = vector.shape_cast %474 : vector<48x32xf32> to vector<6x8x32xf32>
    %c0_186 = arith.constant 0 : index
    %c0_187 = arith.constant 0 : index
    %476 = vector.load %arg4[%c0_186, %c0_187] : memref<6x8xf32, #tpu.memory_space<vmem>>, vector<6x8xf32>
    %477 = vector.shape_cast %476 : vector<6x8xf32> to vector<6x8x1xf32>
    %478 = vector.broadcast %477 : vector<6x8x1xf32> to vector<6x8x32xf32>
    %479 = arith.mulf %478, %475 : vector<6x8x32xf32>
    %cst_188 = arith.constant dense<0.000000e+00> : vector<6x32xf32>
    %480 = vector.multi_reduction <add>, %479, %cst_188 [1] : vector<6x8x32xf32> to vector<6x32xf32>
    %481 = arith.truncf %480 : vector<6x32xf32> to vector<6x32xbf16>
    %c0_189 = arith.constant 0 : index
    %c0_190 = arith.constant 0 : index
    %482 = vector.load %arg21[%c0_189, %c0_190] : memref<32x32xbf16, #tpu.memory_space<vmem>>, vector<32x32xbf16>
    %cst_191 = arith.constant dense<0.000000e+00> : vector<6x32xf32>
    %483 = tpu.matmul %481, %482, %cst_191 {dimension_numbers = #tpu.dot_dimension_numbers<[1], [0], [0], [1], [0, 0, 1, 1], [], []>} : vector<6x32xbf16>, vector<32x32xbf16>, vector<6x32xf32> -> vector<6x32xf32>
    %484 = arith.mulf %483, %483 : vector<6x32xf32>
    %cst_192 = arith.constant dense<0.000000e+00> : vector<6xf32>
    %485 = vector.multi_reduction <add>, %484, %cst_192 [1] : vector<6x32xf32> to vector<6xf32>
    %486 = vector.shape_cast %485 : vector<6xf32> to vector<6x1xf32>
    %cst_193 = arith.constant 9.99999996E-13 : f32
    %487 = vector.broadcast %cst_193 : f32 to vector<6x1xf32>
    %488 = arith.addf %486, %487 : vector<6x1xf32>
    %489 = math.rsqrt %488 : vector<6x1xf32>
    %490 = vector.broadcast %489 : vector<6x1xf32> to vector<6x32xf32>
    %491 = arith.mulf %483, %490 : vector<6x32xf32>
    %c0_194 = arith.constant 0 : index
    %c0_195 = arith.constant 0 : index
    %492 = memref.load %arg6[%c0_194, %c0_195] : memref<1x1xf32, #tpu.memory_space<smem>>
    %c0_196 = arith.constant 0 : index
    %c0_197 = arith.constant 0 : index
    %493 = vector.load %arg5[%c0_196, %c0_197] : memref<6x32xf32, #tpu.memory_space<vmem>>, vector<6x32xf32>
    %494 = arith.mulf %493, %491 : vector<6x32xf32>
    %cst_198 = arith.constant dense<0.000000e+00> : vector<6xf32>
    %495 = vector.multi_reduction <add>, %494, %cst_198 [1] : vector<6x32xf32> to vector<6xf32>
    %496 = vector.shape_cast %495 : vector<6xf32> to vector<6x1xf32>
    %497 = vector.broadcast %492 : f32 to vector<6x1xf32>
    %498 = arith.mulf %497, %496 : vector<6x1xf32>
    %c0_199 = arith.constant 0 : index
    %c0_200 = arith.constant 0 : index
    %499 = vector.load %arg22[%c0_199, %c0_200] : memref<6x1xf32, #tpu.memory_space<vmem>>, vector<6x1xf32>
    tpu.vector_store %arg22[%c0_199, %c0_200], %498 {strides = array<i32>} : memref<6x1xf32, #tpu.memory_space<vmem>>, vector<6x1xf32>,
    return
  }
}

</mosaic_0001>

<bundles_post_ra>
// kernel: tile.9
= control target key start
LH: loop header
LB: loop body
LE: loop exit
PB: predicated region body
PF: predicated region fallthrough
CT: control target
= control target key end

     0   :  { %vm11_vm0 = vcmask 64512   ;;  %s42_s0 = inlined_call_operand.vmem [shape: f32[2,3,8], index: 0, kind: input, shape index: {}]   ;;  %s43_s1 = inlined_call_operand.vmem [shape: f32[6,8], index: 1, kind: output, shape index: {}]  }
   0x1   :  { %v18_v0 = vld [vmem:[%s42_s0 + $0x4] sm:$0xf]  ;;  %v8_v1 = vld [vmem:[%s42_s0] sm:$0xf] }
   0x2   :  { %7 = vst [vmem:[#allocation0 + $0x8] sm:$0xf] %v18_v0 }
   0x3   :  { %9 = vst [vmem:[#allocation0] sm:$0xf] %v8_v1 }
   0x9   :  { %v14_v2 = vld [vmem:[#allocation0 + $0x8] sm:$0x7]  }
   0xa   :  { %v10_v3 = vld [vmem:[#allocation0] sm:$0x7]   ;;  %19 = vst.msk [vmem:[%s43_s1 + $0x3] sm:$0x7] %vm11_vm0, %v14_v2  }
   0xb   :  { %12 = vst.msk [vmem:[%s43_s1] sm:$0x7] %vm11_vm0, %v10_v3  }

// kernel: _lambda_.2
= control target key start
LH: loop header
LB: loop body
LE: loop exit
PB: predicated region body
PF: predicated region fallthrough
CT: control target
= control target key end

     0   :  { %vm68_vm0 = vcmask 392192   ;;  %vm94_vm1 = vcmask 261120   ;;  %v382_v14 = vmov 16.0   ;;  %vm126_vm3 = vcmask 1041409   ;;  %s517_s1 = inlined_call_operand.vmem [shape: bf16[48,32], index: 1, kind: input, shape index: {}]   ;;  %s518_s0 = inlined_call_operand.vmem [shape: f32[32,48], index: 0, kind: input, shape index: {}]   ;;  %s519_s2 = inlined_call_operand.vmem [shape: f32[1,32], index: 2, kind: input, shape index: {}]   ;;  %s520_s3 = inlined_call_operand.vmem [shape: f32[1,32], index: 3, kind: input, shape index: {}]   ;;  %s521_s4 = inlined_call_operand.vmem [shape: bf16[32,32], index: 4, kind: input, shape index: {}]   ;;  %s522_s6 = inlined_call_operand.vmem [shape: f32[1,2], index: 6, kind: input, shape index: {}]   ;;  %s523_s5 = inlined_call_operand.vmem [shape: bf16[32,2], index: 5, kind: input, shape index: {}]   ;;  %s524_s10 = inlined_call_operand.vmem [shape: f32[2,32], index: 10, kind: output, shape index: {0}]   ;;  %s525_s8 = inlined_call_operand.vmem [shape: f32[1,32], index: 8, kind: input, shape index: {}]   ;;  %s526_s7 = inlined_call_operand.vmem [shape: bf16[2,32], index: 7, kind: input, shape index: {}]   ;;  %s527_s9 = inlined_call_operand.vmem [shape: f32[4,32], index: 9, kind: input, shape index: {}]   ;;  %s528_s11 = inlined_call_operand.vmem [shape: f32[2,4,32], index: 11, kind: output, shape index: {1}]  }
   0x1   :  { %v363_v0 = vld [vmem:[%s517_s1 + $0x10] sm:$0xff]  ;;  %v362_v1 = vld [vmem:[%s517_s1 + $0x8] sm:$0xff]  ;;  %v361_v2 = vld [vmem:[%s517_s1] sm:$0xff]  ;;  %374 = vrcp.f32 %v382_v14  ;;  %vm129_vm4 = vcmask 254976   ;;  %v383_v42 = vmov 32.0   ;;  %vm291_vm12 = vcmask 1040384  }
   0x2   :  { %80 = vmatpush.bf16.msra.mxu0 %v363_v0  ;;  %v38_v3 = vld [vmem:[%s518_s0] sm:$0xff]  ;;  %v39_v4 = vld [vmem:[%s518_s0 + $0x8] sm:$0xff]  ;;  %v40_v6 = vld [vmem:[%s518_s0 + $0x10] sm:$0xff]  ;;  %376 = vrcp.f32 %v383_v42  ;;  %vm287_vm13 = vcmask 15360   ;;  %vm317_vm14 = vcmask 257024  }
   0x3   :  { %v42_v5 = vpack.c.bf16 %v39_v4, %v38_v3  ;;  %v41_v7 = vld [vmem:[%s518_s0 + $0x18] sm:$0xff]  ;;  %v365_v59 = vld [vmem:[%s521_s4 + $0x8] sm:$0xff]  ;;  %v364_v60 = vld [vmem:[%s521_s4] sm:$0xff] }
   0x4   :  { %v43_v8 = vpack.c.bf16 %v41_v7, %v40_v6  ;;  %219 = vmatpush.bf16.msra.mxu1 %v365_v59  ;;  %v370_v6 = vld [vmem:[%s519_s2] ss:$0 sm:$0xff] }
   0x5   :  { %v372_v42 = vld [vmem:[%s522_s6] ss:$0 sm:$0xff] }
   0x6   :  { %81 = vmatpush.bf16.msra.mxu0 %v362_v1 }
   0x7   :  { %v375_v17 = vpop.eup %374 }
   0x8   :  { %v114_v19 = vmul.f32 16.0, %v375_v17  ;;  %vm118_vm2 = vweird.f32 %v375_v17  ;;  %v377_v43 = vpop.eup %376  ;;  %220 = vmatpush.bf16.msra.mxu1 %v364_v60 }
   0x9   :  { %v134_v44 = vmul.f32 32.0, %v377_v43  ;;  %vm138_vm5 = vweird.f32 %v377_v43 }
   0xa   :  { %82 = vmatpush.bf16.msra.mxu0 %v361_v2  ;;  %v115_v24 = vsub.f32 1.0, %v114_v19 }
   0xb   :  { %v135_v45 = vsub.f32 1.0, %v134_v44 }
   0xc   :  { %v116_v28 = vmul.f32 %v375_v17, %v115_v24 }
   0xd   :  { %340 = vmatmul.msk.bf16.vlgmr.msra.gmra.mxu0 %vm68_vm0, %v42_v5  ;;  %v136_v46 = vmul.f32 %v377_v43, %v135_v45 }
   0xe   :  { %v117_v32 = vadd.f32 %v375_v17, %v116_v28  ;;  %v366_v28 = vld [vmem:[%s523_s5] sm:$0xff] }
   0xf   :  { %v137_v47 = vadd.f32 %v377_v43, %v136_v46 }
  0x10   :  { %v119_v36 = vsel %vm118_vm2, %v375_v17, %v117_v32 }
  0x11   :  { %v139_v48 = vsel %vm138_vm5, %v377_v43, %v137_v47 }
  0x1d   :  { %341 = vmatmul.msk.bf16.gmra.mxu0 %vm68_vm0, %v43_v8 }
  0x8a   :  { %v84_v9 = vpop.f32.mrf.mxu0 }
  0x8b   :  { %v95_v12 = vsel %vm94_vm1, %v84_v9, 0.0 }
  0x92   :  { %v86_v10 = vpop.f32.mrf.mxu0 }
  0x93   :  { %v96_v11 = vsel %vm94_vm1, %v86_v10, 0.0  ;;  %v371_v10 = vld [vmem:[%s520_s3] ss:$0 sm:$0xff] }
  0x94   :  { %v97_v13 = vadd.f32 %v96_v11, %v95_v12 }
  0x96   :  { %v98_v15 = vrot.slane %v97_v13, 4 }
  0x98   :  { %v99_v18 = vadd.f32 %v98_v15, %v97_v13 }
  0x9a   :  { %v89_v16 = vpop.f32.mrf.mxu0  ;;  %v100_v20 = vrot.slane %v99_v18, 2 }
  0x9b   :  { %v104_v22 = vsel %vm94_vm1, %v89_v16, 0.0 }
  0x9c   :  { %v101_v26 = vadd.f32 %v100_v20, %v99_v18 }
  0x9e   :  { %v102_v30 = vrot.slane %v101_v26, 1 }
  0xa0   :  { %v103_v35 = vadd.f32 %v102_v30, %v101_v26 }
  0xa2   :  { %v91_v21 = vpop.f32.mrf.mxu0  ;;  %v120_v38 = vmul.f32 %v119_v36, %v103_v35 }
  0xa3   :  { %v105_v23 = vsel %vm94_vm1, %v91_v21, 0.0 }
  0xa4   :  { %v106_v25 = vadd.f32 %v105_v23, %v104_v22 }
  0xa6   :  { %v107_v27 = vrot.slane %v106_v25, 4 }
  0xa8   :  { %v108_v29 = vadd.f32 %v107_v27, %v106_v25  ;;  %v367_v27 = vld [vmem:[%s523_s5 + $0x8] sm:$0xff] }
  0xa9   :  { %273 = vmatpush.bf16.msra.mxu2 %v367_v27 }
  0xaa   :  { %v109_v31 = vrot.slane %v108_v29, 2 }
  0xac   :  { %v110_v33 = vadd.f32 %v109_v31, %v108_v29 }
  0xad   :  { %274 = vmatpush.bf16.msra.mxu2 %v366_v28 }
  0xae   :  { %v111_v34 = vrot.slane %v110_v33, 1 }
  0xb0   :  { %v112_v37 = vadd.f32 %v111_v34, %v110_v33 }
  0xb2   :  { %v121_v39 = vmul.f32 %v119_v36, %v112_v37 }
  0xb4   :  { %v127_v40 = vsel %vm126_vm3, %v121_v39, %v120_v38 }
  0xb5   :  { %v130_v41 = vsel %vm129_vm4, %v127_v40, 0.0  ;;  %v282_v40 = vld [vmem:[%s526_s7] sm:$0x1] }
  0xb6   :  { %131 = vadd.xlane.f32.xlu0 %v130_v41  ;;  %v293_v41 = vsel %vm291_vm12, %v282_v40, 0 }
  0xb7   :  { %302 = vmatpush.bf16.msra.mxu3 %v293_v41 }
 0x129   :  { %v132_v49 = vpop.xlane.xlu0 %131 }
 0x12a   :  { %v140_v50 = vmul.f32 %v139_v48, %v132_v49 }
 0x12c   :  { %v142_v51 = vrot.slane %v140_v50, 1  ;;  %v145_v52 = vsub.f32 %v120_v38, %v140_v50 }
 0x12e   :  { %v146_v53 = vsub.f32 %v121_v39, %v142_v51  ;;  %v147_v55 = vmul.f32 %v145_v52, %v145_v52  ;;  %v308_v51 = vld [vmem:[%s527_s9] sm:$0xf] }
 0x130   :  { %v148_v54 = vmul.f32 %v146_v53, %v146_v53 }
 0x132   :  { %v151_v56 = vrot.slane %v148_v54, 7 }
 0x134   :  { %v152_v57 = vsel %vm126_vm3, %v151_v56, %v147_v55 }
 0x135   :  { %v154_v58 = vsel %vm129_vm4, %v152_v57, 0.0 }
 0x136   :  { %155 = vadd.xlane.f32.xlu0 %v154_v58 }
 0x1a9   :  { %v156_v61 = vpop.xlane.xlu0 %155 }
 0x1aa   :  { %v157_v62 = vmul.f32 %v156_v61, %v139_v48  ;;  %v373_v48 = vld [vmem:[%s525_s8] ss:$0 sm:$0xff] }
 0x1ac   :  { %v158_v63 = vadd.f32 1e-05, %v157_v62 }
 0x1ae   :  { %378 = vrsqrt.f32 %v158_v63  ;;  %vm165_vm7 = vweird.f32 %v158_v63 }
 0x1b4   :  { %v379_v0 = vpop.eup %378 }
 0x1b5   :  { %v160_v1 = vmul.f32 %v379_v0, %v158_v63  ;;  %vm166_vm6 = vweird.f32 %v379_v0 }
 0x1b6   :  { %vm167_vm8 = vmor %vm165_vm7, %vm166_vm6 }
 0x1b7   :  { %v161_v2 = vmul.f32 %v379_v0, %v160_v1 }
 0x1b9   :  { %v162_v3 = vmul.f32 0.5, %v161_v2 }
 0x1bb   :  { %v163_v4 = vsub.f32 1.5, %v162_v3 }
 0x1bd   :  { %v164_v5 = vmul.f32 %v379_v0, %v163_v4 }
 0x1bf   :  { %v168_v7 = vsel %vm167_vm8, %v379_v0, %v164_v5 }
 0x1c0   :  { %v170_v8 = vrot.slane %v168_v7, 1  ;;  %v173_v9 = vmul.f32 %v168_v7, %v145_v52 }
 0x1c2   :  { %v174_v11 = vmul.f32 %v170_v8, %v146_v53  ;;  %v178_v12 = vmul.f32 %v370_v6, %v173_v9 }
 0x1c4   :  { %v179_v13 = vmul.f32 %v370_v6, %v174_v11  ;;  %v183_v14 = vadd.f32 %v371_v10, %v178_v12 }
 0x1c6   :  { %v184_v15 = vadd.f32 %v371_v10, %v179_v13  ;;  %v185_v16 = vpack.c.bf16 %v183_v14, %v183_v14 }
 0x1c8   :  { %v186_v17 = vpack.c.bf16 %v184_v15, %v184_v15  ;;  %v193_v19 = vunpack.c.l.b16 %v185_v16 }
 0x1ca   :  { %v194_v18 = vunpack.c.l.b16 %v186_v17 }
 0x1cc   :  { %v195_v20 = vrot.slane %v194_v18, 7 }
 0x1ce   :  { %v196_v21 = vsel %vm126_vm3, %v195_v20, %v193_v19 }
 0x1cf   :  { %v197_v22 = vpack.c.b16 %v196_v21, %v196_v21 }
 0x1d1   :  { %350 = vmatmul.msk.bf16.vlgmr.msra.gmra.mxu1 %vm94_vm1, %v197_v22 }
 0x24e   :  { %v222_v23 = vpop.f32.mrf.mxu1 }
 0x24f   :  { %v226_v24 = vmul.f32 %v222_v23, %v222_v23 }
 0x251   :  { %v227_v25 = vsel %vm129_vm4, %v226_v24, 0.0 }
 0x252   :  { %228 = vadd.xlane.f32.xlu1 %v227_v25 }
 0x256   :  { %v224_v26 = vpop.f32.mrf.mxu1 }
 0x2c5   :  { %v229_v29 = vpop.xlane.xlu1 %228 }
 0x2c6   :  { %v230_v30 = vadd.f32 1e-12, %v229_v29 }
 0x2c8   :  { %380 = vrsqrt.f32 %v230_v30  ;;  %vm237_vm10 = vweird.f32 %v230_v30 }
 0x2ce   :  { %v381_v31 = vpop.eup %380 }
 0x2cf   :  { %v232_v32 = vmul.f32 %v381_v31, %v230_v30  ;;  %vm238_vm9 = vweird.f32 %v381_v31 }
 0x2d0   :  { %vm239_vm11 = vmor %vm237_vm10, %vm238_vm9 }
 0x2d1   :  { %v233_v33 = vmul.f32 %v381_v31, %v232_v32 }
 0x2d3   :  { %v234_v34 = vmul.f32 0.5, %v233_v33 }
 0x2d5   :  { %v235_v35 = vsub.f32 1.5, %v234_v34 }
 0x2d7   :  { %v236_v36 = vmul.f32 %v381_v31, %v235_v35 }
 0x2d9   :  { %v240_v37 = vsel %vm239_vm11, %v381_v31, %v236_v36 }
 0x2da   :  { %v241_v38 = vmul.f32 %v240_v37, %v222_v23 }
 0x2dc   :  { %242 = vst.msk [vmem:[%s524_s10] sm:$0x3] %vm129_vm4, %v241_v38  ;;  %v243_v39 = vpack.c.bf16 %v241_v38, %v241_v38 }
 0x2de   :  { %359 = vmatmul.msk.bf16.vlgmr.msra.gmra.mxu2 %vm94_vm1, %v243_v39 }
 0x361   :  { %v276_v43 = vpop.f32.mrf.mxu2 }
 0x362   :  { %v277_v44 = vadd.f32 %v372_v42, %v276_v43 }
 0x364   :  { %v280_v45 = vmax.f32 %v277_v44, 0.0 }
 0x366   :  { %v281_v46 = vpack.c.bf16 %v280_v45, %v280_v45 }
 0x368   :  { %360 = vmatmul.msk.bf16.vlgmr.msra.gmra.mxu3 %vm287_vm13, %v281_v46 }
 0x369   :  { %v278_v47 = vpop.f32.mrf.mxu2 }
 0x3eb   :  { %v304_v49 = vpop.f32.mrf.mxu3 }
 0x3ec   :  { %v305_v50 = vadd.f32 %v373_v48, %v304_v49 }
 0x3ee   :  { %v310_v52 = vrot.slane %v305_v50, 1  ;;  %v311_v53 = vperm.slane %v305_v50, 0 }
 0x3f0   :  { %v312_v54 = vperm.slane %v310_v52, 0  ;;  %v315_v55 = vadd.f32 %v311_v53, %v308_v51 }
 0x3f2   :  { %v316_v56 = vadd.f32 %v312_v54, %v308_v51  ;;  %318 = vst.msk [vmem:[%s528_s11] sm:$0xf] %vm317_vm14, %v315_v55 }
 0x3f3   :  { %v306_v57 = vpop.f32.mrf.mxu3 }
 0x3f4   :  { %319 = vst.msk [vmem:[%s528_s11 + $0x4] sm:$0xf] %vm317_vm14, %v316_v56 }

// kernel: _lambda_.3
= control target key start
LH: loop header
LB: loop body
LE: loop exit
PB: predicated region body
PF: predicated region fallthrough
CT: control target
= control target key end

     0   :  { %vm76_vm0 = vcmask 253952   ;;  %vm85_vm1 = vcmask 257024   ;;  %vm95_vm2 = vcmask 256000   ;;  %vm122_vm3 = vcmask 261120   ;;  %s6222_s23 = smov 96   ;;  %s8341_s24 = smov 56   ;;  %s8300_s0 = inlined_call_operand.vmem [shape: f32[2,4,32], index: 0, kind: input, shape index: {}]   ;;  %s8301_s1 = inlined_call_operand.vmem [shape: f32[3,1,32], index: 1, kind: input, shape index: {}]   ;;  %s8302_s2 = inlined_call_operand.vmem [shape: f32[3,3,32], index: 2, kind: input, shape index: {}]   ;;  %s8303_s3 = inlined_call_operand.vmem [shape: f32[8,32], index: 3, kind: input, shape index: {}]   ;;  %s8304_s7 = inlined_call_operand.vmem [shape: f32[2,1,32], index: 7, kind: input, shape index: {}]   ;;  %s8305_s8 = inlined_call_operand.vmem [shape: f32[2,1,32], index: 8, kind: input, shape index: {}]   ;;  %s8306_s10 = inlined_call_operand.vmem [shape: f32[2,1,96], index: 10, kind: input, shape index: {}]   ;;  %s8307_s9 = inlined_call_operand.vmem [shape: bf16[2,32,96], index: 9, kind: input, shape index: {}]   ;;  %s8308_s11 = inlined_call_operand.vmem [shape: bf16[2,32,32], index: 11, kind: input, shape index: {}]   ;;  %s8309_s12 = inlined_call_operand.vmem [shape: f32[2,1,32], index: 12, kind: input, shape index: {}]   ;;  %s8310_s13 = inlined_call_operand.vmem [shape: f32[2,1,32], index: 13, kind: input, shape index: {}]   ;;  %s8311_s14 = inlined_call_operand.vmem [shape: f32[2,1,32], index: 14, kind: input, shape index: {}]   ;;  %s8312_s15 = inlined_call_operand.vmem [shape: bf16[2,32,128], index: 15, kind: input, shape index: {}]   ;;  %s8313_s16 = inlined_call_operand.vmem [shape: f32[2,1,128], index: 16, kind: input, shape index: {}]   ;;  %s8314_s17 = inlined_call_operand.vmem [shape: bf16[2,128,32], index: 17, kind: input, shape index: {}]   ;;  %s8315_s18 = inlined_call_operand.vmem [shape: f32[2,1,32], index: 18, kind: input, shape index: {}]   ;;  %s8316_s4 = inlined_call_operand.vmem [shape: f32[6,8], index: 4, kind: input, shape index: {}]   ;;  %s8317_s19 = inlined_call_operand.vmem [shape: f32[1,32], index: 19, kind: input, shape index: {}]   ;;  %s8318_s20 = inlined_call_operand.vmem [shape: f32[1,32], index: 20, kind: input, shape index: {}]   ;;  %s8319_s21 = inlined_call_operand.vmem [shape: bf16[32,32], index: 21, kind: input, shape index: {}]   ;;  %s8320_s5 = inlined_call_operand.vmem [shape: f32[6,32], index: 5, kind: input, shape index: {}]   ;;  %s8321_s6 = inlined_call_operand.<no memory space> [shape: f32[1,1], index: 6, kind: input, shape index: {}]   ;;  %s8322_s22 = inlined_call_operand.vmem [shape: f32[6,1], index: 22, kind: output, shape index: {}]  }
   0x1   :  { %8343 = sst [smem:[#allocation4_spill]] %s8300_s0  ;;  %v6221_v27 = vmov 32.0   ;;  %s8339_s25 = smov 112  }
   0x2   :  { %8344 = sst [smem:[#allocation5_spill]] %s8301_s1  ;;  %5917 = vrcp.f32 %v6221_v27  ;;  %s6223_s1 = smov 64  }
   0x3   :  { %8345 = sst [smem:[#allocation6_spill]] %s8302_s2  ;;  %s8335_s26 = smov 48  }
   0x4   :  { %8346 = sst [smem:[#allocation7_spill]] %s8303_s3  ;;  %s8333_s27 = smov 72  }
   0x5   :  { %8347 = sst [smem:[#allocation8_spill]] %s8304_s7  ;;  %s8331_s7 = smov 104  }
   0x6   :  { %8348 = sst [smem:[#allocation9_spill]] %s8305_s8  ;;  %s8329_s3 = smov 40  }
   0x7   :  { %8349 = sst [smem:[#allocation10_spill]] %s8306_s10  ;;  %s8337_s10 = smov 80  }
   0x8   :  { %s8350_s29 = sld [smem:[#allocation5_spill]]  ;;  %v5918_v28 = vpop.eup %5917 }
   0x9   :  { %s8351_s0 = sld [smem:[#allocation4_spill]]  ;;  %v142_v29 = vmul.f32 32.0, %v5918_v28  ;;  %vm146_vm4 = vweird.f32 %v5918_v28 }
   0xa   :  { %s8352_s8 = sld [smem:[#allocation6_spill]] }
   0xb   :  { %s8353_s30 = sld [smem:[#allocation7_spill]]  ;;  %v143_v30 = vsub.f32 1.0, %v142_v29 }
   0xc   :  { %s8354_s2 = sld [smem:[#allocation8_spill]] }
   0xd   :  { %v144_v31 = vmul.f32 %v5918_v28, %v143_v30  ;;  %s8355_s28 = sld [smem:[#allocation9_spill]] }
   0xe   :  { %v74_v0 = vld [vmem:[%s8350_s29 + $0x1] sm:$0x1]  ;;  %v75_v3 = vld [vmem:[%s8350_s29 + $0x2] sm:$0x1]  ;;  %v73_v9 = vld [vmem:[%s8350_s29] sm:$0x1] }
   0xf   :  { %v84_v1 = vld [vmem:[%s8351_s0 + $0x4] sm:$0xf]  ;;  %81 = vst.msk [vmem:[#allocation2 + $0x20] sm:$0x1] %vm76_vm0, %v74_v0  ;;  %v83_v4 = vld [vmem:[%s8351_s0] sm:$0xf]  ;;  %v145_v32 = vadd.f32 %v5918_v28, %v144_v31 }
  0x10   :  { %v93_v2 = vld [vmem:[%s8352_s8 + $0x4] sm:$0x7]  ;;  %90 = vst.msk [vmem:[#allocation2 + $0x21] sm:$0xf] %vm85_vm1, %v84_v1  ;;  %v94_v5 = vld [vmem:[%s8352_s8 + $0x8] sm:$0x7] }
  0x11   :  { %100 = vst.msk [vmem:[#allocation2 + $0x25] sm:$0x7] %vm95_vm2, %v93_v2  ;;  %v108_v6 = vld [vmem:[%s8353_s30] sm:$0xff]  ;;  %v6417_v34 = vsel %vm146_vm4, %v5918_v28, %v145_v32  ;;  %s8356_s0 = sld [smem:[#allocation10_spill]]  ;;  %s6224_s29 = smov 88  }
  0x12   :  { %78 = vst.msk [vmem:[#allocation2 + $0x8] sm:$0x1] %vm76_vm0, %v74_v0  ;;  %v92_v11 = vld [vmem:[%s8352_s8] sm:$0x7]  ;;  %s6225_s8 = smov 120  }
  0x13   :  { %89 = vst.msk [vmem:[#allocation2 + $0x19] sm:$0xf] %vm85_vm1, %v84_v1 }
  0x14   :  { %91 = vst.msk [vmem:[#allocation2 + $0x29] sm:$0xf] %vm85_vm1, %v84_v1 }
  0x15   :  { %97 = vst.msk [vmem:[#allocation2 + $0xd] sm:$0x7] %vm95_vm2, %v93_v2  ;;  %v5859_v2 = vld [vmem:[%s8307_s9 + $0x8] sm:$0xff] }
  0x16   :  { %79 = vst.msk [vmem:[#allocation2 + $0x10] sm:$0x1] %vm76_vm0, %v75_v3  ;;  %318 = vmatpush.bf16.msra.mxu0 %v5859_v2 }
  0x17   :  { %88 = vst.msk [vmem:[#allocation2 + $0x11] sm:$0xf] %vm85_vm1, %v83_v4 }
  0x18   :  { %v106_v7 = vld [vmem:[#allocation2 + $0x20] sm:$0xff]  ;;  %98 = vst.msk [vmem:[#allocation2 + $0x15] sm:$0x7] %vm95_vm2, %v94_v5 }
  0x19   :  { %v6379_v8 = vadd.f32 %v108_v6, %v106_v7  ;;  %82 = vst.msk [vmem:[#allocation2 + $0x28] sm:$0x1] %vm76_vm0, %v75_v3 }
  0x1a   :  { %86 = vst.msk [vmem:[#allocation2 + $0x1] sm:$0xf] %vm85_vm1, %v83_v4 }
  0x1b   :  { %v135_v10 = vsel %vm122_vm3, %v6379_v8, 0.0  ;;  %87 = vst.msk [vmem:[#allocation2 + $0x9] sm:$0xf] %vm85_vm1, %v83_v4 }
  0x1c   :  { %136 = vadd.xlane.f32.xlu2 %v135_v10  ;;  %101 = vst.msk [vmem:[#allocation2 + $0x2d] sm:$0x7] %vm95_vm2, %v94_v5 }
  0x1d   :  { %77 = vst.msk [vmem:[#allocation2] sm:$0x1] %vm76_vm0, %v73_v9 }
  0x1e   :  { %96 = vst.msk [vmem:[#allocation2 + $0x5] sm:$0x7] %vm95_vm2, %v92_v11 }
  0x1f   :  { %v104_v12 = vld [vmem:[#allocation2 + $0x10] sm:$0xff]  ;;  %80 = vst.msk [vmem:[#allocation2 + $0x18] sm:$0x1] %vm76_vm0, %v73_v9 }
  0x20   :  { %v6396_v13 = vadd.f32 %v108_v6, %v104_v12  ;;  %99 = vst.msk [vmem:[#allocation2 + $0x1d] sm:$0x7] %vm95_vm2, %v92_v11 }
  0x22   :  { %v129_v14 = vsel %vm122_vm3, %v6396_v13, 0.0  ;;  %v103_v21 = vld [vmem:[#allocation2 + $0x8] sm:$0xff] }
  0x23   :  { %130 = vadd.xlane.f32.xlu1 %v129_v14  ;;  %v107_v15 = vld [vmem:[#allocation2 + $0x28] sm:$0xff]  ;;  %v6413_v25 = vadd.f32 %v108_v6, %v103_v21 }
  0x24   :  { %v6401_v16 = vadd.f32 %v108_v6, %v107_v15 }
  0x25   :  { %v102_v17 = vld [vmem:[#allocation2] sm:$0xff]  ;;  %v126_v26 = vsel %vm122_vm3, %v6413_v25, 0.0 }
  0x26   :  { %v6403_v18 = vadd.f32 %v108_v6, %v102_v17  ;;  %v138_v19 = vsel %vm122_vm3, %v6401_v16, 0.0 }
  0x27   :  { %139 = vadd.xlane.f32.xlu2 %v138_v19  ;;  %v105_v20 = vld [vmem:[#allocation2 + $0x18] sm:$0xff] }
  0x28   :  { %v123_v22 = vsel %vm122_vm3, %v6403_v18, 0.0  ;;  %v6409_v23 = vadd.f32 %v108_v6, %v105_v20  ;;  %v5858_v6 = vld [vmem:[%s8307_s9] sm:$0xff] }
  0x29   :  { %124 = vadd.xlane.f32.xlu0 %v123_v22  ;;  %319 = vmatpush.bf16.msra.mxu0 %v5858_v6 }
  0x2a   :  { %v132_v24 = vsel %vm122_vm3, %v6409_v23, 0.0 }
  0x2b   :  { %133 = vadd.xlane.f32.xlu1 %v132_v24 }
  0x31   :  { %127 = vadd.xlane.f32.xlu0 %v126_v26 }
  0x8f   :  { %v137_v33 = vpop.xlane.xlu2 %136 }
  0x90   :  { %v152_v54 = vmul.f32 %v6417_v34, %v137_v33 }
  0x92   :  { %v6452_v58 = vsub.f32 %v6379_v8, %v152_v54 }
  0x94   :  { %v164_v62 = vmul.f32 %v6452_v58, %v6452_v58 }
  0x96   :  { %v131_v35 = vpop.xlane.xlu1 %130  ;;  %v178_v63 = vsel %vm122_vm3, %v164_v62, 0.0 }
  0x97   :  { %v150_v36 = vmul.f32 %v6417_v34, %v131_v35 }
  0x99   :  { %v6421_v37 = vsub.f32 %v6396_v13, %v150_v36 }
  0x9a   :  { %v140_v38 = vpop.xlane.xlu2 %139 }
  0x9b   :  { %v153_v39 = vmul.f32 %v6417_v34, %v140_v38  ;;  %v162_v40 = vmul.f32 %v6421_v37, %v6421_v37 }
  0x9c   :  { %v125_v41 = vpop.xlane.xlu0 %124 }
  0x9d   :  { %v148_v42 = vmul.f32 %v6417_v34, %v125_v41  ;;  %v6428_v43 = vsub.f32 %v6401_v16, %v153_v39  ;;  %v172_v44 = vsel %vm122_vm3, %v162_v40, 0.0 }
  0x9e   :  { %173 = vadd.xlane.f32.xlu2 %v172_v44  ;;  %v134_v45 = vpop.xlane.xlu1 %133 }
  0x9f   :  { %v6432_v46 = vsub.f32 %v6403_v18, %v148_v42  ;;  %v151_v47 = vmul.f32 %v6417_v34, %v134_v45  ;;  %v165_v48 = vmul.f32 %v6428_v43, %v6428_v43 }
  0xa1   :  { %v6438_v49 = vsub.f32 %v6409_v23, %v151_v47  ;;  %v160_v50 = vmul.f32 %v6432_v46, %v6432_v46  ;;  %v181_v52 = vsel %vm122_vm3, %v165_v48, 0.0 }
  0xa3   :  { %v166_v51 = vsel %vm122_vm3, %v160_v50, 0.0  ;;  %v163_v56 = vmul.f32 %v6438_v49, %v6438_v49 }
  0xa4   :  { %167 = vadd.xlane.f32.xlu0 %v166_v51  ;;  %v128_v53 = vpop.xlane.xlu0 %127  ;;  %v5899_v51 = vld [vmem:[%s8354_s2] ss:$0 sm:$0xff] }
  0xa5   :  { %v149_v55 = vmul.f32 %v6417_v34, %v128_v53  ;;  %v175_v59 = vsel %vm122_vm3, %v163_v56, 0.0 }
  0xa6   :  { %182 = vadd.xlane.f32.xlu2 %v181_v52 }
  0xa7   :  { %v6449_v57 = vsub.f32 %v6413_v25, %v149_v55 }
  0xa9   :  { %v161_v60 = vmul.f32 %v6449_v57, %v6449_v57 }
  0xab   :  { %v169_v61 = vsel %vm122_vm3, %v161_v60, 0.0 }
  0xac   :  { %176 = vadd.xlane.f32.xlu0 %v175_v59  ;;  %170 = vadd.xlane.f32.xlu1 %v169_v61  ;;  %v5900_v61 = vld [vmem:[%s8355_s28] ss:$0 sm:$0xff] }
  0xb4   :  { %179 = vadd.xlane.f32.xlu1 %v178_v63 }
 0x111   :  { %v174_v0 = vpop.xlane.xlu2 %173 }
 0x112   :  { %v186_v4 = vmul.f32 %v174_v0, %v6417_v34 }
 0x114   :  { %v6469_v7 = vadd.f32 1e-05, %v186_v4 }
 0x116   :  { %vm222_vm13 = vweird.f32 %v6469_v7 }
 0x117   :  { %v168_v1 = vpop.xlane.xlu0 %167 }
 0x118   :  { %v184_v3 = vmul.f32 %v168_v1, %v6417_v34 }
 0x119   :  { %v183_v22 = vpop.xlane.xlu2 %182 }
 0x11a   :  { %v190_v5 = vadd.f32 1e-05, %v184_v3  ;;  %v189_v30 = vmul.f32 %v183_v22, %v6417_v34 }
 0x11c   :  { %5919 = vrsqrt.f32 %v190_v5  ;;  %vm202_vm6 = vweird.f32 %v190_v5  ;;  %v195_v40 = vadd.f32 1e-05, %v189_v30 }
 0x11d   :  { %5921 = vrsqrt.f32 %v6469_v7 }
 0x11e   :  { %vm252_vm4 = vweird.f32 %v195_v40 }
 0x11f   :  { %v171_v9 = vpop.xlane.xlu1 %170  ;;  %v177_v10 = vpop.xlane.xlu0 %176 }
 0x120   :  { %v185_v11 = vmul.f32 %v171_v9, %v6417_v34  ;;  %v187_v12 = vmul.f32 %v177_v10, %v6417_v34 }
 0x122   :  { %v5920_v14 = vpop.eup %5919  ;;  %v191_v15 = vadd.f32 1e-05, %v185_v11  ;;  %v193_v17 = vadd.f32 1e-05, %v187_v12 }
 0x123   :  { %v197_v19 = vmul.f32 %v5920_v14, %v190_v5  ;;  %v5922_v26 = vpop.eup %5921  ;;  %vm203_vm5 = vweird.f32 %v5920_v14 }
 0x124   :  { %5923 = vrsqrt.f32 %v191_v15  ;;  %v217_v31 = vmul.f32 %v5922_v26, %v6469_v7  ;;  %vm204_vm7 = vmor %vm202_vm6, %vm203_vm5  ;;  %vm212_vm9 = vweird.f32 %v191_v15  ;;  %vm232_vm11 = vweird.f32 %v193_v17 }
 0x125   :  { %v198_v20 = vmul.f32 %v5920_v14, %v197_v19  ;;  %5925 = vrsqrt.f32 %v193_v17  ;;  %vm223_vm14 = vweird.f32 %v5922_v26 }
 0x126   :  { %v218_v41 = vmul.f32 %v5922_v26, %v217_v31  ;;  %vm224_vm0 = vmor %vm222_vm13, %vm223_vm14 }
 0x127   :  { %v199_v21 = vmul.f32 0.5, %v198_v20  ;;  %v180_v24 = vpop.xlane.xlu1 %179 }
 0x128   :  { %v188_v27 = vmul.f32 %v180_v24, %v6417_v34  ;;  %v219_v52 = vmul.f32 0.5, %v218_v41 }
 0x129   :  { %v200_v28 = vsub.f32 1.5, %v199_v21 }
 0x12a   :  { %v5924_v29 = vpop.eup %5923  ;;  %v194_v36 = vadd.f32 1e-05, %v188_v27  ;;  %v220_v62 = vsub.f32 1.5, %v219_v52 }
 0x12b   :  { %v201_v32 = vmul.f32 %v5920_v14, %v200_v28  ;;  %v207_v33 = vmul.f32 %v5924_v29, %v191_v15  ;;  %v5926_v35 = vpop.eup %5925  ;;  %vm213_vm8 = vweird.f32 %v5924_v29 }
 0x12c   :  { %v227_v39 = vmul.f32 %v5926_v35, %v193_v17  ;;  %5927 = vrsqrt.f32 %v194_v36  ;;  %vm214_vm10 = vmor %vm212_vm9, %vm213_vm8  ;;  %vm233_vm12 = vweird.f32 %v5926_v35  ;;  %v221_v4 = vmul.f32 %v5922_v26, %v220_v62 }
 0x12d   :  { %v208_v38 = vmul.f32 %v5924_v29, %v207_v33  ;;  %v205_v42 = vsel %vm204_vm7, %v5920_v14, %v201_v32  ;;  %5929 = vrsqrt.f32 %v195_v40  ;;  %vm234_vm15 = vmor %vm232_vm11, %vm233_vm12  ;;  %vm242_vm1 = vweird.f32 %v194_v36 }
 0x12e   :  { %v228_v45 = vmul.f32 %v5926_v35, %v227_v39  ;;  %v256_v50 = vmul.f32 %v205_v42, %v6432_v46  ;;  %v225_v10 = vsel %vm224_vm0, %v5922_v26, %v221_v4  ;;  %vm351_vm8 = vcmask 64512  }
 0x12f   :  { %v209_v44 = vmul.f32 0.5, %v208_v38  ;;  %v258_v7 = vmul.f32 %v225_v10, %v6421_v37  ;;  %v5903_v38 = vld [vmem:[%s8356_s0] ss:$0 sm:$0xff]  ;;  %vm660_vm9 = vcmask 1043456  }
 0x130   :  { %v229_v48 = vmul.f32 0.5, %v228_v45  ;;  %v265_v60 = vmul.f32 %v5899_v51, %v256_v50 }
 0x131   :  { %v210_v47 = vsub.f32 1.5, %v209_v44  ;;  %v267_v20 = vmul.f32 %v5899_v51, %v258_v7 }
 0x132   :  { %v230_v55 = vsub.f32 1.5, %v229_v48  ;;  %v5928_v56 = vpop.eup %5927  ;;  %v274_v2 = vadd.f32 %v5900_v61, %v265_v60 }
 0x133   :  { %v211_v53 = vmul.f32 %v5924_v29, %v210_v47  ;;  %v5930_v46 = vpop.eup %5929  ;;  %v237_v1 = vmul.f32 %v5928_v56, %v194_v36  ;;  %vm243_vm2 = vweird.f32 %v5928_v56  ;;  %v276_v27 = vadd.f32 %v5900_v61, %v267_v20 }
 0x134   :  { %v231_v0 = vmul.f32 %v5926_v35, %v230_v55  ;;  %vm253_vm5 = vweird.f32 %v5930_v46  ;;  %vm244_vm6 = vmor %vm242_vm1, %vm243_vm2 }
 0x135   :  { %v215_v54 = vsel %vm214_vm10, %v5924_v29, %v211_v53  ;;  %v238_v9 = vmul.f32 %v5928_v56, %v237_v1  ;;  %vm254_vm7 = vmor %vm252_vm4, %vm253_vm5 }
 0x136   :  { %v257_v59 = vmul.f32 %v215_v54, %v6449_v57  ;;  %v247_v57 = vmul.f32 %v5930_v46, %v195_v40  ;;  %v235_v6 = vsel %vm234_vm15, %v5926_v35, %v231_v0 }
 0x137   :  { %v259_v12 = vmul.f32 %v235_v6, %v6438_v49  ;;  %v239_v14 = vmul.f32 0.5, %v238_v9 }
 0x138   :  { %v266_v63 = vmul.f32 %v5899_v51, %v257_v59  ;;  %v248_v11 = vmul.f32 %v5930_v46, %v247_v57 }
 0x139   :  { %v268_v17 = vmul.f32 %v5899_v51, %v259_v12  ;;  %v240_v19 = vsub.f32 1.5, %v239_v14 }
 0x13a   :  { %v275_v3 = vadd.f32 %v5900_v61, %v266_v63  ;;  %v249_v15 = vmul.f32 0.5, %v248_v11 }
 0x13b   :  { %v277_v22 = vadd.f32 %v5900_v61, %v268_v17  ;;  %v241_v24 = vmul.f32 %v5928_v56, %v240_v19 }
 0x13c   :  { %v280_v5 = vpack.c.bf16 %v275_v3, %v274_v2  ;;  %v250_v21 = vsub.f32 1.5, %v249_v15 }
 0x13d   :  { %v281_v28 = vpack.c.bf16 %v277_v22, %v276_v27  ;;  %v245_v49 = vsel %vm244_vm6, %v5928_v56, %v241_v24 }
 0x13e   :  { %5581 = vmatmul.msk.bf16.vlgmr.msra.gmra.mxu0 %vm122_vm3, %v280_v5  ;;  %v251_v26 = vmul.f32 %v5930_v46, %v250_v21  ;;  %v260_v29 = vmul.f32 %v245_v49, %v6452_v58 }
 0x140   :  { %v255_v37 = vsel %vm254_vm7, %v5930_v46, %v251_v26  ;;  %v269_v31 = vmul.f32 %v5899_v51, %v260_v29 }
 0x141   :  { %v261_v30 = vmul.f32 %v255_v37, %v6428_v43 }
 0x142   :  { %v278_v33 = vadd.f32 %v5900_v61, %v269_v31 }
 0x143   :  { %v270_v32 = vmul.f32 %v5899_v51, %v261_v30 }
 0x145   :  { %v279_v35 = vadd.f32 %v5900_v61, %v270_v32  ;;  %v115_v32 = vlaneseq }
 0x147   :  { %v282_v36 = vpack.c.bf16 %v279_v35, %v278_v33  ;;  %v116_v33 = vshrl.u32 %v115_v32, 7 }
 0x149   :  { %5896 = vset.pattern.permute.xlu2 %v116_v33  ;;  %5898 = vset.pattern.permute.xlu1 %v116_v33 }
 0x14a   :  { %5897 = vset.pattern.permute.xlu0 %v116_v33 }
 0x14e   :  { %5582 = vmatmul.msk.bf16.gmra.mxu0 %vm122_vm3, %v281_v28 }
 0x15e   :  { %5583 = vmatmul.msk.bf16.gmra.mxu0 %vm122_vm3, %v282_v36 }
 0x1bb   :  { %v321_v39 = vpop.f32.mrf.mxu0 }
 0x1bc   :  { %v322_v40 = vadd.f32 %v5903_v38, %v321_v39 }
 0x1be   :  { %v340_v41 = vpack.c.bf16 %v322_v40, %v322_v40 }
 0x1c0   :  { %v347_v42 = vunpack.c.l.b16 %v340_v41 }
 0x1c2   :  { %v6496_v44 = vpack.c.b16 %v347_v42, %v347_v42 }
 0x1c3   :  { %v323_v58 = vpop.f32.mrf.mxu0 }
 0x1c4   :  { %v324_v45 = vadd.f32 %v5903_v38, %v323_v58  ;;  %349 = vrot.lane.b32.xlu0 %v6496_v44, %s6222_s23 }
 0x1c6   :  { %v341_v43 = vpack.c.bf16 %v324_v45, %v324_v45 }
 0x1c8   :  { %v372_v47 = vunpack.c.l.b16 %v341_v43 }
 0x1ca   :  { %v6500_v48 = vpack.c.b16 %v372_v47, %v372_v47 }
 0x1cb   :  { %v326_v50 = vpop.f32.mrf.mxu0 }
 0x1cc   :  { %v327_v51 = vadd.f32 %v5903_v38, %v326_v50  ;;  %374 = vrot.lane.b32.xlu1 %v6500_v48, %s6222_s23 }
 0x1ce   :  { %v342_v52 = vpack.c.bf16 %v327_v51, %v327_v51 }
 0x1d0   :  { %v396_v53 = vunpack.c.l.b16 %v342_v52 }
 0x1d2   :  { %v6504_v54 = vpack.c.b16 %v396_v53, %v396_v53 }
 0x1d3   :  { %v328_v55 = vpop.f32.mrf.mxu0 }
 0x1d4   :  { %v329_v56 = vadd.f32 %v5903_v38, %v328_v55  ;;  %398 = vrot.lane.b32.xlu2 %v6504_v54, %s6222_s23 }
 0x1d6   :  { %v343_v59 = vpack.c.bf16 %v329_v56, %v329_v56 }
 0x1d8   :  { %v420_v60 = vunpack.c.l.b16 %v343_v59 }
 0x1da   :  { %v6508_v61 = vpack.c.b16 %v420_v60, %v420_v60 }
 0x1db   :  { %v331_v62 = vpop.f32.mrf.mxu0 }
 0x1dc   :  { %v332_v46 = vadd.f32 %v5903_v38, %v331_v62  ;;  %422 = vrot.lane.b32.xlu2 %v6508_v61, %s6222_s23 }
 0x1de   :  { %v344_v63 = vpack.c.bf16 %v332_v46, %v332_v46 }
 0x1e0   :  { %v444_v0 = vunpack.c.l.b16 %v344_v63 }
 0x1e2   :  { %v6512_v1 = vpack.c.b16 %v444_v0, %v444_v0 }
 0x1e3   :  { %v333_v2 = vpop.f32.mrf.mxu0 }
 0x1e4   :  { %v334_v3 = vadd.f32 %v5903_v38, %v333_v2  ;;  %446 = vrot.lane.b32.xlu1 %v6512_v1, %s6222_s23  ;;  %719 = vrot.lane.b32.xlu2 %v6508_v61, %s6223_s1  ;;  %v118_v38 = vand.u32 127, %v115_v32 }
 0x1e6   :  { %v345_v4 = vpack.c.bf16 %v334_v3, %v334_v3  ;;  %vm6549_vm10 = vcmp.le.s32.totalorder %v118_v38, %v116_v33 }
 0x1e8   :  { %v468_v57 = vunpack.c.l.b16 %v345_v4 }
 0x1ea   :  { %v6518_v5 = vpack.c.b16 %v468_v57, %v468_v57 }
 0x1ec   :  { %470 = vrot.lane.b32.xlu0 %v6518_v5, %s6222_s23  ;;  %677 = vrot.lane.b32.xlu1 %v6500_v48, %s6223_s1 }
 0x1f4   :  { %787 = vrot.lane.b32.xlu1 %v6496_v44, %s6224_s29  ;;  %698 = vrot.lane.b32.xlu0 %v6504_v54, %s6223_s1 }
 0x1fc   :  { %761 = vrot.lane.b32.xlu0 %v6518_v5, %s6223_s1 }
 0x22e   :  { %v399_v6 = vpop.permute.xlu2 %398 }
 0x22f   :  { %v404_v12 = vsel %vm351_vm8, %v399_v6, 0 }
 0x236   :  { %v423_v9 = vpop.permute.xlu2 %422  ;;  %v350_v10 = vpop.permute.xlu0 %349 }
 0x237   :  { %v356_v11 = vsel %vm351_vm8, %v350_v10, 0  ;;  %v428_v15 = vsel %vm351_vm8, %v423_v9, 0 }
 0x238   :  { %365 = vmatpush.bf16.xpose.msra.mxu1 %v356_v11 }
 0x23e   :  { %v375_v14 = vpop.permute.xlu1 %374  ;;  %v720_v7 = vpop.permute.xlu2 %719 }
 0x23f   :  { %5584 = vmatmul.msk.bf16.vlgmr.msra.gmra.mxu1 %vm351_vm8, %v340_v41  ;;  %v380_v17 = vsel %vm351_vm8, %v375_v14, 0  ;;  %v725_v19 = vsel %vm660_vm9, %v720_v7, 0 }
 0x240   :  { %413 = vmatpush.bf16.xpose.msrb.mxu1 %v404_v12  ;;  %389 = vmatpush.bf16.xpose.msra.mxu2 %v380_v17 }
 0x241   :  { %734 = vmatpush.bf16.msrb.mxu0 %v725_v19 }
 0x247   :  { %5585 = vmatmul.msk.bf16.vlgmr.msra.gmra.mxu2 %vm351_vm8, %v341_v43 }
 0x248   :  { %437 = vmatpush.bf16.xpose.msra.mxu1 %v428_v15 }
 0x24f   :  { %5586 = vmatmul.msk.bf16.vlgmr.msrb.gmra.mxu1 %vm351_vm8, %v342_v52 }
 0x256   :  { %v447_v20 = vpop.permute.xlu1 %446 }
 0x257   :  { %v452_v21 = vsel %vm351_vm8, %v447_v20, 0 }
 0x258   :  { %461 = vmatpush.bf16.xpose.msrb.mxu2 %v452_v21 }
 0x25e   :  { %v678_v22 = vpop.permute.xlu1 %677  ;;  %v471_v24 = vpop.permute.xlu0 %470 }
 0x25f   :  { %v683_v27 = vsel %vm660_vm9, %v678_v22, 0  ;;  %5587 = vmatmul.msk.bf16.vlgmr.msra.gmra.mxu1 %vm351_vm8, %v343_v59  ;;  %5588 = vmatmul.msk.bf16.vlgmr.msrb.gmra.mxu2 %vm351_vm8, %v344_v63  ;;  %v476_v26 = vsel %vm351_vm8, %v471_v24, 0 }
 0x260   :  { %485 = vmatpush.bf16.xpose.msra.mxu3 %v476_v26  ;;  %692 = vmatpush.bf16.msra.mxu2 %v683_v27 }
 0x266   :  { %v788_v28 = vpop.permute.xlu1 %787  ;;  %v699_v49 = vpop.permute.xlu0 %698 }
 0x267   :  { %v793_v37 = vsel %vm351_vm8, %v788_v28, 0  ;;  %5589 = vmatmul.msk.bf16.vlgmr.msra.gmra.mxu3 %vm351_vm8, %v345_v4  ;;  %v704_v29 = vsel %vm660_vm9, %v699_v49, 0 }
 0x268   :  { %713 = vmatpush.bf16.msrb.mxu3 %v704_v29 }
 0x26c   :  { %802 = vmatpush.bf16.xpose.msra.mxu3 %v793_v37 }
 0x26e   :  { %v762_v30 = vpop.permute.xlu0 %761 }
 0x26f   :  { %v767_v31 = vsel %vm660_vm9, %v762_v30, 0 }
 0x270   :  { %776 = vmatpush.bf16.msrb.mxu2 %v767_v31 }
 0x2bc   :  { %v6547_v35 = vpop.f32.mrf.mxu1 }
 0x2bd   :  { %v491_v30 = vmul.f32 0.35355338, %v6547_v35 }
 0x2bf   :  { %v6602_v33 = vsel %vm6549_vm10, %v491_v30, -1e+30 }
 0x2c4   :  { %v369_v36 = vpop.f32.mrf.mxu1 }
 0x2c5   :  { %v505_v36 = vsel %vm351_vm8, %v6602_v33, -inf }
 0x2ca   :  { %v391_v39 = vpop.f32.mrf.mxu2 }
 0x2cb   :  { %v492_v40 = vmul.f32 0.35355338, %v391_v39 }
 0x2cc   :  { %v415_v41 = vpop.f32.mrf.mxu1 }
 0x2cd   :  { %v493_v58 = vmul.f32 0.35355338, %v415_v41  ;;  %v500_v45 = vsel %vm6549_vm10, %v492_v40, -1e+30 }
 0x2ce   :  { %v508_v43 = vsel %vm351_vm8, %v500_v45, -inf }
 0x2cf   :  { %509 = vmax.xlane.f32.xlu0 %v508_v43  ;;  %v501_v47 = vsel %vm6549_vm10, %v493_v58, -1e+30 }
 0x2d0   :  { %v511_v50 = vsel %vm351_vm8, %v501_v47, -inf }
 0x2d1   :  { %512 = vmax.xlane.f32.xlu2 %v511_v50 }
 0x2d2   :  { %v393_v51 = vpop.f32.mrf.mxu2 }
 0x2d4   :  { %v417_v52 = vpop.f32.mrf.mxu1 }
 0x2dc   :  { %v439_v53 = vpop.f32.mrf.mxu1 }
 0x2dd   :  { %v494_v55 = vmul.f32 0.35355338, %v439_v53 }
 0x2df   :  { %v502_v56 = vsel %vm6549_vm10, %v494_v55, -1e+30 }
 0x2e0   :  { %v514_v59 = vsel %vm351_vm8, %v502_v56, -inf }
 0x2e1   :  { %515 = vmax.xlane.f32.xlu1 %v514_v59 }
 0x2e2   :  { %v463_v60 = vpop.f32.mrf.mxu2 }
 0x2e3   :  { %v495_v29 = vmul.f32 0.35355338, %v463_v60 }
 0x2e4   :  { %v441_v62 = vpop.f32.mrf.mxu1 }
 0x2e5   :  { %v6596_v31 = vsel %vm6549_vm10, %v495_v29, -1e+30 }
 0x2e6   :  { %v517_v32 = vsel %vm351_vm8, %v6596_v31, -inf }
 0x2ea   :  { %v465_v46 = vpop.f32.mrf.mxu2  ;;  %v487_v63 = vpop.f32.mrf.mxu3 }
 0x2eb   :  { %v496_v0 = vmul.f32 0.35355338, %v487_v63 }
 0x2ed   :  { %v504_v2 = vsel %vm6549_vm10, %v496_v0, -1e+30 }
 0x2ee   :  { %v520_v3 = vsel %vm351_vm8, %v504_v2, -inf }
 0x2ef   :  { %521 = vmax.xlane.f32.xlu0 %v520_v3 }
 0x2f2   :  { %v489_v4 = vpop.f32.mrf.mxu3 }
 0x2fa   :  { %785 = vrot.lane.b32.xlu1 %v6496_v44, %s6225_s8 }
 0x303   :  { %856 = vrot.lane.b32.xlu0 %v6508_v61, %s6224_s29 }
 0x342   :  { %v510_v57 = vpop.xlane.xlu0 %509 }
 0x343   :  { %v524_v6 = vsub.f32 %v500_v45, %v510_v57 }
 0x344   :  { %v513_v9 = vpop.xlane.xlu2 %512 }
 0x345   :  { %v531_v10 = vmul.f32 1.442695, %v524_v6  ;;  %v525_v11 = vsub.f32 %v501_v47, %v513_v9 }
 0x347   :  { %5931 = vpow2.f32 %v531_v10  ;;  %v533_v12 = vmul.f32 1.442695, %v525_v11 }
 0x349   :  { %5933 = vpow2.f32 %v533_v12 }
 0x34d   :  { %v6569_v14 = vpop.eup %5931 }
 0x34e   :  { %v544_v7 = vsel %vm351_vm8, %v6569_v14, 0.0 }
 0x34f   :  { %v6573_v15 = vpop.eup %5933  ;;  %545 = vadd.xlane.f32.xlu2 %v544_v7 }
 0x350   :  { %v547_v17 = vsel %vm351_vm8, %v6573_v15, 0.0 }
 0x351   :  { %548 = vadd.xlane.f32.xlu1 %v547_v17 }
 0x354   :  { %v516_v19 = vpop.xlane.xlu1 %515 }
 0x355   :  { %v526_v20 = vsub.f32 %v502_v56, %v516_v19 }
 0x357   :  { %v535_v21 = vmul.f32 1.442695, %v526_v20 }
 0x359   :  { %5935 = vpow2.f32 %v535_v21 }
 0x35f   :  { %v6577_v22 = vpop.eup %5935 }
 0x360   :  { %v550_v24 = vsel %vm351_vm8, %v6577_v22, 0.0 }
 0x361   :  { %551 = vadd.xlane.f32.xlu0 %v550_v24 }
 0x362   :  { %v522_v27 = vpop.xlane.xlu0 %521 }
 0x363   :  { %v528_v26 = vsub.f32 %v504_v2, %v522_v27 }
 0x365   :  { %v539_v28 = vmul.f32 1.442695, %v528_v26 }
 0x367   :  { %810 = vrot.lane.b32.xlu2 %v6500_v48, %s6224_s29  ;;  %5937 = vpow2.f32 %v539_v28 }
 0x36a   :  { %879 = vrot.lane.b32.xlu1 %v6512_v1, %s6224_s29 }
 0x36c   :  { %v6614_v35 = vpop.permute.xlu1 %785 }
 0x36d   :  { %v6589_v49 = vpop.eup %5937 }
 0x36e   :  { %v556_v37 = vsel %vm351_vm8, %v6589_v49, 0.0 }
 0x372   :  { %877 = vrot.lane.b32.xlu1 %v6512_v1, %s6225_s8 }
 0x375   :  { %854 = vrot.lane.b32.xlu0 %v6508_v61, %s6225_s8  ;;  %v857_v47 = vpop.permute.xlu0 %856 }
 0x376   :  { %v862_v7 = vsel %vm351_vm8, %v857_v47, 0 }
 0x390   :  { %557 = vadd.xlane.f32.xlu2 %v556_v37 }
 0x39c   :  { %518 = vmax.xlane.f32.xlu1 %v517_v32 }
 0x39f   :  { %506 = vmax.xlane.f32.xlu0 %v505_v36 }
 0x3a8   :  { %808 = vrot.lane.b32.xlu2 %v6500_v48, %s6225_s8 }
 0x3b0   :  { %902 = vrot.lane.b32.xlu2 %v6518_v5, %s6224_s29 }
 0x3b5   :  { %740 = vrot.lane.b32.xlu1 %v6512_v1, %s6223_s1 }
 0x3b8   :  { %900 = vrot.lane.b32.xlu2 %v6518_v5, %s6225_s8 }
 0x3bd   :  { %1106 = vrot.lane.b32.xlu1 %v6500_v48, %s8341_s24 }
 0x3c2   :  { %v546_v38 = vpop.xlane.xlu2 %545 }
 0x3c3   :  { %5939 = vrcp.f32 %v546_v38  ;;  %v585_v52 = vand.u32 2147483648, %v546_v38  ;;  %v583_v55 = vand.u32 2147483647, %v546_v38  ;;  %vm579_vm12 = vweird.f32 %v546_v38 }
 0x3c4   :  { %v549_v39 = vpop.xlane.xlu1 %548 }
 0x3c5   :  { %5941 = vrcp.f32 %v549_v39  ;;  %v600_v59 = vand.u32 2147483648, %v549_v39  ;;  %v598_v46 = vand.u32 2147483647, %v549_v39  ;;  %v586_v63 = vor.u32 1.1754944e-38, %v585_v52 }
 0x3c6   :  { %vm584_vm15 = vcmp.eq.f32.partialorder %v583_v55, 8.507059e+37  ;;  %vm594_vm0 = vweird.f32 %v549_v39 }
 0x3c7   :  { %v601_v3 = vor.u32 1.1754944e-38, %v600_v59  ;;  %vm599_vm2 = vcmp.eq.f32.partialorder %v598_v46, 8.507059e+37 }
 0x3c9   :  { %v5940_v40 = vpop.eup %5939 }
 0x3ca   :  { %v575_v41 = vmul.f32 %v5940_v40, %v546_v38  ;;  %v811_v58 = vpop.permute.xlu2 %810  ;;  %vm580_vm11 = vweird.f32 %v5940_v40 }
 0x3cb   :  { %v5942_v45 = vpop.eup %5941  ;;  %v816_v43 = vsel %vm351_vm8, %v811_v58, 0  ;;  %vm581_vm14 = vmor %vm579_vm12, %vm580_vm11 }
 0x3cc   :  { %v576_v50 = vsub.f32 1.0, %v575_v41  ;;  %v590_v51 = vmul.f32 %v5942_v45, %v549_v39  ;;  %825 = vmatpush.bf16.xpose.msra.mxu0 %v816_v43  ;;  %vm595_vm13 = vweird.f32 %v5942_v45 }
 0x3cd   :  { %vm596_vm1 = vmor %vm594_vm0, %vm595_vm13 }
 0x3ce   :  { %v577_v53 = vmul.f32 %v5940_v40, %v576_v50  ;;  %v591_v56 = vsub.f32 1.0, %v590_v51 }
 0x3d0   :  { %v578_v60 = vadd.f32 %v5940_v40, %v577_v53  ;;  %v592_v62 = vmul.f32 %v5942_v45, %v591_v56 }
 0x3d2   :  { %v582_v0 = vsel %vm581_vm14, %v5940_v40, %v578_v60  ;;  %v593_v2 = vadd.f32 %v5942_v45, %v592_v62 }
 0x3d3   :  { %v587_v4 = vsel %vm584_vm15, %v586_v63, %v582_v0 }
 0x3d4   :  { %v552_v57 = vpop.xlane.xlu0 %551  ;;  %v588_v6 = vmul.f32 %v6569_v14, %v587_v4  ;;  %v597_v9 = vsel %vm596_vm1, %v5942_v45, %v593_v2 }
 0x3d5   :  { %5943 = vrcp.f32 %v552_v57  ;;  %v602_v10 = vsel %vm599_vm2, %v601_v3, %v597_v9  ;;  %v615_v27 = vand.u32 2147483648, %v552_v57  ;;  %v613_v28 = vand.u32 2147483647, %v552_v57 }
 0x3d6   :  { %v650_v11 = vpack.c.bf16 %v588_v6, %v588_v6  ;;  %v603_v12 = vmul.f32 %v6573_v15, %v602_v10  ;;  %vm609_vm5 = vweird.f32 %v552_v57 }
 0x3d7   :  { %v616_v37 = vor.u32 1.1754944e-38, %v615_v27  ;;  %vm614_vm7 = vcmp.eq.f32.partialorder %v613_v28, 8.507059e+37 }
 0x3d8   :  { %5591 = vmatmul.msk.bf16.vlgmr.msra.gmra.mxu2 %vm351_vm8, %v650_v11  ;;  %v651_v17 = vpack.c.bf16 %v603_v12, %v603_v12 }
 0x3d9   :  { %871 = vmatpush.bf16.xpose.msra.mxu2 %v862_v7 }
 0x3da   :  { %5592 = vmatmul.msk.bf16.vlgmr.msrb.gmra.mxu3 %vm351_vm8, %v651_v17 }
 0x3db   :  { %v5944_v19 = vpop.eup %5943 }
 0x3dc   :  { %v605_v20 = vmul.f32 %v5944_v19, %v552_v57  ;;  %v880_v21 = vpop.permute.xlu1 %879  ;;  %vm610_vm4 = vweird.f32 %v5944_v19 }
 0x3dd   :  { %v885_v14 = vsel %vm351_vm8, %v880_v21, 0  ;;  %vm611_vm6 = vmor %vm609_vm5, %vm610_vm4 }
 0x3de   :  { %v606_v24 = vsub.f32 1.0, %v605_v20  ;;  %894 = vmatpush.bf16.xpose.msrb.mxu3 %v885_v14 }
 0x3e0   :  { %v607_v26 = vmul.f32 %v5944_v19, %v606_v24 }
 0x3e2   :  { %v608_v15 = vadd.f32 %v5944_v19, %v607_v26 }
 0x3e4   :  { %v612_v29 = vsel %vm611_vm6, %v5944_v19, %v608_v15  ;;  %v878_v38 = vpop.permute.xlu1 %877 }
 0x3e5   :  { %v617_v30 = vsel %vm614_vm7, %v616_v37, %v612_v29 }
 0x3e6   :  { %v618_v32 = vmul.f32 %v6577_v22, %v617_v30 }
 0x3e7   :  { %v855_v41 = vpop.permute.xlu0 %854 }
 0x3e8   :  { %v652_v36 = vpack.c.bf16 %v618_v32, %v618_v32 }
 0x3ea   :  { %5593 = vmatmul.msk.bf16.vlgmr.msrb.gmra.mxu0 %vm351_vm8, %v652_v36  ;;  %5596 = vmatmul.msk.bf16.vlgmr.msra.gmra.mxu3 %vm351_vm8, %v6614_v35 }
 0x3fa   :  { %5600 = vmatmul.msk.bf16.vlgmr.msrb.gmra.mxu3 %vm351_vm8, %v878_v38 }
 0x403   :  { %v558_v39 = vpop.xlane.xlu2 %557 }
 0x404   :  { %5945 = vrcp.f32 %v558_v39  ;;  %v645_v47 = vand.u32 2147483648, %v558_v39  ;;  %v643_v50 = vand.u32 2147483647, %v558_v39  ;;  %vm639_vm12 = vweird.f32 %v558_v39 }
 0x406   :  { %v646_v53 = vor.u32 1.1754944e-38, %v645_v47  ;;  %vm644_vm14 = vcmp.eq.f32.partialorder %v643_v50, 8.507059e+37 }
 0x40a   :  { %v5946_v40 = vpop.eup %5945 }
 0x40b   :  { %v635_v58 = vmul.f32 %v5946_v40, %v558_v39  ;;  %v809_v45 = vpop.permute.xlu2 %808  ;;  %vm640_vm11 = vweird.f32 %v5946_v40 }
 0x40c   :  { %5597 = vmatmul.msk.bf16.vlgmr.msra.gmra.mxu0 %vm351_vm8, %v809_v45  ;;  %vm641_vm13 = vmor %vm639_vm12, %vm640_vm11 }
 0x40d   :  { %v636_v43 = vsub.f32 1.0, %v635_v58 }
 0x40f   :  { %v637_v22 = vmul.f32 %v5946_v40, %v636_v43  ;;  %v519_v51 = vpop.xlane.xlu1 %518 }
 0x410   :  { %v527_v52 = vsub.f32 %v6596_v31, %v519_v51 }
 0x411   :  { %v638_v35 = vadd.f32 %v5946_v40, %v637_v22 }
 0x412   :  { %v537_v55 = vmul.f32 1.442695, %v527_v52  ;;  %v507_v56 = vpop.xlane.xlu0 %506 }
 0x413   :  { %v642_v59 = vsel %vm641_vm13, %v5946_v40, %v638_v35  ;;  %v523_v60 = vsub.f32 %v6602_v33, %v507_v56  ;;  %v903_v62 = vpop.permute.xlu2 %902 }
 0x414   :  { %5947 = vpow2.f32 %v537_v55  ;;  %v908_v46 = vsel %vm351_vm8, %v903_v62, 0  ;;  %v647_v63 = vsel %vm644_vm14, %v646_v53, %v642_v59 }
 0x415   :  { %v529_v0 = vmul.f32 1.442695, %v523_v60  ;;  %917 = vmatpush.bf16.xpose.msrb.mxu0 %v908_v46  ;;  %v648_v2 = vmul.f32 %v6589_v49, %v647_v63 }
 0x417   :  { %5949 = vpow2.f32 %v529_v0  ;;  %v654_v31 = vpack.c.bf16 %v648_v2, %v648_v2 }
 0x419   :  { %5595 = vmatmul.msk.bf16.vlgmr.msrb.gmra.mxu2 %vm351_vm8, %v654_v31 }
 0x41a   :  { %v6636_v3 = vpop.eup %5947 }
 0x41b   :  { %v901_v4 = vpop.permute.xlu2 %900  ;;  %v553_v57 = vsel %vm351_vm8, %v6636_v3, 0.0 }
 0x41c   :  { %554 = vadd.xlane.f32.xlu0 %v553_v57  ;;  %5601 = vmatmul.msk.bf16.vlgmr.msrb.gmra.mxu0 %vm351_vm8, %v901_v4 }
 0x41d   :  { %v6641_v33 = vpop.eup %5949 }
 0x41e   :  { %v541_v6 = vsel %vm351_vm8, %v6641_v33, 0.0 }
 0x41f   :  { %542 = vadd.xlane.f32.xlu2 %v541_v6 }
 0x427   :  { %v6645_v49 = vpop.permute.xlu1 %740 }
 0x429   :  { %5599 = vmatmul.msk.bf16.vlgmr.msra.gmra.mxu2 %vm351_vm8, %v855_v41 }
 0x42f   :  { %v1107_v9 = vpop.permute.xlu1 %1106 }
 0x430   :  { %v1112_v10 = vsel %vm660_vm9, %v1107_v9, 0  ;;  %655 = vrot.lane.b32.xlu0 %v6496_v44, %s6223_s1 }
 0x431   :  { %1121 = vmatpush.bf16.msrb.mxu2 %v1112_v10  ;;  %v746_v10 = vsel %vm660_vm9, %v6645_v49, 0 }
 0x437   :  { %833 = vrot.lane.b32.xlu2 %v6504_v54, %s6224_s29 }
 0x438   :  { %831 = vrot.lane.b32.xlu0 %v6504_v54, %s6225_s8 }
 0x43f   :  { %1085 = vrot.lane.b32.xlu2 %v6496_v44, %s8341_s24 }
 0x440   :  { %1148 = vrot.lane.b32.xlu0 %v6508_v61, %s8341_s24 }
 0x447   :  { %1252 = vrot.lane.b32.xlu2 %v6496_v44, %s8337_s10 }
 0x45b   :  { %v6661_v11 = vpop.f32.mrf.mxu2 }
 0x45d   :  { %v6663_v12 = vpop.f32.mrf.mxu3 }
 0x463   :  { %v696_v7 = vpop.f32.mrf.mxu2 }
 0x465   :  { %v717_v17 = vpop.f32.mrf.mxu3 }
 0x467   :  { %v6665_v19 = vpop.f32.mrf.mxu0 }
 0x468   :  { %v783_v20 = vpack.c.bf16 %v6665_v19, %v6663_v12 }
 0x46d   :  { %v804_v21 = vpop.f32.mrf.mxu3 }
 0x46e   :  { %v923_v14 = vmul.f32 0.35355338, %v804_v21 }
 0x46f   :  { %v738_v24 = vpop.f32.mrf.mxu0 }
 0x470   :  { %v6671_v27 = vsel %vm6549_vm10, %v923_v14, -1e+30 }
 0x471   :  { %v935_v26 = vsel %vm351_vm8, %v6671_v27, -inf }
 0x472   :  { %936 = vmax.xlane.f32.xlu0 %v935_v26 }
 0x475   :  { %v806_v28 = vpop.f32.mrf.mxu3 }
 0x47d   :  { %v896_v15 = vpop.f32.mrf.mxu3 }
 0x47e   :  { %v927_v37 = vmul.f32 0.35355338, %v896_v15 }
 0x480   :  { %v6677_v29 = vsel %vm6549_vm10, %v927_v37, -1e+30 }
 0x481   :  { %v947_v30 = vsel %vm351_vm8, %v6677_v29, -inf }
 0x482   :  { %948 = vmax.xlane.f32.xlu0 %v947_v30 }
 0x485   :  { %v898_v32 = vpop.f32.mrf.mxu3 }
 0x489   :  { %v827_v36 = vpop.f32.mrf.mxu0 }
 0x48a   :  { %v924_v38 = vmul.f32 0.35355338, %v827_v36 }
 0x48c   :  { %v6683_v39 = vsel %vm6549_vm10, %v924_v38, -1e+30 }
 0x48d   :  { %v938_v40 = vsel %vm351_vm8, %v6683_v39, -inf }
 0x48e   :  { %939 = vmax.xlane.f32.xlu1 %v938_v40 }
 0x48f   :  { %v555_v41 = vpop.xlane.xlu0 %554 }
 0x490   :  { %5951 = vrcp.f32 %v555_v41  ;;  %v630_v15 = vand.u32 2147483648, %v555_v41  ;;  %vm624_vm5 = vweird.f32 %v555_v41  ;;  %v628_v37 = vand.u32 2147483647, %v555_v41 }
 0x491   :  { %v829_v58 = vpop.f32.mrf.mxu0 }
 0x492   :  { %v543_v45 = vpop.xlane.xlu2 %542  ;;  %v631_v36 = vor.u32 1.1754944e-38, %v630_v15  ;;  %vm629_vm7 = vcmp.eq.f32.partialorder %v628_v37, 8.507059e+37 }
 0x493   :  { %5953 = vrcp.f32 %v543_v45  ;;  %v570_v56 = vand.u32 2147483648, %v543_v45  ;;  %v568_v46 = vand.u32 2147483647, %v543_v45  ;;  %vm564_vm0 = vweird.f32 %v543_v45 }
 0x495   :  { %v571_v2 = vor.u32 1.1754944e-38, %v570_v56  ;;  %vm569_vm2 = vcmp.eq.f32.partialorder %v568_v46, 8.507059e+37 }
 0x496   :  { %1169 = vrot.lane.b32.xlu0 %v6512_v1, %s8341_s24  ;;  %v5952_v43 = vpop.eup %5951 }
 0x497   :  { %v620_v52 = vmul.f32 %v5952_v43, %v555_v41  ;;  %vm625_vm4 = vweird.f32 %v5952_v43 }
 0x498   :  { %vm626_vm6 = vmor %vm624_vm5, %vm625_vm4 }
 0x499   :  { %v5954_v47 = vpop.eup %5953  ;;  %v919_v22 = vpop.f32.mrf.mxu0  ;;  %v621_v63 = vsub.f32 1.0, %v620_v52 }
 0x49a   :  { %v560_v50 = vmul.f32 %v5954_v47, %v543_v45  ;;  %v928_v51 = vmul.f32 0.35355338, %v919_v22  ;;  %v834_v59 = vpop.permute.xlu2 %833  ;;  %vm565_vm15 = vweird.f32 %v5954_v47 }
 0x49b   :  { %vm566_vm1 = vmor %vm564_vm0, %vm565_vm15  ;;  %v622_v7 = vmul.f32 %v5952_v43, %v621_v63  ;;  %v839_v28 = vsel %vm351_vm8, %v834_v59, 0 }
 0x49c   :  { %v561_v35 = vsub.f32 1.0, %v560_v50  ;;  %v6689_v53 = vpop.f32.mrf.mxu2  ;;  %v6693_v55 = vsel %vm6549_vm10, %v928_v51, -1e+30 }
 0x49d   :  { %v950_v60 = vsel %vm351_vm8, %v6693_v55, -inf  ;;  %v623_v26 = vadd.f32 %v5952_v43, %v622_v7 }
 0x49e   :  { %v562_v62 = vmul.f32 %v5954_v47, %v561_v35  ;;  %1275 = vrot.lane.b32.xlu0 %v6500_v48, %s8337_s10  ;;  %951 = vmax.xlane.f32.xlu1 %v950_v60 }
 0x49f   :  { %v627_v49 = vsel %vm626_vm6, %v5952_v43, %v623_v26 }
 0x4a0   :  { %v563_v0 = vadd.f32 %v5954_v47, %v562_v62  ;;  %v632_v40 = vsel %vm629_vm7, %v631_v36, %v627_v49 }
 0x4a1   :  { %v921_v31 = vpop.f32.mrf.mxu0  ;;  %v633_v22 = vmul.f32 %v6636_v3, %v632_v40 }
 0x4a2   :  { %v567_v4 = vsel %vm566_vm1, %v5954_v47, %v563_v0  ;;  %v656_v57 = vpop.permute.xlu0 %655  ;;  %v1086_v24 = vpop.permute.xlu2 %1085 }
 0x4a3   :  { %v662_v6 = vsel %vm660_vm9, %v656_v57, 0  ;;  %v572_v9 = vsel %vm569_vm2, %v571_v2, %v567_v4  ;;  %v653_v51 = vpack.c.bf16 %v633_v22, %v633_v22  ;;  %v1091_v52 = vsel %vm660_vm9, %v1086_v24, 0 }
 0x4a4   :  { %671 = vmatpush.bf16.msrb.mxu1 %v662_v6  ;;  %v780_v17 = vpop.f32.mrf.mxu2  ;;  %v573_v21 = vmul.f32 %v6641_v33, %v572_v9 }
 0x4a6   :  { %v649_v14 = vpack.c.bf16 %v573_v21, %v573_v21 }
 0x4a8   :  { %755 = vmatpush.bf16.msra.mxu1 %v746_v10 }
 0x4a9   :  { %5590 = vmatmul.msk.bf16.vlgmr.msrb.gmra.mxu1 %vm351_vm8, %v649_v14 }
 0x4aa   :  { %v832_v30 = vpop.permute.xlu0 %831  ;;  %v1253_v45 = vpop.permute.xlu2 %1252 }
 0x4ab   :  { %v1258_v50 = vsel %vm351_vm8, %v1253_v45, 0 }
 0x4ac   :  { %848 = vmatpush.bf16.xpose.msrb.mxu1 %v839_v28  ;;  %v873_v32 = vpop.f32.mrf.mxu2 }
 0x4ad   :  { %v926_v38 = vmul.f32 0.35355338, %v873_v32 }
 0x4af   :  { %v932_v33 = vsel %vm6549_vm10, %v926_v38, -1e+30 }
 0x4b0   :  { %v944_v58 = vsel %vm351_vm8, %v932_v33, -inf }
 0x4b1   :  { %945 = vmax.xlane.f32.xlu2 %v944_v58 }
 0x4b2   :  { %v1149_v47 = vpop.permute.xlu0 %1148 }
 0x4b3   :  { %v1154_v41 = vsel %vm660_vm9, %v1149_v47, 0 }
 0x4b4   :  { %v875_v43 = vpop.f32.mrf.mxu2  ;;  %1163 = vmatpush.bf16.msra.mxu0 %v1154_v41 }
 0x4b7   :  { %1190 = vrot.lane.b32.xlu1 %v6518_v5, %s8341_s24 }
 0x4b8   :  { %1267 = vmatpush.bf16.xpose.msrb.mxu0 %v1258_v50 }
 0x4b9   :  { %5594 = vmatmul.msk.bf16.vlgmr.msra.gmra.mxu1 %vm351_vm8, %v653_v51 }
 0x4ba   :  { %1100 = vmatpush.bf16.msra.mxu1 %v1091_v52 }
 0x4c9   :  { %5598 = vmatmul.msk.bf16.vlgmr.msrb.gmra.mxu1 %vm351_vm8, %v832_v30 }
 0x4e5   :  { %v937_v35 = vpop.xlane.xlu0 %936 }
 0x4e6   :  { %v953_v3 = vsub.f32 %v6671_v27, %v937_v35 }
 0x4e8   :  { %v959_v56 = vmul.f32 1.442695, %v953_v3 }
 0x4ea   :  { %5955 = vpow2.f32 %v959_v56 }
 0x4f0   :  { %v6717_v59 = vpop.eup %5955 }
 0x4f1   :  { %v971_v60 = vsel %vm351_vm8, %v6717_v59, 0.0 }
 0x4f2   :  { %972 = vadd.xlane.f32.xlu1 %v971_v60 }
 0x4f5   :  { %v949_v62 = vpop.xlane.xlu0 %948 }
 0x4f6   :  { %v957_v46 = vsub.f32 %v6677_v29, %v949_v62 }
 0x4f8   :  { %v967_v63 = vmul.f32 1.442695, %v957_v46 }
 0x4fa   :  { %5957 = vpow2.f32 %v967_v63 }
 0x500   :  { %v6722_v0 = vpop.eup %5957 }
 0x501   :  { %v940_v2 = vpop.xlane.xlu1 %939  ;;  %v983_v31 = vsel %vm351_vm8, %v6722_v0, 0.0 }
 0x502   :  { %v954_v27 = vsub.f32 %v6683_v39, %v940_v2  ;;  %984 = vadd.xlane.f32.xlu0 %v983_v31 }
 0x504   :  { %v961_v4 = vmul.f32 1.442695, %v954_v27 }
 0x506   :  { %5959 = vpow2.f32 %v961_v4 }
 0x508   :  { %v1170_v57 = vpop.permute.xlu0 %1169 }
 0x509   :  { %v1175_v6 = vsel %vm660_vm9, %v1170_v57, 0 }
 0x50a   :  { %1184 = vmatpush.bf16.msrb.mxu1 %v1175_v6 }
 0x50b   :  { %1250 = vrot.lane.b32.xlu1 %v6496_v44, %s8339_s25 }
 0x50c   :  { %v6730_v29 = vpop.eup %5959 }
 0x50d   :  { %v974_v9 = vsel %vm351_vm8, %v6730_v29, 0.0 }
 0x50e   :  { %975 = vadd.xlane.f32.xlu2 %v974_v9 }
 0x510   :  { %v1276_v22 = vpop.permute.xlu0 %1275 }
 0x511   :  { %v952_v39 = vpop.xlane.xlu1 %951  ;;  %v1281_v27 = vsel %vm351_vm8, %v1276_v22, 0 }
 0x512   :  { %v958_v30 = vsub.f32 %v6693_v55, %v952_v39 }
 0x513   :  { %1321 = vrot.lane.b32.xlu1 %v6508_v61, %s8337_s10 }
 0x514   :  { %v969_v32 = vmul.f32 1.442695, %v958_v30 }
 0x51b   :  { %1319 = vrot.lane.b32.xlu1 %v6508_v61, %s8339_s25 }
 0x523   :  { %1344 = vrot.lane.b32.xlu1 %v6512_v1, %s8337_s10 }
 0x524   :  { %v946_v10 = vpop.xlane.xlu2 %945 }
 0x525   :  { %v956_v7 = vsub.f32 %v932_v33, %v946_v10 }
 0x526   :  { %v6740_v17 = vpop.f32.mrf.mxu1  ;;  %1298 = vrot.lane.b32.xlu2 %v6504_v54, %s8337_s10 }
 0x527   :  { %v965_v21 = vmul.f32 1.442695, %v956_v7 }
 0x529   :  { %5961 = vpow2.f32 %v965_v21  ;;  %v1191_v14 = vpop.permute.xlu1 %1190 }
 0x52a   :  { %v1196_v24 = vsel %vm660_vm9, %v1191_v14, 0  ;;  %5963 = vpow2.f32 %v969_v32 }
 0x52b   :  { %1205 = vmatpush.bf16.msra.mxu2 %v1196_v24  ;;  %1342 = vrot.lane.b32.xlu1 %v6512_v1, %s8339_s25 }
 0x52e   :  { %v675_v26 = vpop.f32.mrf.mxu1 }
 0x52f   :  { %v6747_v28 = vpop.eup %5961 }
 0x530   :  { %v980_v15 = vsel %vm351_vm8, %v6747_v28, 0.0  ;;  %v6760_v38 = vpop.eup %5963 }
 0x531   :  { %981 = vadd.xlane.f32.xlu0 %v980_v15  ;;  %v986_v40 = vsel %vm351_vm8, %v6760_v38, 0.0 }
 0x533   :  { %1127 = vrot.lane.b32.xlu1 %v6504_v54, %s8341_s24 }
 0x536   :  { %v6753_v37 = vpop.f32.mrf.mxu1 }
 0x53b   :  { %1571 = vrot.lane.b32.xlu1 %v6500_v48, %s8335_s26 }
 0x53e   :  { %v759_v49 = vpop.f32.mrf.mxu1 }
 0x545   :  { %1273 = vrot.lane.b32.xlu0 %v6500_v48, %s8339_s25 }
 0x546   :  { %v850_v36 = vpop.f32.mrf.mxu1 }
 0x547   :  { %v925_v45 = vmul.f32 0.35355338, %v850_v36 }
 0x549   :  { %v6768_v55 = vsel %vm6549_vm10, %v925_v45, -1e+30 }
 0x54a   :  { %v941_v50 = vsel %vm351_vm8, %v6768_v55, -inf }
 0x54e   :  { %v852_v33 = vpop.f32.mrf.mxu1 }
 0x54f   :  { %987 = vadd.xlane.f32.xlu2 %v986_v40 }
 0x565   :  { %v973_v58 = vpop.xlane.xlu1 %972 }
 0x566   :  { %5965 = vrcp.f32 %v973_v58  ;;  %v1000_v52 = vand.u32 2147483648, %v973_v58  ;;  %v998_v35 = vand.u32 2147483647, %v973_v58  ;;  %vm994_vm12 = vweird.f32 %v973_v58 }
 0x567   :  { %1296 = vrot.lane.b32.xlu2 %v6504_v54, %s8339_s25 }
 0x568   :  { %v1001_v60 = vor.u32 1.1754944e-38, %v1000_v52  ;;  %vm999_vm14 = vcmp.eq.f32.partialorder %v998_v35, 8.507059e+37 }
 0x56c   :  { %v5966_v47 = vpop.eup %5965 }
 0x56d   :  { %v990_v41 = vmul.f32 %v5966_v47, %v973_v58  ;;  %vm995_vm11 = vweird.f32 %v5966_v47 }
 0x56e   :  { %vm996_vm13 = vmor %vm994_vm12, %vm995_vm11 }
 0x56f   :  { %v991_v43 = vsub.f32 1.0, %v990_v41  ;;  %1367 = vrot.lane.b32.xlu2 %v6518_v5, %s8337_s10  ;;  %942 = vmax.xlane.f32.xlu0 %v941_v50 }
 0x571   :  { %v992_v51 = vmul.f32 %v5966_v47, %v991_v43 }
 0x573   :  { %v993_v3 = vadd.f32 %v5966_v47, %v992_v51 }
 0x575   :  { %v997_v56 = vsel %vm996_vm13, %v5966_v47, %v993_v3  ;;  %v985_v62 = vpop.xlane.xlu0 %984 }
 0x576   :  { %5967 = vrcp.f32 %v985_v62  ;;  %v1002_v46 = vsel %vm999_vm14, %v1001_v60, %v997_v56  ;;  %v1060_v9 = vand.u32 2147483648, %v985_v62  ;;  %v1058_v10 = vand.u32 2147483647, %v985_v62 }
 0x577   :  { %1365 = vrot.lane.b32.xlu2 %v6518_v5, %s8339_s25  ;;  %v1003_v63 = vmul.f32 %v6717_v59, %v1002_v46  ;;  %vm1054_vm0 = vweird.f32 %v985_v62 }
 0x578   :  { %v1061_v59 = vor.u32 1.1754944e-38, %v1060_v9  ;;  %vm1059_vm2 = vcmp.eq.f32.partialorder %v1058_v10, 8.507059e+37 }
 0x579   :  { %v1079_v2 = vpack.c.bf16 %v1003_v63, %v1003_v63 }
 0x57b   :  { %5602 = vmatmul.msk.bf16.vlgmr.msra.gmra.mxu1 %vm351_vm8, %v1079_v2 }
 0x57c   :  { %v5968_v31 = vpop.eup %5967  ;;  %1290 = vmatpush.bf16.xpose.msra.mxu1 %v1281_v27 }
 0x57d   :  { %v1050_v4 = vmul.f32 %v5968_v31, %v985_v62  ;;  %v6779_v57 = vpop.permute.xlu1 %1250  ;;  %vm1055_vm15 = vweird.f32 %v5968_v31 }
 0x57e   :  { %vm1056_vm1 = vmor %vm1054_vm0, %vm1055_vm15 }
 0x57f   :  { %v1051_v6 = vsub.f32 1.0, %v1050_v4 }
 0x581   :  { %v1052_v39 = vmul.f32 %v5968_v31, %v1051_v6  ;;  %v976_v7 = vpop.xlane.xlu2 %975 }
 0x582   :  { %5969 = vrcp.f32 %v976_v7  ;;  %v1015_v33 = vand.u32 2147483648, %v976_v7  ;;  %v1013_v58 = vand.u32 2147483647, %v976_v7  ;;  %vm1009_vm5 = vweird.f32 %v976_v7 }
 0x583   :  { %v1053_v21 = vadd.f32 %v5968_v31, %v1052_v39  ;;  %1550 = vrot.lane.b32.xlu0 %v6496_v44, %s8335_s26 }
 0x584   :  { %v1016_v22 = vor.u32 1.1754944e-38, %v1015_v33  ;;  %vm1014_vm7 = vcmp.eq.f32.partialorder %v1013_v58, 8.507059e+37 }
 0x585   :  { %v1057_v14 = vsel %vm1056_vm1, %v5968_v31, %v1053_v21  ;;  %v1322_v24 = vpop.permute.xlu1 %1321 }
 0x586   :  { %v1062_v26 = vsel %vm1059_vm2, %v1061_v59, %v1057_v14 }
 0x587   :  { %v1063_v15 = vmul.f32 %v6722_v0, %v1062_v26 }
 0x588   :  { %v5970_v30 = vpop.eup %5969 }
 0x589   :  { %v1005_v49 = vmul.f32 %v5970_v30, %v976_v7  ;;  %v1083_v32 = vpack.c.bf16 %v1063_v15, %v1063_v15  ;;  %vm1010_vm4 = vweird.f32 %v5970_v30  ;;  %v1299_v43 = vpop.permute.xlu2 %1298  ;;  %v1327_v15 = vsel %vm351_vm8, %v1322_v24, 0 }
 0x58a   :  { %vm1011_vm6 = vmor %vm1009_vm5, %vm1010_vm4  ;;  %v1304_v3 = vsel %vm351_vm8, %v1299_v43, 0 }
 0x58b   :  { %v1006_v36 = vsub.f32 1.0, %v1005_v49  ;;  %1613 = vrot.lane.b32.xlu0 %v6508_v61, %s8335_s26  ;;  %5606 = vmatmul.msk.bf16.vlgmr.msrb.gmra.mxu1 %vm351_vm8, %v1083_v32 }
 0x58d   :  { %v1007_v40 = vmul.f32 %v5970_v30, %v1006_v36  ;;  %v6787_v45 = vpop.permute.xlu1 %1319 }
 0x58f   :  { %v1008_v47 = vadd.f32 %v5970_v30, %v1007_v40 }
 0x591   :  { %v1012_v0 = vsel %vm1011_vm6, %v5970_v30, %v1008_v47 }
 0x592   :  { %v1017_v41 = vsel %vm1014_vm7, %v1016_v22, %v1012_v0 }
 0x593   :  { %v1018_v50 = vmul.f32 %v6730_v29, %v1017_v41 }
 0x595   :  { %v1345_v51 = vpop.permute.xlu1 %1344  ;;  %v1080_v52 = vpack.c.bf16 %v1018_v50, %v1018_v50 }
 0x596   :  { %v1350_v35 = vsel %vm351_vm8, %v1345_v51, 0 }
 0x597   :  { %5603 = vmatmul.msk.bf16.vlgmr.msrb.gmra.mxu2 %vm351_vm8, %v1080_v52  ;;  %1359 = vmatpush.bf16.xpose.msrb.mxu1 %v1350_v35 }
 0x598   :  { %1313 = vmatpush.bf16.xpose.msrb.mxu2 %v1304_v3 }
 0x59d   :  { %v1343_v56 = vpop.permute.xlu1 %1342 }
 0x5a4   :  { %v982_v60 = vpop.xlane.xlu0 %981 }
 0x5a5   :  { %5971 = vrcp.f32 %v982_v60  ;;  %v1128_v62 = vpop.permute.xlu1 %1127  ;;  %v1045_v31 = vand.u32 2147483648, %v982_v60  ;;  %v1043_v4 = vand.u32 2147483647, %v982_v60  ;;  %vm1039_vm12 = vweird.f32 %v982_v60 }
 0x5a6   :  { %v1133_v46 = vsel %vm660_vm9, %v1128_v62, 0 }
 0x5a7   :  { %1142 = vmatpush.bf16.msra.mxu3 %v1133_v46  ;;  %v1046_v9 = vor.u32 1.1754944e-38, %v1045_v31  ;;  %vm1044_vm14 = vcmp.eq.f32.partialorder %v1043_v4, 8.507059e+37 }
 0x5ab   :  { %v5972_v63 = vpop.eup %5971 }
 0x5ac   :  { %v1035_v29 = vmul.f32 %v5972_v63, %v982_v60  ;;  %vm1040_vm11 = vweird.f32 %v5972_v63 }
 0x5ad   :  { %vm1041_vm13 = vmor %vm1039_vm12, %vm1040_vm11  ;;  %v1572_v10 = vpop.permute.xlu1 %1571 }
 0x5ae   :  { %v1036_v2 = vsub.f32 1.0, %v1035_v29  ;;  %v1577_v14 = vsel %vm660_vm9, %v1572_v10, 0 }
 0x5b0   :  { %v1037_v27 = vmul.f32 %v5972_v63, %v1036_v2 }
 0x5b2   :  { %v1038_v6 = vadd.f32 %v5972_v63, %v1037_v27 }
 0x5b4   :  { %v1042_v39 = vsel %vm1041_vm13, %v5972_v63, %v1038_v6 }
 0x5b5   :  { %v1047_v7 = vsel %vm1044_vm14, %v1046_v9, %v1042_v39 }
 0x5b6   :  { %v1048_v21 = vmul.f32 %v6747_v28, %v1047_v7 }
 0x5b7   :  { %v1274_v59 = vpop.permute.xlu0 %1273 }
 0x5b8   :  { %5612 = vmatmul.msk.bf16.vlgmr.msra.gmra.mxu1 %vm351_vm8, %v1274_v59  ;;  %v1082_v26 = vpack.c.bf16 %v1048_v21, %v1048_v21 }
 0x5b9   :  { %1586 = vmatpush.bf16.msra.mxu1 %v1577_v14 }
 0x5ba   :  { %5605 = vmatmul.msk.bf16.vlgmr.msra.gmra.mxu0 %vm351_vm8, %v1082_v26 }
 0x5bb   :  { %1336 = vmatpush.bf16.xpose.msra.mxu0 %v1327_v15 }
 0x5c2   :  { %v988_v30 = vpop.xlane.xlu2 %987 }
 0x5c3   :  { %5973 = vrcp.f32 %v988_v30  ;;  %v1075_v33 = vand.u32 2147483648, %v988_v30  ;;  %v1073_v58 = vand.u32 2147483647, %v988_v30  ;;  %vm1069_vm0 = vweird.f32 %v988_v30 }
 0x5c5   :  { %v1076_v24 = vor.u32 1.1754944e-38, %v1075_v33  ;;  %vm1074_vm2 = vcmp.eq.f32.partialorder %v1073_v58, 8.507059e+37 }
 0x5c8   :  { %5615 = vmatmul.msk.bf16.vlgmr.msrb.gmra.mxu1 %vm351_vm8, %v1343_v56 }
 0x5c9   :  { %v5974_v49 = vpop.eup %5973 }
 0x5ca   :  { %v1065_v32 = vmul.f32 %v5974_v49, %v988_v30  ;;  %5611 = vmatmul.msk.bf16.vlgmr.msrb.gmra.mxu0 %vm351_vm8, %v6779_v57  ;;  %v1297_v28 = vpop.permute.xlu2 %1296  ;;  %vm1070_vm15 = vweird.f32 %v5974_v49 }
 0x5cb   :  { %vm1071_vm1 = vmor %vm1069_vm0, %vm1070_vm15 }
 0x5cc   :  { %v1066_v36 = vsub.f32 1.0, %v1065_v32  ;;  %v337_v32 = vld [vmem:[%s8308_s11 + $0x4] sm:$0xf] }
 0x5ce   :  { %v1067_v40 = vmul.f32 %v5974_v49, %v1066_v36 }
 0x5d0   :  { %v1068_v47 = vadd.f32 %v5974_v49, %v1067_v40 }
 0x5d2   :  { %v1072_v22 = vsel %vm1071_vm1, %v5974_v49, %v1068_v47  ;;  %v1368_v50 = vpop.permute.xlu2 %1367 }
 0x5d3   :  { %v1077_v0 = vsel %vm1074_vm2, %v1076_v24, %v1072_v22  ;;  %v1373_v51 = vsel %vm351_vm8, %v1368_v50, 0 }
 0x5d4   :  { %v1078_v41 = vmul.f32 %v6760_v38, %v1077_v0 }
 0x5d6   :  { %v1084_v43 = vpack.c.bf16 %v1078_v41, %v1078_v41 }
 0x5d8   :  { %5607 = vmatmul.msk.bf16.vlgmr.msra.gmra.mxu2 %vm351_vm8, %v1084_v43 }
 0x5d9   :  { %1382 = vmatpush.bf16.xpose.msra.mxu2 %v1373_v51 }
 0x5da   :  { %5614 = vmatmul.msk.bf16.vlgmr.msra.gmra.mxu0 %vm351_vm8, %v6787_v45  ;;  %v1366_v62 = vpop.permute.xlu2 %1365 }
 0x5e2   :  { %v943_v57 = vpop.xlane.xlu0 %942 }
 0x5e3   :  { %v955_v52 = vsub.f32 %v6768_v55, %v943_v57 }
 0x5e5   :  { %v963_v35 = vmul.f32 1.442695, %v955_v52 }
 0x5e7   :  { %5975 = vpow2.f32 %v963_v35 }
 0x5e8   :  { %5613 = vmatmul.msk.bf16.vlgmr.msrb.gmra.mxu2 %vm351_vm8, %v1297_v28  ;;  %v1224_v28 = vsel %vm660_vm9, %v337_v32, 0 }
 0x5e9   :  { %1233 = vmatpush.bf16.msrb.mxu3 %v1224_v28 }
 0x5ed   :  { %v6809_v3 = vpop.eup %5975 }
 0x5ee   :  { %v977_v38 = vsel %vm351_vm8, %v6809_v3, 0.0 }
 0x5ef   :  { %978 = vadd.xlane.f32.xlu2 %v977_v38 }
 0x5f5   :  { %v1551_v56 = vpop.permute.xlu0 %1550 }
 0x5f6   :  { %v1556_v60 = vsel %vm660_vm9, %v1551_v56, 0 }
 0x5f7   :  { %1565 = vmatpush.bf16.msrb.mxu0 %v1556_v60 }
 0x5f8   :  { %5616 = vmatmul.msk.bf16.vlgmr.msra.gmra.mxu2 %vm351_vm8, %v1366_v62  ;;  %v6815_v45 = vpop.f32.mrf.mxu1 }
 0x600   :  { %v1104_v55 = vpop.f32.mrf.mxu1 }
 0x607   :  { %1592 = vrot.lane.b32.xlu2 %v6504_v54, %s8335_s26 }
 0x608   :  { %v6819_v46 = vpop.f32.mrf.mxu1 }
 0x60f   :  { %1704 = vrot.lane.b32.xlu2 %v6500_v48, %s8333_s27 }
 0x610   :  { %v1188_v63 = vpop.f32.mrf.mxu1 }
 0x61a   :  { %v6823_v29 = vpop.f32.mrf.mxu2 }
 0x61b   :  { %v1211_v2 = vpack.c.bf16 %v6823_v29, %v6815_v45 }
 0x622   :  { %v1125_v31 = vpop.f32.mrf.mxu2 }
 0x635   :  { %v1292_v27 = vpop.f32.mrf.mxu1 }
 0x636   :  { %v1389_v4 = vmul.f32 0.35355338, %v1292_v27 }
 0x637   :  { %v6827_v6 = vpop.f32.mrf.mxu0 }
 0x638   :  { %v6831_v9 = vsel %vm6549_vm10, %v1389_v4, -1e+30 }
 0x639   :  { %v1403_v39 = vsel %vm351_vm8, %v6831_v9, -inf }
 0x63a   :  { %1404 = vmax.xlane.f32.xlu0 %v1403_v39 }
 0x63d   :  { %v1294_v10 = vpop.f32.mrf.mxu1 }
 0x63f   :  { %v1167_v7 = vpop.f32.mrf.mxu0 }
 0x645   :  { %v1361_v21 = vpop.f32.mrf.mxu1 }
 0x646   :  { %v1392_v63 = vmul.f32 0.35355338, %v1361_v21 }
 0x647   :  { %v1269_v59 = vpop.f32.mrf.mxu0 }
 0x648   :  { %v1388_v14 = vmul.f32 0.35355338, %v1269_v59  ;;  %v1398_v7 = vsel %vm6549_vm10, %v1392_v63, -1e+30 }
 0x64a   :  { %v6837_v26 = vsel %vm6549_vm10, %v1388_v14, -1e+30  ;;  %v1614_v14 = vpop.permute.xlu0 %1613 }
 0x64b   :  { %v1400_v15 = vsel %vm351_vm8, %v6837_v26, -inf  ;;  %v1619_v21 = vsel %vm660_vm9, %v1614_v14, 0 }
 0x64c   :  { %1401 = vmax.xlane.f32.xlu1 %v1400_v15 }
 0x64d   :  { %v1363_v30 = vpop.f32.mrf.mxu1 }
 0x64e   :  { %v1412_v30 = vsel %vm351_vm8, %v1398_v7, -inf }
 0x64f   :  { %v1271_v49 = vpop.f32.mrf.mxu0 }
 0x657   :  { %v1338_v36 = vpop.f32.mrf.mxu0 }
 0x658   :  { %v1391_v33 = vmul.f32 0.35355338, %v1338_v36 }
 0x65a   :  { %v6847_v40 = vsel %vm6549_vm10, %v1391_v33, -1e+30 }
 0x65b   :  { %v6849_v58 = vpop.f32.mrf.mxu2  ;;  %v1409_v47 = vsel %vm351_vm8, %v6847_v40, -inf }
 0x65c   :  { %1410 = vmax.xlane.f32.xlu2 %v1409_v47 }
 0x65f   :  { %v1340_v24 = vpop.f32.mrf.mxu0 }
 0x662   :  { %v979_v22 = vpop.xlane.xlu2 %978 }
 0x663   :  { %5977 = vrcp.f32 %v979_v22  ;;  %v1209_v0 = vpop.f32.mrf.mxu2  ;;  %v1030_v38 = vand.u32 2147483648, %v979_v22  ;;  %v1028_v60 = vand.u32 2147483647, %v979_v22  ;;  %vm1024_vm5 = vweird.f32 %v979_v22 }
 0x665   :  { %1634 = vrot.lane.b32.xlu1 %v6512_v1, %s8335_s26  ;;  %v1031_v27 = vor.u32 1.1754944e-38, %v1030_v38  ;;  %vm1029_vm7 = vcmp.eq.f32.partialorder %v1028_v60, 8.507059e+37 }
 0x669   :  { %v5978_v41 = vpop.eup %5977 }
 0x66a   :  { %v1020_v50 = vmul.f32 %v5978_v41, %v979_v22  ;;  %v1593_v43 = vpop.permute.xlu2 %1592  ;;  %vm1025_vm4 = vweird.f32 %v5978_v41 }
 0x66b   :  { %v1598_v51 = vsel %vm660_vm9, %v1593_v43, 0  ;;  %v1315_v57 = vpop.f32.mrf.mxu2  ;;  %vm1026_vm6 = vmor %vm1024_vm5, %vm1025_vm4 }
 0x66c   :  { %v1021_v52 = vsub.f32 1.0, %v1020_v50  ;;  %v1390_v35 = vmul.f32 0.35355338, %v1315_v57  ;;  %1607 = vmatpush.bf16.msrb.mxu2 %v1598_v51 }
 0x66e   :  { %v1022_v56 = vmul.f32 %v5978_v41, %v1021_v52  ;;  %v1396_v62 = vsel %vm6549_vm10, %v1390_v35, -1e+30 }
 0x66f   :  { %v1406_v55 = vsel %vm351_vm8, %v1396_v62, -inf }
 0x670   :  { %v1023_v31 = vadd.f32 %v5978_v41, %v1022_v56  ;;  %1407 = vmax.xlane.f32.xlu0 %v1406_v55 }
 0x672   :  { %v1027_v4 = vsel %vm1026_vm6, %v5978_v41, %v1023_v31  ;;  %v1705_v33 = vpop.permute.xlu2 %1704 }
 0x673   :  { %v1317_v39 = vpop.f32.mrf.mxu2  ;;  %v1032_v10 = vsel %vm1029_vm7, %v1031_v27, %v1027_v4  ;;  %v1710_v47 = vsel %vm351_vm8, %v1705_v33, 0 }
 0x674   :  { %v1033_v59 = vmul.f32 %v6809_v3, %v1032_v10 }
 0x676   :  { %v1081_v15 = vpack.c.bf16 %v1033_v59, %v1033_v59 }
 0x678   :  { %1413 = vmax.xlane.f32.xlu0 %v1412_v30  ;;  %5604 = vmatmul.msk.bf16.vlgmr.msra.gmra.mxu3 %vm351_vm8, %v1081_v15 }
 0x679   :  { %1628 = vmatpush.bf16.msra.mxu3 %v1619_v21 }
 0x67b   :  { %v1384_v49 = vpop.f32.mrf.mxu2 }
 0x67c   :  { %v1393_v32 = vmul.f32 0.35355338, %v1384_v49 }
 0x67e   :  { %v6867_v28 = vsel %vm6549_vm10, %v1393_v32, -1e+30 }
 0x67f   :  { %v1415_v36 = vsel %vm351_vm8, %v6867_v28, -inf }
 0x680   :  { %1416 = vmax.xlane.f32.xlu2 %v1415_v36 }
 0x683   :  { %v1386_v3 = vpop.f32.mrf.mxu2 }
 0x688   :  { %5608 = vmatmul.msk.bf16.vlgmr.msrb.gmra.mxu3 %vm351_vm8, %v1211_v2 }
 0x689   :  { %1719 = vmatpush.bf16.xpose.msrb.mxu3 %v1710_v47 }
 0x68c   :  { %1681 = vrot.lane.b32.xlu0 %v6496_v44, %s8333_s27 }
 0x6ad   :  { %v1405_v24 = vpop.xlane.xlu0 %1404 }
 0x6ae   :  { %v1419_v22 = vsub.f32 %v6831_v9, %v1405_v24 }
 0x6b0   :  { %v1426_v0 = vmul.f32 1.442695, %v1419_v22 }
 0x6b2   :  { %5979 = vpow2.f32 %v1426_v0 }
 0x6b8   :  { %v6879_v41 = vpop.eup %5979 }
 0x6b9   :  { %v1439_v50 = vsel %vm351_vm8, %v6879_v41, 0.0 }
 0x6ba   :  { %1440 = vadd.xlane.f32.xlu1 %v1439_v50 }
 0x6bf   :  { %v1402_v43 = vpop.xlane.xlu1 %1401 }
 0x6c0   :  { %v1418_v45 = vsub.f32 %v6837_v26, %v1402_v43 }
 0x6c2   :  { %v1424_v29 = vmul.f32 1.442695, %v1418_v45 }
 0x6c4   :  { %5981 = vpow2.f32 %v1424_v29 }
 0x6ca   :  { %v6884_v2 = vpop.eup %5981 }
 0x6cb   :  { %v1436_v51 = vsel %vm351_vm8, %v6884_v2, 0.0 }
 0x6cc   :  { %1437 = vadd.xlane.f32.xlu0 %v1436_v51 }
 0x6cf   :  { %v1411_v9 = vpop.xlane.xlu2 %1410 }
 0x6d0   :  { %v1421_v57 = vsub.f32 %v6847_v40, %v1411_v9 }
 0x6d2   :  { %v1430_v52 = vmul.f32 1.442695, %v1421_v57 }
 0x6d4   :  { %5983 = vpow2.f32 %v1430_v52 }
 0x6d7   :  { %v1635_v35 = vpop.permute.xlu1 %1634 }
 0x6d8   :  { %v1640_v38 = vsel %vm660_vm9, %v1635_v35, 0 }
 0x6d9   :  { %1649 = vmatpush.bf16.msra.mxu0 %v1640_v38 }
 0x6da   :  { %v6890_v56 = vpop.eup %5983 }
 0x6db   :  { %v1445_v26 = vsel %vm351_vm8, %v6890_v56, 0.0 }
 0x6dc   :  { %1446 = vadd.xlane.f32.xlu0 %v1445_v26 }
 0x6e3   :  { %v1408_v60 = vpop.xlane.xlu0 %1407 }
 0x6e4   :  { %v1420_v55 = vsub.f32 %v1396_v62, %v1408_v60 }
 0x6e6   :  { %v1428_v63 = vmul.f32 1.442695, %v1420_v55 }
 0x6e8   :  { %5985 = vpow2.f32 %v1428_v63 }
 0x6eb   :  { %v1414_v31 = vpop.xlane.xlu0 %1413 }
 0x6ec   :  { %v1422_v27 = vsub.f32 %v1398_v7, %v1414_v31 }
 0x6ee   :  { %v6894_v4 = vpop.eup %5985  ;;  %v1432_v40 = vmul.f32 1.442695, %v1422_v27 }
 0x6ef   :  { %v1442_v39 = vsel %vm351_vm8, %v6894_v4, 0.0 }
 0x6f0   :  { %5987 = vpow2.f32 %v1432_v40  ;;  %1655 = vrot.lane.b32.xlu0 %v6518_v5, %s8335_s26  ;;  %1443 = vadd.xlane.f32.xlu2 %v1442_v39 }
 0x6f3   :  { %v1417_v21 = vpop.xlane.xlu2 %1416 }
 0x6f4   :  { %v1423_v49 = vsub.f32 %v6867_v28, %v1417_v21 }
 0x6f6   :  { %v6900_v10 = vpop.eup %5987  ;;  %v1434_v32 = vmul.f32 1.442695, %v1423_v49 }
 0x6f7   :  { %v1448_v62 = vsel %vm351_vm8, %v6900_v10, 0.0 }
 0x6f8   :  { %1727 = vrot.lane.b32.xlu0 %v6504_v54, %s8333_s27  ;;  %1449 = vadd.xlane.f32.xlu1 %v1448_v62  ;;  %5989 = vpow2.f32 %v1434_v32 }
 0x6fb   :  { %v1144_v7 = vpop.f32.mrf.mxu3 }
 0x6fc   :  { %v1212_v59 = vpack.c.bf16 %v6827_v6, %v1144_v7  ;;  %v1213_v6 = vpack.c.bf16 %v6849_v58, %v6819_v46 }
 0x6fe   :  { %5609 = vmatmul.msk.bf16.gmra.mxu3 %vm351_vm8, %v1212_v59  ;;  %v1682_v14 = vpop.permute.xlu0 %1681  ;;  %v6925_v36 = vpop.eup %5989 }
 0x6ff   :  { %v1687_v15 = vsel %vm351_vm8, %v1682_v14, 0  ;;  %v1451_v46 = vsel %vm351_vm8, %v6925_v36, 0.0 }
 0x700   :  { %1748 = vrot.lane.b32.xlu0 %v6508_v61, %s8331_s7  ;;  %1696 = vmatpush.bf16.xpose.msra.mxu2 %v1687_v15 }
 0x703   :  { %v1146_v30 = vpop.f32.mrf.mxu3 }
 0x708   :  { %1771 = vrot.lane.b32.xlu0 %v6512_v1, %s8331_s7  ;;  %1679 = vrot.lane.b32.xlu2 %v6496_v44, %s8331_s7 }
 0x70e   :  { %5610 = vmatmul.msk.bf16.gmra.mxu3 %vm351_vm8, %v1213_v6 }
 0x711   :  { %1702 = vrot.lane.b32.xlu1 %v6500_v48, %s8331_s7 }
 0x719   :  { %1725 = vrot.lane.b32.xlu1 %v6504_v54, %s8331_s7 }
 0x721   :  { %1796 = vrot.lane.b32.xlu1 %v6518_v5, %s8333_s27 }
 0x72d   :  { %v1441_v3 = vpop.xlane.xlu1 %1440 }
 0x72e   :  { %5991 = vrcp.f32 %v1441_v3  ;;  %v1480_v24 = vand.u32 2147483648, %v1441_v3  ;;  %v1478_v28 = vand.u32 2147483647, %v1441_v3  ;;  %vm1474_vm12 = vweird.f32 %v1441_v3 }
 0x730   :  { %v1481_v50 = vor.u32 1.1754944e-38, %v1480_v24  ;;  %vm1479_vm14 = vcmp.eq.f32.partialorder %v1478_v28, 8.507059e+37 }
 0x731   :  { %1452 = vadd.xlane.f32.xlu2 %v1451_v46 }
 0x734   :  { %v5992_v58 = vpop.eup %5991 }
 0x735   :  { %v1470_v33 = vmul.f32 %v5992_v58, %v1441_v3  ;;  %vm1475_vm11 = vweird.f32 %v5992_v58 }
 0x736   :  { %vm1476_vm13 = vmor %vm1474_vm12, %vm1475_vm11 }
 0x737   :  { %v1471_v47 = vsub.f32 1.0, %v1470_v33 }
 0x739   :  { %v1472_v22 = vmul.f32 %v5992_v58, %v1471_v47 }
 0x73b   :  { %v1473_v0 = vadd.f32 %v5992_v58, %v1472_v22 }
 0x73d   :  { %v1477_v43 = vsel %vm1476_vm13, %v5992_v58, %v1473_v0 }
 0x73e   :  { %v1482_v45 = vsel %vm1479_vm14, %v1481_v50, %v1477_v43 }
 0x73f   :  { %v1438_v29 = vpop.xlane.xlu0 %1437  ;;  %v1483_v51 = vmul.f32 %v6879_v41, %v1482_v45 }
 0x740   :  { %5993 = vrcp.f32 %v1438_v29  ;;  %v1465_v26 = vand.u32 2147483648, %v1438_v29  ;;  %v1463_v60 = vand.u32 2147483647, %v1438_v29  ;;  %vm1459_vm0 = vweird.f32 %v1438_v29 }
 0x741   :  { %v1545_v9 = vpack.c.bf16 %v1483_v51, %v1483_v51 }
 0x742   :  { %v1466_v31 = vor.u32 1.1754944e-38, %v1465_v26  ;;  %vm1464_vm2 = vcmp.eq.f32.partialorder %v1463_v60, 8.507059e+37 }
 0x743   :  { %5618 = vmatmul.msk.bf16.vlgmr.msra.gmra.mxu1 %vm351_vm8, %v1545_v9 }
 0x746   :  { %v5994_v57 = vpop.eup %5993 }
 0x747   :  { %v1455_v52 = vmul.f32 %v5994_v57, %v1438_v29  ;;  %vm1460_vm15 = vweird.f32 %v5994_v57 }
 0x748   :  { %vm1461_vm1 = vmor %vm1459_vm0, %vm1460_vm15 }
 0x749   :  { %v1456_v35 = vsub.f32 1.0, %v1455_v52  ;;  %1750 = vrot.lane.b32.xlu2 %v6508_v61, %s8333_s27 }
 0x74b   :  { %v1457_v38 = vmul.f32 %v5994_v57, %v1456_v35 }
 0x74d   :  { %v1458_v55 = vadd.f32 %v5994_v57, %v1457_v38 }
 0x74f   :  { %v1462_v63 = vsel %vm1461_vm1, %v5994_v57, %v1458_v55  ;;  %v1447_v41 = vpop.xlane.xlu0 %1446 }
 0x750   :  { %5995 = vrcp.f32 %v1447_v41  ;;  %v1467_v27 = vsel %vm1464_vm2, %v1466_v31, %v1462_v63  ;;  %v1510_v14 = vand.u32 2147483648, %v1447_v41  ;;  %v1508_v30 = vand.u32 2147483647, %v1447_v41 }
 0x751   :  { %1773 = vrot.lane.b32.xlu2 %v6512_v1, %s8333_s27  ;;  %v1468_v40 = vmul.f32 %v6884_v2, %v1467_v27  ;;  %vm1504_vm5 = vweird.f32 %v1447_v41 }
 0x752   :  { %v1511_v21 = vor.u32 1.1754944e-38, %v1510_v14  ;;  %vm1509_vm7 = vcmp.eq.f32.partialorder %v1508_v30, 8.507059e+37 }
 0x753   :  { %v1544_v39 = vpack.c.bf16 %v1468_v40, %v1468_v40 }
 0x755   :  { %5617 = vmatmul.msk.bf16.vlgmr.msrb.gmra.mxu0 %vm351_vm8, %v1544_v39 }
 0x756   :  { %v5996_v62 = vpop.eup %5995 }
 0x757   :  { %v1500_v7 = vmul.f32 %v5996_v62, %v1447_v41  ;;  %vm1505_vm4 = vweird.f32 %v5996_v62 }
 0x758   :  { %vm1506_vm6 = vmor %vm1504_vm5, %vm1505_vm4 }
 0x759   :  { %v1501_v59 = vsub.f32 1.0, %v1500_v7  ;;  %1794 = vrot.lane.b32.xlu2 %v6518_v5, %s8331_s7  ;;  %s8368_s7 = smov 104  }
 0x75b   :  { %v1502_v15 = vmul.f32 %v5996_v62, %v1501_v59 }
 0x75d   :  { %v1503_v6 = vadd.f32 %v5996_v62, %v1502_v15 }
 0x75f   :  { %v1507_v49 = vsel %vm1506_vm6, %v5996_v62, %v1503_v6 }
 0x760   :  { %v1512_v2 = vsel %vm1509_vm7, %v1511_v21, %v1507_v49 }
 0x761   :  { %v1513_v32 = vmul.f32 %v6890_v56, %v1512_v2 }
 0x762   :  { %v1656_v3 = vpop.permute.xlu0 %1655 }
 0x763   :  { %v1661_v46 = vsel %vm660_vm9, %v1656_v3, 0  ;;  %v1444_v58 = vpop.xlane.xlu2 %1443  ;;  %v1547_v33 = vpack.c.bf16 %v1513_v32, %v1513_v32 }
 0x764   :  { %5997 = vrcp.f32 %v1444_v58  ;;  %1670 = vmatpush.bf16.msrb.mxu1 %v1661_v46  ;;  %v1495_v43 = vand.u32 2147483648, %v1444_v58  ;;  %v1493_v45 = vand.u32 2147483647, %v1444_v58  ;;  %vm1489_vm12 = vweird.f32 %v1444_v58  ;;  %v6952_v46 = vpop.f32.mrf.mxu3 }
 0x765   :  { %5620 = vmatmul.msk.bf16.vlgmr.msra.gmra.mxu3 %vm351_vm8, %v1547_v33 }
 0x766   :  { %v1496_v9 = vor.u32 1.1754944e-38, %v1495_v43  ;;  %vm1494_vm14 = vcmp.eq.f32.partialorder %v1493_v45, 8.507059e+37 }
 0x76a   :  { %v5998_v47 = vpop.eup %5997  ;;  %v1728_v24 = vpop.permute.xlu0 %1727 }
 0x76b   :  { %v1485_v22 = vmul.f32 %v5998_v47, %v1444_v58  ;;  %v1733_v28 = vsel %vm351_vm8, %v1728_v24, 0  ;;  %v1450_v0 = vpop.xlane.xlu1 %1449  ;;  %vm1490_vm11 = vweird.f32 %v5998_v47  ;;  %v1680_v59 = vpop.permute.xlu2 %1679 }
 0x76c   :  { %5999 = vrcp.f32 %v1450_v0  ;;  %1742 = vmatpush.bf16.xpose.msrb.mxu0 %v1733_v28  ;;  %vm1491_vm13 = vmor %vm1489_vm12, %vm1490_vm11  ;;  %v1525_v60 = vand.u32 2147483648, %v1450_v0  ;;  %v1523_v63 = vand.u32 2147483647, %v1450_v0  ;;  %vm1519_vm0 = vweird.f32 %v1450_v0 }
 0x76d   :  { %v1486_v50 = vsub.f32 1.0, %v1485_v22 }
 0x76e   :  { %v1526_v27 = vor.u32 1.1754944e-38, %v1525_v60  ;;  %vm1524_vm2 = vcmp.eq.f32.partialorder %v1523_v63, 8.507059e+37 }
 0x76f   :  { %v1487_v56 = vmul.f32 %v5998_v47, %v1486_v50 }
 0x771   :  { %v1488_v29 = vadd.f32 %v5998_v47, %v1487_v56 }
 0x772   :  { %v6000_v51 = vpop.eup %5999 }
 0x773   :  { %v1492_v57 = vsel %vm1491_vm13, %v5998_v47, %v1488_v29  ;;  %v1515_v52 = vmul.f32 %v6000_v51, %v1450_v0  ;;  %vm1520_vm15 = vweird.f32 %v6000_v51  ;;  %v1749_v47 = vpop.permute.xlu0 %1748  ;;  %v6956_v29 = vpop.f32.mrf.mxu3 }
 0x774   :  { %v1497_v35 = vsel %vm1494_vm14, %v1496_v9, %v1492_v57  ;;  %vm1521_vm1 = vmor %vm1519_vm0, %vm1520_vm15 }
 0x775   :  { %v1516_v38 = vsub.f32 1.0, %v1515_v52  ;;  %v1498_v26 = vmul.f32 %v6894_v4, %v1497_v35 }
 0x777   :  { %v1517_v55 = vmul.f32 %v6000_v51, %v1516_v38  ;;  %v1546_v31 = vpack.c.bf16 %v1498_v26, %v1498_v26 }
 0x779   :  { %v1518_v41 = vadd.f32 %v6000_v51, %v1517_v55  ;;  %5619 = vmatmul.msk.bf16.vlgmr.msrb.gmra.mxu2 %vm351_vm8, %v1546_v31 }
 0x77b   :  { %v1522_v40 = vsel %vm1521_vm1, %v6000_v51, %v1518_v41  ;;  %v1772_v51 = vpop.permute.xlu0 %1771 }
 0x77c   :  { %v1527_v39 = vsel %vm1524_vm2, %v1526_v27, %v1522_v40 }
 0x77d   :  { %v1528_v62 = vmul.f32 %v6900_v10, %v1527_v39 }
 0x77f   :  { %v1548_v7 = vpack.c.bf16 %v1528_v62, %v1528_v62 }
 0x781   :  { %5621 = vmatmul.msk.bf16.vlgmr.msra.gmra.mxu0 %vm351_vm8, %v1548_v7  ;;  %v6963_v52 = vpop.f32.mrf.mxu3 }
 0x783   :  { %v1703_v4 = vpop.permute.xlu1 %1702 }
 0x784   :  { %5624 = vmatmul.msk.bf16.vlgmr.msrb.gmra.mxu3 %vm351_vm8, %v1703_v4 }
 0x789   :  { %5623 = vmatmul.msk.bf16.vlgmr.msra.gmra.mxu2 %vm351_vm8, %v1680_v59  ;;  %v6966_v38 = vpop.f32.mrf.mxu3 }
 0x78b   :  { %v1726_v14 = vpop.permute.xlu1 %1725 }
 0x791   :  { %5625 = vmatmul.msk.bf16.vlgmr.msrb.gmra.mxu0 %vm351_vm8, %v1726_v14  ;;  %v6972_v60 = vpop.f32.mrf.mxu3 }
 0x793   :  { %v1797_v15 = vpop.permute.xlu1 %1796 }
 0x794   :  { %v1802_v30 = vsel %vm351_vm8, %v1797_v15, 0 }
 0x795   :  { %1811 = vmatpush.bf16.xpose.msra.mxu3 %v1802_v30 }
 0x799   :  { %v6974_v63 = vpop.f32.mrf.mxu3 }
 0x7a4   :  { %v1453_v6 = vpop.xlane.xlu2 %1452 }
 0x7a5   :  { %6001 = vrcp.f32 %v1453_v6  ;;  %v1540_v3 = vand.u32 2147483648, %v1453_v6  ;;  %v1538_v33 = vand.u32 2147483647, %v1453_v6  ;;  %vm1534_vm5 = vweird.f32 %v1453_v6 }
 0x7a7   :  { %v1541_v22 = vor.u32 1.1754944e-38, %v1540_v3  ;;  %vm1539_vm7 = vcmp.eq.f32.partialorder %v1538_v33, 8.507059e+37 }
 0x7ab   :  { %v6002_v21 = vpop.eup %6001 }
 0x7ac   :  { %v1530_v10 = vmul.f32 %v6002_v21, %v1453_v6  ;;  %v1751_v49 = vpop.permute.xlu2 %1750  ;;  %vm1535_vm4 = vweird.f32 %v6002_v21 }
 0x7ad   :  { %v1756_v2 = vsel %vm351_vm8, %v1751_v49, 0  ;;  %vm1536_vm6 = vmor %vm1534_vm5, %vm1535_vm4 }
 0x7ae   :  { %v1531_v32 = vsub.f32 1.0, %v1530_v10  ;;  %1765 = vmatpush.bf16.xpose.msra.mxu1 %v1756_v2 }
 0x7b0   :  { %v1532_v58 = vmul.f32 %v6002_v21, %v1531_v32 }
 0x7b2   :  { %v1533_v24 = vadd.f32 %v6002_v21, %v1532_v58 }
 0x7b4   :  { %v1537_v28 = vsel %vm1536_vm6, %v6002_v21, %v1533_v24  ;;  %v1774_v0 = vpop.permute.xlu2 %1773 }
 0x7b5   :  { %v1779_v50 = vsel %vm351_vm8, %v1774_v0, 0  ;;  %v1542_v43 = vsel %vm1539_vm7, %v1541_v22, %v1537_v28 }
 0x7b6   :  { %1788 = vmatpush.bf16.xpose.msrb.mxu2 %v1779_v50  ;;  %v1543_v56 = vmul.f32 %v6925_v36, %v1542_v43 }
 0x7b8   :  { %v1549_v45 = vpack.c.bf16 %v1543_v56, %v1543_v56 }
 0x7ba   :  { %5622 = vmatmul.msk.bf16.vlgmr.msrb.gmra.mxu1 %vm351_vm8, %v1549_v45 }
 0x7bc   :  { %v1795_v9 = vpop.permute.xlu2 %1794 }
 0x7bd   :  { %5627 = vmatmul.msk.bf16.vlgmr.msrb.gmra.mxu2 %vm351_vm8, %v1772_v51  ;;  %5628 = vmatmul.msk.bf16.vlgmr.msra.gmra.mxu3 %vm351_vm8, %v1795_v9 }
 0x7c0   :  { %v6961_v57 = vpop.f32.mrf.mxu1 }
 0x7c8   :  { %v1590_v35 = vpop.f32.mrf.mxu1 }
 0x7ca   :  { %5626 = vmatmul.msk.bf16.vlgmr.msra.gmra.mxu1 %vm351_vm8, %v1749_v47 }
 0x7d2   :  { %v6968_v36 = vpop.f32.mrf.mxu0 }
 0x7d3   :  { %v1676_v26 = vpack.c.bf16 %v6961_v57, %v6968_v36  ;;  %v784_v36 = vpack.c.bf16 %v6689_v53, %v6753_v37 }
 0x7da   :  { %v1569_v55 = vpop.f32.mrf.mxu0 }
 0x7e8   :  { %v6976_v31 = vpop.f32.mrf.mxu3 }
 0x7f0   :  { %v1632_v41 = vpop.f32.mrf.mxu3 }
 0x7fc   :  { %v6978_v27 = vpop.f32.mrf.mxu2 }
 0x7fd   :  { %v1677_v40 = vpack.c.bf16 %v6976_v31, %v6978_v27 }
 0x7fe   :  { %v6982_v39 = vpop.f32.mrf.mxu0 }
 0x804   :  { %v1611_v62 = vpop.f32.mrf.mxu2 }
 0x806   :  { %v1653_v7 = vpop.f32.mrf.mxu0 }
 0x807   :  { %v1721_v4 = vpop.f32.mrf.mxu3 }
 0x808   :  { %v1818_v59 = vmul.f32 0.35355338, %v1721_v4 }
 0x80a   :  { %v1824_v14 = vsel %vm6549_vm10, %v1818_v59, -1e+30 }
 0x80b   :  { %v1832_v15 = vsel %vm351_vm8, %v1824_v14, -inf }
 0x80c   :  { %v1698_v30 = vpop.f32.mrf.mxu2  ;;  %1833 = vmax.xlane.f32.xlu0 %v1832_v15 }
 0x80d   :  { %v1817_v6 = vmul.f32 0.35355338, %v1698_v30 }
 0x80e   :  { %v1744_v21 = vpop.f32.mrf.mxu0 }
 0x80f   :  { %v1819_v10 = vmul.f32 0.35355338, %v1744_v21  ;;  %v1723_v49 = vpop.f32.mrf.mxu3  ;;  %v1823_v2 = vsel %vm6549_vm10, %v1817_v6, -1e+30 }
 0x810   :  { %v1829_v32 = vsel %vm351_vm8, %v1823_v2, -inf }
 0x811   :  { %1830 = vmax.xlane.f32.xlu1 %v1829_v32  ;;  %v1825_v3 = vsel %vm6549_vm10, %v1819_v10, -1e+30 }
 0x812   :  { %v1835_v58 = vsel %vm351_vm8, %v1825_v3, -inf }
 0x813   :  { %1836 = vmax.xlane.f32.xlu2 %v1835_v58 }
 0x814   :  { %v1700_v33 = vpop.f32.mrf.mxu2 }
 0x816   :  { %v1746_v47 = vpop.f32.mrf.mxu0 }
 0x837   :  { %v6993_v24 = vpop.f32.mrf.mxu1 }
 0x838   :  { %v1678_v22 = vpack.c.bf16 %v6993_v24, %v6982_v39 }
 0x83f   :  { %v1674_v28 = vpop.f32.mrf.mxu1 }
 0x840   :  { %v1790_v0 = vpop.f32.mrf.mxu2  ;;  %v1813_v50 = vpop.f32.mrf.mxu3 }
 0x841   :  { %v1821_v43 = vmul.f32 0.35355338, %v1790_v0  ;;  %v1822_v56 = vmul.f32 0.35355338, %v1813_v50 }
 0x843   :  { %v1828_v45 = vsel %vm6549_vm10, %v1822_v56, -1e+30  ;;  %v1827_v51 = vsel %vm6549_vm10, %v1821_v43, -1e+30 }
 0x844   :  { %v1844_v9 = vsel %vm351_vm8, %v1828_v45, -inf  ;;  %v1841_v35 = vsel %vm351_vm8, %v1827_v51, -inf }
 0x845   :  { %1845 = vmax.xlane.f32.xlu0 %v1844_v9  ;;  %1842 = vmax.xlane.f32.xlu2 %v1841_v35 }
 0x847   :  { %v1767_v55 = vpop.f32.mrf.mxu1 }
 0x848   :  { %v1820_v41 = vmul.f32 0.35355338, %v1767_v55  ;;  %v1792_v62 = vpop.f32.mrf.mxu2  ;;  %v1815_v7 = vpop.f32.mrf.mxu3 }
 0x84a   :  { %v1826_v4 = vsel %vm6549_vm10, %v1820_v41, -1e+30 }
 0x84b   :  { %v1838_v59 = vsel %vm351_vm8, %v1826_v4, -inf }
 0x84c   :  { %1839 = vmax.xlane.f32.xlu1 %v1838_v59 }
 0x84f   :  { %v1769_v15 = vpop.f32.mrf.mxu1 }
 0x87f   :  { %v1834_v30 = vpop.xlane.xlu0 %1833 }
 0x880   :  { %v1848_v6 = vsub.f32 %v1824_v14, %v1834_v30 }
 0x882   :  { %v1855_v21 = vmul.f32 1.442695, %v1848_v6 }
 0x884   :  { %6003 = vpow2.f32 %v1855_v21  ;;  %v1831_v10 = vpop.xlane.xlu1 %1830 }
 0x885   :  { %v1847_v49 = vsub.f32 %v1823_v2, %v1831_v10 }
 0x886   :  { %v1837_v32 = vpop.xlane.xlu2 %1836 }
 0x887   :  { %v1853_v58 = vmul.f32 1.442695, %v1847_v49  ;;  %v1849_v33 = vsub.f32 %v1825_v3, %v1837_v32 }
 0x889   :  { %6005 = vpow2.f32 %v1853_v58  ;;  %v1857_v47 = vmul.f32 1.442695, %v1849_v33 }
 0x88a   :  { %v7006_v28 = vpop.eup %6003 }
 0x88b   :  { %6007 = vpow2.f32 %v1857_v47  ;;  %v1868_v0 = vsel %vm351_vm8, %v7006_v28, 0.0 }
 0x88c   :  { %1869 = vadd.xlane.f32.xlu2 %v1868_v0 }
 0x88f   :  { %v7010_v50 = vpop.eup %6005 }
 0x890   :  { %v1865_v14 = vsel %vm351_vm8, %v7010_v50, 0.0 }
 0x891   :  { %v7014_v43 = vpop.eup %6007  ;;  %1866 = vadd.xlane.f32.xlu1 %v1865_v14 }
 0x892   :  { %v1871_v2 = vsel %vm351_vm8, %v7014_v43, 0.0 }
 0x893   :  { %1872 = vadd.xlane.f32.xlu0 %v1871_v2 }
 0x8a4   :  { %1979 = vrot.lane.b32.xlu2 %v6496_v44, %s8329_s3 }
 0x8a7   :  { %2000 = vrot.lane.b32.xlu0 %v6500_v48, %s8329_s3 }
 0x8af   :  { %2042 = vrot.lane.b32.xlu0 %v6508_v61, %s8329_s3 }
 0x8b7   :  { %2063 = vrot.lane.b32.xlu0 %v6512_v1, %s8329_s3 }
 0x8b8   :  { %v1843_v3 = vpop.xlane.xlu2 %1842 }
 0x8b9   :  { %v1851_v56 = vsub.f32 %v1827_v51, %v1843_v3 }
 0x8bb   :  { %v1861_v9 = vmul.f32 1.442695, %v1851_v56 }
 0x8bd   :  { %6009 = vpow2.f32 %v1861_v9 }
 0x8bf   :  { %2084 = vrot.lane.b32.xlu0 %v6518_v5, %s8329_s3  ;;  %v1840_v35 = vpop.xlane.xlu1 %1839  ;;  %v1846_v5 = vpop.xlane.xlu0 %1845 }
 0x8c0   :  { %v1850_v55 = vsub.f32 %v1826_v4, %v1840_v35  ;;  %v1852_v51 = vsub.f32 %v1828_v45, %v1846_v5 }
 0x8c2   :  { %v1859_v41 = vmul.f32 1.442695, %v1850_v55  ;;  %v1863_v7 = vmul.f32 1.442695, %v1852_v51 }
 0x8c3   :  { %v7028_v44 = vpop.eup %6009 }
 0x8c4   :  { %6011 = vpow2.f32 %v1859_v41  ;;  %v1877_v1 = vsel %vm351_vm8, %v7028_v44, 0.0 }
 0x8ca   :  { %v7030_v48 = vpop.eup %6011 }
 0x8cb   :  { %v1874_v61 = vsel %vm351_vm8, %v7030_v48, 0.0 }
 0x8cc   :  { %1875 = vadd.xlane.f32.xlu1 %v1874_v61 }
 0x8cd   :  { %1878 = vadd.xlane.f32.xlu2 %v1877_v1 }
 0x8e5   :  { %2021 = vrot.lane.b32.xlu1 %v6504_v54, %s8329_s3  ;;  %s8369_s3 = smov 40  }
 0x8ff   :  { %v1870_v62 = vpop.xlane.xlu2 %1869 }
 0x900   :  { %6013 = vrcp.f32 %v1870_v62  ;;  %vm1903_vm12 = vweird.f32 %v1870_v62  ;;  %v1909_v47 = vand.u32 2147483648, %v1870_v62  ;;  %v1907_v14 = vand.u32 2147483647, %v1870_v62 }
 0x901   :  { %6015 = vpow2.f32 %v1863_v7 }
 0x902   :  { %v1910_v55 = vor.u32 1.1754944e-38, %v1909_v47  ;;  %vm1908_vm1 = vcmp.eq.f32.partialorder %v1907_v14, 8.507059e+37 }
 0x904   :  { %v1867_v4 = vpop.xlane.xlu1 %1866 }
 0x905   :  { %6017 = vrcp.f32 %v1867_v4  ;;  %v1894_v0 = vand.u32 2147483648, %v1867_v4  ;;  %v1892_v3 = vand.u32 2147483647, %v1867_v4  ;;  %vm1888_vm15 = vweird.f32 %v1867_v4 }
 0x906   :  { %v6014_v59 = vpop.eup %6013  ;;  %v7043_v56 = vpop.xlane.xlu0 %1872 }
 0x907   :  { %v1899_v15 = vmul.f32 %v6014_v59, %v1870_v62  ;;  %v1980_v30 = vpop.permute.xlu2 %1979  ;;  %v7039_v10 = vpop.eup %6015  ;;  %vm1904_vm11 = vweird.f32 %v6014_v59  ;;  %v1895_v41 = vor.u32 1.1754944e-38, %v1894_v0  ;;  %vm1893_vm2 = vcmp.eq.f32.partialorder %v1892_v3, 8.507059e+37 }
 0x908   :  { %v1985_v21 = vsel %vm660_vm9, %v1980_v30, 0  ;;  %v1880_v33 = vsel %vm351_vm8, %v7039_v10, 0.0  ;;  %vm1905_vm14 = vmor %vm1903_vm12, %vm1904_vm11  ;;  %6019 = vrcp.f32 %v7043_v56  ;;  %vm1918_vm4 = vweird.f32 %v7043_v56 }
 0x909   :  { %v1900_v6 = vsub.f32 1.0, %v1899_v15  ;;  %1994 = vmatpush.bf16.msra.mxu0 %v1985_v21 }
 0x90b   :  { %v6018_v49 = vpop.eup %6017  ;;  %v1901_v32 = vmul.f32 %v6014_v59, %v1900_v6 }
 0x90c   :  { %v1884_v54 = vmul.f32 %v6018_v49, %v1867_v4  ;;  %vm1889_vm13 = vweird.f32 %v6018_v49 }
 0x90d   :  { %v1902_v58 = vadd.f32 %v6014_v59, %v1901_v32  ;;  %vm1890_vm0 = vmor %vm1888_vm15, %vm1889_vm13  ;;  %v336_v32 = vld [vmem:[%s8308_s11] sm:$0xf] }
 0x90e   :  { %v1885_v45 = vsub.f32 1.0, %v1884_v54  ;;  %v338_v54 = vld [vmem:[%s8308_s11 + $0x8] sm:$0xf] }
 0x90f   :  { %1881 = vadd.xlane.f32.xlu1 %v1880_v33  ;;  %v1906_v9 = vsel %vm1905_vm14, %v6014_v59, %v1902_v58  ;;  %v6020_v58 = vpop.eup %6019  ;;  %v2190_v33 = vsel %vm660_vm9, %v338_v54, 0 }
 0x910   :  { %v1886_v2 = vmul.f32 %v6018_v49, %v1885_v45  ;;  %v1911_v1 = vsel %vm1908_vm1, %v1910_v55, %v1906_v9  ;;  %v2154_v45 = vsel %vm660_vm9, %v336_v32, 0  ;;  %v1914_v0 = vmul.f32 %v6020_v58, %v7043_v56 }
 0x911   :  { %v1912_v62 = vmul.f32 %v7006_v28, %v1911_v1  ;;  %vm1919_vm5 = vweird.f32 %v6020_v58 }
 0x912   :  { %v1887_v35 = vadd.f32 %v6018_v49, %v1886_v2  ;;  %v1915_v2 = vsub.f32 1.0, %v1914_v0  ;;  %vm7064_vm11 = vmor %vm1918_vm4, %vm1919_vm5 }
 0x913   :  { %v1974_v4 = vpack.c.bf16 %v1912_v62, %v1912_v62 }
 0x914   :  { %v1891_v61 = vsel %vm1890_vm0, %v6018_v49, %v1887_v35  ;;  %v1916_v55 = vmul.f32 %v6020_v58, %v1915_v2 }
 0x915   :  { %v1896_v5 = vsel %vm1893_vm2, %v1895_v41, %v1891_v61 }
 0x916   :  { %v1897_v51 = vmul.f32 %v7010_v50, %v1896_v5 }
 0x918   :  { %v1973_v7 = vpack.c.bf16 %v1897_v51, %v1897_v51 }
 0x919   :  { %v2001_v15 = vpop.permute.xlu0 %2000 }
 0x91a   :  { %v2006_v30 = vsel %vm660_vm9, %v2001_v15, 0  ;;  %5629 = vmatmul.msk.bf16.vlgmr.msra.gmra.mxu0 %vm351_vm8, %v1973_v7  ;;  %v1917_v15 = vadd.f32 %v6020_v58, %v1916_v55 }
 0x91b   :  { %2015 = vmatpush.bf16.msrb.mxu1 %v2006_v30 }
 0x91e   :  { %5630 = vmatmul.msk.bf16.vlgmr.msrb.gmra.mxu1 %vm351_vm8, %v1974_v4 }
 0x921   :  { %v2043_v59 = vpop.permute.xlu0 %2042 }
 0x922   :  { %v2048_v6 = vsel %vm660_vm9, %v2043_v59, 0 }
 0x923   :  { %2057 = vmatpush.bf16.msrb.mxu3 %v2048_v6  ;;  %v1924_v6 = vand.u32 2147483648, %v7043_v56 }
 0x925   :  { %v1925_v2 = vor.u32 1.1754944e-38, %v1924_v6 }
 0x927   :  { %2163 = vmatpush.bf16.msra.mxu3 %v2154_v45  ;;  %v1921_v45 = vsel %vm7064_vm11, %v6020_v58, %v1917_v15 }
 0x929   :  { %v2064_v21 = vpop.permute.xlu0 %2063 }
 0x92a   :  { %v2069_v49 = vsel %vm660_vm9, %v2064_v21, 0 }
 0x92b   :  { %2078 = vmatpush.bf16.msrb.mxu0 %v2069_v49  ;;  %v1922_v49 = vand.u32 2147483647, %v7043_v56 }
 0x92d   :  { %vm1923_vm2 = vcmp.eq.f32.partialorder %v1922_v49, 8.507059e+37 }
 0x92e   :  { %v1926_v55 = vsel %vm1923_vm2, %v1925_v2, %v1921_v45 }
 0x92f   :  { %2199 = vmatpush.bf16.msra.mxu0 %v2190_v33 }
 0x931   :  { %v2085_v50 = vpop.permute.xlu0 %2084 }
 0x932   :  { %v2090_v28 = vsel %vm660_vm9, %v2085_v50, 0 }
 0x933   :  { %2099 = vmatpush.bf16.msra.mxu1 %v2090_v28 }
 0x93f   :  { %v1876_v47 = vpop.xlane.xlu1 %1875 }
 0x940   :  { %6021 = vrcp.f32 %v1876_v47  ;;  %v1879_v14 = vpop.xlane.xlu2 %1878  ;;  %v1939_v1 = vand.u32 2147483648, %v1876_v47  ;;  %v1937_v62 = vand.u32 2147483647, %v1876_v47  ;;  %vm1933_vm12 = vweird.f32 %v1876_v47 }
 0x941   :  { %6023 = vrcp.f32 %v1879_v14  ;;  %v1954_v7 = vand.u32 2147483648, %v1879_v14  ;;  %v1952_v4 = vand.u32 2147483647, %v1879_v14  ;;  %vm1948_vm14 = vweird.f32 %v1879_v14 }
 0x942   :  { %v1940_v50 = vor.u32 1.1754944e-38, %v1939_v1  ;;  %vm1938_vm15 = vcmp.eq.f32.partialorder %v1937_v62, 8.507059e+37 }
 0x943   :  { %v1955_v54 = vor.u32 1.1754944e-38, %v1954_v7  ;;  %vm1953_vm1 = vcmp.eq.f32.partialorder %v1952_v4, 8.507059e+37 }
 0x946   :  { %v6022_v3 = vpop.eup %6021 }
 0x947   :  { %v6024_v9 = vpop.eup %6023  ;;  %v1929_v35 = vmul.f32 %v6022_v3, %v1876_v47  ;;  %vm1934_vm6 = vweird.f32 %v6022_v3 }
 0x948   :  { %v1944_v41 = vmul.f32 %v6024_v9, %v1879_v14  ;;  %vm1949_vm7 = vweird.f32 %v6024_v9  ;;  %vm1935_vm13 = vmor %vm1933_vm12, %vm1934_vm6 }
 0x949   :  { %v1930_v61 = vsub.f32 1.0, %v1929_v35  ;;  %vm1950_vm0 = vmor %vm1948_vm14, %vm1949_vm7 }
 0x94a   :  { %v1945_v5 = vsub.f32 1.0, %v1944_v41 }
 0x94b   :  { %v1931_v51 = vmul.f32 %v6022_v3, %v1930_v61 }
 0x94c   :  { %v1946_v30 = vmul.f32 %v6024_v9, %v1945_v5 }
 0x94d   :  { %v1932_v21 = vadd.f32 %v6022_v3, %v1931_v51 }
 0x94e   :  { %v1947_v28 = vadd.f32 %v6024_v9, %v1946_v30 }
 0x94f   :  { %v1936_v32 = vsel %vm1935_vm13, %v6022_v3, %v1932_v21  ;;  %v1927_v3 = vmul.f32 %v7014_v43, %v1926_v55 }
 0x950   :  { %v1951_v33 = vsel %vm1950_vm0, %v6024_v9, %v1947_v28  ;;  %v1941_v0 = vsel %vm1938_vm15, %v1940_v50, %v1936_v32 }
 0x951   :  { %v1956_v35 = vsel %vm1953_vm1, %v1955_v54, %v1951_v33  ;;  %v1942_v47 = vmul.f32 %v7030_v48, %v1941_v0  ;;  %v1975_v61 = vpack.c.bf16 %v1927_v3, %v1927_v3  ;;  %v782_v48 = vpack.c.bf16 %v6661_v11, %v6740_v17  ;;  %v339_v11 = vld [vmem:[%s8308_s11 + $0xc] sm:$0xf]  ;;  %v5904_v0 = vld [vmem:[%s8309_s12] ss:$0 sm:$0xff] }
 0x952   :  { %v1957_v56 = vmul.f32 %v7028_v44, %v1956_v35  ;;  %v2118_v17 = vsel %vm660_vm9, %v339_v11, 0 }
 0x953   :  { %v1976_v41 = vpack.c.bf16 %v1942_v47, %v1942_v47 }
 0x954   :  { %v1977_v14 = vpack.c.bf16 %v1957_v56, %v1957_v56 }
 0x955   :  { %5632 = vmatmul.msk.bf16.vlgmr.msrb.gmra.mxu3 %vm351_vm8, %v1976_v41 }
 0x956   :  { %5633 = vmatmul.msk.bf16.vlgmr.msrb.gmra.mxu0 %vm351_vm8, %v1977_v14 }
 0x957   :  { %v2022_v58 = vpop.permute.xlu1 %2021 }
 0x958   :  { %v2027_v9 = vsel %vm660_vm9, %v2022_v58, 0 }
 0x959   :  { %2036 = vmatpush.bf16.msra.mxu2 %v2027_v9 }
 0x95c   :  { %5631 = vmatmul.msk.bf16.vlgmr.msra.gmra.mxu2 %vm351_vm8, %v1975_v61 }
 0x95d   :  { %2127 = vmatpush.bf16.msrb.mxu2 %v2118_v17 }
 0x965   :  { %5638 = vmatmul.msk.bf16.vlgmr.msra.gmra.mxu3 %vm351_vm8, %v782_v48 }
 0x966   :  { %5641 = vmatmul.msk.bf16.vlgmr.msra.gmra.mxu0 %vm351_vm8, %v1676_v26 }
 0x975   :  { %5639 = vmatmul.msk.bf16.gmra.mxu3 %vm351_vm8, %v783_v20 }
 0x976   :  { %5642 = vmatmul.msk.bf16.gmra.mxu0 %vm351_vm8, %v1677_v40 }
 0x982   :  { %v1882_v57 = vpop.xlane.xlu1 %1881 }
 0x983   :  { %6025 = vrcp.f32 %v1882_v57  ;;  %v1969_v26 = vand.u32 2147483648, %v1882_v57  ;;  %v1967_v27 = vand.u32 2147483647, %v1882_v57  ;;  %vm1963_vm5 = vweird.f32 %v1882_v57 }
 0x985   :  { %5640 = vmatmul.msk.bf16.gmra.mxu3 %vm351_vm8, %v784_v36  ;;  %v1970_v43 = vor.u32 1.1754944e-38, %v1969_v26  ;;  %vm1968_vm7 = vcmp.eq.f32.partialorder %v1967_v27, 8.507059e+37 }
 0x986   :  { %5643 = vmatmul.msk.bf16.gmra.mxu0 %vm351_vm8, %v1678_v22 }
 0x989   :  { %v6026_v12 = vpop.eup %6025 }
 0x98a   :  { %v1959_v19 = vmul.f32 %v6026_v12, %v1882_v57  ;;  %vm1964_vm4 = vweird.f32 %v6026_v12 }
 0x98b   :  { %vm1965_vm6 = vmor %vm1963_vm5, %vm1964_vm4 }
 0x98c   :  { %v1960_v20 = vsub.f32 1.0, %v1959_v19 }
 0x98e   :  { %v1961_v31 = vmul.f32 %v6026_v12, %v1960_v20 }
 0x990   :  { %v1962_v40 = vadd.f32 %v6026_v12, %v1961_v31 }
 0x992   :  { %v1966_v53 = vsel %vm1965_vm6, %v6026_v12, %v1962_v40 }
 0x993   :  { %v1971_v37 = vsel %vm1968_vm7, %v1970_v43, %v1966_v53 }
 0x994   :  { %v1972_v44 = vmul.f32 %v7039_v10, %v1971_v37 }
 0x996   :  { %v1978_v1 = vpack.c.bf16 %v1972_v44, %v1972_v44 }
 0x997   :  { %v1996_v39 = vpop.f32.mrf.mxu0 }
 0x998   :  { %5634 = vmatmul.msk.bf16.vlgmr.msra.gmra.mxu1 %vm351_vm8, %v1978_v1 }
 0x99b   :  { %v2017_v24 = vpop.f32.mrf.mxu1 }
 0x99c   :  { %v2105_v22 = vpack.c.bf16 %v2017_v24, %v1996_v39 }
 0x99e   :  { %5635 = vmatmul.msk.bf16.vlgmr.msrb.gmra.mxu2 %vm351_vm8, %v2105_v22 }
 0x99f   :  { %v1998_v5 = vpop.f32.mrf.mxu0 }
 0x9a3   :  { %v2019_v51 = vpop.f32.mrf.mxu1 }
 0x9d3   :  { %v2080_v62 = vpop.f32.mrf.mxu0 }
 0x9d8   :  { %v2059_v7 = vpop.f32.mrf.mxu3 }
 0x9db   :  { %v2082_v15 = vpop.f32.mrf.mxu0 }
 0x9df   :  { %v2038_v30 = vpop.f32.mrf.mxu2 }
 0x9e0   :  { %v2106_v4 = vpack.c.bf16 %v2059_v7, %v2038_v30  ;;  %v2061_v59 = vpop.f32.mrf.mxu3 }
 0x9e2   :  { %5636 = vmatmul.msk.bf16.gmra.mxu2 %vm351_vm8, %v2106_v4 }
 0x9e3   :  { %v2201_v28 = vpop.f32.mrf.mxu0 }
 0x9e7   :  { %v2040_v6 = vpop.f32.mrf.mxu2 }
 0x9e8   :  { %v2165_v49 = vpop.f32.mrf.mxu3 }
 0x9e9   :  { %v2166_v54 = vadd.f32 %v2165_v49, %v6952_v46 }
 0x9eb   :  { %v2203_v56 = vpop.f32.mrf.mxu0 }
 0x9f0   :  { %v2167_v35 = vpop.f32.mrf.mxu3 }
 0x9f1   :  { %v2168_v41 = vadd.f32 %v2167_v35, %v6956_v29 }
 0x9f3   :  { %v2206_v48 = vpop.f32.mrf.mxu0 }
 0x9f8   :  { %v2170_v61 = vpop.f32.mrf.mxu3 }
 0x9f9   :  { %v2171_v17 = vadd.f32 %v2170_v61, %v6963_v52 }
 0x9fb   :  { %v2208_v20 = vpop.f32.mrf.mxu0 }
 0xa00   :  { %v2172_v12 = vpop.f32.mrf.mxu3 }
 0xa01   :  { %v2173_v26 = vadd.f32 %v2172_v12, %v6966_v38 }
 0xa03   :  { %v2211_v37 = vpop.f32.mrf.mxu0 }
 0xa08   :  { %v2175_v53 = vpop.f32.mrf.mxu3 }
 0xa09   :  { %v2176_v1 = vadd.f32 %v2175_v53, %v6972_v60 }
 0xa10   :  { %v2177_v51 = vpop.f32.mrf.mxu3 }
 0xa11   :  { %v2178_v15 = vadd.f32 %v2177_v51, %v6974_v63  ;;  %v7202_v51 = vld [vmem:[%s8310_s13] ss:$0 sm:$0xff] }
 0xa15   :  { %v2101_v10 = vpop.f32.mrf.mxu1 }
 0xa16   :  { %v2107_v21 = vpack.c.bf16 %v2101_v10, %v2080_v62  ;;  %v2213_v62 = vpop.f32.mrf.mxu0 }
 0xa18   :  { %5637 = vmatmul.msk.bf16.gmra.mxu2 %vm351_vm8, %v2107_v21 }
 0xa1d   :  { %v2103_v50 = vpop.f32.mrf.mxu1 }
 0xa21   :  { %v2129_v32 = vpop.f32.mrf.mxu2 }
 0xa22   :  { %v2202_v45 = vadd.f32 %v2201_v28, %v2129_v32 }
 0xa24   :  { %v2216_v33 = vadd.f32 %v2202_v45, %v2166_v54 }
 0xa26   :  { %v2222_v2 = vadd.f32 %v2216_v33, %v6403_v18 }
 0xa28   :  { %v7115_v47 = vadd.f32 %v5904_v0, %v2222_v2 }
 0xa29   :  { %v2131_v55 = vpop.f32.mrf.mxu2 }
 0xa2a   :  { %v2204_v14 = vadd.f32 %v2203_v56, %v2131_v55  ;;  %v2240_v3 = vsel %vm122_vm3, %v7115_v47, 0.0 }
 0xa2b   :  { %2241 = vadd.xlane.f32.xlu0 %v2240_v3 }
 0xa2c   :  { %v2217_v46 = vadd.f32 %v2204_v14, %v2168_v41 }
 0xa2e   :  { %v2223_v58 = vadd.f32 %v2217_v46, %v6413_v25 }
 0xa30   :  { %v7121_v9 = vadd.f32 %v5904_v0, %v2223_v58  ;;  %v5861_v58 = vld [vmem:[%s8312_s15 + $0x8] sm:$0xff] }
 0xa31   :  { %2428 = vmatpush.bf16.msrb.mxu1 %v5861_v58 }
 0xa32   :  { %v2243_v18 = vsel %vm122_vm3, %v7121_v9, 0.0 }
 0xa33   :  { %2244 = vadd.xlane.f32.xlu2 %v2243_v18 }
 0xa65   :  { %v2134_v11 = vpop.f32.mrf.mxu2 }
 0xa66   :  { %v2207_v29 = vadd.f32 %v2206_v48, %v2134_v11  ;;  %v5860_v48 = vld [vmem:[%s8312_s15] sm:$0xff] }
 0xa67   :  { %2429 = vmatpush.bf16.msrb.mxu1 %v5860_v48 }
 0xa68   :  { %v2218_v57 = vadd.f32 %v2207_v29, %v2171_v17 }
 0xa6a   :  { %v2224_v36 = vadd.f32 %v2218_v57, %v6396_v13 }
 0xa6c   :  { %v7127_v19 = vadd.f32 %v5904_v0, %v2224_v36 }
 0xa6d   :  { %v2136_v25 = vpop.f32.mrf.mxu2 }
 0xa6e   :  { %v2209_v31 = vadd.f32 %v2208_v20, %v2136_v25  ;;  %v2246_v27 = vsel %vm122_vm3, %v7127_v19, 0.0 }
 0xa6f   :  { %2247 = vadd.xlane.f32.xlu1 %v2246_v27 }
 0xa70   :  { %v2219_v40 = vadd.f32 %v2209_v31, %v2173_v26 }
 0xa72   :  { %v2225_v43 = vadd.f32 %v2219_v40, %v6409_v23 }
 0xa74   :  { %v7133_v52 = vadd.f32 %v5904_v0, %v2225_v43 }
 0xa76   :  { %v2249_v13 = vsel %vm122_vm3, %v7133_v52, 0.0 }
 0xa77   :  { %2250 = vadd.xlane.f32.xlu2 %v2249_v13 }
 0xa9b   :  { %v2139_v44 = vpop.f32.mrf.mxu2 }
 0xa9c   :  { %v2212_v38 = vadd.f32 %v2211_v37, %v2139_v44 }
 0xa9e   :  { %v2220_v39 = vadd.f32 %v2212_v38, %v2176_v1  ;;  %v2242_v24 = vpop.xlane.xlu0 %2241 }
 0xa9f   :  { %v2258_v5 = vmul.f32 %v2242_v24, %v6417_v34 }
 0xaa0   :  { %v2226_v22 = vadd.f32 %v2220_v39, %v6379_v8 }
 0xaa1   :  { %v7144_v30 = vsub.f32 %v7115_v47, %v2258_v5 }
 0xaa2   :  { %v7140_v23 = vadd.f32 %v5904_v0, %v2226_v22 }
 0xaa3   :  { %v2141_v7 = vpop.f32.mrf.mxu2  ;;  %v2270_v21 = vmul.f32 %v7144_v30, %v7144_v30 }
 0xaa4   :  { %v2214_v4 = vadd.f32 %v2213_v62, %v2141_v7  ;;  %v2252_v60 = vsel %vm122_vm3, %v7140_v23, 0.0 }
 0xaa5   :  { %2253 = vadd.xlane.f32.xlu1 %v2252_v60  ;;  %v2276_v32 = vsel %vm122_vm3, %v2270_v21, 0.0 }
 0xaa6   :  { %v2221_v59 = vadd.f32 %v2214_v4, %v2178_v15  ;;  %v2245_v6 = vpop.xlane.xlu2 %2244  ;;  %v7207_v15 = vld [vmem:[%s8311_s14] ss:$0 sm:$0xff] }
 0xaa7   :  { %v2259_v8 = vmul.f32 %v2245_v6, %v6417_v34 }
 0xaa8   :  { %v2227_v10 = vadd.f32 %v2221_v59, %v6401_v16 }
 0xaa9   :  { %v7153_v49 = vsub.f32 %v7121_v9, %v2259_v8 }
 0xaaa   :  { %v7155_v63 = vadd.f32 %v5904_v0, %v2227_v10 }
 0xaab   :  { %v2271_v50 = vmul.f32 %v7153_v49, %v7153_v49 }
 0xaac   :  { %v2255_v28 = vsel %vm122_vm3, %v7155_v63, 0.0 }
 0xaad   :  { %2256 = vadd.xlane.f32.xlu2 %v2255_v28  ;;  %2277 = vadd.xlane.f32.xlu1 %v2276_v32  ;;  %v2279_v16 = vsel %vm122_vm3, %v2271_v50, 0.0 }
 0xaae   :  { %2280 = vadd.xlane.f32.xlu0 %v2279_v16 }
 0xae2   :  { %v2248_v54 = vpop.xlane.xlu1 %2247 }
 0xae3   :  { %v2260_v45 = vmul.f32 %v2248_v54, %v6417_v34 }
 0xae5   :  { %v7165_v33 = vsub.f32 %v7127_v19, %v2260_v45 }
 0xae7   :  { %v2272_v0 = vmul.f32 %v7165_v33, %v7165_v33 }
 0xae9   :  { %v2282_v2 = vsel %vm122_vm3, %v2272_v0, 0.0 }
 0xaea   :  { %v2251_v35 = vpop.xlane.xlu2 %2250  ;;  %2283 = vadd.xlane.f32.xlu2 %v2282_v2 }
 0xaeb   :  { %v2261_v56 = vmul.f32 %v2251_v35, %v6417_v34 }
 0xaed   :  { %v7172_v55 = vsub.f32 %v7133_v52, %v2261_v56 }
 0xaef   :  { %v2273_v41 = vmul.f32 %v7172_v55, %v7172_v55 }
 0xaf1   :  { %v2285_v14 = vsel %vm122_vm3, %v2273_v41, 0.0 }
 0xaf2   :  { %2286 = vadd.xlane.f32.xlu1 %v2285_v14 }
 0xb18   :  { %v2254_v3 = vpop.xlane.xlu1 %2253 }
 0xb19   :  { %v2262_v46 = vmul.f32 %v2254_v3, %v6417_v34 }
 0xb1b   :  { %v7182_v18 = vsub.f32 %v7140_v23, %v2262_v46 }
 0xb1d   :  { %v2274_v61 = vmul.f32 %v7182_v18, %v7182_v18 }
 0xb1f   :  { %v2288_v11 = vsel %vm122_vm3, %v2274_v61, 0.0 }
 0xb20   :  { %2289 = vadd.xlane.f32.xlu0 %v2288_v11  ;;  %v2257_v17 = vpop.xlane.xlu2 %2256  ;;  %v2278_v29 = vpop.xlane.xlu1 %2277 }
 0xb21   :  { %v2263_v57 = vmul.f32 %v2257_v17, %v6417_v34  ;;  %v2294_v36 = vmul.f32 %v2278_v29, %v6417_v34  ;;  %v2281_v12 = vpop.xlane.xlu0 %2280 }
 0xb22   :  { %v2295_v20 = vmul.f32 %v2281_v12, %v6417_v34 }
 0xb23   :  { %v7194_v25 = vsub.f32 %v7155_v63, %v2263_v57  ;;  %v2300_v26 = vadd.f32 1e-05, %v2294_v36 }
 0xb24   :  { %v2301_v31 = vadd.f32 1e-05, %v2295_v20 }
 0xb25   :  { %6027 = vrsqrt.f32 %v2300_v26  ;;  %v2275_v27 = vmul.f32 %v7194_v25, %v7194_v25  ;;  %vm2312_vm13 = vweird.f32 %v2300_v26 }
 0xb26   :  { %6029 = vrsqrt.f32 %v2301_v31  ;;  %vm2322_vm15 = vweird.f32 %v2301_v31 }
 0xb27   :  { %v2291_v40 = vsel %vm122_vm3, %v2275_v27, 0.0 }
 0xb28   :  { %2292 = vadd.xlane.f32.xlu2 %v2291_v40 }
 0xb2b   :  { %v6028_v43 = vpop.eup %6027 }
 0xb2c   :  { %v6030_v13 = vpop.eup %6029  ;;  %v2307_v53 = vmul.f32 %v6028_v43, %v2300_v26  ;;  %vm2313_vm11 = vweird.f32 %v6028_v43 }
 0xb2d   :  { %v2317_v37 = vmul.f32 %v6030_v13, %v2301_v31  ;;  %vm2323_vm12 = vweird.f32 %v6030_v13  ;;  %vm2314_vm14 = vmor %vm2312_vm13, %vm2313_vm11 }
 0xb2e   :  { %v2308_v44 = vmul.f32 %v6028_v43, %v2307_v53  ;;  %vm2324_vm0 = vmor %vm2322_vm15, %vm2323_vm12 }
 0xb2f   :  { %v2318_v1 = vmul.f32 %v6030_v13, %v2317_v37 }
 0xb30   :  { %v2309_v38 = vmul.f32 0.5, %v2308_v44 }
 0xb31   :  { %v2319_v39 = vmul.f32 0.5, %v2318_v1 }
 0xb32   :  { %v2310_v24 = vsub.f32 1.5, %v2309_v38 }
 0xb33   :  { %v2320_v22 = vsub.f32 1.5, %v2319_v39 }
 0xb34   :  { %v2311_v5 = vmul.f32 %v6028_v43, %v2310_v24 }
 0xb35   :  { %v2321_v62 = vmul.f32 %v6030_v13, %v2320_v22 }
 0xb36   :  { %v2315_v7 = vsel %vm2314_vm14, %v6028_v43, %v2311_v5 }
 0xb37   :  { %v2366_v4 = vmul.f32 %v2315_v7, %v7144_v30  ;;  %v2325_v60 = vsel %vm2324_vm0, %v6030_v13, %v2321_v62 }
 0xb38   :  { %v2367_v59 = vmul.f32 %v2325_v60, %v7153_v49 }
 0xb39   :  { %v2375_v6 = vmul.f32 %v7202_v51, %v2366_v4  ;;  %v5869_v4 = vld [vmem:[%s8314_s17 + $0x38] sm:$0xff] }
 0xb3a   :  { %v2376_v8 = vmul.f32 %v7202_v51, %v2367_v59  ;;  %2639 = vmatpush.bf16.msra.mxu2 %v5869_v4 }
 0xb3b   :  { %v2384_v10 = vadd.f32 %v7207_v15, %v2375_v6 }
 0xb3c   :  { %v2385_v21 = vadd.f32 %v7207_v15, %v2376_v8  ;;  %v5868_v8 = vld [vmem:[%s8314_s17 + $0x30] sm:$0xff] }
 0xb3e   :  { %v2390_v50 = vpack.c.bf16 %v2385_v21, %v2384_v10  ;;  %2640 = vmatpush.bf16.msra.mxu2 %v5868_v8 }
 0xb40   :  { %5652 = vmatmul.msk.bf16.vlgmr.msrb.gmra.mxu1 %vm122_vm3, %v2390_v50 }
 0xb5d   :  { %v2284_v28 = vpop.xlane.xlu2 %2283 }
 0xb5e   :  { %v2296_v32 = vmul.f32 %v2284_v28, %v6417_v34  ;;  %v5867_v28 = vld [vmem:[%s8314_s17 + $0x28] sm:$0xff] }
 0xb5f   :  { %2641 = vmatpush.bf16.msra.mxu2 %v5867_v28 }
 0xb60   :  { %v2302_v16 = vadd.f32 1e-05, %v2296_v32 }
 0xb62   :  { %6031 = vrsqrt.f32 %v2302_v16  ;;  %vm2332_vm2 = vweird.f32 %v2302_v16 }
 0xb65   :  { %v2287_v30 = vpop.xlane.xlu1 %2286 }
 0xb66   :  { %v2297_v54 = vmul.f32 %v2287_v30, %v6417_v34  ;;  %v5866_v30 = vld [vmem:[%s8314_s17 + $0x20] sm:$0xff] }
 0xb67   :  { %2642 = vmatpush.bf16.msra.mxu2 %v5866_v30 }
 0xb68   :  { %v6032_v49 = vpop.eup %6031  ;;  %v2303_v45 = vadd.f32 1e-05, %v2297_v54 }
 0xb69   :  { %v2327_v0 = vmul.f32 %v6032_v49, %v2302_v16  ;;  %vm2333_vm1 = vweird.f32 %v6032_v49 }
 0xb6a   :  { %6033 = vrsqrt.f32 %v2303_v45  ;;  %vm2334_vm4 = vmor %vm2332_vm2, %vm2333_vm1  ;;  %vm2342_vm6 = vweird.f32 %v2303_v45 }
 0xb6b   :  { %v2328_v2 = vmul.f32 %v6032_v49, %v2327_v0 }
 0xb6d   :  { %v2329_v35 = vmul.f32 0.5, %v2328_v2 }
 0xb6f   :  { %v2330_v56 = vsub.f32 1.5, %v2329_v35  ;;  %v5863_v35 = vld [vmem:[%s8314_s17 + $0x8] sm:$0xff] }
 0xb70   :  { %v6034_v41 = vpop.eup %6033 }
 0xb71   :  { %v2331_v14 = vmul.f32 %v6032_v49, %v2330_v56  ;;  %v2337_v3 = vmul.f32 %v6034_v41, %v2303_v45  ;;  %vm2343_vm5 = vweird.f32 %v6034_v41  ;;  %v5864_v45 = vld [vmem:[%s8314_s17 + $0x10] sm:$0xff] }
 0xb72   :  { %vm2344_vm7 = vmor %vm2342_vm6, %vm2343_vm5 }
 0xb73   :  { %v2338_v46 = vmul.f32 %v6034_v41, %v2337_v3  ;;  %v2335_v58 = vsel %vm2334_vm4, %v6032_v49, %v2331_v14  ;;  %v5862_v14 = vld [vmem:[%s8314_s17] sm:$0xff] }
 0xb74   :  { %v2368_v11 = vmul.f32 %v2335_v58, %v7165_v33 }
 0xb75   :  { %v2339_v61 = vmul.f32 0.5, %v2338_v46 }
 0xb76   :  { %v2377_v36 = vmul.f32 %v7202_v51, %v2368_v11 }
 0xb77   :  { %v2340_v48 = vsub.f32 1.5, %v2339_v61 }
 0xb78   :  { %v2386_v20 = vadd.f32 %v7207_v15, %v2377_v36 }
 0xb79   :  { %v2341_v17 = vmul.f32 %v6034_v41, %v2340_v48 }
 0xb7b   :  { %v2345_v29 = vsel %vm2344_vm7, %v6034_v41, %v2341_v17 }
 0xb7c   :  { %v2369_v57 = vmul.f32 %v2345_v29, %v7172_v55 }
 0xb7e   :  { %v2378_v12 = vmul.f32 %v7202_v51, %v2369_v57 }
 0xb80   :  { %v2387_v26 = vadd.f32 %v7207_v15, %v2378_v12 }
 0xb82   :  { %v2391_v31 = vpack.c.bf16 %v2387_v26, %v2386_v20 }
 0xb84   :  { %5653 = vmatmul.msk.bf16.gmra.mxu1 %vm122_vm3, %v2391_v31 }
 0xb93   :  { %v2290_v27 = vpop.xlane.xlu0 %2289 }
 0xb94   :  { %v2298_v33 = vmul.f32 %v2290_v27, %v6417_v34 }
 0xb96   :  { %v2304_v40 = vadd.f32 1e-05, %v2298_v33 }
 0xb98   :  { %6035 = vrsqrt.f32 %v2304_v40  ;;  %vm2352_vm12 = vweird.f32 %v2304_v40 }
 0xb9b   :  { %v2293_v43 = vpop.xlane.xlu2 %2292 }
 0xb9c   :  { %v2299_v13 = vmul.f32 %v2293_v43, %v6417_v34 }
 0xb9e   :  { %v6036_v55 = vpop.eup %6035  ;;  %v2305_v53 = vadd.f32 1e-05, %v2299_v13 }
 0xb9f   :  { %v2347_v37 = vmul.f32 %v6036_v55, %v2304_v40  ;;  %vm2353_vm11 = vweird.f32 %v6036_v55 }
 0xba0   :  { %6037 = vrsqrt.f32 %v2305_v53  ;;  %vm2354_vm13 = vmor %vm2352_vm12, %vm2353_vm11  ;;  %vm2362_vm15 = vweird.f32 %v2305_v53 }
 0xba1   :  { %v2348_v44 = vmul.f32 %v6036_v55, %v2347_v37 }
 0xba3   :  { %v2349_v1 = vmul.f32 0.5, %v2348_v44 }
 0xba5   :  { %v2350_v38 = vsub.f32 1.5, %v2349_v1 }
 0xba6   :  { %v6038_v39 = vpop.eup %6037 }
 0xba7   :  { %v2351_v24 = vmul.f32 %v6036_v55, %v2350_v38  ;;  %v2357_v22 = vmul.f32 %v6038_v39, %v2305_v53  ;;  %vm2363_vm14 = vweird.f32 %v6038_v39 }
 0xba8   :  { %vm2364_vm0 = vmor %vm2362_vm15, %vm2363_vm14 }
 0xba9   :  { %v2358_v5 = vmul.f32 %v6038_v39, %v2357_v22  ;;  %v2355_v62 = vsel %vm2354_vm13, %v6036_v55, %v2351_v24 }
 0xbaa   :  { %v2370_v59 = vmul.f32 %v2355_v62, %v7182_v18 }
 0xbab   :  { %v2359_v7 = vmul.f32 0.5, %v2358_v5 }
 0xbac   :  { %v2379_v50 = vmul.f32 %v7202_v51, %v2370_v59 }
 0xbad   :  { %v2360_v60 = vsub.f32 1.5, %v2359_v7 }
 0xbae   :  { %v2388_v18 = vadd.f32 %v7207_v15, %v2379_v50 }
 0xbaf   :  { %v2361_v6 = vmul.f32 %v6038_v39, %v2360_v60 }
 0xbb1   :  { %v2365_v10 = vsel %vm2364_vm0, %v6038_v39, %v2361_v6 }
 0xbb2   :  { %v2371_v21 = vmul.f32 %v2365_v10, %v7194_v25  ;;  %v7249_v25 = vld [vmem:[%s8313_s16] ss:$0 sm:$0xff] }
 0xbb4   :  { %v2380_v32 = vmul.f32 %v7202_v51, %v2371_v21  ;;  %v5865_v51 = vld [vmem:[%s8314_s17 + $0x18] sm:$0xff] }
 0xbb5   :  { %2643 = vmatpush.bf16.msra.mxu2 %v5865_v51 }
 0xbb6   :  { %v2389_v16 = vadd.f32 %v7207_v15, %v2380_v32 }
 0xbb8   :  { %v2392_v54 = vpack.c.bf16 %v2389_v16, %v2388_v18 }
 0xbb9   :  { %2644 = vmatpush.bf16.msra.mxu2 %v5864_v45 }
 0xbba   :  { %5654 = vmatmul.msk.bf16.gmra.mxu1 %vm122_vm3, %v2392_v54 }
 0xbbd   :  { %v2431_v49 = vpop.f32.mrf.mxu1  ;;  %2645 = vmatpush.bf16.msra.mxu2 %v5863_v35 }
 0xbbe   :  { %v2432_v15 = vadd.f32 %v7249_v25, %v2431_v49 }
 0xbc0   :  { %v5655_v0 = vmul.f32 -1.702, %v2432_v15 }
 0xbc1   :  { %2646 = vmatpush.bf16.msra.mxu2 %v5862_v14 }
 0xbc2   :  { %v2458_v2 = vmul.f32 1.442695, %v5655_v0 }
 0xbc4   :  { %6039 = vpow2.f32 %v2458_v2 }
 0xbc5   :  { %v2433_v56 = vpop.f32.mrf.mxu1 }
 0xbc6   :  { %v2434_v41 = vadd.f32 %v7249_v25, %v2433_v56 }
 0xbc8   :  { %v5656_v3 = vmul.f32 -1.702, %v2434_v41 }
 0xbca   :  { %v6040_v46 = vpop.eup %6039  ;;  %v2460_v58 = vmul.f32 1.442695, %v5656_v3 }
 0xbcb   :  { %v2470_v61 = vadd.f32 1.0, %v6040_v46 }
 0xbcc   :  { %6041 = vpow2.f32 %v2460_v58 }
 0xbcd   :  { %6043 = vrcp.f32 %v2470_v61  ;;  %v2487_v31 = vand.u32 2147483648, %v2470_v61  ;;  %vm2481_vm2 = vweird.f32 %v2470_v61  ;;  %v2485_v27 = vand.u32 2147483647, %v2470_v61 }
 0xbcf   :  { %v2488_v53 = vor.u32 1.1754944e-38, %v2487_v31  ;;  %vm2486_vm6 = vcmp.eq.f32.partialorder %v2485_v27, 8.507059e+37 }
 0xbd2   :  { %v6042_v48 = vpop.eup %6041 }
 0xbd3   :  { %v6044_v11 = vpop.eup %6043  ;;  %v2471_v17 = vadd.f32 1.0, %v6042_v48 }
 0xbd4   :  { %v2477_v29 = vmul.f32 %v6044_v11, %v2470_v61  ;;  %vm2482_vm1 = vweird.f32 %v6044_v11 }
 0xbd5   :  { %6045 = vrcp.f32 %v2471_v17  ;;  %vm2483_vm4 = vmor %vm2481_vm2, %vm2482_vm1  ;;  %v2502_v40 = vand.u32 2147483648, %v2471_v17  ;;  %v2500_v55 = vand.u32 2147483647, %v2471_v17  ;;  %vm2496_vm7 = vweird.f32 %v2471_v17 }
 0xbd6   :  { %v2478_v57 = vsub.f32 1.0, %v2477_v29 }
 0xbd7   :  { %v2503_v1 = vor.u32 1.1754944e-38, %v2502_v40  ;;  %vm2501_vm12 = vcmp.eq.f32.partialorder %v2500_v55, 8.507059e+37 }
 0xbd8   :  { %v2479_v36 = vmul.f32 %v6044_v11, %v2478_v57 }
 0xbda   :  { %v2480_v20 = vadd.f32 %v6044_v11, %v2479_v36 }
 0xbdb   :  { %v6046_v12 = vpop.eup %6045 }
 0xbdc   :  { %v2492_v26 = vmul.f32 %v6046_v12, %v2471_v17  ;;  %v2484_v43 = vsel %vm2483_vm4, %v6044_v11, %v2480_v20  ;;  %vm2497_vm5 = vweird.f32 %v6046_v12 }
 0xbdd   :  { %v2489_v44 = vsel %vm2486_vm6, %v2488_v53, %v2484_v43  ;;  %vm2498_vm11 = vmor %vm2496_vm7, %vm2497_vm5 }
 0xbde   :  { %v2493_v33 = vsub.f32 1.0, %v2492_v26  ;;  %v2566_v24 = vmul.f32 %v2489_v44, %v2432_v15 }
 0xbe0   :  { %v2494_v13 = vmul.f32 %v6046_v12, %v2493_v33 }
 0xbe2   :  { %v2495_v37 = vadd.f32 %v6046_v12, %v2494_v13 }
 0xbe4   :  { %v2499_v38 = vsel %vm2498_vm11, %v6046_v12, %v2495_v37 }
 0xbe5   :  { %v2504_v39 = vsel %vm2501_vm12, %v2503_v1, %v2499_v38 }
 0xbe6   :  { %v2567_v22 = vmul.f32 %v2504_v39, %v2434_v41 }
 0xbe8   :  { %v2572_v5 = vpack.c.bf16 %v2567_v22, %v2566_v24 }
 0xbea   :  { %2647 = vmatmul.bf16.vlgmr.msra.gmra.mxu2 %v2572_v5 }
 0xc01   :  { %v2436_v62 = vpop.f32.mrf.mxu1 }
 0xc02   :  { %v2437_v7 = vadd.f32 %v7249_v25, %v2436_v62 }
 0xc04   :  { %v5657_v4 = vmul.f32 -1.702, %v2437_v7 }
 0xc06   :  { %v2462_v60 = vmul.f32 1.442695, %v5657_v4 }
 0xc08   :  { %6047 = vpow2.f32 %v2462_v60 }
 0xc09   :  { %v2438_v59 = vpop.f32.mrf.mxu1 }
 0xc0a   :  { %v2439_v6 = vadd.f32 %v7249_v25, %v2438_v59 }
 0xc0c   :  { %v5658_v8 = vmul.f32 -1.702, %v2439_v6 }
 0xc0e   :  { %v6048_v10 = vpop.eup %6047  ;;  %v2464_v21 = vmul.f32 1.442695, %v5658_v8 }
 0xc0f   :  { %v2472_v50 = vadd.f32 1.0, %v6048_v10 }
 0xc10   :  { %6049 = vpow2.f32 %v2464_v21 }
 0xc11   :  { %6051 = vrcp.f32 %v2472_v50  ;;  %v2517_v45 = vand.u32 2147483648, %v2472_v50  ;;  %vm2511_vm14 = vweird.f32 %v2472_v50  ;;  %v2515_v0 = vand.u32 2147483647, %v2472_v50 }
 0xc13   :  { %v2518_v3 = vor.u32 1.1754944e-38, %v2517_v45  ;;  %vm2516_vm1 = vcmp.eq.f32.partialorder %v2515_v0, 8.507059e+37 }
 0xc16   :  { %v6050_v28 = vpop.eup %6049 }
 0xc17   :  { %v6052_v32 = vpop.eup %6051  ;;  %v2473_v18 = vadd.f32 1.0, %v6050_v28 }
 0xc18   :  { %v2507_v16 = vmul.f32 %v6052_v32, %v2472_v50  ;;  %vm2512_vm13 = vweird.f32 %v6052_v32 }
 0xc19   :  { %6053 = vrcp.f32 %v2473_v18  ;;  %vm2513_vm15 = vmor %vm2511_vm14, %vm2512_vm13  ;;  %v2532_v35 = vand.u32 2147483648, %v2473_v18  ;;  %v2530_v14 = vand.u32 2147483647, %v2473_v18  ;;  %vm2526_vm2 = vweird.f32 %v2473_v18 }
 0xc1a   :  { %v2508_v30 = vsub.f32 1.0, %v2507_v16 }
 0xc1b   :  { %v2533_v61 = vor.u32 1.1754944e-38, %v2532_v35  ;;  %vm2531_vm5 = vcmp.eq.f32.partialorder %v2530_v14, 8.507059e+37 }
 0xc1c   :  { %v2509_v54 = vmul.f32 %v6052_v32, %v2508_v30  ;;  %v5908_v30 = vld [vmem:[%s8315_s18] ss:$0 sm:$0xff] }
 0xc1e   :  { %v2510_v49 = vadd.f32 %v6052_v32, %v2509_v54 }
 0xc1f   :  { %v6054_v51 = vpop.eup %6053 }
 0xc20   :  { %v2522_v15 = vmul.f32 %v6054_v51, %v2473_v18  ;;  %v2514_v56 = vsel %vm2513_vm15, %v6052_v32, %v2510_v49  ;;  %vm2527_vm0 = vweird.f32 %v6054_v51 }
 0xc21   :  { %v2519_v58 = vsel %vm2516_vm1, %v2518_v3, %v2514_v56  ;;  %vm2528_vm4 = vmor %vm2526_vm2, %vm2527_vm0 }
 0xc22   :  { %v2523_v2 = vsub.f32 1.0, %v2522_v15  ;;  %v2568_v17 = vmul.f32 %v2519_v58, %v2437_v7 }
 0xc24   :  { %v2524_v41 = vmul.f32 %v6054_v51, %v2523_v2 }
 0xc26   :  { %v2525_v46 = vadd.f32 %v6054_v51, %v2524_v41 }
 0xc28   :  { %v2529_v48 = vsel %vm2528_vm4, %v6054_v51, %v2525_v46 }
 0xc29   :  { %v2534_v11 = vsel %vm2531_vm5, %v2533_v61, %v2529_v48 }
 0xc2a   :  { %v2569_v29 = vmul.f32 %v2534_v11, %v2439_v6 }
 0xc2c   :  { %v2573_v57 = vpack.c.bf16 %v2569_v29, %v2568_v17 }
 0xc2e   :  { %2652 = vmatmul.bf16.gmra.mxu2 %v2573_v57 }
 0xc37   :  { %v2441_v36 = vpop.f32.mrf.mxu1 }
 0xc38   :  { %v2442_v12 = vadd.f32 %v7249_v25, %v2441_v36 }
 0xc3a   :  { %v5659_v20 = vmul.f32 -1.702, %v2442_v12 }
 0xc3c   :  { %v2466_v26 = vmul.f32 1.442695, %v5659_v20 }
 0xc3e   :  { %6055 = vpow2.f32 %v2466_v26 }
 0xc3f   :  { %v2443_v31 = vpop.f32.mrf.mxu1 }
 0xc40   :  { %v2444_v27 = vadd.f32 %v7249_v25, %v2443_v31 }
 0xc42   :  { %v5660_v33 = vmul.f32 -1.702, %v2444_v27 }
 0xc44   :  { %v6056_v40 = vpop.eup %6055  ;;  %v2468_v43 = vmul.f32 1.442695, %v5660_v33 }
 0xc45   :  { %v2474_v13 = vadd.f32 1.0, %v6056_v40 }
 0xc46   :  { %6057 = vpow2.f32 %v2468_v43 }
 0xc47   :  { %6059 = vrcp.f32 %v2474_v13  ;;  %v2547_v5 = vand.u32 2147483648, %v2474_v13  ;;  %vm2541_vm7 = vweird.f32 %v2474_v13  ;;  %v2545_v25 = vand.u32 2147483647, %v2474_v13 }
 0xc49   :  { %v2548_v6 = vor.u32 1.1754944e-38, %v2547_v5  ;;  %vm2546_vm13 = vcmp.eq.f32.partialorder %v2545_v25, 8.507059e+37 }
 0xc4c   :  { %v6058_v55 = vpop.eup %6057 }
 0xc4d   :  { %v6060_v53 = vpop.eup %6059  ;;  %v2475_v37 = vadd.f32 1.0, %v6058_v55 }
 0xc4e   :  { %v2537_v44 = vmul.f32 %v6060_v53, %v2474_v13  ;;  %vm2542_vm6 = vweird.f32 %v6060_v53 }
 0xc4f   :  { %6061 = vrcp.f32 %v2475_v37  ;;  %vm2543_vm11 = vmor %vm2541_vm7, %vm2542_vm6  ;;  %v2562_v7 = vand.u32 2147483648, %v2475_v37  ;;  %v2560_v59 = vand.u32 2147483647, %v2475_v37  ;;  %vm2556_vm14 = vweird.f32 %v2475_v37 }
 0xc50   :  { %v2538_v1 = vsub.f32 1.0, %v2537_v44 }
 0xc51   :  { %v2563_v21 = vor.u32 1.1754944e-38, %v2562_v7  ;;  %vm2561_vm0 = vcmp.eq.f32.partialorder %v2560_v59, 8.507059e+37 }
 0xc52   :  { %v2539_v38 = vmul.f32 %v6060_v53, %v2538_v1 }
 0xc54   :  { %v2540_v24 = vadd.f32 %v6060_v53, %v2539_v38 }
 0xc55   :  { %v6062_v39 = vpop.eup %6061 }
 0xc56   :  { %v2552_v22 = vmul.f32 %v6062_v39, %v2475_v37  ;;  %v2544_v4 = vsel %vm2543_vm11, %v6060_v53, %v2540_v24  ;;  %vm2557_vm12 = vweird.f32 %v6062_v39 }
 0xc57   :  { %v2549_v10 = vsel %vm2546_vm13, %v2548_v6, %v2544_v4  ;;  %vm2558_vm15 = vmor %vm2556_vm14, %vm2557_vm12  ;;  %v5870_v6 = vld [vmem:[%s8307_s9 + $0x10] sm:$0xff] }
 0xc58   :  { %v2553_v62 = vsub.f32 1.0, %v2552_v22  ;;  %v2570_v32 = vmul.f32 %v2549_v10, %v2442_v12 }
 0xc5a   :  { %v2554_v60 = vmul.f32 %v6062_v39, %v2553_v62  ;;  %v5871_v62 = vld [vmem:[%s8307_s9 + $0x18] sm:$0xff] }
 0xc5b   :  { %2873 = vmatpush.bf16.msrb.mxu3 %v5871_v62 }
 0xc5c   :  { %v2555_v8 = vadd.f32 %v6062_v39, %v2554_v60 }
 0xc5e   :  { %v2559_v50 = vsel %vm2558_vm15, %v6062_v39, %v2555_v8 }
 0xc5f   :  { %v2564_v28 = vsel %vm2561_vm0, %v2563_v21, %v2559_v50  ;;  %2874 = vmatpush.bf16.msrb.mxu3 %v5870_v6 }
 0xc60   :  { %v2571_v18 = vmul.f32 %v2564_v28, %v2444_v27 }
 0xc62   :  { %v2574_v16 = vpack.c.bf16 %v2571_v18, %v2570_v32 }
 0xc64   :  { %2657 = vmatmul.bf16.gmra.mxu2 %v2574_v16 }
 0xc6d   :  { %v2648_v54 = vpop.f32.mrf.mxu2 }
 0xc6e   :  { %v2663_v51 = vadd.f32 %v2648_v54, %v7115_v47 }
 0xc70   :  { %v7273_v49 = vadd.f32 %v5908_v30, %v2663_v51 }
 0xc72   :  { %v2683_v15 = vsel %vm122_vm3, %v7273_v49, 0.0 }
 0xc73   :  { %2684 = vadd.xlane.f32.xlu1 %v2683_v15 }
 0xc75   :  { %v2650_v45 = vpop.f32.mrf.mxu2 }
 0xc76   :  { %v2664_v0 = vadd.f32 %v2650_v45, %v7121_v9 }
 0xc78   :  { %v7278_v2 = vadd.f32 %v5908_v30, %v2664_v0 }
 0xc7a   :  { %v2686_v35 = vsel %vm122_vm3, %v7278_v2, 0.0 }
 0xc7b   :  { %2687 = vadd.xlane.f32.xlu0 %v2686_v35 }
 0xcb1   :  { %v2653_v56 = vpop.f32.mrf.mxu2 }
 0xcb2   :  { %v2665_v41 = vadd.f32 %v2653_v56, %v7127_v19 }
 0xcb4   :  { %v7283_v14 = vadd.f32 %v5908_v30, %v2665_v41 }
 0xcb6   :  { %v2689_v47 = vsel %vm122_vm3, %v7283_v14, 0.0 }
 0xcb7   :  { %2690 = vadd.xlane.f32.xlu2 %v2689_v47 }
 0xcb9   :  { %v2655_v3 = vpop.f32.mrf.mxu2 }
 0xcba   :  { %v2666_v46 = vadd.f32 %v2655_v3, %v7133_v52 }
 0xcbc   :  { %v7288_v58 = vadd.f32 %v5908_v30, %v2666_v46 }
 0xcbe   :  { %v2692_v9 = vsel %vm122_vm3, %v7288_v58, 0.0 }
 0xcbf   :  { %2693 = vadd.xlane.f32.xlu1 %v2692_v9 }
 0xce6   :  { %v2685_v61 = vpop.xlane.xlu1 %2684 }
 0xce7   :  { %v2701_v48 = vmul.f32 %v2685_v61, %v6417_v34  ;;  %v2658_v11 = vpop.f32.mrf.mxu2  ;;  %v7355_v61 = vld [vmem:[%s8354_s2 + $0x1] ss:$0 sm:$0xff] }
 0xce8   :  { %v2667_v19 = vadd.f32 %v2658_v11, %v7140_v23 }
 0xce9   :  { %v7295_v17 = vsub.f32 %v7273_v49, %v2701_v48 }
 0xcea   :  { %v7297_v29 = vadd.f32 %v5908_v30, %v2667_v19 }
 0xceb   :  { %v2713_v52 = vmul.f32 %v7295_v17, %v7295_v17 }
 0xcec   :  { %v2695_v57 = vsel %vm122_vm3, %v7297_v29, 0.0 }
 0xced   :  { %2696 = vadd.xlane.f32.xlu0 %v2695_v57  ;;  %v2719_v36 = vsel %vm122_vm3, %v2713_v52, 0.0  ;;  %v7361_v52 = vld [vmem:[%s8355_s28 + $0x1] ss:$0 sm:$0xff] }
 0xcee   :  { %2720 = vadd.xlane.f32.xlu1 %v2719_v36  ;;  %v2688_v12 = vpop.xlane.xlu0 %2687 }
 0xcef   :  { %v2702_v20 = vmul.f32 %v2688_v12, %v6417_v34  ;;  %v2660_v26 = vpop.f32.mrf.mxu2 }
 0xcf0   :  { %v2668_v23 = vadd.f32 %v2660_v26, %v7155_v63 }
 0xcf1   :  { %v7307_v31 = vsub.f32 %v7278_v2, %v2702_v20 }
 0xcf2   :  { %v7309_v27 = vadd.f32 %v5908_v30, %v2668_v23 }
 0xcf3   :  { %v2714_v33 = vmul.f32 %v7307_v31, %v7307_v31 }
 0xcf4   :  { %v2698_v40 = vsel %vm122_vm3, %v7309_v27, 0.0 }
 0xcf5   :  { %2699 = vadd.xlane.f32.xlu2 %v2698_v40  ;;  %v2722_v43 = vsel %vm122_vm3, %v2714_v33, 0.0 }
 0xcf6   :  { %2723 = vadd.xlane.f32.xlu0 %v2722_v43 }
 0xd2a   :  { %v2691_v13 = vpop.xlane.xlu2 %2690 }
 0xd2b   :  { %v2703_v55 = vmul.f32 %v2691_v13, %v6417_v34 }
 0xd2d   :  { %v7318_v63 = vsub.f32 %v7283_v14, %v2703_v55 }
 0xd2f   :  { %v2715_v53 = vmul.f32 %v7318_v63, %v7318_v63 }
 0xd31   :  { %v2725_v37 = vsel %vm122_vm3, %v2715_v53, 0.0 }
 0xd32   :  { %v2694_v44 = vpop.xlane.xlu1 %2693  ;;  %2726 = vadd.xlane.f32.xlu2 %v2725_v37 }
 0xd33   :  { %v2704_v1 = vmul.f32 %v2694_v44, %v6417_v34 }
 0xd35   :  { %v7325_v38 = vsub.f32 %v7288_v58, %v2704_v1 }
 0xd37   :  { %v2716_v39 = vmul.f32 %v7325_v38, %v7325_v38 }
 0xd39   :  { %v2728_v24 = vsel %vm122_vm3, %v2716_v39, 0.0 }
 0xd3a   :  { %2729 = vadd.xlane.f32.xlu1 %v2728_v24 }
 0xd60   :  { %v2697_v22 = vpop.xlane.xlu0 %2696 }
 0xd61   :  { %v2705_v5 = vmul.f32 %v2697_v22, %v6417_v34  ;;  %v2721_v25 = vpop.xlane.xlu1 %2720 }
 0xd62   :  { %v2737_v7 = vmul.f32 %v2721_v25, %v6417_v34 }
 0xd63   :  { %v7336_v4 = vsub.f32 %v7297_v29, %v2705_v5 }
 0xd64   :  { %v2743_v60 = vadd.f32 1e-05, %v2737_v7 }
 0xd65   :  { %v2717_v59 = vmul.f32 %v7336_v4, %v7336_v4 }
 0xd66   :  { %6063 = vrsqrt.f32 %v2743_v60  ;;  %vm2755_vm2 = vweird.f32 %v2743_v60 }
 0xd67   :  { %v2731_v8 = vsel %vm122_vm3, %v2717_v59, 0.0 }
 0xd68   :  { %v2700_v10 = vpop.xlane.xlu2 %2699  ;;  %2732 = vadd.xlane.f32.xlu0 %v2731_v8 }
 0xd69   :  { %v2706_v21 = vmul.f32 %v2700_v10, %v6417_v34  ;;  %v2724_v50 = vpop.xlane.xlu0 %2723 }
 0xd6a   :  { %v2738_v28 = vmul.f32 %v2724_v50, %v6417_v34 }
 0xd6b   :  { %v7347_v32 = vsub.f32 %v7309_v27, %v2706_v21 }
 0xd6c   :  { %v6064_v18 = vpop.eup %6063  ;;  %v2744_v16 = vadd.f32 1e-05, %v2738_v28 }
 0xd6d   :  { %v2750_v30 = vmul.f32 %v6064_v18, %v2743_v60  ;;  %v2718_v54 = vmul.f32 %v7347_v32, %v7347_v32  ;;  %vm2756_vm1 = vweird.f32 %v6064_v18 }
 0xd6e   :  { %6065 = vrsqrt.f32 %v2744_v16  ;;  %vm2757_vm4 = vmor %vm2755_vm2, %vm2756_vm1  ;;  %vm2765_vm6 = vweird.f32 %v2744_v16 }
 0xd6f   :  { %v2751_v51 = vmul.f32 %v6064_v18, %v2750_v30  ;;  %v2734_v15 = vsel %vm122_vm3, %v2718_v54, 0.0 }
 0xd70   :  { %2735 = vadd.xlane.f32.xlu2 %v2734_v15 }
 0xd71   :  { %v2752_v45 = vmul.f32 0.5, %v2751_v51 }
 0xd73   :  { %v2753_v0 = vsub.f32 1.5, %v2752_v45 }
 0xd74   :  { %v6066_v35 = vpop.eup %6065 }
 0xd75   :  { %v2754_v56 = vmul.f32 %v6064_v18, %v2753_v0  ;;  %v2760_v41 = vmul.f32 %v6066_v35, %v2744_v16  ;;  %vm2766_vm5 = vweird.f32 %v6066_v35 }
 0xd76   :  { %vm2767_vm7 = vmor %vm2765_vm6, %vm2766_vm5 }
 0xd77   :  { %v2761_v47 = vmul.f32 %v6066_v35, %v2760_v41  ;;  %v2758_v3 = vsel %vm2757_vm4, %v6064_v18, %v2754_v56 }
 0xd78   :  { %v2809_v48 = vmul.f32 %v2758_v3, %v7295_v17 }
 0xd79   :  { %v2762_v46 = vmul.f32 0.5, %v2761_v47 }
 0xd7a   :  { %v2818_v57 = vmul.f32 %v7355_v61, %v2809_v48 }
 0xd7b   :  { %v2763_v9 = vsub.f32 1.5, %v2762_v46 }
 0xd7c   :  { %v2827_v20 = vadd.f32 %v7361_v52, %v2818_v57 }
 0xd7d   :  { %v2764_v11 = vmul.f32 %v6066_v35, %v2763_v9 }
 0xd7f   :  { %v2768_v19 = vsel %vm2767_vm7, %v6066_v35, %v2764_v11 }
 0xd80   :  { %v2810_v36 = vmul.f32 %v2768_v19, %v7307_v31 }
 0xd82   :  { %v2819_v12 = vmul.f32 %v7355_v61, %v2810_v36 }
 0xd84   :  { %v2828_v26 = vadd.f32 %v7361_v52, %v2819_v12 }
 0xd86   :  { %v2833_v17 = vpack.c.bf16 %v2828_v26, %v2827_v20 }
 0xd88   :  { %5708 = vmatmul.msk.bf16.vlgmr.msrb.gmra.mxu3 %vm122_vm3, %v2833_v17 }
 0xda5   :  { %v2727_v23 = vpop.xlane.xlu2 %2726 }
 0xda6   :  { %v2739_v33 = vmul.f32 %v2727_v23, %v6417_v34 }
 0xda8   :  { %v2745_v40 = vadd.f32 1e-05, %v2739_v33 }
 0xdaa   :  { %6067 = vrsqrt.f32 %v2745_v40  ;;  %vm2775_vm12 = vweird.f32 %v2745_v40 }
 0xdad   :  { %v2730_v43 = vpop.xlane.xlu1 %2729 }
 0xdae   :  { %v2740_v13 = vmul.f32 %v2730_v43, %v6417_v34 }
 0xdb0   :  { %v6068_v55 = vpop.eup %6067  ;;  %v2746_v53 = vadd.f32 1e-05, %v2740_v13 }
 0xdb1   :  { %v2770_v31 = vmul.f32 %v6068_v55, %v2745_v40  ;;  %vm2776_vm11 = vweird.f32 %v6068_v55 }
 0xdb2   :  { %6069 = vrsqrt.f32 %v2746_v53  ;;  %vm2777_vm13 = vmor %vm2775_vm12, %vm2776_vm11  ;;  %vm2785_vm15 = vweird.f32 %v2746_v53 }
 0xdb3   :  { %v2771_v37 = vmul.f32 %v6068_v55, %v2770_v31 }
 0xdb5   :  { %v2772_v44 = vmul.f32 0.5, %v2771_v37 }
 0xdb7   :  { %v2773_v1 = vsub.f32 1.5, %v2772_v44 }
 0xdb8   :  { %v6070_v39 = vpop.eup %6069 }
 0xdb9   :  { %v2774_v24 = vmul.f32 %v6068_v55, %v2773_v1  ;;  %v2780_v22 = vmul.f32 %v6070_v39, %v2746_v53  ;;  %vm2786_vm14 = vweird.f32 %v6070_v39 }
 0xdba   :  { %vm2787_vm0 = vmor %vm2785_vm15, %vm2786_vm14 }
 0xdbb   :  { %v2781_v5 = vmul.f32 %v6070_v39, %v2780_v22  ;;  %v2778_v25 = vsel %vm2777_vm13, %v6068_v55, %v2774_v24 }
 0xdbc   :  { %v2811_v60 = vmul.f32 %v2778_v25, %v7318_v63 }
 0xdbd   :  { %v2782_v62 = vmul.f32 0.5, %v2781_v5 }
 0xdbe   :  { %v2820_v10 = vmul.f32 %v7355_v61, %v2811_v60 }
 0xdbf   :  { %v2783_v7 = vsub.f32 1.5, %v2782_v62 }
 0xdc0   :  { %v2829_v50 = vadd.f32 %v7361_v52, %v2820_v10 }
 0xdc1   :  { %v2784_v59 = vmul.f32 %v6070_v39, %v2783_v7 }
 0xdc3   :  { %v2788_v6 = vsel %vm2787_vm0, %v6070_v39, %v2784_v59 }
 0xdc4   :  { %v2812_v8 = vmul.f32 %v2788_v6, %v7325_v38 }
 0xdc6   :  { %v2821_v21 = vmul.f32 %v7355_v61, %v2812_v8 }
 0xdc8   :  { %v2830_v28 = vadd.f32 %v7361_v52, %v2821_v21 }
 0xdca   :  { %v2834_v18 = vpack.c.bf16 %v2830_v28, %v2829_v50 }
 0xdcc   :  { %5709 = vmatmul.msk.bf16.gmra.mxu3 %vm122_vm3, %v2834_v18 }
 0xddb   :  { %v2733_v16 = vpop.xlane.xlu0 %2732 }
 0xddc   :  { %v2741_v63 = vmul.f32 %v2733_v16, %v6417_v34 }
 0xdde   :  { %v2747_v30 = vadd.f32 1e-05, %v2741_v63 }
 0xde0   :  { %6071 = vrsqrt.f32 %v2747_v30  ;;  %vm2795_vm2 = vweird.f32 %v2747_v30 }
 0xde3   :  { %v2736_v54 = vpop.xlane.xlu2 %2735 }
 0xde4   :  { %v2742_v51 = vmul.f32 %v2736_v54, %v6417_v34 }
 0xde6   :  { %v6072_v38 = vpop.eup %6071  ;;  %v2748_v15 = vadd.f32 1e-05, %v2742_v51 }
 0xde7   :  { %v2790_v45 = vmul.f32 %v6072_v38, %v2747_v30  ;;  %vm2796_vm1 = vweird.f32 %v6072_v38 }
 0xde8   :  { %6073 = vrsqrt.f32 %v2748_v15  ;;  %vm2797_vm4 = vmor %vm2795_vm2, %vm2796_vm1  ;;  %vm2805_vm6 = vweird.f32 %v2748_v15 }
 0xde9   :  { %v2791_v0 = vmul.f32 %v6072_v38, %v2790_v45 }
 0xdeb   :  { %v2792_v35 = vmul.f32 0.5, %v2791_v0 }
 0xded   :  { %v2793_v56 = vsub.f32 1.5, %v2792_v35 }
 0xdee   :  { %v6074_v41 = vpop.eup %6073 }
 0xdef   :  { %v2794_v47 = vmul.f32 %v6072_v38, %v2793_v56  ;;  %v2800_v3 = vmul.f32 %v6074_v41, %v2748_v15  ;;  %vm2806_vm5 = vweird.f32 %v6074_v41 }
 0xdf0   :  { %vm2807_vm7 = vmor %vm2805_vm6, %vm2806_vm5 }
 0xdf1   :  { %v2801_v46 = vmul.f32 %v6074_v41, %v2800_v3  ;;  %v2798_v9 = vsel %vm2797_vm4, %v6072_v38, %v2794_v47 }
 0xdf2   :  { %v2813_v19 = vmul.f32 %v2798_v9, %v7336_v4  ;;  %v5909_v4 = vld [vmem:[%s8356_s0 + $0x1] ss:$0 sm:$0xff]  ;;  %s8361_s0 = smov 56  }
 0xdf3   :  { %v2802_v48 = vmul.f32 0.5, %v2801_v46 }
 0xdf4   :  { %v2822_v20 = vmul.f32 %v7355_v61, %v2813_v19 }
 0xdf5   :  { %v2803_v11 = vsub.f32 1.5, %v2802_v48 }
 0xdf6   :  { %v2831_v17 = vadd.f32 %v7361_v52, %v2822_v20 }
 0xdf7   :  { %v2804_v57 = vmul.f32 %v6074_v41, %v2803_v11 }
 0xdf9   :  { %v2808_v36 = vsel %vm2807_vm7, %v6074_v41, %v2804_v57 }
 0xdfa   :  { %v2814_v12 = vmul.f32 %v2808_v36, %v7347_v32 }
 0xdfc   :  { %v2823_v26 = vmul.f32 %v7355_v61, %v2814_v12 }
 0xdfe   :  { %v2832_v23 = vadd.f32 %v7361_v52, %v2823_v26 }
 0xe00   :  { %v2835_v33 = vpack.c.bf16 %v2832_v23, %v2831_v17 }
 0xe02   :  { %5710 = vmatmul.msk.bf16.gmra.mxu3 %vm122_vm3, %v2835_v33 }
 0xe0b   :  { %v2876_v40 = vpop.f32.mrf.mxu3 }
 0xe0c   :  { %v2877_v43 = vadd.f32 %v5909_v4, %v2876_v40 }
 0xe0e   :  { %v2896_v13 = vpack.c.bf16 %v2877_v43, %v2877_v43 }
 0xe10   :  { %v2903_v55 = vunpack.c.l.b16 %v2896_v13 }
 0xe12   :  { %v7390_v32 = vpack.c.b16 %v2903_v55, %v2903_v55 }
 0xe13   :  { %v2878_v53 = vpop.f32.mrf.mxu3 }
 0xe14   :  { %v2879_v31 = vadd.f32 %v5909_v4, %v2878_v53  ;;  %2905 = vrot.lane.b32.xlu0 %v7390_v32, %s6222_s23 }
 0xe16   :  { %v2897_v61 = vpack.c.bf16 %v2879_v31, %v2879_v31 }
 0xe18   :  { %v2927_v52 = vunpack.c.l.b16 %v2897_v61 }
 0xe1a   :  { %v7394_v37 = vpack.c.b16 %v2927_v52, %v2927_v52 }
 0xe1c   :  { %2929 = vrot.lane.b32.xlu1 %v7394_v37, %s6222_s23 }
 0xe4f   :  { %v2881_v44 = vpop.f32.mrf.mxu3 }
 0xe50   :  { %v2882_v1 = vadd.f32 %v5909_v4, %v2881_v44 }
 0xe52   :  { %v2898_v39 = vpack.c.bf16 %v2882_v1, %v2882_v1 }
 0xe54   :  { %v2951_v24 = vunpack.c.l.b16 %v2898_v39 }
 0xe56   :  { %v7398_v22 = vpack.c.b16 %v2951_v24, %v2951_v24 }
 0xe57   :  { %v2883_v5 = vpop.f32.mrf.mxu3 }
 0xe58   :  { %v2884_v25 = vadd.f32 %v5909_v4, %v2883_v5  ;;  %2953 = vrot.lane.b32.xlu0 %v7398_v22, %s6222_s23 }
 0xe5a   :  { %v2899_v62 = vpack.c.bf16 %v2884_v25, %v2884_v25 }
 0xe5c   :  { %v2975_v7 = vunpack.c.l.b16 %v2899_v62 }
 0xe5e   :  { %v7402_v60 = vpack.c.b16 %v2975_v7, %v2975_v7 }
 0xe60   :  { %2977 = vrot.lane.b32.xlu2 %v7402_v60, %s6222_s23  ;;  %3250 = vrot.lane.b32.xlu0 %v7398_v22, %s6223_s1 }
 0xe85   :  { %v2886_v59 = vpop.f32.mrf.mxu3 }
 0xe86   :  { %v2887_v6 = vadd.f32 %v5909_v4, %v2886_v59  ;;  %v2906_v8 = vpop.permute.xlu0 %2905 }
 0xe87   :  { %v2911_v10 = vsel %vm351_vm8, %v2906_v8, 0 }
 0xe88   :  { %v2900_v21 = vpack.c.bf16 %v2887_v6, %v2887_v6  ;;  %2920 = vmatpush.bf16.xpose.msrb.mxu0 %v2911_v10 }
 0xe8a   :  { %v2999_v50 = vunpack.c.l.b16 %v2900_v21 }
 0xe8c   :  { %v7409_v28 = vpack.c.b16 %v2999_v50, %v2999_v50 }
 0xe8d   :  { %v2888_v18 = vpop.f32.mrf.mxu3 }
 0xe8e   :  { %v2889_v16 = vadd.f32 %v5909_v4, %v2888_v18  ;;  %v2930_v63 = vpop.permute.xlu1 %2929  ;;  %3001 = vrot.lane.b32.xlu2 %v7409_v28, %s6222_s23 }
 0xe8f   :  { %v2935_v30 = vsel %vm351_vm8, %v2930_v63, 0  ;;  %5715 = vmatmul.msk.bf16.vlgmr.msrb.gmra.mxu0 %vm351_vm8, %v2896_v13 }
 0xe90   :  { %v2901_v54 = vpack.c.bf16 %v2889_v16, %v2889_v16  ;;  %2944 = vmatpush.bf16.xpose.msra.mxu1 %v2935_v30 }
 0xe92   :  { %v3023_v51 = vunpack.c.l.b16 %v2901_v54 }
 0xe94   :  { %v7415_v38 = vpack.c.b16 %v3023_v51, %v3023_v51 }
 0xe96   :  { %3313 = vrot.lane.b32.xlu0 %v7415_v38, %s6223_s1  ;;  %3025 = vrot.lane.b32.xlu1 %v7415_v38, %s6222_s23  ;;  %s8362_s23 = smov 112  }
 0xe97   :  { %3229 = vrot.lane.b32.xlu2 %v7394_v37, %s6223_s1  ;;  %5716 = vmatmul.msk.bf16.vlgmr.msra.gmra.mxu1 %vm351_vm8, %v2897_v61 }
 0xe9e   :  { %3271 = vrot.lane.b32.xlu1 %v7402_v60, %s6223_s1 }
 0xe9f   :  { %3339 = vrot.lane.b32.xlu2 %v7390_v32, %s6224_s29 }
 0xeba   :  { %v2978_v15 = vpop.permute.xlu2 %2977 }
 0xebb   :  { %v2983_v45 = vsel %vm351_vm8, %v2978_v15, 0 }
 0xebc   :  { %2992 = vmatpush.bf16.xpose.msrb.mxu1 %v2983_v45 }
 0xec3   :  { %5718 = vmatmul.msk.bf16.vlgmr.msrb.gmra.mxu1 %vm351_vm8, %v2899_v62 }
 0xeca   :  { %v2954_v0 = vpop.permute.xlu0 %2953 }
 0xecb   :  { %v2959_v35 = vsel %vm351_vm8, %v2954_v0, 0 }
 0xecc   :  { %2968 = vmatpush.bf16.xpose.msra.mxu0 %v2959_v35 }
 0xed2   :  { %v3251_v56 = vpop.permute.xlu0 %3250 }
 0xed3   :  { %5717 = vmatmul.msk.bf16.vlgmr.msra.gmra.mxu0 %vm351_vm8, %v2898_v39  ;;  %v3256_v3 = vsel %vm660_vm9, %v3251_v56, 0 }
 0xee8   :  { %v3002_v41 = vpop.permute.xlu2 %3001 }
 0xee9   :  { %v3007_v47 = vsel %vm351_vm8, %v3002_v41, 0 }
 0xeea   :  { %3016 = vmatpush.bf16.xpose.msrb.mxu0 %v3007_v47 }
 0xef1   :  { %v3230_v46 = vpop.permute.xlu2 %3229  ;;  %5719 = vmatmul.msk.bf16.vlgmr.msrb.gmra.mxu0 %vm351_vm8, %v2900_v21 }
 0xef2   :  { %3265 = vmatpush.bf16.msra.mxu0 %v3256_v3  ;;  %v3235_v9 = vsel %vm660_vm9, %v3230_v46, 0 }
 0xef3   :  { %3244 = vmatpush.bf16.msra.mxu3 %v3235_v9 }
 0xef9   :  { %v3340_v48 = vpop.permute.xlu2 %3339 }
 0xefa   :  { %v3345_v11 = vsel %vm351_vm8, %v3340_v48, 0 }
 0xefb   :  { %3354 = vmatpush.bf16.xpose.msrb.mxu0 %v3345_v11 }
 0xf08   :  { %v3026_v19 = vpop.permute.xlu1 %3025  ;;  %v3314_v57 = vpop.permute.xlu0 %3313 }
 0xf09   :  { %v3031_v36 = vsel %vm351_vm8, %v3026_v19, 0  ;;  %v3319_v12 = vsel %vm660_vm9, %v3314_v57, 0 }
 0xf0a   :  { %3040 = vmatpush.bf16.xpose.msra.mxu1 %v3031_v36  ;;  %3328 = vmatpush.bf16.msrb.mxu3 %v3319_v12 }
 0xf0c   :  { %v7439_v20 = vpop.f32.mrf.mxu0 }
 0xf10   :  { %v3272_v26 = vpop.permute.xlu1 %3271 }
 0xf11   :  { %v3277_v17 = vsel %vm660_vm9, %v3272_v26, 0  ;;  %5720 = vmatmul.msk.bf16.vlgmr.msra.gmra.mxu1 %vm351_vm8, %v2901_v54 }
 0xf12   :  { %3286 = vmatpush.bf16.msrb.mxu1 %v3277_v17 }
 0xf14   :  { %v2924_v23 = vpop.f32.mrf.mxu0  ;;  %v2946_v33 = vpop.f32.mrf.mxu1 }
 0xf15   :  { %v3047_v4 = vmul.f32 0.35355338, %v2946_v33 }
 0xf17   :  { %v3053_v40 = vsel %vm6549_vm10, %v3047_v4, -1e+30 }
 0xf18   :  { %v3061_v43 = vsel %vm351_vm8, %v3053_v40, -inf }
 0xf19   :  { %3062 = vmax.xlane.f32.xlu0 %v3061_v43 }
 0xf1c   :  { %v2948_v13 = vpop.f32.mrf.mxu1 }
 0xf40   :  { %v2994_v55 = vpop.f32.mrf.mxu1 }
 0xf41   :  { %v3049_v53 = vmul.f32 0.35355338, %v2994_v55 }
 0xf43   :  { %v3055_v31 = vsel %vm6549_vm10, %v3049_v53, -1e+30 }
 0xf44   :  { %v3067_v61 = vsel %vm351_vm8, %v3055_v31, -inf }
 0xf45   :  { %3068 = vmax.xlane.f32.xlu2 %v3067_v61 }
 0xf48   :  { %v2996_v52 = vpop.f32.mrf.mxu1 }
 0xf50   :  { %v2970_v44 = vpop.f32.mrf.mxu0 }
 0xf51   :  { %v3048_v1 = vmul.f32 0.35355338, %v2970_v44 }
 0xf53   :  { %v3054_v39 = vsel %vm6549_vm10, %v3048_v1, -1e+30 }
 0xf54   :  { %v3064_v24 = vsel %vm351_vm8, %v3054_v39, -inf }
 0xf55   :  { %3065 = vmax.xlane.f32.xlu1 %v3064_v24 }
 0xf58   :  { %v2972_v5 = vpop.f32.mrf.mxu0 }
 0xf5d   :  { %3337 = vrot.lane.b32.xlu2 %v7390_v32, %s6225_s8 }
 0xf6e   :  { %3408 = vrot.lane.b32.xlu1 %v7402_v60, %s6224_s29  ;;  %v3018_v25 = vpop.f32.mrf.mxu0 }
 0xf6f   :  { %v3050_v26 = vmul.f32 0.35355338, %v3018_v25 }
 0xf71   :  { %v7486_v43 = vsel %vm6549_vm10, %v3050_v26, -1e+30 }
 0xf72   :  { %v3070_v52 = vsel %vm351_vm8, %v7486_v43, -inf }
 0xf76   :  { %v3020_v62 = vpop.f32.mrf.mxu0 }
 0xf8c   :  { %v3063_v7 = vpop.xlane.xlu0 %3062 }
 0xf8d   :  { %v3077_v59 = vsub.f32 %v3053_v40, %v3063_v7 }
 0xf8e   :  { %v3042_v6 = vpop.f32.mrf.mxu1 }
 0xf8f   :  { %v3084_v8 = vmul.f32 1.442695, %v3077_v59  ;;  %v3051_v10 = vmul.f32 0.35355338, %v3042_v6  ;;  %v3046_v59 = vmul.f32 0.35355338, %v7439_v20 }
 0xf91   :  { %6075 = vpow2.f32 %v3084_v8  ;;  %v3057_v21 = vsel %vm6549_vm10, %v3051_v10, -1e+30 }
 0xf92   :  { %v3073_v50 = vsel %vm351_vm8, %v3057_v21, -inf }
 0xf93   :  { %3074 = vmax.xlane.f32.xlu0 %v3073_v50 }
 0xf96   :  { %v3044_v18 = vpop.f32.mrf.mxu1 }
 0xf97   :  { %v6076_v16 = vpop.eup %6075 }
 0xf98   :  { %v3097_v63 = vsel %vm351_vm8, %v6076_v16, 0.0 }
 0xf99   :  { %3098 = vadd.xlane.f32.xlu1 %v3097_v63 }
 0xfa7   :  { %3362 = vrot.lane.b32.xlu0 %v7394_v37, %s6224_s29 }
 0xfb8   :  { %v3069_v30 = vpop.xlane.xlu2 %3068 }
 0xfb9   :  { %v3079_v54 = vsub.f32 %v3055_v31, %v3069_v30 }
 0xfbb   :  { %v3088_v51 = vmul.f32 1.442695, %v3079_v54 }
 0xfbd   :  { %6077 = vpow2.f32 %v3088_v51 }
 0xfc0   :  { %v3338_v24 = vpop.permute.xlu2 %3337 }
 0xfc3   :  { %v7462_v35 = vpop.eup %6077 }
 0xfc4   :  { %v3103_v56 = vsel %vm351_vm8, %v7462_v35, 0.0 }
 0xfc8   :  { %v3066_v15 = vpop.xlane.xlu1 %3065 }
 0xfc9   :  { %v3078_v45 = vsub.f32 %v3054_v39, %v3066_v15 }
 0xfcb   :  { %v3086_v0 = vmul.f32 1.442695, %v3078_v45 }
 0xfcd   :  { %6079 = vpow2.f32 %v3086_v0 }
 0xfd1   :  { %3104 = vadd.xlane.f32.xlu0 %v3103_v56 }
 0xfd3   :  { %v7466_v41 = vpop.eup %6079 }
 0xfd4   :  { %v3100_v47 = vsel %vm351_vm8, %v7466_v41, 0.0 }
 0xfd5   :  { %3101 = vadd.xlane.f32.xlu2 %v3100_v47 }
 0xfe0   :  { %v3409_v3 = vpop.permute.xlu1 %3408 }
 0xfe1   :  { %v3414_v39 = vsel %vm351_vm8, %v3409_v3, 0 }
 0xfe5   :  { %3360 = vrot.lane.b32.xlu0 %v7394_v37, %s6225_s8 }
 0xfed   :  { %3454 = vrot.lane.b32.xlu0 %v7415_v38, %s6224_s29  ;;  %3431 = vrot.lane.b32.xlu2 %v7409_v28, %s6224_s29 }
 0xff5   :  { %3452 = vrot.lane.b32.xlu0 %v7415_v38, %s6225_s8  ;;  %3429 = vrot.lane.b32.xlu2 %v7409_v28, %s6225_s8 }
0x1006   :  { %v3075_v46 = vpop.xlane.xlu0 %3074 }
0x1007   :  { %v3081_v9 = vsub.f32 %v3057_v21, %v3075_v46 }
0x1009   :  { %v3092_v48 = vmul.f32 1.442695, %v3081_v9 }
0x100b   :  { %6081 = vpow2.f32 %v3092_v48 }
0x100c   :  { %v3099_v11 = vpop.xlane.xlu1 %3098 }
0x100d   :  { %6083 = vrcp.f32 %v3099_v11  ;;  %v3138_v23 = vand.u32 2147483648, %v3099_v11  ;;  %v3136_v4 = vand.u32 2147483647, %v3099_v11  ;;  %vm3132_vm12 = vweird.f32 %v3099_v11 }
0x100f   :  { %v3139_v53 = vor.u32 1.1754944e-38, %v3138_v23  ;;  %vm3137_vm14 = vcmp.eq.f32.partialorder %v3136_v4, 8.507059e+37 }
0x1011   :  { %v7480_v19 = vpop.eup %6081 }
0x1012   :  { %v3109_v57 = vsel %vm351_vm8, %v7480_v19, 0.0 }
0x1013   :  { %v6084_v36 = vpop.eup %6083  ;;  %3110 = vadd.xlane.f32.xlu1 %v3109_v57 }
0x1014   :  { %v3128_v12 = vmul.f32 %v6084_v36, %v3099_v11  ;;  %vm3133_vm11 = vweird.f32 %v6084_v36 }
0x1015   :  { %vm3134_vm13 = vmor %vm3132_vm12, %vm3133_vm11 }
0x1016   :  { %v3129_v17 = vsub.f32 1.0, %v3128_v12 }
0x1018   :  { %v3130_v33 = vmul.f32 %v6084_v36, %v3129_v17 }
0x1019   :  { %v3363_v40 = vpop.permute.xlu0 %3362 }
0x101a   :  { %v3131_v13 = vadd.f32 %v6084_v36, %v3130_v33  ;;  %v3368_v55 = vsel %vm351_vm8, %v3363_v40, 0 }
0x101b   :  { %3377 = vmatpush.bf16.xpose.msra.mxu1 %v3368_v55 }
0x101c   :  { %v3135_v31 = vsel %vm3134_vm13, %v6084_v36, %v3131_v13 }
0x101d   :  { %v3140_v61 = vsel %vm3137_vm14, %v3139_v53, %v3135_v31 }
0x101e   :  { %v3141_v44 = vmul.f32 %v6076_v16, %v3140_v61  ;;  %3071 = vmax.xlane.f32.xlu2 %v3070_v52  ;;  %v7506_v16 = vsel %vm6549_vm10, %v3046_v59, -1e+30 }
0x101f   :  { %v3058_v56 = vsel %vm351_vm8, %v7506_v16, -inf }
0x1020   :  { %v3203_v1 = vpack.c.bf16 %v3141_v44, %v3141_v44 }
0x1022   :  { %5722 = vmatmul.msk.bf16.vlgmr.msra.gmra.mxu3 %vm351_vm8, %v3203_v1 }
0x1023   :  { %3423 = vmatpush.bf16.xpose.msra.mxu3 %v3414_v39 }
0x102c   :  { %3406 = vrot.lane.b32.xlu1 %v7402_v60, %s6225_s8 }
0x1036   :  { %3292 = vrot.lane.b32.xlu2 %v7409_v28, %s6223_s1 }
0x103e   :  { %3383 = vrot.lane.b32.xlu2 %v7398_v22, %s6225_s8  ;;  %s8365_s8 = smov 72  }
0x1044   :  { %v3105_v5 = vpop.xlane.xlu0 %3104 }
0x1045   :  { %6085 = vrcp.f32 %v3105_v5  ;;  %v3166_v10 = vand.u32 2147483647, %v3105_v5  ;;  %v3168_v21 = vand.u32 2147483648, %v3105_v5  ;;  %vm3162_vm0 = vweird.f32 %v3105_v5 }
0x1046   :  { %3658 = vrot.lane.b32.xlu2 %v7394_v37, %s8361_s0 }
0x1047   :  { %vm3167_vm2 = vcmp.eq.f32.partialorder %v3166_v10, 8.507059e+37  ;;  %v3169_v20 = vor.u32 1.1754944e-38, %v3168_v21 }
0x1048   :  { %v3102_v25 = vpop.xlane.xlu2 %3101 }
0x1049   :  { %6087 = vrcp.f32 %v3102_v25  ;;  %v3153_v54 = vand.u32 2147483648, %v3102_v25  ;;  %v3151_v45 = vand.u32 2147483647, %v3102_v25  ;;  %vm3147_vm5 = vweird.f32 %v3102_v25 }
0x104b   :  { %v6086_v62 = vpop.eup %6085  ;;  %v3154_v46 = vor.u32 1.1754944e-38, %v3153_v54  ;;  %vm3152_vm7 = vcmp.eq.f32.partialorder %v3151_v45, 8.507059e+37 }
0x104c   :  { %v3158_v7 = vmul.f32 %v6086_v62, %v3105_v5  ;;  %vm3163_vm15 = vweird.f32 %v6086_v62 }
0x104d   :  { %vm3164_vm1 = vmor %vm3162_vm0, %vm3163_vm15 }
0x104e   :  { %v3159_v6 = vsub.f32 1.0, %v3158_v7  ;;  %3742 = vrot.lane.b32.xlu2 %v7415_v38, %s8361_s0 }
0x104f   :  { %v6088_v8 = vpop.eup %6087 }
0x1050   :  { %v3160_v50 = vmul.f32 %v6086_v62, %v3159_v6  ;;  %v3143_v18 = vmul.f32 %v6088_v8, %v3102_v25  ;;  %vm3148_vm4 = vweird.f32 %v6088_v8  ;;  %v3432_v12 = vpop.permute.xlu2 %3431 }
0x1051   :  { %vm3149_vm6 = vmor %vm3147_vm5, %vm3148_vm4  ;;  %v3437_v17 = vsel %vm351_vm8, %v3432_v12, 0 }
0x1052   :  { %v3161_v63 = vadd.f32 %v6086_v62, %v3160_v50  ;;  %v3144_v30 = vsub.f32 1.0, %v3143_v18 }
0x1054   :  { %v3165_v51 = vsel %vm3164_vm1, %v6086_v62, %v3161_v63  ;;  %v3145_v15 = vmul.f32 %v6088_v8, %v3144_v30 }
0x1055   :  { %v3170_v0 = vsel %vm3167_vm2, %v3169_v20, %v3165_v51 }
0x1056   :  { %v3171_v47 = vmul.f32 %v7462_v35, %v3170_v0  ;;  %v3146_v3 = vadd.f32 %v6088_v8, %v3145_v15  ;;  %3059 = vmax.xlane.f32.xlu1 %v3058_v56 }
0x1057   :  { %v3361_v9 = vpop.permute.xlu0 %3360 }
0x1058   :  { %v3205_v48 = vpack.c.bf16 %v3171_v47, %v3171_v47  ;;  %v3150_v11 = vsel %vm3149_vm6, %v6088_v8, %v3146_v3 }
0x1059   :  { %v3155_v57 = vsel %vm3152_vm7, %v3154_v46, %v3150_v11 }
0x105a   :  { %v3156_v36 = vmul.f32 %v7466_v41, %v3155_v57  ;;  %5724 = vmatmul.msk.bf16.vlgmr.msrb.gmra.mxu1 %vm351_vm8, %v3205_v48  ;;  %v3430_v41 = vpop.permute.xlu2 %3429 }
0x105c   :  { %v3204_v26 = vpack.c.bf16 %v3156_v36, %v3156_v36 }
0x105e   :  { %5723 = vmatmul.msk.bf16.vlgmr.msra.gmra.mxu0 %vm351_vm8, %v3204_v26 }
0x105f   :  { %3446 = vmatpush.bf16.xpose.msra.mxu0 %v3437_v17  ;;  %v3455_v35 = vpop.permute.xlu0 %3454 }
0x1060   :  { %v3460_v23 = vsel %vm351_vm8, %v3455_v35, 0 }
0x1061   :  { %3469 = vmatpush.bf16.xpose.msrb.mxu1 %v3460_v23 }
0x1067   :  { %v3453_v33 = vpop.permute.xlu0 %3452 }
0x106a   :  { %5728 = vmatmul.msk.bf16.vlgmr.msra.gmra.mxu1 %vm351_vm8, %v3361_v9 }
0x106e   :  { %5727 = vmatmul.msk.bf16.vlgmr.msrb.gmra.mxu0 %vm351_vm8, %v3338_v24 }
0x107a   :  { %5732 = vmatmul.msk.bf16.vlgmr.msrb.gmra.mxu1 %vm351_vm8, %v3453_v33 }
0x107e   :  { %5731 = vmatmul.msk.bf16.vlgmr.msra.gmra.mxu0 %vm351_vm8, %v3430_v41 }
0x1086   :  { %v3111_v4 = vpop.xlane.xlu1 %3110 }
0x1087   :  { %6089 = vrcp.f32 %v3111_v4  ;;  %v3198_v53 = vand.u32 2147483648, %v3111_v4  ;;  %v3196_v52 = vand.u32 2147483647, %v3111_v4  ;;  %vm3192_vm12 = vweird.f32 %v3111_v4 }
0x1089   :  { %v3199_v24 = vor.u32 1.1754944e-38, %v3198_v53  ;;  %vm3197_vm14 = vcmp.eq.f32.partialorder %v3196_v52, 8.507059e+37 }
0x108d   :  { %v6090_v40 = vpop.eup %6089 }
0x108e   :  { %v3188_v13 = vmul.f32 %v6090_v40, %v3111_v4  ;;  %vm3193_vm11 = vweird.f32 %v6090_v40 }
0x108f   :  { %vm3194_vm13 = vmor %vm3192_vm12, %vm3193_vm11 }
0x1090   :  { %v3189_v55 = vsub.f32 1.0, %v3188_v13 }
0x1091   :  { %v3072_v31 = vpop.xlane.xlu2 %3071 }
0x1092   :  { %v3190_v61 = vmul.f32 %v6090_v40, %v3189_v55  ;;  %v3080_v44 = vsub.f32 %v7486_v43, %v3072_v31 }
0x1094   :  { %v3191_v1 = vadd.f32 %v6090_v40, %v3190_v61  ;;  %v3090_v39 = vmul.f32 1.442695, %v3080_v44 }
0x1096   :  { %v3195_v5 = vsel %vm3194_vm13, %v6090_v40, %v3191_v1  ;;  %6091 = vpow2.f32 %v3090_v39 }
0x1097   :  { %v3200_v25 = vsel %vm3197_vm14, %v3199_v24, %v3195_v5 }
0x1098   :  { %v3201_v62 = vmul.f32 %v7480_v19, %v3200_v25 }
0x1099   :  { %v3293_v7 = vpop.permute.xlu2 %3292 }
0x109a   :  { %v3207_v59 = vpack.c.bf16 %v3201_v62, %v3201_v62  ;;  %v3298_v24 = vsel %vm660_vm9, %v3293_v7, 0 }
0x109c   :  { %v7522_v6 = vpop.eup %6091  ;;  %5726 = vmatmul.msk.bf16.vlgmr.msrb.gmra.mxu3 %vm351_vm8, %v3207_v59 }
0x109d   :  { %v3106_v43 = vsel %vm351_vm8, %v7522_v6, 0.0 }
0x109e   :  { %3107 = vadd.xlane.f32.xlu1 %v3106_v43  ;;  %v3407_v18 = vpop.permute.xlu1 %3406 }
0x10a1   :  { %v7527_v8 = vpop.permute.xlu2 %3383 }
0x10a5   :  { %v7529_v10 = vpop.f32.mrf.mxu3 }
0x10a9   :  { %v3659_v21 = vpop.permute.xlu2 %3658 }
0x10aa   :  { %v3664_v50 = vsel %vm660_vm9, %v3659_v21, 0 }
0x10ab   :  { %3673 = vmatpush.bf16.msrb.mxu3 %v3664_v50 }
0x10ac   :  { %5730 = vmatmul.msk.bf16.vlgmr.msra.gmra.mxu3 %vm351_vm8, %v3407_v18 }
0x10ad   :  { %v3248_v19 = vpop.f32.mrf.mxu3 }
0x10b1   :  { %v3743_v63 = vpop.permute.xlu2 %3742 }
0x10b2   :  { %v3748_v30 = vsel %vm660_vm9, %v3743_v63, 0 }
0x10b3   :  { %3757 = vmatpush.bf16.msra.mxu3 %v3748_v30 }
0x10b7   :  { %3208 = vrot.lane.b32.xlu1 %v7390_v32, %s6223_s1  ;;  %s8363_s1 = smov 80  }
0x10bf   :  { %3700 = vrot.lane.b32.xlu1 %v7402_v60, %s8361_s0 }
0x10c9   :  { %v3060_v20 = vpop.xlane.xlu1 %3059 }
0x10ca   :  { %v3076_v54 = vsub.f32 %v7506_v16, %v3060_v20 }
0x10cc   :  { %v3082_v51 = vmul.f32 1.442695, %v3076_v54 }
0x10ce   :  { %6093 = vpow2.f32 %v3082_v51 }
0x10d4   :  { %v7539_v15 = vpop.eup %6093 }
0x10d5   :  { %v3094_v45 = vsel %vm351_vm8, %v7539_v15, 0.0 }
0x10d6   :  { %3095 = vadd.xlane.f32.xlu0 %v3094_v45 }
0x10d7   :  { %v7543_v0 = vpop.f32.mrf.mxu1 }
0x10db   :  { %v7545_v56 = vpop.f32.mrf.mxu0 }
0x10dc   :  { %v3335_v47 = vpack.c.bf16 %v7543_v0, %v7545_v56 }
0x10df   :  { %v3290_v3 = vpop.f32.mrf.mxu1 }
0x10e3   :  { %v3269_v46 = vpop.f32.mrf.mxu0 }
0x10e7   :  { %v3379_v9 = vpop.f32.mrf.mxu1 }
0x10e8   :  { %v3476_v40 = vmul.f32 0.35355338, %v3379_v9 }
0x10ea   :  { %3385 = vrot.lane.b32.xlu0 %v7398_v22, %s6224_s29  ;;  %v7573_v55 = vsel %vm6549_vm10, %v3476_v40, -1e+30  ;;  %s8364_s29 = smov 48  }
0x10eb   :  { %v3356_v16 = vpop.f32.mrf.mxu0  ;;  %v3490_v31 = vsel %vm351_vm8, %v7573_v55, -inf }
0x10ec   :  { %v3475_v48 = vmul.f32 0.35355338, %v3356_v16 }
0x10ee   :  { %v7553_v11 = vsel %vm6549_vm10, %v3475_v48, -1e+30 }
0x10ef   :  { %v3381_v57 = vpop.f32.mrf.mxu1  ;;  %v3487_v36 = vsel %vm351_vm8, %v7553_v11, -inf }
0x10f0   :  { %3488 = vmax.xlane.f32.xlu1 %v3487_v36 }
0x10f2   :  { %3637 = vrot.lane.b32.xlu0 %v7390_v32, %s8361_s0 }
0x10f3   :  { %v3358_v12 = vpop.f32.mrf.mxu0 }
0x10f7   :  { %v3471_v26 = vpop.f32.mrf.mxu1 }
0x10f8   :  { %v3480_v61 = vmul.f32 0.35355338, %v3471_v26 }
0x10fa   :  { %3721 = vrot.lane.b32.xlu0 %v7409_v28, %s8361_s0  ;;  %v7579_v44 = vsel %vm6549_vm10, %v3480_v61, -1e+30 }
0x10fb   :  { %v3448_v17 = vpop.f32.mrf.mxu0  ;;  %v3502_v5 = vsel %vm351_vm8, %v7579_v44, -inf }
0x10fc   :  { %v3479_v35 = vmul.f32 0.35355338, %v3448_v17 }
0x10fe   :  { %v7563_v23 = vsel %vm6549_vm10, %v3479_v35, -1e+30 }
0x10ff   :  { %v3473_v33 = vpop.f32.mrf.mxu1  ;;  %v3499_v41 = vsel %vm351_vm8, %v7563_v23, -inf }
0x1100   :  { %3500 = vmax.xlane.f32.xlu1 %v3499_v41 }
0x1103   :  { %v3450_v4 = vpop.f32.mrf.mxu0 }
0x1111   :  { %v3108_v53 = vpop.xlane.xlu1 %3107 }
0x1112   :  { %6095 = vrcp.f32 %v3108_v53  ;;  %v3183_v41 = vand.u32 2147483648, %v3108_v53  ;;  %vm3177_vm5 = vweird.f32 %v3108_v53  ;;  %v3181_v4 = vand.u32 2147483647, %v3108_v53 }
0x1114   :  { %v3184_v61 = vor.u32 1.1754944e-38, %v3183_v41  ;;  %vm3182_vm7 = vcmp.eq.f32.partialorder %v3181_v4, 8.507059e+37 }
0x1118   :  { %v6096_v19 = vpop.eup %6095 }
0x1119   :  { %3802 = vrot.lane.b32.xlu1 %v7390_v32, %s8362_s23  ;;  %v3173_v20 = vmul.f32 %v6096_v19, %v3108_v53  ;;  %vm3178_vm4 = vweird.f32 %v6096_v19 }
0x111a   :  { %vm3179_vm6 = vmor %vm3177_vm5, %vm3178_vm4 }
0x111b   :  { %v3174_v46 = vsub.f32 1.0, %v3173_v20 }
0x111d   :  { %v3175_v36 = vmul.f32 %v6096_v19, %v3174_v46 }
0x111f   :  { %v7569_v13 = vpop.f32.mrf.mxu3  ;;  %v3176_v33 = vadd.f32 %v6096_v19, %v3175_v36 }
0x1121   :  { %v3180_v40 = vsel %vm3179_vm6, %v6096_v19, %v3176_v33 }
0x1124   :  { %3491 = vmax.xlane.f32.xlu0 %v3490_v31 }
0x1127   :  { %v3332_v52 = vpop.f32.mrf.mxu3 }
0x1129   :  { %v3209_v1 = vpop.permute.xlu1 %3208 }
0x112a   :  { %v3214_v39 = vsel %vm660_vm9, %v3209_v1, 0 }
0x112b   :  { %3223 = vmatpush.bf16.msrb.mxu2 %v3214_v39 }
0x112c   :  { %3503 = vmax.xlane.f32.xlu0 %v3502_v5 }
0x112f   :  { %3307 = vmatpush.bf16.msra.mxu2 %v3298_v24  ;;  %v3425_v25 = vpop.f32.mrf.mxu3 }
0x1130   :  { %v3478_v62 = vmul.f32 0.35355338, %v3425_v25 }
0x1131   :  { %v3701_v59 = vpop.permute.xlu1 %3700 }
0x1132   :  { %v7587_v43 = vsel %vm6549_vm10, %v3478_v62, -1e+30  ;;  %v3706_v21 = vsel %vm660_vm9, %v3701_v59, 0 }
0x1133   :  { %3715 = vmatpush.bf16.msra.mxu1 %v3706_v21  ;;  %v3496_v50 = vsel %vm351_vm8, %v7587_v43, -inf }
0x1134   :  { %3497 = vmax.xlane.f32.xlu2 %v3496_v50 }
0x1137   :  { %v3427_v7 = vpop.f32.mrf.mxu3 }
0x1140   :  { %3804 = vrot.lane.b32.xlu0 %v7390_v32, %s8363_s1 }
0x1149   :  { %v3096_v18 = vpop.xlane.xlu0 %3095 }
0x114a   :  { %6097 = vrcp.f32 %v3096_v18  ;;  %v3123_v51 = vand.u32 2147483648, %v3096_v18  ;;  %v3121_v3 = vand.u32 2147483647, %v3096_v18  ;;  %vm3117_vm0 = vweird.f32 %v3096_v18 }
0x114c   :  { %v3124_v16 = vor.u32 1.1754944e-38, %v3123_v51  ;;  %vm3122_vm2 = vcmp.eq.f32.partialorder %v3121_v3, 8.507059e+37 }
0x1150   :  { %v6098_v63 = vpop.eup %6097 }
0x1151   :  { %v3113_v30 = vmul.f32 %v6098_v63, %v3096_v18  ;;  %vm3118_vm15 = vweird.f32 %v6098_v63 }
0x1152   :  { %vm3119_vm1 = vmor %vm3117_vm0, %vm3118_vm15 }
0x1153   :  { %v3114_v54 = vsub.f32 1.0, %v3113_v30 }
0x1155   :  { %v3115_v45 = vmul.f32 %v6098_v63, %v3114_v54 }
0x1157   :  { %v3116_v9 = vadd.f32 %v6098_v63, %v3115_v45 }
0x1159   :  { %v3120_v48 = vsel %vm3119_vm1, %v6098_v63, %v3116_v9 }
0x115a   :  { %v3125_v57 = vsel %vm3122_vm2, %v3124_v16, %v3120_v48 }
0x115b   :  { %v3126_v12 = vmul.f32 %v7539_v15, %v3125_v57  ;;  %v3185_v15 = vsel %vm3182_vm7, %v3184_v61, %v3180_v40 }
0x115c   :  { %v3386_v26 = vpop.permute.xlu0 %3385  ;;  %v3186_v39 = vmul.f32 %v7522_v6, %v3185_v15 }
0x115d   :  { %v3202_v17 = vpack.c.bf16 %v3126_v12, %v3126_v12  ;;  %v3391_v35 = vsel %vm351_vm8, %v3386_v26, 0 }
0x115e   :  { %v3206_v5 = vpack.c.bf16 %v3186_v39, %v3186_v39 }
0x115f   :  { %5721 = vmatmul.msk.bf16.vlgmr.msrb.gmra.mxu2 %vm351_vm8, %v3202_v17 }
0x1160   :  { %3400 = vmatpush.bf16.xpose.msrb.mxu2 %v3391_v35 }
0x1163   :  { %v3489_v31 = vpop.xlane.xlu1 %3488 }
0x1164   :  { %v3505_v52 = vsub.f32 %v7553_v11, %v3489_v31  ;;  %v3638_v24 = vpop.permute.xlu0 %3637 }
0x1165   :  { %v3643_v62 = vsel %vm660_vm9, %v3638_v24, 0 }
0x1166   :  { %v3511_v1 = vmul.f32 1.442695, %v3505_v52 }
0x1168   :  { %6099 = vpow2.f32 %v3511_v1 }
0x116c   :  { %v3722_v11 = vpop.permute.xlu0 %3721 }
0x116d   :  { %v3727_v59 = vsel %vm660_vm9, %v3722_v11, 0 }
0x116e   :  { %v7599_v25 = vpop.eup %6099 }
0x116f   :  { %5725 = vmatmul.msk.bf16.vlgmr.msra.gmra.mxu2 %vm351_vm8, %v3206_v5  ;;  %v3523_v53 = vsel %vm351_vm8, %v7599_v25, 0.0 }
0x1170   :  { %3652 = vmatpush.bf16.msra.mxu2 %v3643_v62  ;;  %3524 = vadd.xlane.f32.xlu2 %v3523_v53 }
0x1173   :  { %v3501_v7 = vpop.xlane.xlu1 %3500 }
0x1174   :  { %v3509_v18 = vsub.f32 %v7563_v23, %v3501_v7 }
0x1176   :  { %v3519_v54 = vmul.f32 1.442695, %v3509_v18 }
0x117f   :  { %5729 = vmatmul.msk.bf16.vlgmr.msrb.gmra.mxu2 %vm351_vm8, %v7527_v8 }
0x1180   :  { %3736 = vmatpush.bf16.msrb.mxu2 %v3727_v59 }
0x1188   :  { %3827 = vrot.lane.b32.xlu2 %v7394_v37, %s8363_s1 }
0x1197   :  { %v3492_v6 = vpop.xlane.xlu0 %3491 }
0x1198   :  { %v3506_v21 = vsub.f32 %v7573_v55, %v3492_v6 }
0x119a   :  { %v3513_v50 = vmul.f32 1.442695, %v3506_v21  ;;  %v7668_v21 = vpop.permute.xlu1 %3802 }
0x119c   :  { %6101 = vpow2.f32 %v3513_v50 }
0x119f   :  { %v3504_v19 = vpop.xlane.xlu0 %3503 }
0x11a0   :  { %v3510_v63 = vsub.f32 %v7579_v44, %v3504_v19 }
0x11a2   :  { %v7613_v30 = vpop.eup %6101  ;;  %v3521_v20 = vmul.f32 1.442695, %v3510_v63 }
0x11a3   :  { %v3526_v8 = vsel %vm351_vm8, %v7613_v30, 0.0 }
0x11a4   :  { %6103 = vpow2.f32 %v3521_v20  ;;  %3527 = vadd.xlane.f32.xlu1 %v3526_v8 }
0x11a5   :  { %6105 = vpow2.f32 %v3519_v54 }
0x11a7   :  { %v3498_v51 = vpop.xlane.xlu2 %3497 }
0x11a8   :  { %v3508_v55 = vsub.f32 %v7587_v43, %v3498_v51 }
0x11aa   :  { %v7618_v45 = vpop.eup %6103  ;;  %v3517_v3 = vmul.f32 1.442695, %v3508_v55 }
0x11ab   :  { %v3538_v23 = vsel %vm351_vm8, %v7618_v45, 0.0  ;;  %v7622_v44 = vpop.eup %6105 }
0x11ac   :  { %6107 = vpow2.f32 %v3517_v3  ;;  %3539 = vadd.xlane.f32.xlu1 %v3538_v23  ;;  %v3535_v46 = vsel %vm351_vm8, %v7622_v44, 0.0 }
0x11b1   :  { %3536 = vadd.xlane.f32.xlu2 %v3535_v46 }
0x11b2   :  { %v7626_v9 = vpop.eup %6107  ;;  %v3805_v16 = vpop.permute.xlu0 %3804 }
0x11b3   :  { %v3810_v48 = vsel %vm351_vm8, %v3805_v16, 0  ;;  %v3532_v43 = vsel %vm351_vm8, %v7626_v9, 0.0 }
0x11b4   :  { %3533 = vadd.xlane.f32.xlu0 %v3532_v43  ;;  %3819 = vmatpush.bf16.xpose.msrb.mxu1 %v3810_v48 }
0x11c5   :  { %3873 = vrot.lane.b32.xlu1 %v7402_v60, %s8363_s1 }
0x11c8   :  { %3850 = vrot.lane.b32.xlu0 %v7398_v22, %s8363_s1 }
0x11c9   :  { %3825 = vrot.lane.b32.xlu2 %v7394_v37, %s8362_s23 }
0x11cd   :  { %3871 = vrot.lane.b32.xlu1 %v7402_v60, %s8362_s23 }
0x11d0   :  { %3848 = vrot.lane.b32.xlu0 %v7398_v22, %s8362_s23 }
0x11d1   :  { %3896 = vrot.lane.b32.xlu2 %v7409_v28, %s8363_s1 }
0x11d8   :  { %3919 = vrot.lane.b32.xlu0 %v7415_v38, %s8363_s1 }
0x11d9   :  { %3894 = vrot.lane.b32.xlu2 %v7409_v28, %s8362_s23 }
0x11e0   :  { %3917 = vrot.lane.b32.xlu0 %v7415_v38, %s8362_s23 }
0x11e2   :  { %v7649_v57 = vpop.f32.mrf.mxu2 }
0x11e3   :  { %v3525_v36 = vpop.xlane.xlu2 %3524 }
0x11e4   :  { %6109 = vrcp.f32 %v3525_v36  ;;  %v3552_v33 = vand.u32 2147483648, %v3525_v36  ;;  %v3550_v4 = vand.u32 2147483647, %v3525_v36  ;;  %vm3546_vm12 = vweird.f32 %v3525_v36 }
0x11e6   :  { %v3553_v31 = vor.u32 1.1754944e-38, %v3552_v33  ;;  %vm3551_vm14 = vcmp.eq.f32.partialorder %v3550_v4, 8.507059e+37 }
0x11e8   :  { %3679 = vrot.lane.b32.xlu0 %v7398_v22, %s8361_s0 }
0x11ea   :  { %v6110_v12 = vpop.eup %6109  ;;  %v3227_v26 = vpop.f32.mrf.mxu2 }
0x11eb   :  { %v3542_v17 = vmul.f32 %v6110_v12, %v3525_v36  ;;  %vm3547_vm11 = vweird.f32 %v6110_v12  ;;  %v3828_v39 = vpop.permute.xlu2 %3827 }
0x11ec   :  { %vm3548_vm13 = vmor %vm3546_vm12, %vm3547_vm11  ;;  %v3833_v5 = vsel %vm351_vm8, %v3828_v39, 0 }
0x11ed   :  { %v3543_v35 = vsub.f32 1.0, %v3542_v17 }
0x11ef   :  { %v3544_v41 = vmul.f32 %v6110_v12, %v3543_v35 }
0x11f0   :  { %4102 = vrot.lane.b32.xlu0 %v7390_v32, %s8364_s29 }
0x11f1   :  { %v3545_v40 = vadd.f32 %v6110_v12, %v3544_v41 }
0x11f2   :  { %v7655_v61 = vpop.f32.mrf.mxu2 }
0x11f3   :  { %v3549_v52 = vsel %vm3548_vm13, %v6110_v12, %v3545_v40 }
0x11f4   :  { %v3554_v15 = vsel %vm3551_vm14, %v3553_v31, %v3549_v52 }
0x11f5   :  { %v3555_v1 = vmul.f32 %v7599_v25, %v3554_v15 }
0x11f7   :  { %v3631_v24 = vpack.c.bf16 %v3555_v1, %v3555_v1 }
0x11f8   :  { %4165 = vrot.lane.b32.xlu0 %v7402_v60, %s8364_s29 }
0x11f9   :  { %5733 = vmatmul.msk.bf16.vlgmr.msra.gmra.mxu2 %vm351_vm8, %v3631_v24 }
0x11fa   :  { %3842 = vmatpush.bf16.xpose.msra.mxu2 %v3833_v5  ;;  %v3311_v62 = vpop.f32.mrf.mxu2 }
0x1202   :  { %v3402_v53 = vpop.f32.mrf.mxu2 }
0x1203   :  { %v3477_v11 = vmul.f32 0.35355338, %v3402_v53 }
0x1205   :  { %v7664_v59 = vsel %vm6549_vm10, %v3477_v11, -1e+30 }
0x1206   :  { %v3493_v25 = vsel %vm351_vm8, %v7664_v59, -inf }
0x1207   :  { %3494 = vmax.xlane.f32.xlu1 %v3493_v25 }
0x120a   :  { %v3404_v6 = vpop.f32.mrf.mxu2 }
0x1217   :  { %v3528_v50 = vpop.xlane.xlu1 %3527 }
0x1218   :  { %6111 = vrcp.f32 %v3528_v50  ;;  %v3567_v20 = vand.u32 2147483648, %v3528_v50  ;;  %v3565_v8 = vand.u32 2147483647, %v3528_v50  ;;  %vm3561_vm0 = vweird.f32 %v3528_v50 }
0x121a   :  { %v3568_v23 = vor.u32 1.1754944e-38, %v3567_v20  ;;  %vm3566_vm2 = vcmp.eq.f32.partialorder %v3565_v8, 8.507059e+37 }
0x121e   :  { %v6112_v7 = vpop.eup %6111 }
0x121f   :  { %v3557_v18 = vmul.f32 %v6112_v7, %v3528_v50  ;;  %v3540_v19 = vpop.xlane.xlu1 %3539  ;;  %vm3562_vm15 = vweird.f32 %v6112_v7 }
0x1220   :  { %6113 = vrcp.f32 %v3540_v19  ;;  %4123 = vrot.lane.b32.xlu1 %v7394_v37, %s8364_s29  ;;  %vm3563_vm1 = vmor %vm3561_vm0, %vm3562_vm15  ;;  %v3625_v4 = vand.u32 2147483647, %v3540_v19  ;;  %v3627_v52 = vand.u32 2147483648, %v3540_v19  ;;  %vm3621_vm5 = vweird.f32 %v3540_v19 }
0x1221   :  { %v3558_v63 = vsub.f32 1.0, %v3557_v18 }
0x1222   :  { %vm3626_vm11 = vcmp.eq.f32.partialorder %v3625_v4, 8.507059e+37  ;;  %v3628_v11 = vor.u32 1.1754944e-38, %v3627_v52 }
0x1223   :  { %v3559_v54 = vmul.f32 %v6112_v7, %v3558_v63 }
0x1224   :  { %v3537_v51 = vpop.xlane.xlu2 %3536 }
0x1225   :  { %v3560_v55 = vadd.f32 %v6112_v7, %v3559_v54  ;;  %6115 = vrcp.f32 %v3537_v51  ;;  %v3612_v1 = vand.u32 2147483648, %v3537_v51  ;;  %v3610_v5 = vand.u32 2147483647, %v3537_v51 }
0x1226   :  { %v6114_v3 = vpop.eup %6113  ;;  %vm3606_vm12 = vweird.f32 %v3537_v51 }
0x1227   :  { %v3564_v46 = vsel %vm3563_vm1, %v6112_v7, %v3560_v55  ;;  %v3617_v16 = vmul.f32 %v6114_v3, %v3540_v19  ;;  %v3534_v48 = vpop.xlane.xlu0 %3533  ;;  %vm3622_vm4 = vweird.f32 %v6114_v3  ;;  %v3613_v50 = vor.u32 1.1754944e-38, %v3612_v1 }
0x1228   :  { %v3569_v43 = vsel %vm3566_vm2, %v3568_v23, %v3564_v46  ;;  %6117 = vrcp.f32 %v3534_v48  ;;  %4233 = vrot.lane.b32.xlu1 %v7390_v32, %s8365_s8  ;;  %vm7676_vm6 = vmor %vm3621_vm5, %vm3622_vm4  ;;  %v3597_v6 = vand.u32 2147483648, %v3534_v48  ;;  %v3595_v18 = vand.u32 2147483647, %v3534_v48 }
0x1229   :  { %v3570_v36 = vmul.f32 %v7613_v30, %v3569_v43  ;;  %v3618_v12 = vsub.f32 1.0, %v3617_v16  ;;  %vm3611_vm15 = vcmp.eq.f32.partialorder %v3610_v5, 8.507059e+37  ;;  %vm3591_vm0 = vweird.f32 %v3534_v48 }
0x122a   :  { %v3598_v55 = vor.u32 1.1754944e-38, %v3597_v6  ;;  %vm3596_vm2 = vcmp.eq.f32.partialorder %v3595_v18, 8.507059e+37 }
0x122b   :  { %v6116_v26 = vpop.eup %6115  ;;  %v3632_v17 = vpack.c.bf16 %v3570_v36, %v3570_v36  ;;  %v3619_v35 = vmul.f32 %v6114_v3, %v3618_v12 }
0x122c   :  { %v3602_v33 = vmul.f32 %v6116_v26, %v3537_v51  ;;  %v3826_v40 = vpop.permute.xlu2 %3825  ;;  %vm3607_vm7 = vweird.f32 %v6116_v26 }
0x122d   :  { %v3620_v41 = vadd.f32 %v6114_v3, %v3619_v35  ;;  %5734 = vmatmul.msk.bf16.vlgmr.msrb.gmra.mxu3 %vm351_vm8, %v3632_v17  ;;  %vm3608_vm13 = vmor %vm3606_vm12, %vm3607_vm7 }
0x122e   :  { %v6118_v31 = vpop.eup %6117  ;;  %v3603_v15 = vsub.f32 1.0, %v3602_v33 }
0x122f   :  { %v3587_v39 = vmul.f32 %v6118_v31, %v3534_v48  ;;  %v3624_v62 = vsel %vm7676_vm6, %v6114_v3, %v3620_v41  ;;  %vm3592_vm14 = vweird.f32 %v6118_v31 }
0x1230   :  { %v3604_v30 = vmul.f32 %v6116_v26, %v3603_v15  ;;  %v3629_v19 = vsel %vm3626_vm11, %v3628_v11, %v3624_v62  ;;  %vm3593_vm1 = vmor %vm3591_vm0, %vm3592_vm14 }
0x1231   :  { %v3588_v53 = vsub.f32 1.0, %v3587_v39  ;;  %v3630_v3 = vmul.f32 %v7618_v45, %v3629_v19 }
0x1232   :  { %v3605_v25 = vadd.f32 %v6116_v26, %v3604_v30 }
0x1233   :  { %v3589_v7 = vmul.f32 %v6118_v31, %v3588_v53  ;;  %v3636_v48 = vpack.c.bf16 %v3630_v3, %v3630_v3 }
0x1234   :  { %v3609_v63 = vsel %vm3608_vm13, %v6116_v26, %v3605_v25  ;;  %v3897_v51 = vpop.permute.xlu2 %3896 }
0x1235   :  { %v3614_v20 = vsel %vm3611_vm15, %v3613_v50, %v3609_v63  ;;  %v3590_v54 = vadd.f32 %v6118_v31, %v3589_v7  ;;  %v3902_v36 = vsel %vm351_vm8, %v3897_v51, 0 }
0x1236   :  { %v3615_v8 = vmul.f32 %v7622_v44, %v3614_v20 }
0x1237   :  { %v3594_v23 = vsel %vm3593_vm1, %v6118_v31, %v3590_v54  ;;  %v3874_v12 = vpop.permute.xlu1 %3873 }
0x1238   :  { %v3635_v46 = vpack.c.bf16 %v3615_v8, %v3615_v8  ;;  %v3599_v16 = vsel %vm3596_vm2, %v3598_v55, %v3594_v23  ;;  %v3879_v45 = vsel %vm351_vm8, %v3874_v12, 0 }
0x1239   :  { %v3600_v43 = vmul.f32 %v7626_v9, %v3599_v16 }
0x123a   :  { %5737 = vmatmul.msk.bf16.vlgmr.msrb.gmra.mxu2 %vm351_vm8, %v3635_v46  ;;  %v3851_v26 = vpop.permute.xlu0 %3850 }
0x123b   :  { %v3634_v17 = vpack.c.bf16 %v3600_v43, %v3600_v43  ;;  %3911 = vmatpush.bf16.xpose.msrb.mxu2 %v3902_v36  ;;  %v3856_v44 = vsel %vm351_vm8, %v3851_v26, 0 }
0x123c   :  { %3865 = vmatpush.bf16.xpose.msrb.mxu3 %v3856_v44  ;;  %v3895_v4 = vpop.permute.xlu2 %3894 }
0x123d   :  { %5736 = vmatmul.msk.bf16.vlgmr.msra.gmra.mxu1 %vm351_vm8, %v3634_v17  ;;  %5738 = vmatmul.msk.bf16.vlgmr.msra.gmra.mxu3 %vm351_vm8, %v3636_v48 }
0x123e   :  { %3888 = vmatpush.bf16.xpose.msra.mxu1 %v3879_v45 }
0x123f   :  { %v3872_v15 = vpop.permute.xlu1 %3871 }
0x1242   :  { %v3849_v9 = vpop.permute.xlu0 %3848 }
0x124a   :  { %5743 = vmatmul.msk.bf16.vlgmr.msra.gmra.mxu2 %vm351_vm8, %v3826_v40  ;;  %v3920_v35 = vpop.permute.xlu0 %3919 }
0x124b   :  { %v3925_v33 = vsel %vm351_vm8, %v3920_v35, 0 }
0x124c   :  { %3934 = vmatpush.bf16.xpose.msra.mxu3 %v3925_v33 }
0x124d   :  { %5742 = vmatmul.msk.bf16.vlgmr.msrb.gmra.mxu1 %vm351_vm8, %v7668_v21  ;;  %5744 = vmatmul.msk.bf16.vlgmr.msrb.gmra.mxu3 %vm351_vm8, %v3849_v9 }
0x1252   :  { %v3918_v41 = vpop.permute.xlu0 %3917 }
0x125a   :  { %5746 = vmatmul.msk.bf16.vlgmr.msrb.gmra.mxu2 %vm351_vm8, %v3895_v4  ;;  %v3680_v31 = vpop.permute.xlu0 %3679 }
0x125b   :  { %v3685_v52 = vsel %vm660_vm9, %v3680_v31, 0 }
0x125c   :  { %3694 = vmatpush.bf16.msrb.mxu0 %v3685_v52 }
0x125d   :  { %5745 = vmatmul.msk.bf16.vlgmr.msra.gmra.mxu1 %vm351_vm8, %v3872_v15  ;;  %5747 = vmatmul.msk.bf16.vlgmr.msra.gmra.mxu3 %vm351_vm8, %v3918_v41 }
0x1262   :  { %v4103_v40 = vpop.permute.xlu0 %4102 }
0x1263   :  { %v4108_v1 = vsel %vm660_vm9, %v4103_v40, 0 }
0x1264   :  { %4117 = vmatpush.bf16.msrb.mxu1 %v4108_v1 }
0x127a   :  { %v3495_v21 = vpop.xlane.xlu1 %3494 }
0x127b   :  { %v3507_v39 = vsub.f32 %v7664_v59, %v3495_v21 }
0x127c   :  { %v7702_v24 = vpop.f32.mrf.mxu2 }
0x127d   :  { %v3515_v30 = vmul.f32 1.442695, %v3507_v39 }
0x127f   :  { %6119 = vpow2.f32 %v3515_v30 }
0x1284   :  { %v3656_v5 = vpop.f32.mrf.mxu2 }
0x1285   :  { %v7704_v62 = vpop.eup %6119 }
0x1286   :  { %v3529_v53 = vsel %vm351_vm8, %v7704_v62, 0.0 }
0x1287   :  { %3530 = vadd.xlane.f32.xlu2 %v3529_v53 }
0x1292   :  { %v4124_v11 = vpop.permute.xlu1 %4123 }
0x1293   :  { %v4129_v25 = vsel %vm660_vm9, %v4124_v11, 0 }
0x1294   :  { %4138 = vmatpush.bf16.msra.mxu2 %v4129_v25  ;;  %v5712_v25 = vld [vmem:[%s8308_s11 + $0x14] sm:$0xf] }
0x129f   :  { %4144 = vrot.lane.b32.xlu2 %v7398_v22, %s8364_s29 }
0x12a7   :  { %4186 = vrot.lane.b32.xlu2 %v7409_v28, %s8364_s29 }
0x12b0   :  { %v7713_v59 = vpop.f32.mrf.mxu3 }
0x12b1   :  { %v3763_v6 = vpack.c.bf16 %v7713_v59, %v7702_v24 }
0x12b8   :  { %v3677_v50 = vpop.f32.mrf.mxu3 }
0x12b9   :  { %v3776_v50 = vsel %vm660_vm9, %v5712_v25, 0 }
0x12ba   :  { %v7717_v7 = vpop.f32.mrf.mxu1  ;;  %3785 = vmatpush.bf16.msra.mxu0 %v3776_v50 }
0x12bd   :  { %v7719_v18 = vpop.f32.mrf.mxu2 }
0x12c0   :  { %v7721_v19 = vpop.f32.mrf.mxu3 }
0x12c1   :  { %v3765_v63 = vpack.c.bf16 %v7721_v19, %v7719_v18 }
0x12c2   :  { %v3719_v20 = vpop.f32.mrf.mxu1 }
0x12c5   :  { %v3740_v54 = vpop.f32.mrf.mxu2 }
0x12c8   :  { %v3761_v8 = vpop.f32.mrf.mxu3 }
0x12c9   :  { %v4234_v8 = vpop.permute.xlu1 %4233 }
0x12ca   :  { %v3821_v55 = vpop.f32.mrf.mxu1 }
0x12cb   :  { %v3940_v3 = vmul.f32 0.35355338, %v3821_v55 }
0x12cd   :  { %v7727_v23 = vsel %vm6549_vm10, %v3940_v3, -1e+30  ;;  %v3844_v51 = vpop.f32.mrf.mxu2 }
0x12ce   :  { %v3941_v46 = vmul.f32 0.35355338, %v3844_v51  ;;  %v3952_v16 = vsel %vm351_vm8, %v7727_v23, -inf }
0x12cf   :  { %3953 = vmax.xlane.f32.xlu0 %v3952_v16 }
0x12d0   :  { %v7733_v43 = vsel %vm6549_vm10, %v3941_v46, -1e+30  ;;  %v3867_v36 = vpop.f32.mrf.mxu3  ;;  %v4239_v46 = vsel %vm351_vm8, %v4234_v8, 0 }
0x12d1   :  { %v3955_v12 = vsel %vm351_vm8, %v7733_v43, -inf  ;;  %v3942_v26 = vmul.f32 0.35355338, %v3867_v36 }
0x12d2   :  { %3956 = vmax.xlane.f32.xlu1 %v3955_v12  ;;  %v3823_v48 = vpop.f32.mrf.mxu1 }
0x12d3   :  { %v7739_v44 = vsel %vm6549_vm10, %v3942_v26, -1e+30 }
0x12d4   :  { %v3958_v9 = vsel %vm351_vm8, %v7739_v44, -inf }
0x12d5   :  { %v3846_v17 = vpop.f32.mrf.mxu2 }
0x12d8   :  { %v3869_v45 = vpop.f32.mrf.mxu3 }
0x12da   :  { %v3890_v35 = vpop.f32.mrf.mxu1  ;;  %3959 = vmax.xlane.f32.xlu1 %v3958_v9 }
0x12db   :  { %v3943_v33 = vmul.f32 0.35355338, %v3890_v35 }
0x12dd   :  { %v7745_v41 = vsel %vm6549_vm10, %v3943_v33, -1e+30  ;;  %v3913_v4 = vpop.f32.mrf.mxu2 }
0x12de   :  { %v3944_v31 = vmul.f32 0.35355338, %v3913_v4  ;;  %v3961_v52 = vsel %vm351_vm8, %v7745_v41, -inf }
0x12df   :  { %3962 = vmax.xlane.f32.xlu2 %v3961_v52 }
0x12e0   :  { %v7751_v15 = vsel %vm6549_vm10, %v3944_v31, -1e+30  ;;  %v3936_v40 = vpop.f32.mrf.mxu3  ;;  %v4166_v31 = vpop.permute.xlu0 %4165 }
0x12e1   :  { %v3945_v1 = vmul.f32 0.35355338, %v3936_v40  ;;  %v3964_v21 = vsel %vm351_vm8, %v7751_v15, -inf  ;;  %v4171_v40 = vsel %vm660_vm9, %v4166_v31, 0 }
0x12e2   :  { %v3892_v39 = vpop.f32.mrf.mxu1  ;;  %3965 = vmax.xlane.f32.xlu1 %v3964_v21 }
0x12e3   :  { %v7757_v30 = vsel %vm6549_vm10, %v3945_v1, -1e+30  ;;  %4256 = vrot.lane.b32.xlu0 %v7394_v37, %s8365_s8 }
0x12e4   :  { %v3967_v53 = vsel %vm351_vm8, %v7757_v30, -inf }
0x12e5   :  { %v3915_v5 = vpop.f32.mrf.mxu2 }
0x12e7   :  { %3968 = vmax.xlane.f32.xlu2 %v3967_v53 }
0x12e8   :  { %v3938_v11 = vpop.f32.mrf.mxu3 }
0x12fa   :  { %v3531_v20 = vpop.xlane.xlu2 %3530 }
0x12fb   :  { %6121 = vrcp.f32 %v3531_v20  ;;  %4207 = vrot.lane.b32.xlu1 %v7415_v38, %s8364_s29  ;;  %v3582_v36 = vand.u32 2147483648, %v3531_v20  ;;  %v3580_v26 = vand.u32 2147483647, %v3531_v20  ;;  %vm3576_vm5 = vweird.f32 %v3531_v20 }
0x12fd   :  { %v3583_v17 = vor.u32 1.1754944e-38, %v3582_v36  ;;  %vm3581_vm7 = vcmp.eq.f32.partialorder %v3580_v26, 8.507059e+37 }
0x1301   :  { %v6122_v54 = vpop.eup %6121 }
0x1302   :  { %v3572_v55 = vmul.f32 %v6122_v54, %v3531_v20  ;;  %v4145_v3 = vpop.permute.xlu2 %4144  ;;  %vm3577_vm4 = vweird.f32 %v6122_v54 }
0x1303   :  { %v4150_v51 = vsel %vm660_vm9, %v4145_v3, 0  ;;  %vm3578_vm6 = vmor %vm3576_vm5, %vm3577_vm4 }
0x1304   :  { %v3573_v16 = vsub.f32 1.0, %v3572_v55  ;;  %4159 = vmatpush.bf16.msrb.mxu3 %v4150_v51 }
0x1306   :  { %v3574_v12 = vmul.f32 %v6122_v54, %v3573_v16 }
0x1308   :  { %4248 = vmatpush.bf16.xpose.msra.mxu3 %v4239_v46  ;;  %v3575_v48 = vadd.f32 %v6122_v54, %v3574_v12 }
0x130a   :  { %v3579_v45 = vsel %vm3578_vm6, %v6122_v54, %v3575_v48  ;;  %v4187_v9 = vpop.permute.xlu2 %4186 }
0x130b   :  { %v3584_v35 = vsel %vm3581_vm7, %v3583_v17, %v3579_v45  ;;  %v4192_v33 = vsel %vm660_vm9, %v4187_v9, 0 }
0x130c   :  { %v3585_v4 = vmul.f32 %v7704_v62, %v3584_v35  ;;  %4201 = vmatpush.bf16.msra.mxu1 %v4192_v33 }
0x130e   :  { %v3633_v52 = vpack.c.bf16 %v3585_v4, %v3585_v4 }
0x1310   :  { %5735 = vmatmul.msk.bf16.vlgmr.msrb.gmra.mxu0 %vm351_vm8, %v3633_v52 }
0x1311   :  { %4180 = vmatpush.bf16.msrb.mxu0 %v4171_v40 }
0x1320   :  { %5739 = vmatmul.msk.bf16.vlgmr.msra.gmra.mxu0 %vm351_vm8, %v3763_v6 }
0x1342   :  { %v3954_v1 = vpop.xlane.xlu0 %3953 }
0x1343   :  { %v3970_v21 = vsub.f32 %v7727_v23, %v3954_v1 }
0x1345   :  { %v3976_v39 = vmul.f32 1.442695, %v3970_v21  ;;  %v3957_v5 = vpop.xlane.xlu1 %3956 }
0x1346   :  { %v3971_v62 = vsub.f32 %v7733_v43, %v3957_v5 }
0x1347   :  { %6123 = vpow2.f32 %v3976_v39 }
0x1348   :  { %v3978_v53 = vmul.f32 1.442695, %v3971_v62 }
0x134a   :  { %6125 = vpow2.f32 %v3978_v53 }
0x134d   :  { %v7781_v11 = vpop.eup %6123  ;;  %v3960_v25 = vpop.xlane.xlu1 %3959 }
0x134e   :  { %v3972_v50 = vsub.f32 %v7739_v44, %v3960_v25  ;;  %v3988_v24 = vsel %vm351_vm8, %v7781_v11, 0.0 }
0x134f   :  { %3989 = vadd.xlane.f32.xlu0 %v3988_v24 }
0x1350   :  { %v7786_v59 = vpop.eup %6125  ;;  %v3980_v6 = vmul.f32 1.442695, %v3972_v50 }
0x1351   :  { %v3991_v23 = vsel %vm351_vm8, %v7786_v59, 0.0 }
0x1352   :  { %6127 = vpow2.f32 %v3980_v6  ;;  %v3963_v43 = vpop.xlane.xlu2 %3962  ;;  %3992 = vadd.xlane.f32.xlu1 %v3991_v23 }
0x1353   :  { %v3973_v20 = vsub.f32 %v7745_v41, %v3963_v43 }
0x1355   :  { %v3982_v54 = vmul.f32 1.442695, %v3973_v20  ;;  %v3966_v8 = vpop.xlane.xlu1 %3965  ;;  %v4257_v55 = vpop.permute.xlu0 %4256 }
0x1356   :  { %v3974_v44 = vsub.f32 %v7751_v15, %v3966_v8  ;;  %v4262_v3 = vsel %vm351_vm8, %v4257_v55, 0 }
0x1357   :  { %6129 = vpow2.f32 %v3982_v54  ;;  %4271 = vmatpush.bf16.xpose.msra.mxu0 %v4262_v3 }
0x1358   :  { %v7793_v51 = vpop.eup %6127  ;;  %v3984_v46 = vmul.f32 1.442695, %v3974_v44 }
0x1359   :  { %v3994_v16 = vsel %vm351_vm8, %v7793_v51, 0.0 }
0x135a   :  { %6131 = vpow2.f32 %v3984_v46  ;;  %3995 = vadd.xlane.f32.xlu2 %v3994_v16  ;;  %v3969_v17 = vpop.xlane.xlu2 %3968 }
0x135b   :  { %v3975_v45 = vsub.f32 %v7757_v30, %v3969_v17 }
0x135d   :  { %v7797_v36 = vpop.eup %6129  ;;  %v3986_v9 = vmul.f32 1.442695, %v3975_v45 }
0x135e   :  { %v3997_v41 = vsel %vm351_vm8, %v7797_v36, 0.0 }
0x135f   :  { %3998 = vadd.xlane.f32.xlu0 %v3997_v41  ;;  %6133 = vpow2.f32 %v3986_v9 }
0x1360   :  { %v7801_v12 = vpop.eup %6131 }
0x1361   :  { %v4000_v15 = vsel %vm351_vm8, %v7801_v12, 0.0 }
0x1362   :  { %4001 = vadd.xlane.f32.xlu1 %v4000_v15 }
0x1365   :  { %v7825_v31 = vpop.eup %6133 }
0x1366   :  { %v4003_v52 = vsel %vm351_vm8, %v7825_v31, 0.0 }
0x136d   :  { %v4208_v26 = vpop.permute.xlu1 %4207 }
0x136e   :  { %v4213_v48 = vsel %vm660_vm9, %v4208_v26, 0 }
0x136f   :  { %4222 = vmatpush.bf16.msrb.mxu2 %v4213_v48 }
0x1372   :  { %4254 = vrot.lane.b32.xlu2 %v7394_v37, %s8368_s7 }
0x1373   :  { %4231 = vrot.lane.b32.xlu0 %v7390_v32, %s8368_s7 }
0x137b   :  { %4279 = vrot.lane.b32.xlu1 %v7398_v22, %s8365_s8  ;;  %4302 = vrot.lane.b32.xlu0 %v7402_v60, %s8365_s8 }
0x1383   :  { %4300 = vrot.lane.b32.xlu1 %v7402_v60, %s8368_s7  ;;  %4325 = vrot.lane.b32.xlu0 %v7409_v28, %s8365_s8 }
0x138b   :  { %4323 = vrot.lane.b32.xlu1 %v7409_v28, %s8368_s7  ;;  %4346 = vrot.lane.b32.xlu0 %v7415_v38, %s8368_s7 }
0x138d   :  { %v3696_v35 = vpop.f32.mrf.mxu0 }
0x138e   :  { %v3764_v33 = vpack.c.bf16 %v7717_v7, %v3696_v35 }
0x1390   :  { %5740 = vmatmul.msk.bf16.gmra.mxu0 %vm351_vm8, %v3764_v33 }
0x1395   :  { %v3698_v4 = vpop.f32.mrf.mxu0 }
0x139b   :  { %4004 = vadd.xlane.f32.xlu2 %v4003_v52 }
0x13a0   :  { %5741 = vmatmul.msk.bf16.gmra.mxu0 %vm351_vm8, %v3765_v63 }
0x13b3   :  { %4277 = vrot.lane.b32.xlu2 %v7398_v22, %s8368_s7 }
0x13bb   :  { %4348 = vrot.lane.b32.xlu2 %v7415_v38, %s8365_s8 }
0x13c2   :  { %v3990_v7 = vpop.xlane.xlu0 %3989 }
0x13c3   :  { %6135 = vrcp.f32 %v3990_v7  ;;  %v4017_v5 = vand.u32 2147483648, %v3990_v7  ;;  %v4015_v19 = vand.u32 2147483647, %v3990_v7  ;;  %vm4011_vm12 = vweird.f32 %v3990_v7 }
0x13c5   :  { %v3993_v30 = vpop.xlane.xlu1 %3992  ;;  %v4018_v24 = vor.u32 1.1754944e-38, %v4017_v5  ;;  %vm4016_vm15 = vcmp.eq.f32.partialorder %v4015_v19, 8.507059e+37 }
0x13c6   :  { %6137 = vrcp.f32 %v3993_v30  ;;  %v4032_v50 = vand.u32 2147483648, %v3993_v30  ;;  %v4030_v23 = vand.u32 2147483647, %v3993_v30  ;;  %vm4026_vm0 = vweird.f32 %v3993_v30 }
0x13c8   :  { %v4033_v3 = vor.u32 1.1754944e-38, %v4032_v50  ;;  %vm4031_vm2 = vcmp.eq.f32.partialorder %v4030_v23, 8.507059e+37 }
0x13c9   :  { %v6136_v40 = vpop.eup %6135 }
0x13ca   :  { %v4007_v1 = vmul.f32 %v6136_v40, %v3990_v7  ;;  %vm4012_vm11 = vweird.f32 %v6136_v40 }
0x13cb   :  { %vm4013_vm13 = vmor %vm4011_vm12, %vm4012_vm11 }
0x13cc   :  { %v6138_v21 = vpop.eup %6137  ;;  %v4008_v39 = vsub.f32 1.0, %v4007_v1 }
0x13cd   :  { %v4022_v62 = vmul.f32 %v6138_v21, %v3993_v30  ;;  %v3996_v53 = vpop.xlane.xlu2 %3995  ;;  %vm4027_vm14 = vweird.f32 %v6138_v21 }
0x13ce   :  { %v4009_v18 = vmul.f32 %v6136_v40, %v4008_v39  ;;  %6139 = vrcp.f32 %v3996_v53  ;;  %vm4028_vm1 = vmor %vm4026_vm0, %vm4027_vm14  ;;  %v4047_v45 = vand.u32 2147483648, %v3996_v53  ;;  %vm4041_vm5 = vweird.f32 %v3996_v53 }
0x13cf   :  { %v4023_v63 = vsub.f32 1.0, %v4022_v62 }
0x13d0   :  { %v4010_v25 = vadd.f32 %v6136_v40, %v4009_v18  ;;  %v4048_v7 = vor.u32 1.1754944e-38, %v4047_v45 }
0x13d1   :  { %v4024_v6 = vmul.f32 %v6138_v21, %v4023_v63 }
0x13d2   :  { %v4014_v43 = vsel %vm4013_vm13, %v6136_v40, %v4010_v25  ;;  %v3999_v20 = vpop.xlane.xlu0 %3998 }
0x13d3   :  { %v4019_v54 = vsel %vm4016_vm15, %v4018_v24, %v4014_v43  ;;  %v4025_v8 = vadd.f32 %v6138_v21, %v4024_v6  ;;  %6141 = vrcp.f32 %v3999_v20  ;;  %v4060_v1 = vand.u32 2147483647, %v3999_v20 }
0x13d4   :  { %v6140_v55 = vpop.eup %6139  ;;  %v4020_v44 = vmul.f32 %v7781_v11, %v4019_v54  ;;  %v4045_v11 = vand.u32 2147483647, %v3996_v53  ;;  %vm4056_vm12 = vweird.f32 %v3999_v20 }
0x13d5   :  { %v4029_v46 = vsel %vm4028_vm1, %v6138_v21, %v4025_v8  ;;  %v4037_v16 = vmul.f32 %v6140_v55, %v3996_v53  ;;  %v4002_v41 = vpop.xlane.xlu1 %4001  ;;  %vm4042_vm4 = vweird.f32 %v6140_v55  ;;  %v4062_v21 = vand.u32 2147483648, %v3999_v20  ;;  %v4255_v45 = vpop.permute.xlu2 %4254 }
0x13d6   :  { %v4096_v15 = vpack.c.bf16 %v4020_v44, %v4020_v44  ;;  %v4034_v26 = vsel %vm4031_vm2, %v4033_v3, %v4029_v46  ;;  %6143 = vrcp.f32 %v4002_v41  ;;  %vm4043_vm6 = vmor %vm4041_vm5, %vm4042_vm4  ;;  %vm4046_vm7 = vcmp.eq.f32.partialorder %v4045_v11, 8.507059e+37 }
0x13d7   :  { %v4035_v48 = vmul.f32 %v7786_v59, %v4034_v26  ;;  %v4038_v17 = vsub.f32 1.0, %v4037_v16  ;;  %vm4061_vm14 = vcmp.eq.f32.partialorder %v4060_v1, 8.507059e+37  ;;  %v4063_v25 = vor.u32 1.1754944e-38, %v4062_v21 }
0x13d8   :  { %5748 = vmatmul.msk.bf16.vlgmr.msrb.gmra.mxu1 %vm351_vm8, %v4096_v15  ;;  %v4077_v50 = vand.u32 2147483648, %v4002_v41  ;;  %v4075_v23 = vand.u32 2147483647, %v4002_v41  ;;  %vm4071_vm0 = vweird.f32 %v4002_v41 }
0x13d9   :  { %v6142_v9 = vpop.eup %6141  ;;  %v4097_v35 = vpack.c.bf16 %v4035_v48, %v4035_v48  ;;  %v4039_v33 = vmul.f32 %v6140_v55, %v4038_v17 }
0x13da   :  { %v4052_v4 = vmul.f32 %v6142_v9, %v3999_v20  ;;  %vm4057_vm11 = vweird.f32 %v6142_v9  ;;  %vm4076_vm2 = vcmp.eq.f32.partialorder %v4075_v23, 8.507059e+37 }
0x13db   :  { %v4040_v52 = vadd.f32 %v6140_v55, %v4039_v33  ;;  %5749 = vmatmul.msk.bf16.vlgmr.msra.gmra.mxu2 %vm351_vm8, %v4097_v35  ;;  %vm4058_vm13 = vmor %vm4056_vm12, %vm4057_vm11 }
0x13dc   :  { %v4053_v30 = vsub.f32 1.0, %v4052_v4  ;;  %v6144_v40 = vpop.eup %6143 }
0x13dd   :  { %v4044_v59 = vsel %vm4043_vm6, %v6140_v55, %v4040_v52  ;;  %v4067_v62 = vmul.f32 %v6144_v40, %v4002_v41  ;;  %vm4072_vm15 = vweird.f32 %v6144_v40 }
0x13de   :  { %v4049_v39 = vsel %vm4046_vm7, %v4048_v7, %v4044_v59  ;;  %v4054_v5 = vmul.f32 %v6142_v9, %v4053_v30  ;;  %vm4073_vm1 = vmor %vm4071_vm0, %vm4072_vm15 }
0x13df   :  { %v4050_v18 = vmul.f32 %v7793_v51, %v4049_v39  ;;  %v4068_v63 = vsub.f32 1.0, %v4067_v62  ;;  %v4078_v51 = vor.u32 1.1754944e-38, %v4077_v50 }
0x13e0   :  { %v4055_v19 = vadd.f32 %v6142_v9, %v4054_v5 }
0x13e1   :  { %v4098_v53 = vpack.c.bf16 %v4050_v18, %v4050_v18  ;;  %v4069_v6 = vmul.f32 %v6144_v40, %v4068_v63 }
0x13e2   :  { %v4059_v24 = vsel %vm4058_vm13, %v6142_v9, %v4055_v19 }
0x13e3   :  { %v4064_v43 = vsel %vm4061_vm14, %v4063_v25, %v4059_v24  ;;  %5750 = vmatmul.msk.bf16.vlgmr.msrb.gmra.mxu3 %vm351_vm8, %v4098_v53  ;;  %v4070_v8 = vadd.f32 %v6144_v40, %v4069_v6  ;;  %v7858_v53 = vpop.f32.mrf.mxu0 }
0x13e4   :  { %v4065_v54 = vmul.f32 %v7797_v36, %v4064_v43 }
0x13e5   :  { %v4232_v20 = vpop.permute.xlu0 %4231  ;;  %v4074_v44 = vsel %vm4073_vm1, %v6144_v40, %v4070_v8 }
0x13e6   :  { %v4099_v55 = vpack.c.bf16 %v4065_v54, %v4065_v54  ;;  %v4079_v3 = vsel %vm4076_vm2, %v4078_v51, %v4074_v44 }
0x13e7   :  { %v4080_v46 = vmul.f32 %v7801_v12, %v4079_v3 }
0x13e8   :  { %5751 = vmatmul.msk.bf16.vlgmr.msrb.gmra.mxu0 %vm351_vm8, %v4099_v55 }
0x13e9   :  { %v4100_v16 = vpack.c.bf16 %v4080_v46, %v4080_v46 }
0x13eb   :  { %5752 = vmatmul.msk.bf16.vlgmr.msra.gmra.mxu1 %vm351_vm8, %v4100_v16  ;;  %v7861_v25 = vpop.f32.mrf.mxu0 }
0x13ed   :  { %v4280_v15 = vpop.permute.xlu1 %4279  ;;  %v4303_v26 = vpop.permute.xlu0 %4302 }
0x13ee   :  { %v4285_v36 = vsel %vm351_vm8, %v4280_v15, 0  ;;  %v4308_v41 = vsel %vm351_vm8, %v4303_v26, 0 }
0x13ef   :  { %4294 = vmatpush.bf16.xpose.msrb.mxu1 %v4285_v36  ;;  %4317 = vmatpush.bf16.xpose.msra.mxu2 %v4308_v41 }
0x13f3   :  { %5754 = vmatmul.msk.bf16.vlgmr.msra.gmra.mxu3 %vm351_vm8, %v4232_v20 }
0x13f5   :  { %v4326_v48 = vpop.permute.xlu0 %4325  ;;  %v4301_v12 = vpop.permute.xlu1 %4300 }
0x13f6   :  { %v4331_v17 = vsel %vm351_vm8, %v4326_v48, 0 }
0x13f7   :  { %4340 = vmatpush.bf16.xpose.msrb.mxu3 %v4331_v17 }
0x13f8   :  { %5755 = vmatmul.msk.bf16.vlgmr.msra.gmra.mxu0 %vm351_vm8, %v4255_v45 }
0x13fd   :  { %v4324_v9 = vpop.permute.xlu1 %4323  ;;  %v4347_v63 = vpop.permute.xlu0 %4346 }
0x1403   :  { %5758 = vmatmul.msk.bf16.vlgmr.msrb.gmra.mxu3 %vm351_vm8, %v4324_v9 }
0x140d   :  { %v7863_v50 = vpop.f32.mrf.mxu0 }
0x140e   :  { %v4005_v35 = vpop.xlane.xlu2 %4004 }
0x140f   :  { %6145 = vrcp.f32 %v4005_v35  ;;  %v4092_v7 = vand.u32 2147483648, %v4005_v35  ;;  %v4090_v40 = vand.u32 2147483647, %v4005_v35  ;;  %vm4086_vm5 = vweird.f32 %v4005_v35 }
0x1411   :  { %v4093_v1 = vor.u32 1.1754944e-38, %v4092_v7  ;;  %vm4091_vm7 = vcmp.eq.f32.partialorder %v4090_v40, 8.507059e+37 }
0x1415   :  { %v6146_v33 = vpop.eup %6145  ;;  %v7865_v24 = vpop.f32.mrf.mxu0 }
0x1416   :  { %v4082_v11 = vmul.f32 %v6146_v33, %v4005_v35  ;;  %v4278_v4 = vpop.permute.xlu2 %4277  ;;  %vm4087_vm4 = vweird.f32 %v6146_v33 }
0x1417   :  { %5756 = vmatmul.msk.bf16.vlgmr.msrb.gmra.mxu1 %vm351_vm8, %v4278_v4  ;;  %vm4088_vm6 = vmor %vm4086_vm5, %vm4087_vm4 }
0x1418   :  { %v4083_v52 = vsub.f32 1.0, %v4082_v11 }
0x141a   :  { %v4084_v30 = vmul.f32 %v6146_v33, %v4083_v52 }
0x141c   :  { %v4085_v59 = vadd.f32 %v6146_v33, %v4084_v30 }
0x141d   :  { %v7867_v6 = vpop.f32.mrf.mxu0 }
0x141e   :  { %v4089_v21 = vsel %vm4088_vm6, %v6146_v33, %v4085_v59  ;;  %v4349_v39 = vpop.permute.xlu2 %4348 }
0x141f   :  { %v4094_v5 = vsel %vm4091_vm7, %v4093_v1, %v4089_v21  ;;  %v4354_v62 = vsel %vm351_vm8, %v4349_v39, 0 }
0x1420   :  { %v4095_v18 = vmul.f32 %v7825_v31, %v4094_v5  ;;  %4363 = vmatpush.bf16.xpose.msrb.mxu0 %v4354_v62 }
0x1422   :  { %v4101_v19 = vpack.c.bf16 %v4095_v18, %v4095_v18 }
0x1424   :  { %5753 = vmatmul.msk.bf16.vlgmr.msrb.gmra.mxu2 %vm351_vm8, %v4101_v19 }
0x1425   :  { %v7871_v23 = vpop.f32.mrf.mxu0 }
0x1427   :  { %5759 = vmatmul.msk.bf16.vlgmr.msrb.gmra.mxu0 %vm351_vm8, %v4347_v63 }
0x1434   :  { %5757 = vmatmul.msk.bf16.vlgmr.msra.gmra.mxu2 %vm351_vm8, %v4301_v12 }
0x1455   :  { %v7869_v31 = vpop.f32.mrf.mxu1 }
0x145d   :  { %v4121_v43 = vpop.f32.mrf.mxu1 }
0x145e   :  { %v7873_v54 = vpop.f32.mrf.mxu2 }
0x145f   :  { %v4228_v8 = vpack.c.bf16 %v7873_v54, %v7869_v31  ;;  %v3336_v31 = vpack.c.bf16 %v7569_v13, %v7655_v61 }
0x1465   :  { %v7877_v51 = vpop.f32.mrf.mxu0 }
0x1466   :  { %v4142_v20 = vpop.f32.mrf.mxu2  ;;  %v7879_v55 = vpop.f32.mrf.mxu3 }
0x1467   :  { %v4229_v44 = vpack.c.bf16 %v7877_v51, %v7879_v55 }
0x1468   :  { %v7883_v3 = vpop.f32.mrf.mxu1 }
0x146d   :  { %v4184_v46 = vpop.f32.mrf.mxu0 }
0x146e   :  { %v4163_v16 = vpop.f32.mrf.mxu3 }
0x1470   :  { %v4205_v15 = vpop.f32.mrf.mxu1 }
0x1475   :  { %v4273_v26 = vpop.f32.mrf.mxu0 }
0x1476   :  { %v4370_v36 = vmul.f32 0.35355338, %v4273_v26  ;;  %v4250_v41 = vpop.f32.mrf.mxu3 }
0x1477   :  { %v4369_v48 = vmul.f32 0.35355338, %v4250_v41 }
0x1478   :  { %v4376_v17 = vsel %vm6549_vm10, %v4370_v36, -1e+30 }
0x1479   :  { %v4375_v45 = vsel %vm6549_vm10, %v4369_v48, -1e+30  ;;  %v4384_v12 = vsel %vm351_vm8, %v4376_v17, -inf }
0x147a   :  { %4385 = vmax.xlane.f32.xlu2 %v4384_v12  ;;  %v4381_v9 = vsel %vm351_vm8, %v4375_v45, -inf }
0x147b   :  { %4382 = vmax.xlane.f32.xlu1 %v4381_v9 }
0x147d   :  { %v4275_v35 = vpop.f32.mrf.mxu0 }
0x147e   :  { %v4252_v33 = vpop.f32.mrf.mxu3 }
0x1486   :  { %v4342_v11 = vpop.f32.mrf.mxu3 }
0x1487   :  { %v4373_v59 = vmul.f32 0.35355338, %v4342_v11 }
0x1489   :  { %v4379_v21 = vsel %vm6549_vm10, %v4373_v59, -1e+30 }
0x148a   :  { %v4393_v39 = vsel %vm351_vm8, %v4379_v21, -inf }
0x148e   :  { %v4344_v4 = vpop.f32.mrf.mxu3 }
0x1494   :  { %v4296_v52 = vpop.f32.mrf.mxu1 }
0x1495   :  { %v4371_v7 = vmul.f32 0.35355338, %v4296_v52 }
0x1497   :  { %v4377_v30 = vsel %vm6549_vm10, %v4371_v7, -1e+30 }
0x1498   :  { %v4387_v40 = vsel %vm351_vm8, %v4377_v30, -inf }
0x1499   :  { %4388 = vmax.xlane.f32.xlu0 %v4387_v40 }
0x149c   :  { %v4298_v1 = vpop.f32.mrf.mxu1 }
0x14a1   :  { %4394 = vmax.xlane.f32.xlu0 %v4393_v39 }
0x14a4   :  { %v4365_v5 = vpop.f32.mrf.mxu0 }
0x14a5   :  { %v4374_v62 = vmul.f32 0.35355338, %v4365_v5 }
0x14a7   :  { %v4380_v18 = vsel %vm6549_vm10, %v4374_v62, -1e+30  ;;  %v7899_v19 = vpop.f32.mrf.mxu2 }
0x14a8   :  { %v4230_v63 = vpack.c.bf16 %v7899_v19, %v7883_v3  ;;  %v4396_v43 = vsel %vm351_vm8, %v4380_v18, -inf }
0x14a9   :  { %4397 = vmax.xlane.f32.xlu1 %v4396_v43 }
0x14ac   :  { %v4367_v20 = vpop.f32.mrf.mxu0 }
0x14af   :  { %v4226_v46 = vpop.f32.mrf.mxu2 }
0x14b5   :  { %4531 = vrot.lane.b32.xlu0 %v7390_v32, %s8369_s3 }
0x14b7   :  { %v4319_v16 = vpop.f32.mrf.mxu2 }
0x14b8   :  { %v4372_v15 = vmul.f32 0.35355338, %v4319_v16 }
0x14ba   :  { %v4378_v26 = vsel %vm6549_vm10, %v4372_v15, -1e+30 }
0x14bb   :  { %v4390_v36 = vsel %vm351_vm8, %v4378_v26, -inf }
0x14bc   :  { %4391 = vmax.xlane.f32.xlu2 %v4390_v36 }
0x14bf   :  { %v4321_v41 = vpop.f32.mrf.mxu2 }
0x14ed   :  { %v4386_v48 = vpop.xlane.xlu2 %4385 }
0x14ee   :  { %v4400_v12 = vsub.f32 %v4376_v17, %v4386_v48  ;;  %v4383_v9 = vpop.xlane.xlu1 %4382 }
0x14ef   :  { %v4399_v35 = vsub.f32 %v4375_v45, %v4383_v9 }
0x14f0   :  { %v4407_v33 = vmul.f32 1.442695, %v4400_v12 }
0x14f1   :  { %v4405_v11 = vmul.f32 1.442695, %v4399_v35 }
0x14f2   :  { %6147 = vpow2.f32 %v4407_v33 }
0x14f3   :  { %6149 = vpow2.f32 %v4405_v11 }
0x14f8   :  { %v7909_v4 = vpop.eup %6147 }
0x14f9   :  { %v7911_v32 = vpop.eup %6149  ;;  %v4420_v42 = vsel %vm351_vm8, %v7909_v4, 0.0 }
0x14fa   :  { %4421 = vadd.xlane.f32.xlu2 %v4420_v42  ;;  %v4417_v52 = vsel %vm351_vm8, %v7911_v32, 0.0 }
0x14fb   :  { %4418 = vadd.xlane.f32.xlu1 %v4417_v52 }
0x150c   :  { %v4389_v7 = vpop.xlane.xlu0 %4388 }
0x150d   :  { %v4401_v17 = vsub.f32 %v4377_v30, %v4389_v7 }
0x150f   :  { %v4409_v40 = vmul.f32 1.442695, %v4401_v17 }
0x1511   :  { %6151 = vpow2.f32 %v4409_v40 }
0x1512   :  { %4552 = vrot.lane.b32.xlu2 %v7394_v37, %s8369_s3 }
0x1514   :  { %v4395_v1 = vpop.xlane.xlu0 %4394 }
0x1515   :  { %v4403_v62 = vsub.f32 %v4379_v21, %v4395_v1 }
0x1517   :  { %v7919_v45 = vpop.eup %6151  ;;  %v4413_v43 = vmul.f32 1.442695, %v4403_v62 }
0x1518   :  { %v4423_v59 = vsel %vm351_vm8, %v7919_v45, 0.0 }
0x1519   :  { %4424 = vadd.xlane.f32.xlu0 %v4423_v59  ;;  %6153 = vpow2.f32 %v4413_v43 }
0x151c   :  { %v4398_v30 = vpop.xlane.xlu1 %4397 }
0x151d   :  { %v4404_v37 = vsub.f32 %v4380_v18, %v4398_v30 }
0x151f   :  { %v4415_v15 = vmul.f32 1.442695, %v4404_v37  ;;  %v7928_v36 = vpop.eup %6153 }
0x1520   :  { %v4429_v21 = vsel %vm351_vm8, %v7928_v36, 0.0 }
0x1527   :  { %v4532_v39 = vpop.permute.xlu0 %4531 }
0x1528   :  { %v4537_v5 = vsel %vm660_vm9, %v4532_v39, 0 }
0x1529   :  { %4546 = vmatpush.bf16.msra.mxu1 %v4537_v5 }
0x152d   :  { %4594 = vrot.lane.b32.xlu0 %v7402_v60, %s8369_s3 }
0x152f   :  { %v4392_v20 = vpop.xlane.xlu2 %4391 }
0x1530   :  { %v4402_v46 = vsub.f32 %v4378_v26, %v4392_v20 }
0x1532   :  { %v4411_v16 = vmul.f32 1.442695, %v4402_v46 }
0x1534   :  { %6155 = vpow2.f32 %v4411_v16 }
0x1535   :  { %4636 = vrot.lane.b32.xlu0 %v7415_v38, %s8369_s3  ;;  %6157 = vpow2.f32 %v4415_v15 }
0x153a   :  { %v7930_v41 = vpop.eup %6155 }
0x153b   :  { %4430 = vadd.xlane.f32.xlu2 %v4429_v21  ;;  %v4426_v60 = vsel %vm351_vm8, %v7930_v41, 0.0  ;;  %v7938_v18 = vpop.eup %6157 }
0x153c   :  { %4427 = vadd.xlane.f32.xlu1 %v4426_v60  ;;  %v4432_v38 = vsel %vm351_vm8, %v7938_v18, 0.0 }
0x153d   :  { %4615 = vrot.lane.b32.xlu0 %v7409_v28, %s8369_s3 }
0x1544   :  { %4433 = vadd.xlane.f32.xlu1 %v4432_v38 }
0x155d   :  { %4573 = vrot.lane.b32.xlu1 %v7398_v22, %s8369_s3 }
0x156d   :  { %v4422_v26 = vpop.xlane.xlu2 %4421 }
0x156e   :  { %6159 = vrcp.f32 %v4422_v26  ;;  %v4419_v48 = vpop.xlane.xlu1 %4418  ;;  %v4461_v52 = vand.u32 2147483648, %v4422_v26  ;;  %v4459_v40 = vand.u32 2147483647, %v4422_v26  ;;  %vm4455_vm12 = vweird.f32 %v4422_v26 }
0x156f   :  { %6161 = vrcp.f32 %v4419_v48  ;;  %v4446_v59 = vand.u32 2147483648, %v4419_v48  ;;  %v4444_v1 = vand.u32 2147483647, %v4419_v48  ;;  %vm4440_vm14 = vweird.f32 %v4419_v48 }
0x1570   :  { %v4462_v5 = vor.u32 1.1754944e-38, %v4461_v52  ;;  %vm4460_vm15 = vcmp.eq.f32.partialorder %v4459_v40, 8.507059e+37 }
0x1571   :  { %v4447_v30 = vor.u32 1.1754944e-38, %v4446_v59  ;;  %vm4445_vm1 = vcmp.eq.f32.partialorder %v4444_v1, 8.507059e+37 }
0x1574   :  { %v6160_v12 = vpop.eup %6159 }
0x1575   :  { %v6162_v9 = vpop.eup %6161  ;;  %v4451_v35 = vmul.f32 %v6160_v12, %v4422_v26  ;;  %v4553_v33 = vpop.permute.xlu2 %4552  ;;  %vm4456_vm10 = vweird.f32 %v6160_v12 }
0x1576   :  { %v4436_v11 = vmul.f32 %v6162_v9, %v4419_v48  ;;  %v4558_v28 = vsel %vm660_vm9, %v4553_v33, 0  ;;  %vm4441_vm11 = vweird.f32 %v6162_v9  ;;  %vm4457_vm13 = vmor %vm4455_vm12, %vm4456_vm10 }
0x1577   :  { %v4452_v42 = vsub.f32 1.0, %v4451_v35  ;;  %4567 = vmatpush.bf16.msrb.mxu2 %v4558_v28  ;;  %vm4442_vm0 = vmor %vm4440_vm14, %vm4441_vm11 }
0x1578   :  { %v4437_v7 = vsub.f32 1.0, %v4436_v11  ;;  %v5713_v11 = vld [vmem:[%s8308_s11 + $0x18] sm:$0xf] }
0x1579   :  { %v4453_v17 = vmul.f32 %v6160_v12, %v4452_v42  ;;  %v4742_v28 = vsel %vm660_vm9, %v5713_v11, 0  ;;  %v5711_v42 = vld [vmem:[%s8308_s11 + $0x10] sm:$0xf] }
0x157a   :  { %v4438_v22 = vmul.f32 %v6162_v9, %v4437_v7  ;;  %v4706_v52 = vsel %vm660_vm9, %v5711_v42, 0 }
0x157b   :  { %v4454_v39 = vadd.f32 %v6160_v12, %v4453_v17 }
0x157c   :  { %v4439_v62 = vadd.f32 %v6162_v9, %v4438_v22 }
0x157d   :  { %v4458_v43 = vsel %vm4457_vm13, %v6160_v12, %v4454_v39 }
0x157e   :  { %v4463_v20 = vsel %vm4460_vm15, %v4462_v5, %v4458_v43  ;;  %v4443_v46 = vsel %vm4442_vm0, %v6162_v9, %v4439_v62 }
0x157f   :  { %v4464_v37 = vmul.f32 %v7909_v4, %v4463_v20  ;;  %v4448_v16 = vsel %vm4445_vm1, %v4447_v30, %v4443_v46 }
0x1580   :  { %v4449_v15 = vmul.f32 %v7911_v32, %v4448_v16 }
0x1581   :  { %v4526_v21 = vpack.c.bf16 %v4464_v37, %v4464_v37 }
0x1582   :  { %v4525_v60 = vpack.c.bf16 %v4449_v15, %v4449_v15 }
0x1583   :  { %5761 = vmatmul.msk.bf16.vlgmr.msrb.gmra.mxu2 %vm351_vm8, %v4526_v21 }
0x1584   :  { %5760 = vmatmul.msk.bf16.vlgmr.msra.gmra.mxu1 %vm351_vm8, %v4525_v60 }
0x158c   :  { %v7949_v38 = vpop.xlane.xlu0 %4424 }
0x158d   :  { %6163 = vrcp.f32 %v7949_v38  ;;  %vm4470_vm0 = vweird.f32 %v7949_v38 }
0x1593   :  { %v7963_v7 = vpop.eup %6163 }
0x1594   :  { %v4466_v39 = vmul.f32 %v7963_v7, %v7949_v38  ;;  %vm4471_vm14 = vweird.f32 %v7963_v7 }
0x1596   :  { %v4467_v15 = vsub.f32 1.0, %v4466_v39 }
0x159f   :  { %v4595_v26 = vpop.permute.xlu0 %4594 }
0x15a0   :  { %v4600_v48 = vsel %vm660_vm9, %v4595_v26, 0 }
0x15a1   :  { %4609 = vmatpush.bf16.msra.mxu0 %v4600_v48 }
0x15a5   :  { %4715 = vmatpush.bf16.msrb.mxu0 %v4706_v52 }
0x15a7   :  { %v4637_v12 = vpop.permute.xlu0 %4636 }
0x15a8   :  { %v4642_v9 = vsel %vm660_vm9, %v4637_v12, 0 }
0x15a9   :  { %4651 = vmatpush.bf16.msra.mxu2 %v4642_v9 }
0x15ae   :  { %v4431_v4 = vpop.xlane.xlu2 %4430 }
0x15af   :  { %6165 = vrcp.f32 %v4431_v4  ;;  %v4428_v32 = vpop.xlane.xlu1 %4427  ;;  %v4616_v35 = vpop.permute.xlu0 %4615  ;;  %v4506_v62 = vand.u32 2147483648, %v4431_v4  ;;  %v4504_v20 = vand.u32 2147483647, %v4431_v4  ;;  %vm4500_vm5 = vweird.f32 %v4431_v4 }
0x15b0   :  { %6167 = vrcp.f32 %v4428_v32  ;;  %v4621_v33 = vsel %vm660_vm9, %v4616_v35, 0  ;;  %v4491_v46 = vand.u32 2147483648, %v4428_v32  ;;  %v4489_v16 = vand.u32 2147483647, %v4428_v32 }
0x15b1   :  { %4630 = vmatpush.bf16.msrb.mxu1 %v4621_v33  ;;  %v4507_v60 = vor.u32 1.1754944e-38, %v4506_v62  ;;  %vm4485_vm7 = vweird.f32 %v4428_v32  ;;  %vm4505_vm10 = vcmp.eq.f32.partialorder %v4504_v20, 8.507059e+37 }
0x15b2   :  { %v4492_v9 = vor.u32 1.1754944e-38, %v4491_v46  ;;  %vm4490_vm12 = vcmp.eq.f32.partialorder %v4489_v16, 8.507059e+37 }
0x15b5   :  { %4751 = vmatpush.bf16.msra.mxu1 %v4742_v28  ;;  %v6166_v17 = vpop.eup %6165  ;;  %v4468_v28 = vmul.f32 %v7963_v7, %v4467_v15 }
0x15b6   :  { %v6168_v40 = vpop.eup %6167  ;;  %v4496_v59 = vmul.f32 %v6166_v17, %v4431_v4  ;;  %vm4501_vm2 = vweird.f32 %v6166_v17 }
0x15b7   :  { %v4481_v22 = vmul.f32 %v6168_v40, %v4428_v32  ;;  %v4434_v1 = vpop.xlane.xlu1 %4433  ;;  %vm4486_vm4 = vweird.f32 %v6168_v40  ;;  %vm4502_vm6 = vmor %vm4500_vm5, %vm4501_vm2  ;;  %v4469_v62 = vadd.f32 %v7963_v7, %v4468_v28  ;;  %v5910_v28 = vld [vmem:[%s8309_s12 + $0x1] ss:$0 sm:$0xff] }
0x15b8   :  { %v4497_v5 = vsub.f32 1.0, %v4496_v59  ;;  %6169 = vrcp.f32 %v4434_v1  ;;  %vm4487_vm11 = vmor %vm4485_vm7, %vm4486_vm4  ;;  %v4521_v39 = vand.u32 2147483648, %v4434_v1  ;;  %vm4515_vm15 = vweird.f32 %v4434_v1 }
0x15b9   :  { %v4482_v43 = vsub.f32 1.0, %v4481_v22  ;;  %vm4472_vm2 = vmor %vm4470_vm0, %vm4471_vm14 }
0x15ba   :  { %v4498_v30 = vmul.f32 %v6166_v17, %v4497_v5  ;;  %v4473_v20 = vsel %vm4472_vm2, %v7963_v7, %v4469_v62 }
0x15bb   :  { %v4483_v37 = vmul.f32 %v6168_v40, %v4482_v43 }
0x15bc   :  { %v4499_v21 = vadd.f32 %v6166_v17, %v4498_v30 }
0x15bd   :  { %v4484_v26 = vadd.f32 %v6168_v40, %v4483_v37 }
0x15be   :  { %v6170_v48 = vpop.eup %6169  ;;  %v4503_v12 = vsel %vm4502_vm6, %v6166_v17, %v4499_v21  ;;  %v4519_v17 = vand.u32 2147483647, %v4434_v1 }
0x15bf   :  { %v4508_v35 = vsel %vm4505_vm10, %v4507_v60, %v4503_v12  ;;  %v4488_v33 = vsel %vm4487_vm11, %v6168_v40, %v4484_v26  ;;  %v4511_v11 = vmul.f32 %v6170_v48, %v4434_v1  ;;  %vm4516_vm13 = vweird.f32 %v6170_v48 }
0x15c0   :  { %v4509_v42 = vmul.f32 %v7928_v36, %v4508_v35  ;;  %v4493_v52 = vsel %vm4490_vm12, %v4492_v9, %v4488_v33  ;;  %v4476_v40 = vand.u32 2147483648, %v7949_v38  ;;  %v4474_v36 = vand.u32 2147483647, %v7949_v38  ;;  %vm4517_vm1 = vmor %vm4515_vm15, %vm4516_vm13 }
0x15c1   :  { %v4494_v4 = vmul.f32 %v7930_v41, %v4493_v52  ;;  %v4512_v59 = vsub.f32 1.0, %v4511_v11  ;;  %v4522_v41 = vor.u32 1.1754944e-38, %v4521_v39  ;;  %vm4520_vm4 = vcmp.eq.f32.partialorder %v4519_v17, 8.507059e+37 }
0x15c2   :  { %v4529_v22 = vpack.c.bf16 %v4509_v42, %v4509_v42  ;;  %v4477_v37 = vor.u32 1.1754944e-38, %v4476_v40  ;;  %vm4475_vm5 = vcmp.eq.f32.partialorder %v4474_v36, 8.507059e+37 }
0x15c3   :  { %v4528_v32 = vpack.c.bf16 %v4494_v4, %v4494_v4  ;;  %v4513_v5 = vmul.f32 %v6170_v48, %v4512_v59 }
0x15c4   :  { %5764 = vmatmul.msk.bf16.vlgmr.msrb.gmra.mxu1 %vm351_vm8, %v4529_v22  ;;  %v4478_v15 = vsel %vm4475_vm5, %v4477_v37, %v4473_v20 }
0x15c5   :  { %v4514_v43 = vadd.f32 %v6170_v48, %v4513_v5  ;;  %5763 = vmatmul.msk.bf16.vlgmr.msra.gmra.mxu0 %vm351_vm8, %v4528_v32  ;;  %v4479_v21 = vmul.f32 %v7919_v45, %v4478_v15 }
0x15c7   :  { %v4518_v30 = vsel %vm4517_vm1, %v6170_v48, %v4514_v43  ;;  %v4527_v26 = vpack.c.bf16 %v4479_v21, %v4479_v21  ;;  %v3334_v48 = vpack.c.bf16 %v7529_v10, %v7649_v57  ;;  %v5714_v10 = vld [vmem:[%s8308_s11 + $0x1c] sm:$0xf] }
0x15c8   :  { %v4523_v46 = vsel %vm4520_vm4, %v4522_v41, %v4518_v30  ;;  %v4670_v57 = vsel %vm660_vm9, %v5714_v10, 0 }
0x15c9   :  { %v4524_v16 = vmul.f32 %v7938_v18, %v4523_v46 }
0x15cb   :  { %v4530_v1 = vpack.c.bf16 %v4524_v16, %v4524_v16 }
0x15cd   :  { %5765 = vmatmul.msk.bf16.vlgmr.msra.gmra.mxu2 %vm351_vm8, %v4530_v1 }
0x15cf   :  { %v4574_v60 = vpop.permute.xlu1 %4573 }
0x15d0   :  { %v4579_v38 = vsel %vm660_vm9, %v4574_v60, 0 }
0x15d1   :  { %4588 = vmatpush.bf16.msra.mxu3 %v4579_v38 }
0x15d4   :  { %5762 = vmatmul.msk.bf16.vlgmr.msra.gmra.mxu3 %vm351_vm8, %v4527_v26  ;;  %5772 = vmatmul.msk.bf16.vlgmr.msra.gmra.mxu1 %vm351_vm8, %v4228_v8 }
0x15d5   :  { %5769 = vmatmul.msk.bf16.vlgmr.msrb.gmra.mxu0 %vm351_vm8, %v3334_v48  ;;  %4679 = vmatpush.bf16.msrb.mxu3 %v4670_v57 }
0x15e4   :  { %5773 = vmatmul.msk.bf16.gmra.mxu1 %vm351_vm8, %v4229_v44 }
0x15e5   :  { %5770 = vmatmul.msk.bf16.gmra.mxu0 %vm351_vm8, %v3335_v47 }
0x15f4   :  { %5774 = vmatmul.msk.bf16.gmra.mxu1 %vm351_vm8, %v4230_v63 }
0x15f5   :  { %5771 = vmatmul.msk.bf16.gmra.mxu0 %vm351_vm8, %v3336_v31 }
0x1601   :  { %v4548_v0 = vpop.f32.mrf.mxu1 }
0x1606   :  { %v4569_v56 = vpop.f32.mrf.mxu2 }
0x1607   :  { %v4657_v47 = vpack.c.bf16 %v4569_v56, %v4548_v0 }
0x1609   :  { %v4550_v54 = vpop.f32.mrf.mxu1  ;;  %5766 = vmatmul.msk.bf16.vlgmr.msrb.gmra.mxu3 %vm351_vm8, %v4657_v47 }
0x160e   :  { %v4571_v8 = vpop.f32.mrf.mxu2 }
0x1641   :  { %v4632_v51 = vpop.f32.mrf.mxu1 }
0x1642   :  { %v4611_v55 = vpop.f32.mrf.mxu0 }
0x1649   :  { %v4634_v44 = vpop.f32.mrf.mxu1 }
0x164a   :  { %v4613_v45 = vpop.f32.mrf.mxu0 }
0x1650   :  { %v4653_v18 = vpop.f32.mrf.mxu2 }
0x1651   :  { %v4659_v19 = vpack.c.bf16 %v4653_v18, %v4632_v51  ;;  %v4753_v12 = vpop.f32.mrf.mxu1 }
0x1652   :  { %v4717_v63 = vpop.f32.mrf.mxu0 }
0x1653   :  { %v4718_v35 = vadd.f32 %v4717_v63, %v7858_v53 }
0x1657   :  { %v4590_v13 = vpop.f32.mrf.mxu3 }
0x1658   :  { %v4658_v61 = vpack.c.bf16 %v4611_v55, %v4590_v13  ;;  %v4655_v7 = vpop.f32.mrf.mxu2 }
0x1659   :  { %v4755_v59 = vpop.f32.mrf.mxu1 }
0x165a   :  { %5767 = vmatmul.msk.bf16.gmra.mxu3 %vm351_vm8, %v4658_v61  ;;  %v4719_v52 = vpop.f32.mrf.mxu0 }
0x165b   :  { %v4720_v39 = vadd.f32 %v4719_v52, %v7861_v25 }
0x165f   :  { %v4592_v3 = vpop.f32.mrf.mxu3 }
0x1661   :  { %v4758_v43 = vpop.f32.mrf.mxu1 }
0x1662   :  { %v4722_v40 = vpop.f32.mrf.mxu0 }
0x1663   :  { %v4723_v41 = vadd.f32 %v4722_v40, %v7863_v50 }
0x1669   :  { %v4760_v46 = vpop.f32.mrf.mxu1 }
0x166a   :  { %5768 = vmatmul.msk.bf16.gmra.mxu3 %vm351_vm8, %v4659_v19  ;;  %v4724_v30 = vpop.f32.mrf.mxu0 }
0x166b   :  { %v4725_v15 = vadd.f32 %v4724_v30, %v7865_v24 }
0x1671   :  { %v4763_v26 = vpop.f32.mrf.mxu1 }
0x1672   :  { %v4727_v38 = vpop.f32.mrf.mxu0 }
0x1679   :  { %v4765_v54 = vpop.f32.mrf.mxu1 }
0x167a   :  { %v4729_v56 = vpop.f32.mrf.mxu0 }
0x168c   :  { %v4681_v9 = vpop.f32.mrf.mxu3 }
0x168d   :  { %v4754_v33 = vadd.f32 %v4753_v12, %v4681_v9 }
0x168f   :  { %v4768_v11 = vadd.f32 %v4754_v33, %v4718_v35 }
0x1691   :  { %v4774_v42 = vadd.f32 %v4768_v11, %v7273_v49 }
0x1693   :  { %v8017_v4 = vadd.f32 %v5910_v28, %v4774_v42 }
0x1694   :  { %v4683_v22 = vpop.f32.mrf.mxu3 }
0x1695   :  { %v4756_v32 = vadd.f32 %v4755_v59, %v4683_v22  ;;  %v4795_v5 = vsel %vm122_vm3, %v8017_v4, 0.0 }
0x1696   :  { %4796 = vadd.xlane.f32.xlu1 %v4795_v5 }
0x1697   :  { %v4769_v53 = vadd.f32 %v4756_v32, %v4720_v39 }
0x1699   :  { %v4775_v17 = vadd.f32 %v4769_v53, %v7278_v2 }
0x169b   :  { %v8023_v62 = vadd.f32 %v5910_v28, %v4775_v17 }
0x169d   :  { %v4798_v49 = vsel %vm122_vm3, %v8023_v62, 0.0 }
0x169e   :  { %4799 = vadd.xlane.f32.xlu0 %v4798_v49 }
0x16dd   :  { %v4686_v36 = vpop.f32.mrf.mxu3 }
0x16de   :  { %v4759_v25 = vadd.f32 %v4758_v43, %v4686_v36 }
0x16e0   :  { %v4770_v20 = vadd.f32 %v4759_v25, %v4723_v41 }
0x16e2   :  { %v4776_v37 = vadd.f32 %v4770_v20, %v7283_v14  ;;  %v4728_v14 = vadd.f32 %v4727_v38, %v7867_v6  ;;  %v5873_v20 = vld [vmem:[%s8312_s15 + $0x18] sm:$0xff] }
0x16e3   :  { %4985 = vmatpush.bf16.msrb.mxu2 %v5873_v20 }
0x16e4   :  { %v8029_v16 = vadd.f32 %v5910_v28, %v4776_v37 }
0x16e5   :  { %v4688_v2 = vpop.f32.mrf.mxu3 }
0x16e6   :  { %v4761_v1 = vadd.f32 %v4760_v46, %v4688_v2  ;;  %v4801_v21 = vsel %vm122_vm3, %v8029_v16, 0.0  ;;  %v5872_v2 = vld [vmem:[%s8312_s15 + $0x10] sm:$0xff] }
0x16e7   :  { %4802 = vadd.xlane.f32.xlu2 %v4801_v21  ;;  %4986 = vmatpush.bf16.msrb.mxu2 %v5872_v2 }
0x16e8   :  { %v4771_v60 = vadd.f32 %v4761_v1, %v4725_v15 }
0x16ea   :  { %v4777_v50 = vadd.f32 %v4771_v60, %v7288_v58  ;;  %v4730_v58 = vadd.f32 %v4729_v56, %v7871_v23 }
0x16ec   :  { %v8035_v48 = vadd.f32 %v5910_v28, %v4777_v50 }
0x16ed   :  { %v4691_v10 = vpop.f32.mrf.mxu3 }
0x16ee   :  { %v4764_v57 = vadd.f32 %v4763_v26, %v4691_v10  ;;  %v4804_v31 = vsel %vm122_vm3, %v8035_v48, 0.0 }
0x16ef   :  { %4805 = vadd.xlane.f32.xlu2 %v4804_v31 }
0x16f0   :  { %v4772_v24 = vadd.f32 %v4764_v57, %v4728_v14 }
0x16f2   :  { %v4778_v0 = vadd.f32 %v4772_v24, %v7297_v29 }
0x16f4   :  { %v8041_v47 = vadd.f32 %v5910_v28, %v4778_v0 }
0x16f5   :  { %v4693_v8 = vpop.f32.mrf.mxu3 }
0x16f6   :  { %v4766_v51 = vadd.f32 %v4765_v54, %v4693_v8  ;;  %v4807_v55 = vsel %vm122_vm3, %v8041_v47, 0.0  ;;  %v8104_v8 = vld [vmem:[%s8310_s13 + $0x1] ss:$0 sm:$0xff] }
0x16f7   :  { %4808 = vadd.xlane.f32.xlu2 %v4807_v55 }
0x16f8   :  { %v4773_v6 = vadd.f32 %v4766_v51, %v4730_v58 }
0x16fa   :  { %v4779_v44 = vadd.f32 %v4773_v6, %v7309_v27  ;;  %v8110_v6 = vld [vmem:[%s8311_s14 + $0x1] ss:$0 sm:$0xff] }
0x16fc   :  { %v8047_v45 = vadd.f32 %v5910_v28, %v4779_v44 }
0x16fe   :  { %v4810_v29 = vsel %vm122_vm3, %v8047_v45, 0.0 }
0x16ff   :  { %4811 = vadd.xlane.f32.xlu1 %v4810_v29 }
0x1709   :  { %v4797_v18 = vpop.xlane.xlu1 %4796 }
0x170a   :  { %v4813_v13 = vmul.f32 %v4797_v18, %v6417_v34 }
0x170c   :  { %v8053_v61 = vsub.f32 %v8017_v4, %v4813_v13 }
0x170e   :  { %v4825_v23 = vmul.f32 %v8053_v61, %v8053_v61 }
0x1710   :  { %v4831_v7 = vsel %vm122_vm3, %v4825_v23, 0.0 }
0x1711   :  { %v4800_v3 = vpop.xlane.xlu0 %4799  ;;  %4832 = vadd.xlane.f32.xlu2 %v4831_v7 }
0x1712   :  { %v4814_v27 = vmul.f32 %v4800_v3, %v6417_v34 }
0x1714   :  { %v8060_v19 = vsub.f32 %v8023_v62, %v4814_v27 }
0x1716   :  { %v4826_v63 = vmul.f32 %v8060_v19, %v8060_v19 }
0x1718   :  { %v4834_v12 = vsel %vm122_vm3, %v4826_v63, 0.0 }
0x1719   :  { %4835 = vadd.xlane.f32.xlu0 %v4834_v12 }
0x175a   :  { %v4803_v9 = vpop.xlane.xlu2 %4802 }
0x175b   :  { %v4815_v35 = vmul.f32 %v4803_v9, %v6417_v34 }
0x175d   :  { %v8067_v33 = vsub.f32 %v8029_v16, %v4815_v35 }
0x175f   :  { %v4827_v11 = vmul.f32 %v8067_v33, %v8067_v33 }
0x1761   :  { %v4837_v28 = vsel %vm122_vm3, %v4827_v11, 0.0 }
0x1762   :  { %v4806_v42 = vpop.xlane.xlu2 %4805  ;;  %4838 = vadd.xlane.f32.xlu1 %v4837_v28 }
0x1763   :  { %v4816_v52 = vmul.f32 %v4806_v42, %v6417_v34 }
0x1765   :  { %v8074_v59 = vsub.f32 %v8035_v48, %v4816_v52 }
0x1767   :  { %v4828_v22 = vmul.f32 %v8074_v59, %v8074_v59 }
0x1769   :  { %v4840_v39 = vsel %vm122_vm3, %v4828_v22, 0.0 }
0x176a   :  { %v4809_v32 = vpop.xlane.xlu2 %4808  ;;  %4841 = vadd.xlane.f32.xlu2 %v4840_v39 }
0x176b   :  { %v4817_v5 = vmul.f32 %v4809_v32, %v6417_v34 }
0x176d   :  { %v8081_v53 = vsub.f32 %v8041_v47, %v4817_v5 }
0x176f   :  { %v4829_v17 = vmul.f32 %v8081_v53, %v8081_v53 }
0x1771   :  { %v4843_v49 = vsel %vm122_vm3, %v4829_v17, 0.0 }
0x1772   :  { %4844 = vadd.xlane.f32.xlu0 %v4843_v49  ;;  %v4812_v40 = vpop.xlane.xlu1 %4811 }
0x1773   :  { %v4818_v43 = vmul.f32 %v4812_v40, %v6417_v34 }
0x1775   :  { %v8088_v36 = vsub.f32 %v8047_v45, %v4818_v43 }
0x1777   :  { %v4830_v41 = vmul.f32 %v8088_v36, %v8088_v36 }
0x1779   :  { %v4846_v25 = vsel %vm122_vm3, %v4830_v41, 0.0 }
0x177a   :  { %4847 = vadd.xlane.f32.xlu1 %v4846_v25 }
0x1784   :  { %v4833_v30 = vpop.xlane.xlu2 %4832 }
0x1785   :  { %v4849_v46 = vmul.f32 %v4833_v30, %v6417_v34 }
0x1787   :  { %v4855_v37 = vadd.f32 1e-05, %v4849_v46 }
0x1789   :  { %6171 = vrsqrt.f32 %v4855_v37  ;;  %vm4867_vm9 = vweird.f32 %v4855_v37 }
0x178c   :  { %v4836_v15 = vpop.xlane.xlu0 %4835 }
0x178d   :  { %v4850_v1 = vmul.f32 %v4836_v15, %v6417_v34 }
0x178f   :  { %v6172_v21 = vpop.eup %6171  ;;  %v4856_v60 = vadd.f32 1e-05, %v4850_v1 }
0x1790   :  { %v4862_v38 = vmul.f32 %v6172_v21, %v4855_v37  ;;  %vm4868_vm8 = vweird.f32 %v6172_v21 }
0x1791   :  { %6173 = vrsqrt.f32 %v4856_v60  ;;  %vm4869_vm6 = vmor %vm4867_vm9, %vm4868_vm8  ;;  %vm4877_vm10 = vweird.f32 %v4856_v60 }
0x1792   :  { %v4863_v50 = vmul.f32 %v6172_v21, %v4862_v38 }
0x1794   :  { %v4864_v26 = vmul.f32 0.5, %v4863_v50 }
0x1796   :  { %v4865_v10 = vsub.f32 1.5, %v4864_v26 }
0x1797   :  { %v6174_v14 = vpop.eup %6173 }
0x1798   :  { %v4866_v57 = vmul.f32 %v6172_v21, %v4865_v10  ;;  %v4872_v31 = vmul.f32 %v6174_v14, %v4856_v60  ;;  %vm4878_vm7 = vweird.f32 %v6174_v14 }
0x1799   :  { %vm4879_vm11 = vmor %vm4877_vm10, %vm4878_vm7 }
0x179a   :  { %v4873_v24 = vmul.f32 %v6174_v14, %v4872_v31  ;;  %v4870_v0 = vsel %vm4869_vm6, %v6172_v21, %v4866_v57 }
0x179b   :  { %v4921_v58 = vmul.f32 %v4870_v0, %v8053_v61 }
0x179c   :  { %v4874_v56 = vmul.f32 0.5, %v4873_v24 }
0x179d   :  { %v4930_v44 = vmul.f32 %v8104_v8, %v4921_v58 }
0x179e   :  { %v4875_v54 = vsub.f32 1.5, %v4874_v56 }
0x179f   :  { %v4939_v13 = vadd.f32 %v8110_v6, %v4930_v44 }
0x17a0   :  { %v4876_v51 = vmul.f32 %v6174_v14, %v4875_v54 }
0x17a2   :  { %v4880_v55 = vsel %vm4879_vm11, %v6174_v14, %v4876_v51 }
0x17a3   :  { %v4922_v29 = vmul.f32 %v4880_v55, %v8060_v19 }
0x17a5   :  { %v4931_v18 = vmul.f32 %v8104_v8, %v4922_v29 }
0x17a7   :  { %v4940_v23 = vadd.f32 %v8110_v6, %v4931_v18 }
0x17a9   :  { %v4945_v61 = vpack.c.bf16 %v4940_v23, %v4939_v13 }
0x17ab   :  { %5791 = vmatmul.msk.bf16.vlgmr.msrb.gmra.mxu2 %vm122_vm3, %v4945_v61 }
0x17d5   :  { %v4839_v7 = vpop.xlane.xlu1 %4838 }
0x17d6   :  { %v4851_v3 = vmul.f32 %v4839_v7, %v6417_v34 }
0x17d8   :  { %v4857_v27 = vadd.f32 1e-05, %v4851_v3  ;;  %v8151_v3 = vld [vmem:[%s8313_s16 + $0x1] ss:$0 sm:$0xff] }
0x17da   :  { %6175 = vrsqrt.f32 %v4857_v27  ;;  %vm4887_vm13 = vweird.f32 %v4857_v27 }
0x17dd   :  { %v4842_v63 = vpop.xlane.xlu2 %4841 }
0x17de   :  { %v4852_v12 = vmul.f32 %v4842_v63, %v6417_v34 }
0x17e0   :  { %v6176_v9 = vpop.eup %6175  ;;  %v4858_v35 = vadd.f32 1e-05, %v4852_v12 }
0x17e1   :  { %v4882_v19 = vmul.f32 %v6176_v9, %v4857_v27  ;;  %vm4888_vm12 = vweird.f32 %v6176_v9  ;;  %v5877_v27 = vld [vmem:[%s8314_s17 + $0x58] sm:$0xff] }
0x17e2   :  { %6177 = vrsqrt.f32 %v4858_v35  ;;  %vm4889_vm14 = vmor %vm4887_vm13, %vm4888_vm12  ;;  %vm4897_vm0 = vweird.f32 %v4858_v35 }
0x17e3   :  { %v4883_v11 = vmul.f32 %v6176_v9, %v4882_v19 }
0x17e5   :  { %v4884_v28 = vmul.f32 0.5, %v4883_v11  ;;  %v4845_v42 = vpop.xlane.xlu0 %4844  ;;  %v5875_v11 = vld [vmem:[%s8314_s17 + $0x48] sm:$0xff] }
0x17e6   :  { %v4853_v52 = vmul.f32 %v4845_v42, %v6417_v34 }
0x17e7   :  { %v4885_v22 = vsub.f32 1.5, %v4884_v28 }
0x17e8   :  { %v6178_v39 = vpop.eup %6177  ;;  %v4859_v32 = vadd.f32 1e-05, %v4853_v52  ;;  %v5874_v52 = vld [vmem:[%s8314_s17 + $0x40] sm:$0xff] }
0x17e9   :  { %v4886_v5 = vmul.f32 %v6176_v9, %v4885_v22  ;;  %v4892_v17 = vmul.f32 %v6178_v39, %v4858_v35  ;;  %vm4898_vm15 = vweird.f32 %v6178_v39 }
0x17ea   :  { %6179 = vrsqrt.f32 %v4859_v32  ;;  %vm4899_vm1 = vmor %vm4897_vm0, %vm4898_vm15  ;;  %vm4907_vm4 = vweird.f32 %v4859_v32 }
0x17eb   :  { %v4893_v49 = vmul.f32 %v6178_v39, %v4892_v17  ;;  %v4890_v40 = vsel %vm4889_vm14, %v6176_v9, %v4886_v5  ;;  %v5876_v9 = vld [vmem:[%s8314_s17 + $0x50] sm:$0xff] }
0x17ec   :  { %v4923_v46 = vmul.f32 %v4890_v40, %v8067_v33 }
0x17ed   :  { %v4894_v43 = vmul.f32 0.5, %v4893_v49  ;;  %v4848_v41 = vpop.xlane.xlu1 %4847 }
0x17ee   :  { %v4854_v25 = vmul.f32 %v4848_v41, %v6417_v34  ;;  %v4932_v38 = vmul.f32 %v8104_v8, %v4923_v46 }
0x17ef   :  { %v4895_v30 = vsub.f32 1.5, %v4894_v43 }
0x17f0   :  { %v6180_v20 = vpop.eup %6179  ;;  %v4860_v37 = vadd.f32 1e-05, %v4854_v25  ;;  %v4941_v57 = vadd.f32 %v8110_v6, %v4932_v38 }
0x17f1   :  { %v4896_v2 = vmul.f32 %v6178_v39, %v4895_v30  ;;  %v4902_v15 = vmul.f32 %v6180_v20, %v4859_v32  ;;  %vm4908_vm2 = vweird.f32 %v6180_v20 }
0x17f2   :  { %6181 = vrsqrt.f32 %v4860_v37  ;;  %vm4909_vm5 = vmor %vm4907_vm4, %vm4908_vm2  ;;  %vm4917_vm9 = vweird.f32 %v4860_v37 }
0x17f3   :  { %v4900_v1 = vsel %vm4899_vm1, %v6178_v39, %v4896_v2  ;;  %v4903_v21 = vmul.f32 %v6180_v20, %v4902_v15 }
0x17f4   :  { %v4924_v60 = vmul.f32 %v4900_v1, %v8074_v59 }
0x17f5   :  { %v4904_v50 = vmul.f32 0.5, %v4903_v21 }
0x17f6   :  { %v4933_v26 = vmul.f32 %v8104_v8, %v4924_v60 }
0x17f7   :  { %v4905_v10 = vsub.f32 1.5, %v4904_v50 }
0x17f8   :  { %v6182_v14 = vpop.eup %6181  ;;  %v4942_v33 = vadd.f32 %v8110_v6, %v4933_v26 }
0x17f9   :  { %v4906_v31 = vmul.f32 %v6180_v20, %v4905_v10  ;;  %v4912_v24 = vmul.f32 %v6182_v14, %v4860_v37  ;;  %vm4918_vm8 = vweird.f32 %v6182_v14 }
0x17fa   :  { %v4946_v0 = vpack.c.bf16 %v4942_v33, %v4941_v57  ;;  %vm4919_vm6 = vmor %vm4917_vm9, %vm4918_vm8 }
0x17fb   :  { %v4913_v56 = vmul.f32 %v6182_v14, %v4912_v24  ;;  %v4910_v59 = vsel %vm4909_vm5, %v6180_v20, %v4906_v31 }
0x17fc   :  { %5792 = vmatmul.msk.bf16.gmra.mxu2 %vm122_vm3, %v4946_v0  ;;  %v4925_v51 = vmul.f32 %v4910_v59, %v8081_v53  ;;  %v5881_v53 = vld [vmem:[%s8314_s17 + $0x78] sm:$0xff] }
0x17fd   :  { %v4914_v54 = vmul.f32 0.5, %v4913_v56  ;;  %5197 = vmatpush.bf16.msra.mxu3 %v5881_v53 }
0x17fe   :  { %v4934_v18 = vmul.f32 %v8104_v8, %v4925_v51 }
0x17ff   :  { %v4915_v58 = vsub.f32 1.5, %v4914_v54 }
0x1800   :  { %v4943_v23 = vadd.f32 %v8110_v6, %v4934_v18 }
0x1801   :  { %v4916_v55 = vmul.f32 %v6182_v14, %v4915_v58 }
0x1803   :  { %v4920_v44 = vsel %vm4919_vm6, %v6182_v14, %v4916_v55 }
0x1804   :  { %v4926_v29 = vmul.f32 %v4920_v44, %v8088_v36  ;;  %v5880_v36 = vld [vmem:[%s8314_s17 + $0x70] sm:$0xff] }
0x1805   :  { %5198 = vmatpush.bf16.msra.mxu3 %v5880_v36 }
0x1806   :  { %v4935_v13 = vmul.f32 %v8104_v8, %v4926_v29  ;;  %v5879_v8 = vld [vmem:[%s8314_s17 + $0x68] sm:$0xff] }
0x1808   :  { %v4944_v61 = vadd.f32 %v8110_v6, %v4935_v13  ;;  %v5878_v6 = vld [vmem:[%s8314_s17 + $0x60] sm:$0xff] }
0x1809   :  { %5199 = vmatpush.bf16.msra.mxu3 %v5879_v8 }
0x180a   :  { %v4947_v7 = vpack.c.bf16 %v4944_v61, %v4943_v23 }
0x180c   :  { %5793 = vmatmul.msk.bf16.gmra.mxu2 %vm122_vm3, %v4947_v7 }
0x180d   :  { %5200 = vmatpush.bf16.msra.mxu3 %v5878_v6 }
0x1811   :  { %5201 = vmatpush.bf16.msra.mxu3 %v5877_v27 }
0x1815   :  { %5202 = vmatpush.bf16.msra.mxu3 %v5876_v9 }
0x1819   :  { %5203 = vmatpush.bf16.msra.mxu3 %v5875_v11 }
0x181d   :  { %5204 = vmatpush.bf16.msra.mxu3 %v5874_v52 }
0x182e   :  { %v4988_v63 = vpop.f32.mrf.mxu2 }
0x182f   :  { %v4989_v12 = vadd.f32 %v8151_v3, %v4988_v63 }
0x1831   :  { %v5794_v35 = vmul.f32 -1.702, %v4989_v12 }
0x1833   :  { %v5015_v19 = vmul.f32 1.442695, %v5794_v35 }
0x1835   :  { %6183 = vpow2.f32 %v5015_v19 }
0x1836   :  { %v4990_v28 = vpop.f32.mrf.mxu2 }
0x1837   :  { %v4991_v42 = vadd.f32 %v8151_v3, %v4990_v28 }
0x1839   :  { %v5795_v22 = vmul.f32 -1.702, %v4991_v42 }
0x183b   :  { %v6184_v39 = vpop.eup %6183  ;;  %v5017_v32 = vmul.f32 1.442695, %v5795_v22 }
0x183c   :  { %v5027_v5 = vadd.f32 1.0, %v6184_v39 }
0x183d   :  { %6185 = vpow2.f32 %v5017_v32 }
0x183e   :  { %6187 = vrcp.f32 %v5027_v5  ;;  %v5044_v37 = vand.u32 2147483648, %v5027_v5  ;;  %vm5038_vm10 = vweird.f32 %v5027_v5  ;;  %v5042_v2 = vand.u32 2147483647, %v5027_v5 }
0x1840   :  { %v5045_v50 = vor.u32 1.1754944e-38, %v5044_v37  ;;  %vm5043_vm13 = vcmp.eq.f32.partialorder %v5042_v2, 8.507059e+37 }
0x1843   :  { %v6186_v17 = vpop.eup %6185 }
0x1844   :  { %v6188_v49 = vpop.eup %6187  ;;  %v5028_v40 = vadd.f32 1.0, %v6186_v17 }
0x1845   :  { %v5034_v43 = vmul.f32 %v6188_v49, %v5027_v5  ;;  %vm5039_vm7 = vweird.f32 %v6188_v49 }
0x1846   :  { %6189 = vrcp.f32 %v5028_v40  ;;  %vm5040_vm11 = vmor %vm5038_vm10, %vm5039_vm7  ;;  %v5059_v1 = vand.u32 2147483648, %v5028_v40  ;;  %v5057_v38 = vand.u32 2147483647, %v5028_v40  ;;  %vm5053_vm14 = vweird.f32 %v5028_v40 }
0x1847   :  { %v5035_v41 = vsub.f32 1.0, %v5034_v43 }
0x1848   :  { %v5060_v14 = vor.u32 1.1754944e-38, %v5059_v1  ;;  %vm5058_vm0 = vcmp.eq.f32.partialorder %v5057_v38, 8.507059e+37 }
0x1849   :  { %v5036_v25 = vmul.f32 %v6188_v49, %v5035_v41 }
0x184b   :  { %v5037_v20 = vadd.f32 %v6188_v49, %v5036_v25 }
0x184c   :  { %v6190_v30 = vpop.eup %6189 }
0x184d   :  { %v5049_v46 = vmul.f32 %v6190_v30, %v5028_v40  ;;  %v5041_v21 = vsel %vm5040_vm11, %v6188_v49, %v5037_v20  ;;  %vm5054_vm12 = vweird.f32 %v6190_v30 }
0x184e   :  { %v5046_v10 = vsel %vm5043_vm13, %v5045_v50, %v5041_v21  ;;  %vm5055_vm15 = vmor %vm5053_vm14, %vm5054_vm12 }
0x184f   :  { %v5050_v15 = vsub.f32 1.0, %v5049_v46  ;;  %v5123_v31 = vmul.f32 %v5046_v10, %v4989_v12 }
0x1851   :  { %v5051_v60 = vmul.f32 %v6190_v30, %v5050_v15 }
0x1853   :  { %v5052_v26 = vadd.f32 %v6190_v30, %v5051_v60 }
0x1855   :  { %v5056_v57 = vsel %vm5055_vm15, %v6190_v30, %v5052_v26 }
0x1856   :  { %v5061_v33 = vsel %vm5058_vm0, %v5060_v14, %v5056_v57 }
0x1857   :  { %v5124_v24 = vmul.f32 %v5061_v33, %v4991_v42 }
0x1859   :  { %v5129_v0 = vpack.c.bf16 %v5124_v24, %v5123_v31 }
0x185b   :  { %5205 = vmatmul.bf16.vlgmr.msra.gmra.mxu3 %v5129_v0 }
0x187f   :  { %v4993_v56 = vpop.f32.mrf.mxu2 }
0x1880   :  { %v4994_v59 = vadd.f32 %v8151_v3, %v4993_v56 }
0x1882   :  { %v5796_v54 = vmul.f32 -1.702, %v4994_v59 }
0x1884   :  { %v5019_v58 = vmul.f32 1.442695, %v5796_v54 }
0x1886   :  { %6191 = vpow2.f32 %v5019_v58 }
0x1887   :  { %v4995_v51 = vpop.f32.mrf.mxu2 }
0x1888   :  { %v4996_v55 = vadd.f32 %v8151_v3, %v4995_v51 }
0x188a   :  { %v5797_v44 = vmul.f32 -1.702, %v4996_v55 }
0x188c   :  { %v6192_v29 = vpop.eup %6191  ;;  %v5021_v18 = vmul.f32 1.442695, %v5797_v44 }
0x188d   :  { %v5029_v13 = vadd.f32 1.0, %v6192_v29 }
0x188e   :  { %6193 = vpow2.f32 %v5021_v18 }
0x188f   :  { %6195 = vrcp.f32 %v5029_v13  ;;  %v4998_v23 = vpop.f32.mrf.mxu2  ;;  %v5074_v32 = vand.u32 2147483648, %v5029_v13  ;;  %vm5068_vm2 = vweird.f32 %v5029_v13  ;;  %v5072_v5 = vand.u32 2147483647, %v5029_v13 }
0x1890   :  { %v8170_v61 = vadd.f32 %v8151_v3, %v4998_v23 }
0x1891   :  { %v5075_v41 = vor.u32 1.1754944e-38, %v5074_v32  ;;  %vm5073_vm8 = vcmp.eq.f32.partialorder %v5072_v5, 8.507059e+37 }
0x1892   :  { %v5798_v7 = vmul.f32 -1.702, %v8170_v61 }
0x1894   :  { %v6194_v53 = vpop.eup %6193  ;;  %v5023_v36 = vmul.f32 1.442695, %v5798_v7 }
0x1895   :  { %v6196_v8 = vpop.eup %6195  ;;  %v5030_v6 = vadd.f32 1.0, %v6194_v53 }
0x1896   :  { %v5064_v27 = vmul.f32 %v6196_v8, %v5029_v13  ;;  %6197 = vpow2.f32 %v5023_v36  ;;  %vm5069_vm1 = vweird.f32 %v6196_v8  ;;  %v5914_v36 = vld [vmem:[%s8315_s18 + $0x1] ss:$0 sm:$0xff] }
0x1897   :  { %6199 = vrcp.f32 %v5030_v6  ;;  %v5000_v63 = vpop.f32.mrf.mxu2  ;;  %vm5070_vm4 = vmor %vm5068_vm2, %vm5069_vm1  ;;  %v5089_v49 = vand.u32 2147483648, %v5030_v6  ;;  %v5087_v43 = vand.u32 2147483647, %v5030_v6  ;;  %vm5083_vm9 = vweird.f32 %v5030_v6 }
0x1898   :  { %v5065_v12 = vsub.f32 1.0, %v5064_v27  ;;  %v8174_v9 = vadd.f32 %v8151_v3, %v5000_v63 }
0x1899   :  { %v5090_v37 = vor.u32 1.1754944e-38, %v5089_v49  ;;  %vm5088_vm7 = vcmp.eq.f32.partialorder %v5087_v43, 8.507059e+37 }
0x189a   :  { %v5066_v35 = vmul.f32 %v6196_v8, %v5065_v12  ;;  %v5799_v19 = vmul.f32 -1.702, %v8174_v9 }
0x189c   :  { %v6198_v11 = vpop.eup %6197  ;;  %v5025_v28 = vmul.f32 1.442695, %v5799_v19  ;;  %v5067_v22 = vadd.f32 %v6196_v8, %v5066_v35 }
0x189d   :  { %v6200_v42 = vpop.eup %6199  ;;  %v5031_v52 = vadd.f32 1.0, %v6198_v11 }
0x189e   :  { %v5079_v39 = vmul.f32 %v6200_v42, %v5030_v6  ;;  %6201 = vpow2.f32 %v5025_v28  ;;  %v5071_v3 = vsel %vm5070_vm4, %v6196_v8, %v5067_v22  ;;  %vm5084_vm5 = vweird.f32 %v6200_v42 }
0x189f   :  { %6203 = vrcp.f32 %v5031_v52  ;;  %v5076_v46 = vsel %vm5073_vm8, %v5075_v41, %v5071_v3  ;;  %vm5085_vm6 = vmor %vm5083_vm9, %vm5084_vm5  ;;  %v5104_v31 = vand.u32 2147483648, %v5031_v52  ;;  %vm5098_vm11 = vweird.f32 %v5031_v52 }
0x18a0   :  { %v5080_v17 = vsub.f32 1.0, %v5079_v39  ;;  %v5125_v60 = vmul.f32 %v5076_v46, %v4994_v59  ;;  %v5102_v24 = vand.u32 2147483647, %v5031_v52 }
0x18a1   :  { %v5105_v59 = vor.u32 1.1754944e-38, %v5104_v31 }
0x18a2   :  { %v5081_v40 = vmul.f32 %v6200_v42, %v5080_v17  ;;  %vm5103_vm14 = vcmp.eq.f32.partialorder %v5102_v24, 8.507059e+37 }
0x18a4   :  { %v6202_v25 = vpop.eup %6201  ;;  %v5082_v30 = vadd.f32 %v6200_v42, %v5081_v40 }
0x18a5   :  { %v6204_v20 = vpop.eup %6203  ;;  %v5032_v2 = vadd.f32 1.0, %v6202_v25 }
0x18a6   :  { %v5086_v15 = vsel %vm5085_vm6, %v6200_v42, %v5082_v30  ;;  %v5094_v1 = vmul.f32 %v6204_v20, %v5031_v52  ;;  %vm5099_vm10 = vweird.f32 %v6204_v20 }
0x18a7   :  { %v5091_v21 = vsel %vm5088_vm7, %v5090_v37, %v5086_v15  ;;  %6205 = vrcp.f32 %v5032_v2  ;;  %vm5100_vm12 = vmor %vm5098_vm11, %vm5099_vm10  ;;  %v5119_v56 = vand.u32 2147483648, %v5032_v2  ;;  %v5117_v51 = vand.u32 2147483647, %v5032_v2 }
0x18a8   :  { %v5126_v38 = vmul.f32 %v5091_v21, %v4996_v55  ;;  %v5095_v50 = vsub.f32 1.0, %v5094_v1  ;;  %vm5113_vm15 = vweird.f32 %v5032_v2 }
0x18a9   :  { %v5120_v29 = vor.u32 1.1754944e-38, %v5119_v56  ;;  %vm5118_vm1 = vcmp.eq.f32.partialorder %v5117_v51, 8.507059e+37 }
0x18aa   :  { %v5096_v26 = vmul.f32 %v6204_v20, %v5095_v50  ;;  %v5130_v10 = vpack.c.bf16 %v5126_v38, %v5125_v60 }
0x18ac   :  { %5210 = vmatmul.bf16.gmra.mxu3 %v5130_v10  ;;  %v5097_v57 = vadd.f32 %v6204_v20, %v5096_v26 }
0x18ad   :  { %v6206_v14 = vpop.eup %6205 }
0x18ae   :  { %v5109_v33 = vmul.f32 %v6206_v14, %v5032_v2  ;;  %v5101_v54 = vsel %vm5100_vm12, %v6204_v20, %v5097_v57  ;;  %vm5114_vm13 = vweird.f32 %v6206_v14 }
0x18af   :  { %v5106_v44 = vsel %vm5103_vm14, %v5105_v59, %v5101_v54  ;;  %vm5115_vm0 = vmor %vm5113_vm15, %vm5114_vm13 }
0x18b0   :  { %v5110_v0 = vsub.f32 1.0, %v5109_v33  ;;  %v5127_v23 = vmul.f32 %v5106_v44, %v8170_v61 }
0x18b2   :  { %v5111_v58 = vmul.f32 %v6206_v14, %v5110_v0 }
0x18b4   :  { %v5112_v55 = vadd.f32 %v6206_v14, %v5111_v58 }
0x18b6   :  { %v5116_v18 = vsel %vm5115_vm0, %v6206_v14, %v5112_v55 }
0x18b7   :  { %v5121_v13 = vsel %vm5118_vm1, %v5120_v29, %v5116_v18 }
0x18b8   :  { %v5128_v7 = vmul.f32 %v5121_v13, %v8174_v9 }
0x18ba   :  { %v5131_v53 = vpack.c.bf16 %v5128_v7, %v5127_v23 }
0x18bc   :  { %5215 = vmatmul.bf16.gmra.mxu3 %v5131_v53 }
0x18de   :  { %v5206_v8 = vpop.f32.mrf.mxu3 }
0x18df   :  { %v5221_v6 = vadd.f32 %v5206_v8, %v8017_v4 }
0x18e1   :  { %v5232_v27 = vadd.f32 %v5914_v36, %v5221_v6 }
0x18e3   :  { %v5240_v63 = vsel %vm122_vm3, %v5232_v27, 0.0 }
0x18e4   :  { %5241 = vadd.xlane.f32.xlu2 %v5240_v63 }
0x18e6   :  { %v5208_v12 = vpop.f32.mrf.mxu3 }
0x18e7   :  { %v5222_v35 = vadd.f32 %v5208_v12, %v8023_v62 }
0x18e9   :  { %v5233_v19 = vadd.f32 %v5914_v36, %v5222_v35 }
0x18eb   :  { %v5243_v61 = vsel %vm122_vm3, %v5233_v19, 0.0 }
0x18ec   :  { %5244 = vadd.xlane.f32.xlu0 %v5243_v61 }
0x192f   :  { %v5211_v9 = vpop.f32.mrf.mxu3 }
0x1930   :  { %v5223_v11 = vadd.f32 %v5211_v9, %v8029_v16 }
0x1932   :  { %v5234_v28 = vadd.f32 %v5914_v36, %v5223_v11 }
0x1934   :  { %v5246_v42 = vsel %vm122_vm3, %v5234_v28, 0.0 }
0x1935   :  { %5247 = vadd.xlane.f32.xlu1 %v5246_v42 }
0x1937   :  { %v5213_v52 = vpop.f32.mrf.mxu3 }
0x1938   :  { %v5224_v4 = vadd.f32 %v5213_v52, %v8035_v48  ;;  %v5390_v48 = vld [vmem:[%s8316_s4] sm:$0x3f] }
0x1939   :  { %v5391_v43 = vperm.slane %v5390_v48, 0  ;;  %v5405_v58 = vperm.slane %v5390_v48, 2  ;;  %v5412_v51 = vperm.slane %v5390_v48, 3  ;;  %v5398_v59 = vperm.slane %v5390_v48, 1 }
0x193a   :  { %v5235_v22 = vadd.f32 %v5914_v36, %v5224_v4  ;;  %v5419_v55 = vperm.slane %v5390_v48, 4  ;;  %v5426_v7 = vperm.slane %v5390_v48, 5 }
0x193c   :  { %v5249_v39 = vsel %vm122_vm3, %v5235_v22, 0.0 }
0x193d   :  { %5250 = vadd.xlane.f32.xlu2 %v5249_v39 }
0x193f   :  { %v5216_v32 = vpop.f32.mrf.mxu3 }
0x1940   :  { %v5225_v62 = vadd.f32 %v5216_v32, %v8041_v47 }
0x1942   :  { %v5236_v5 = vadd.f32 %v5914_v36, %v5225_v62 }
0x1944   :  { %v5252_v17 = vsel %vm122_vm3, %v5236_v5, 0.0 }
0x1945   :  { %5253 = vadd.xlane.f32.xlu0 %v5252_v17 }
0x1947   :  { %v5218_v49 = vpop.f32.mrf.mxu3 }
0x1948   :  { %v5226_v16 = vadd.f32 %v5218_v49, %v8047_v45 }
0x194a   :  { %v5237_v3 = vadd.f32 %v5914_v36, %v5226_v16 }
0x194c   :  { %v5255_v40 = vsel %vm122_vm3, %v5237_v3, 0.0 }
0x194d   :  { %5256 = vadd.xlane.f32.xlu1 %v5255_v40 }
0x1955   :  { %5396 = vperm.xlu2 %5896, %v5391_v43  }
0x1957   :  { %v5242_v20 = vpop.xlane.xlu2 %5241 }
0x1958   :  { %v5258_v46 = vmul.f32 %v5242_v20, %v6417_v34 }
0x195a   :  { %v8204_v37 = vsub.f32 %v5232_v27, %v5258_v46 }
0x195c   :  { %v5270_v2 = vmul.f32 %v8204_v37, %v8204_v37 }
0x195e   :  { %v5276_v15 = vsel %vm122_vm3, %v5270_v2, 0.0 }
0x195f   :  { %v5245_v41 = vpop.xlane.xlu0 %5244 }
0x1960   :  { %v5259_v47 = vmul.f32 %v5245_v41, %v6417_v34 }
0x1962   :  { %v8198_v25 = vsub.f32 %v5233_v19, %v5259_v47 }
0x1964   :  { %v5271_v30 = vmul.f32 %v8198_v25, %v8198_v25 }
0x1966   :  { %v5279_v45 = vsel %vm122_vm3, %v5271_v30, 0.0 }
0x1967   :  { %5280 = vadd.xlane.f32.xlu0 %v5279_v45 }
0x197e   :  { %5277 = vadd.xlane.f32.xlu2 %v5276_v15 }
0x19a8   :  { %v5248_v1 = vpop.xlane.xlu1 %5247 }
0x19a9   :  { %v5260_v21 = vmul.f32 %v5248_v1, %v6417_v34 }
0x19ab   :  { %v8210_v60 = vsub.f32 %v5234_v28, %v5260_v21 }
0x19ad   :  { %v5272_v38 = vmul.f32 %v8210_v60, %v8210_v60 }
0x19af   :  { %v5282_v50 = vsel %vm122_vm3, %v5272_v38, 0.0 }
0x19b0   :  { %v5251_v26 = vpop.xlane.xlu2 %5250  ;;  %5283 = vadd.xlane.f32.xlu1 %v5282_v50 }
0x19b1   :  { %v5261_v10 = vmul.f32 %v5251_v26, %v6417_v34 }
0x19b3   :  { %v8216_v14 = vsub.f32 %v5235_v22, %v5261_v10 }
0x19b5   :  { %v5273_v57 = vmul.f32 %v8216_v14, %v8216_v14 }
0x19b7   :  { %v5285_v33 = vsel %vm122_vm3, %v5273_v57, 0.0 }
0x19b8   :  { %5286 = vadd.xlane.f32.xlu2 %v5285_v33  ;;  %v5254_v31 = vpop.xlane.xlu0 %5253  ;;  %v8233_v53 = vpop.permute.xlu2 %5396 }
0x19b9   :  { %v5262_v24 = vmul.f32 %v5254_v31, %v6417_v34 }
0x19bb   :  { %v8222_v0 = vsub.f32 %v5236_v5, %v5262_v24 }
0x19bd   :  { %v5274_v56 = vmul.f32 %v8222_v0, %v8222_v0 }
0x19bf   :  { %v5288_v54 = vsel %vm122_vm3, %v5274_v56, 0.0 }
0x19c0   :  { %5289 = vadd.xlane.f32.xlu0 %v5288_v54  ;;  %v5257_v44 = vpop.xlane.xlu1 %5256 }
0x19c1   :  { %v5263_v29 = vmul.f32 %v5257_v44, %v6417_v34 }
0x19c3   :  { %v8228_v18 = vsub.f32 %v5237_v3, %v5263_v29 }
0x19c5   :  { %v5275_v13 = vmul.f32 %v8228_v18, %v8228_v18 }
0x19c7   :  { %v5291_v23 = vsel %vm122_vm3, %v5275_v13, 0.0 }
0x19c9   :  { %5410 = vperm.xlu1 %5898, %v5405_v58   ;;  %v5883_v58 = vld [vmem:[%s8319_s21 + $0x8] sm:$0xff] }
0x19ca   :  { %5535 = vmatpush.bf16.msra.mxu0 %v5883_v58 }
0x19d0   :  { %5417 = vperm.xlu2 %5896, %v5412_v51  }
0x19d4   :  { %5403 = vperm.xlu0 %5897, %v5398_v59   ;;  %v8252_v59 = vld [vmem:[%s8317_s19] ss:$0 sm:$0xff] }
0x19d8   :  { %5424 = vperm.xlu2 %5896, %v5419_v55  }
0x19da   :  { %v5281_v8 = vpop.xlane.xlu0 %5280 }
0x19db   :  { %v5295_v6 = vmul.f32 %v5281_v8, %v6417_v34  ;;  %v8260_v8 = vld [vmem:[%s8318_s20] ss:$0 sm:$0xff] }
0x19dd   :  { %v5301_v19 = vadd.f32 1e-05, %v5295_v6 }
0x19df   :  { %6207 = vrsqrt.f32 %v5301_v19  ;;  %vm5322_vm5 = vweird.f32 %v5301_v19 }
0x19e5   :  { %v6208_v22 = vpop.eup %6207 }
0x19e6   :  { %v5317_v62 = vmul.f32 %v6208_v22, %v5301_v19  ;;  %vm5323_vm2 = vweird.f32 %v6208_v22 }
0x19e7   :  { %vm8240_vm8 = vmor %vm5322_vm5, %vm5323_vm2 }
0x19e8   :  { %v5318_v3 = vmul.f32 %v6208_v22, %v5317_v62 }
0x19ea   :  { %v5319_v47 = vmul.f32 0.5, %v5318_v3 }
0x19ec   :  { %v5320_v2 = vsub.f32 1.5, %v5319_v47 }
0x19ee   :  { %v5321_v50 = vmul.f32 %v6208_v22, %v5320_v2 }
0x19f0   :  { %v5325_v54 = vsel %vm8240_vm8, %v6208_v22, %v5321_v50  ;;  %vm5503_vm8 = vcmask 1041409  }
0x19f1   :  { %v5278_v36 = vpop.xlane.xlu2 %5277  ;;  %v5367_v29 = vmul.f32 %v5325_v54, %v8198_v25 }
0x19f2   :  { %v5294_v27 = vmul.f32 %v5278_v36, %v6417_v34 }
0x19f3   :  { %5292 = vadd.xlane.f32.xlu1 %v5291_v23 }
0x19f4   :  { %v5300_v9 = vadd.f32 1e-05, %v5294_v27  ;;  %v5376_v27 = vmul.f32 %v8252_v59, %v5367_v29 }
0x19f6   :  { %6209 = vrsqrt.f32 %v5300_v9  ;;  %vm5312_vm9 = vweird.f32 %v5300_v9 }
0x19fc   :  { %v6210_v39 = vpop.eup %6209 }
0x19fd   :  { %v5307_v5 = vmul.f32 %v6210_v39, %v5300_v9  ;;  %vm5313_vm4 = vweird.f32 %v6210_v39 }
0x19fe   :  { %vm5314_vm6 = vmor %vm5312_vm9, %vm5313_vm4  ;;  %vm5505_vm9 = vcmask 1042434  }
0x19ff   :  { %v5308_v40 = vmul.f32 %v6210_v39, %v5307_v5 }
0x1a01   :  { %v5309_v30 = vmul.f32 0.5, %v5308_v40 }
0x1a03   :  { %v5310_v15 = vsub.f32 1.5, %v5309_v30 }
0x1a05   :  { %v5311_v26 = vmul.f32 %v6210_v39, %v5310_v15 }
0x1a07   :  { %v5315_v24 = vsel %vm5314_vm6, %v6210_v39, %v5311_v26  ;;  %vm5507_vm6 = vcmask 1043459  }
0x1a08   :  { %v5366_v55 = vmul.f32 %v5315_v24, %v8204_v37 }
0x1a0a   :  { %v5375_v6 = vmul.f32 %v8252_v59, %v5366_v55 }
0x1a0c   :  { %5431 = vperm.xlu1 %5898, %v5426_v7   ;;  %v5384_v19 = vadd.f32 %v8260_v8, %v5375_v6 }
0x1a23   :  { %v5284_v63 = vpop.xlane.xlu1 %5283 }
0x1a24   :  { %v5296_v61 = vmul.f32 %v5284_v63, %v6417_v34 }
0x1a26   :  { %v5302_v42 = vadd.f32 1e-05, %v5296_v61  ;;  %v5385_v61 = vadd.f32 %v8260_v8, %v5376_v27 }
0x1a28   :  { %6211 = vrsqrt.f32 %v5302_v42  ;;  %vm5332_vm11 = vweird.f32 %v5302_v42 }
0x1a2b   :  { %v5287_v12 = vpop.xlane.xlu2 %5286 }
0x1a2c   :  { %v5297_v11 = vmul.f32 %v5287_v12, %v6417_v34 }
0x1a2e   :  { %v5303_v52 = vadd.f32 1e-05, %v5297_v11  ;;  %v6212_v32 = vpop.eup %6211 }
0x1a2f   :  { %v5327_v16 = vmul.f32 %v6212_v32, %v5302_v42  ;;  %vm5333_vm7 = vweird.f32 %v6212_v32 }
0x1a30   :  { %6213 = vrsqrt.f32 %v5303_v52  ;;  %vm5334_vm13 = vmor %vm5332_vm11, %vm5333_vm7  ;;  %vm5342_vm14 = vweird.f32 %v5303_v52  ;;  %vm5509_vm7 = vcmask 1044484   ;;  %vm5543_vm11 = vcmask 259072  }
0x1a31   :  { %v5328_v41 = vmul.f32 %v6212_v32, %v5327_v16 }
0x1a33   :  { %v5290_v35 = vpop.xlane.xlu0 %5289  ;;  %v5329_v46 = vmul.f32 0.5, %v5328_v41  ;;  %v5418_v25 = vpop.permute.xlu2 %5417 }
0x1a34   :  { %v5298_v28 = vmul.f32 %v5290_v35, %v6417_v34 }
0x1a35   :  { %v5330_v38 = vsub.f32 1.5, %v5329_v46 }
0x1a36   :  { %v5304_v4 = vadd.f32 1e-05, %v5298_v28  ;;  %v6214_v17 = vpop.eup %6213 }
0x1a37   :  { %v5337_v48 = vmul.f32 %v6214_v17, %v5303_v52  ;;  %v5331_v31 = vmul.f32 %v6212_v32, %v5330_v38  ;;  %vm5343_vm10 = vweird.f32 %v6214_v17 }
0x1a38   :  { %6215 = vrsqrt.f32 %v5304_v4  ;;  %vm5344_vm15 = vmor %vm5342_vm14, %vm5343_vm10  ;;  %vm5352_vm0 = vweird.f32 %v5304_v4  ;;  %vm5511_vm10 = vcmask 1045509  }
0x1a39   :  { %v5338_v45 = vmul.f32 %v6214_v17, %v5337_v48  ;;  %v5335_v44 = vsel %vm5334_vm13, %v6212_v32, %v5331_v31 }
0x1a3a   :  { %v5368_v36 = vmul.f32 %v5335_v44, %v8210_v60 }
0x1a3b   :  { %v5339_v1 = vmul.f32 0.5, %v5338_v45  ;;  %v5411_v23 = vpop.permute.xlu1 %5410 }
0x1a3c   :  { %v5377_v12 = vmul.f32 %v8252_v59, %v5368_v36 }
0x1a3d   :  { %v5340_v10 = vsub.f32 1.5, %v5339_v1  ;;  %v5882_v1 = vld [vmem:[%s8319_s21] sm:$0xff] }
0x1a3e   :  { %v6216_v49 = vpop.eup %6215  ;;  %v5386_v42 = vadd.f32 %v8260_v8, %v5377_v12  ;;  %5536 = vmatpush.bf16.msra.mxu0 %v5882_v1 }
0x1a3f   :  { %v5347_v43 = vmul.f32 %v6216_v49, %v5304_v4  ;;  %v5341_v56 = vmul.f32 %v6214_v17, %v5340_v10  ;;  %vm5353_vm12 = vweird.f32 %v6216_v49 }
0x1a40   :  { %vm5354_vm1 = vmor %vm5352_vm0, %vm5353_vm12  ;;  %v5435_v32 = vmul.f32 %v5411_v23, %v5386_v42 }
0x1a41   :  { %v5348_v20 = vmul.f32 %v6216_v49, %v5347_v43  ;;  %v5345_v13 = vsel %vm5344_vm15, %v6214_v17, %v5341_v56  ;;  %v5425_v17 = vpop.permute.xlu2 %5424 }
0x1a42   :  { %v5369_v37 = vmul.f32 %v5345_v13, %v8216_v14  ;;  %v5453_v3 = vsel %vm122_vm3, %v5435_v32, 0.0 }
0x1a43   :  { %v5349_v21 = vmul.f32 0.5, %v5348_v20  ;;  %v5454_v47 = vrot.slane %v5453_v3, 4 }
0x1a44   :  { %v5378_v60 = vmul.f32 %v8252_v59, %v5369_v37 }
0x1a45   :  { %v5350_v57 = vsub.f32 1.5, %v5349_v21  ;;  %v5455_v21 = vadd.f32 %v5454_v47, %v5453_v3 }
0x1a46   :  { %v5404_v35 = vpop.permute.xlu0 %5403  ;;  %v5387_v52 = vadd.f32 %v8260_v8, %v5378_v60 }
0x1a47   :  { %v5351_v51 = vmul.f32 %v6216_v49, %v5350_v57  ;;  %v5434_v28 = vmul.f32 %v5404_v35, %v5385_v61  ;;  %v5456_v31 = vrot.slane %v5455_v21, 2 }
0x1a48   :  { %v5436_v5 = vmul.f32 %v5418_v25, %v5387_v52 }
0x1a49   :  { %v5355_v7 = vsel %vm5354_vm1, %v6216_v49, %v5351_v51  ;;  %v5446_v39 = vsel %vm122_vm3, %v5434_v28, 0.0  ;;  %v5457_v44 = vadd.f32 %v5456_v31, %v5455_v21 }
0x1a4a   :  { %v5370_v63 = vmul.f32 %v5355_v7, %v8222_v0  ;;  %v5433_v0 = vmul.f32 %v8233_v53, %v5384_v19  ;;  %v5447_v16 = vrot.slane %v5446_v39, 4  ;;  %v5460_v53 = vsel %vm122_vm3, %v5436_v5, 0.0 }
0x1a4b   :  { %v5461_v45 = vrot.slane %v5460_v53, 4  ;;  %v5458_v27 = vrot.slane %v5457_v44, 1 }
0x1a4c   :  { %v5379_v9 = vmul.f32 %v8252_v59, %v5370_v63  ;;  %v5439_v62 = vsel %vm122_vm3, %v5433_v0, 0.0  ;;  %v5448_v43 = vadd.f32 %v5447_v16, %v5446_v39 }
0x1a4d   :  { %v5462_v50 = vadd.f32 %v5461_v45, %v5460_v53  ;;  %v5459_v61 = vadd.f32 %v5458_v27, %v5457_v44 }
0x1a4e   :  { %v5388_v22 = vadd.f32 %v8260_v8, %v5379_v9  ;;  %v5449_v2 = vrot.slane %v5448_v43, 2 }
0x1a4f   :  { %v5463_v24 = vrot.slane %v5462_v50, 2  ;;  %v5483_v0 = vpack.c.bf16 %v5459_v61, %v5459_v61 }
0x1a50   :  { %v5437_v49 = vmul.f32 %v5425_v17, %v5388_v22  ;;  %v5450_v57 = vadd.f32 %v5449_v2, %v5448_v43 }
0x1a51   :  { %v5464_v13 = vadd.f32 %v5463_v24, %v5462_v50  ;;  %v5565_v24 = vstv %s8321_s6 }
0x1a52   :  { %v5467_v48 = vsel %vm122_vm3, %v5437_v49, 0.0  ;;  %v5451_v55 = vrot.slane %v5450_v57, 1 }
0x1a53   :  { %v5468_v46 = vrot.slane %v5467_v48, 4  ;;  %v5465_v25 = vrot.slane %v5464_v13, 1 }
0x1a54   :  { %v5452_v6 = vadd.f32 %v5451_v55, %v5450_v57 }
0x1a55   :  { %v5469_v10 = vadd.f32 %v5468_v46, %v5467_v48  ;;  %v5466_v9 = vadd.f32 %v5465_v25, %v5464_v13 }
0x1a56   :  { %v5482_v60 = vpack.c.bf16 %v5452_v6, %v5452_v6 }
0x1a57   :  { %v5470_v58 = vrot.slane %v5469_v10, 2 }
0x1a59   :  { %v5471_v7 = vadd.f32 %v5470_v58, %v5469_v10  ;;  %v5560_v10 = vld [vmem:[%s8320_s5] sm:$0x3f] }
0x1a5b   :  { %v5472_v35 = vrot.slane %v5471_v7, 1 }
0x1a5d   :  { %v5473_v28 = vadd.f32 %v5472_v35, %v5471_v7 }
0x1a5f   :  { %v5485_v22 = vpack.c.bf16 %v5473_v28, %v5473_v28 }
0x1a61   :  { %v5501_v49 = vunpack.c.l.b16 %v5485_v22 }
0x1a66   :  { %v5293_v11 = vpop.xlane.xlu1 %5292 }
0x1a67   :  { %v5299_v14 = vmul.f32 %v5293_v11, %v6417_v34  ;;  %v5440_v34 = vrot.slane %v5439_v62, 4 }
0x1a69   :  { %v5305_v4 = vadd.f32 1e-05, %v5299_v14  ;;  %v5441_v30 = vadd.f32 %v5440_v34, %v5439_v62  ;;  %v5498_v14 = vunpack.c.l.b16 %v5482_v60  ;;  %v5499_v62 = vunpack.c.l.b16 %v5483_v0 }
0x1a6b   :  { %6217 = vrsqrt.f32 %v5305_v4  ;;  %v5442_v38 = vrot.slane %v5441_v30, 2  ;;  %vm5362_vm4 = vweird.f32 %v5305_v4 }
0x1a6d   :  { %v5443_v56 = vadd.f32 %v5442_v38, %v5441_v30 }
0x1a6f   :  { %v5444_v23 = vrot.slane %v5443_v56, 1 }
0x1a71   :  { %v6218_v40 = vpop.eup %6217  ;;  %v5445_v12 = vadd.f32 %v5444_v23, %v5443_v56 }
0x1a72   :  { %v5357_v41 = vmul.f32 %v6218_v40, %v5305_v4  ;;  %vm5363_vm2 = vweird.f32 %v6218_v40 }
0x1a73   :  { %vm5364_vm5 = vmor %vm5362_vm4, %vm5363_vm2  ;;  %v5481_v11 = vpack.c.bf16 %v5445_v12, %v5445_v12 }
0x1a74   :  { %v5358_v20 = vmul.f32 %v6218_v40, %v5357_v41 }
0x1a75   :  { %v5497_v52 = vunpack.c.l.b16 %v5481_v11 }
0x1a76   :  { %v5359_v15 = vmul.f32 0.5, %v5358_v20 }
0x1a77   :  { %v5504_v39 = vsel %vm5503_vm8, %v5498_v14, %v5497_v52 }
0x1a78   :  { %v5360_v26 = vsub.f32 1.5, %v5359_v15  ;;  %v5506_v16 = vsel %vm5505_vm9, %v5499_v62, %v5504_v39 }
0x1a7a   :  { %v5361_v33 = vmul.f32 %v6218_v40, %v5360_v26 }
0x1a7c   :  { %v5365_v54 = vsel %vm5364_vm5, %v6218_v40, %v5361_v33 }
0x1a7d   :  { %v5371_v51 = vmul.f32 %v5365_v54, %v8228_v18 }
0x1a7e   :  { %v5432_v37 = vpop.permute.xlu1 %5431 }
0x1a7f   :  { %v5380_v29 = vmul.f32 %v8252_v59, %v5371_v51 }
0x1a81   :  { %v5389_v36 = vadd.f32 %v8260_v8, %v5380_v29  ;;  %v5484_v8 = vpack.c.bf16 %v5466_v9, %v5466_v9 }
0x1a83   :  { %v5438_v63 = vmul.f32 %v5432_v37, %v5389_v36  ;;  %v5500_v5 = vunpack.c.l.b16 %v5484_v8 }
0x1a85   :  { %v5474_v19 = vsel %vm122_vm3, %v5438_v63, 0.0  ;;  %v5508_v3 = vsel %vm5507_vm6, %v5500_v5, %v5506_v16 }
0x1a86   :  { %v5475_v18 = vrot.slane %v5474_v19, 4  ;;  %v5510_v53 = vsel %vm5509_vm7, %v5501_v49, %v5508_v3 }
0x1a88   :  { %v5476_v59 = vadd.f32 %v5475_v18, %v5474_v19 }
0x1a8a   :  { %v5477_v42 = vrot.slane %v5476_v59, 2 }
0x1a8c   :  { %v5478_v4 = vadd.f32 %v5477_v42, %v5476_v59 }
0x1a8e   :  { %v5479_v32 = vrot.slane %v5478_v4, 1 }
0x1a90   :  { %v5480_v17 = vadd.f32 %v5479_v32, %v5478_v4 }
0x1a92   :  { %v5486_v34 = vpack.c.bf16 %v5480_v17, %v5480_v17 }
0x1a94   :  { %v5502_v40 = vunpack.c.l.b16 %v5486_v34 }
0x1a96   :  { %v5512_v48 = vsel %vm5511_vm10, %v5502_v40, %v5510_v53 }
0x1a97   :  { %v5513_v43 = vpack.c.b16 %v5512_v48, %v5512_v48 }
0x1a99   :  { %5857 = vmatmul.msk.bf16.vlgmr.msra.gmra.mxu0 %vm122_vm3, %v5513_v43  ;;  %vm5567_vm3 = vcmask 5120  }
0x1b16   :  { %v5538_v41 = vpop.f32.mrf.mxu0 }
0x1b17   :  { %v5542_v47 = vmul.f32 %v5538_v41, %v5538_v41 }
0x1b19   :  { %v5544_v30 = vsel %vm5543_vm11, %v5542_v47, 0.0 }
0x1b1a   :  { %5545 = vadd.xlane.f32.xlu2 %v5544_v30 }
0x1b1e   :  { %v5540_v45 = vpop.f32.mrf.mxu0 }
0x1b8d   :  { %v5546_v20 = vpop.xlane.xlu2 %5545 }
0x1b8e   :  { %v5547_v46 = vadd.f32 1e-12, %v5546_v20 }
0x1b90   :  { %6219 = vrsqrt.f32 %v5547_v46  ;;  %vm5554_vm13 = vweird.f32 %v5547_v46 }
0x1b96   :  { %v6220_v2 = vpop.eup %6219 }
0x1b97   :  { %v5549_v15 = vmul.f32 %v6220_v2, %v5547_v46  ;;  %vm5555_vm12 = vweird.f32 %v6220_v2 }
0x1b98   :  { %vm5556_vm14 = vmor %vm5554_vm13, %vm5555_vm12 }
0x1b99   :  { %v5550_v1 = vmul.f32 %v6220_v2, %v5549_v15 }
0x1b9b   :  { %v5551_v21 = vmul.f32 0.5, %v5550_v1 }
0x1b9d   :  { %v5552_v38 = vsub.f32 1.5, %v5551_v21 }
0x1b9f   :  { %v5553_v50 = vmul.f32 %v6220_v2, %v5552_v38 }
0x1ba1   :  { %v5557_v26 = vsel %vm5556_vm14, %v6220_v2, %v5553_v50 }
0x1ba2   :  { %v5558_v57 = vmul.f32 %v5557_v26, %v5538_v41 }
0x1ba4   :  { %v5561_v33 = vmul.f32 %v5560_v10, %v5558_v57 }
0x1ba6   :  { %v5562_v31 = vsel %vm5543_vm11, %v5561_v33, 0.0 }
0x1ba7   :  { %5563 = vadd.xlane.f32.xlu1 %v5562_v31 }
0x1c1a   :  { %v5564_v56 = vpop.xlane.xlu1 %5563 }
0x1c1b   :  { %v5566_v54 = vmul.f32 %v5565_v24, %v5564_v56 }
0x1c1d   :  { %5568 = vst.msk [vmem:[%s8322_s22] sm:$0x3f] %vm5567_vm3, %v5566_v54 }

</bundles_post_ra>
